<compile_context>
chip_gen: v7x
topology: tpu7x:2x2x1
jax: 0.10.0
libtpu: 0.0.40
codegen_flags: <defaults>
</compile_context>

<pallas_src>
import jax
import jax.numpy as jnp
import numpy as np
from jax import lax
from jax.experimental import pallas as pl
from jax.experimental.pallas import tpu as pltpu


# Static layer configuration: (Cin, Cout, KH); conv stride is always (2, 1).
_CONV_CFGS = [(1, 3, 6), (3, 5, 5), (5, 10, 4), (10, 20, 4), (20, 20, 4)]
_H_IN = 1250


def _conv_out_sizes(h_in=_H_IN):
    hs, h = [], h_in
    for (_, _, kh) in _CONV_CFGS:
        h = (h - kh) // 2 + 1
        hs.append(h)
    return hs


_H_OUTS = _conv_out_sizes()                 # [623, 310, 154, 76, 37]
_FLAT = _CONV_CFGS[-1][1] * _H_OUTS[-1]     # 20 * 37 = 740


# ------------------------------ fused kernel --------------------------------

def _fused_kernel(x_ref, *refs):
    # refs layout:
    #   [0:20]   5 conv layers x (w(KH,Cin,Cout), b(1,C), scale(1,C), shift(1,C))
    #   [20:24]  w1t(37,20,10), b1(1,10), w2(10,2), b2(1,2)
    #   [24]     output ref (1, 2)
    #   [25:29]  VMEM scratch for act1..act4 (act5 stays a register value)
    conv_refs = [refs[4 * i: 4 * i + 4] for i in range(5)]
    w1t_ref, b1_ref, w2_ref, b2_ref = refs[20:24]
    o_ref = refs[24]
    act_refs = refs[25:29]

    def conv_bn_relu(prev_ref, h_out, kh, cin, w_ref, b_ref, s_ref, t_ref):
        acc = None
        for k in range(kh):
            # Sublane-strided tap read: rows 2h + k, h = 0..h_out-1.
            patch = prev_ref[pl.ds(k, h_out, stride=2), :]       # (h_out, cin)
            w_k = w_ref[k]                                       # (cin, cout)
            if cin == 1:
                term = patch * w_k                               # VPU outer product
            else:
                term = jnp.dot(patch, w_k,
                               preferred_element_type=jnp.float32)
            acc = term if acc is None else acc + term
        y = jnp.maximum(acc + b_ref[...], 0.0)                   # conv bias + ReLU
        return y * s_ref[...] + t_ref[...]                       # folded eval BN

    prev = x_ref                                                 # (1250, 1)
    act = None
    for i, (cin, cout, kh) in enumerate(_CONV_CFGS):
        w_ref, b_ref, s_ref, t_ref = conv_refs[i]
        act = conv_bn_relu(prev, _H_OUTS[i], kh, cin, w_ref, b_ref, s_ref, t_ref)
        if i < len(act_refs):
            act_refs[i][...] = act                               # stays in VMEM
            prev = act_refs[i]

    # FC head.  PyTorch flatten is channel-major: flat[c*37 + h] = act[h, c],
    # so fc1 = sum_h act[h, :] @ W1t[h] with W1t[h, c, j] = W1[c*37 + h, j].
    # TODO(synk): Dropout(0.5) inside fc1 is identity in eval mode; not modeled.
    h1 = b1_ref[...]                                             # (1, 10)
    for h in range(_H_OUTS[-1]):
        h1 = h1 + jnp.dot(act[h:h + 1, :], w1t_ref[h],
                          preferred_element_type=jnp.float32)
    h1 = jnp.maximum(h1, 0.0)                                    # F.relu(fc1(x))
    o_ref[...] = (jnp.dot(h1, w2_ref[...],
                          preferred_element_type=jnp.float32) + b2_ref[...])


# ------------------------------ JAX wrapper ----------------------------------

def iegm_forward(x_nchw, params):
    B = x_nchw.shape[0]
    x3 = x_nchw[:, 0, :, :]                      # (B, 1250, 1): H on sublanes

    inputs = [x3]
    in_specs = [pl.BlockSpec((None, _H_IN, 1), lambda b: (b, 0, 0))]

    def full_spec(shape):
        zeros = (0,) * len(shape)
        return pl.BlockSpec(tuple(shape), lambda b, _z=zeros: _z)

    for layer in params["conv"]:
        for name in ("w", "b", "scale", "shift"):
            arr = layer[name]
            inputs.append(arr)
            in_specs.append(full_spec(arr.shape))
    for name in ("w1t", "b1", "w2", "b2"):
        arr = params[name]
        inputs.append(arr)
        in_specs.append(full_spec(arr.shape))

    scratch = [pltpu.VMEM((h, c), jnp.float32)
               for h, (_, c, _) in zip(_H_OUTS[:4], _CONV_CFGS[:4])]

    out = pl.pallas_call(
        _fused_kernel,
        out_shape=jax.ShapeDtypeStruct((B, 1, 2), jnp.float32),
        grid=(B,),
        in_specs=in_specs,
        out_specs=pl.BlockSpec((None, 1, 2), lambda b: (b, 0, 0)),
        scratch_shapes=scratch,
        compiler_params=pltpu.CompilerParams(
            dimension_semantics=("parallel",)),
        cost_estimate=pl.CostEstimate(flops=800_000, transcendentals=0,
                                      bytes_accessed=60_000),
    )(*inputs)
    return out.reshape(B, 2)


# ------------------------- deterministic parameters --------------------------

def init_params(key):
    eps = 1e-5
    params = {"conv": []}
    for (cin, cout, kh) in _CONV_CFGS:
        key, k1, k2, k3, k4, k5, k6 = jax.random.split(key, 7)
        fan_in = cin * kh
        w = jax.random.normal(k1, (kh, cin, cout), jnp.float32) / np.sqrt(fan_in)
        b = 0.05 * jax.random.normal(k2, (1, cout), jnp.float32)
        gamma = 1.0 + 0.1 * jax.random.normal(k3, (1, cout), jnp.float32)
        beta = 0.1 * jax.random.normal(k4, (1, cout), jnp.float32)
        rmean = 0.05 * jax.random.normal(k5, (1, cout), jnp.float32)
        rvar = 1.0 + 0.2 * jax.random.uniform(k6, (1, cout), jnp.float32)
        scale = gamma / jnp.sqrt(rvar + eps)
        shift = beta - rmean * scale
        params["conv"].append(dict(w=w, b=b, scale=scale, shift=shift))

    key, k1, k2, k3, k4 = jax.random.split(key, 5)
    w1 = jax.random.normal(k1, (_FLAT, 10), jnp.float32) / np.sqrt(float(_FLAT))
    params["w1"] = w1
    # w1t[h, c, j] = w1[c*37 + h, j]  (matches channel-major .view(-1, 740))
    params["w1t"] = w1.reshape(_CONV_CFGS[-1][1], _H_OUTS[-1], 10).transpose(1, 0, 2)
    params["b1"] = 0.05 * jax.random.normal(k2, (1, 10), jnp.float32)
    params["w2"] = jax.random.normal(k3, (10, 2), jnp.float32) / np.sqrt(10.0)
    params["b2"] = 0.05 * jax.random.normal(k4, (1, 2), jnp.float32)
    return params


# --------------------------------- reference ---------------------------------

def ref_forward(x_nchw, params):
    a = x_nchw
    for layer, (cin, cout, kh) in zip(params["conv"], _CONV_CFGS):
        w_oihw = jnp.transpose(layer["w"], (2, 1, 0))[..., None]   # (Cout,Cin,KH,1)
        a = lax.conv_general_dilated(
            a, w_oihw, window_strides=(2, 1), padding="VALID",
            dimension_numbers=("NCHW", "OIHW", "NCHW"),
            precision=lax.Precision.HIGHEST)
        a = a + layer["b"].reshape(1, cout, 1, 1)
        a = jnp.maximum(a, 0.0)
        a = (a * layer["scale"].reshape(1, cout, 1, 1)
             + layer["shift"].reshape(1, cout, 1, 1))
    B = x_nchw.shape[0]
    flat = a.reshape(B, -1)
    h = jnp.maximum(flat @ params["w1"] + params["b1"], 0.0)
    return h @ params["w2"] + params["b2"]


if __name__ == "__main__":
    key = jax.random.PRNGKey(0)
    pkey, xkey = jax.random.split(key)
    params = init_params(pkey)
    # IEGM input: (B, 1, 1250, 1) — H=1250 is required so the flatten gives 740.
    x = jax.random.normal(xkey, (2, 1, _H_IN, 1), jnp.float32)

    fwd = jax.jit(iegm_forward)
    out = jax.block_until_ready(fwd(x, params))
    ref = jax.block_until_ready(ref_forward(x, params))
    np.testing.assert_allclose(np.asarray(out), np.asarray(ref),
                               rtol=1e-2, atol=5e-3)
    assert out.shape == (2, 2)
    print("KERNEL_OK")
</pallas_src>

<mosaic_0001>
module attributes {stable_mosaic.version = 11 : i64} {
  func.func @_fused_kernel(%arg0: i32, %arg1: memref<1x1250x1xf32, #tpu.memory_space<vmem>>, %arg2: memref<6x1x3xf32, #tpu.memory_space<vmem>>, %arg3: memref<1x3xf32, #tpu.memory_space<vmem>>, %arg4: memref<1x3xf32, #tpu.memory_space<vmem>>, %arg5: memref<1x3xf32, #tpu.memory_space<vmem>>, %arg6: memref<5x3x5xf32, #tpu.memory_space<vmem>>, %arg7: memref<1x5xf32, #tpu.memory_space<vmem>>, %arg8: memref<1x5xf32, #tpu.memory_space<vmem>>, %arg9: memref<1x5xf32, #tpu.memory_space<vmem>>, %arg10: memref<4x5x10xf32, #tpu.memory_space<vmem>>, %arg11: memref<1x10xf32, #tpu.memory_space<vmem>>, %arg12: memref<1x10xf32, #tpu.memory_space<vmem>>, %arg13: memref<1x10xf32, #tpu.memory_space<vmem>>, %arg14: memref<4x10x20xf32, #tpu.memory_space<vmem>>, %arg15: memref<1x20xf32, #tpu.memory_space<vmem>>, %arg16: memref<1x20xf32, #tpu.memory_space<vmem>>, %arg17: memref<1x20xf32, #tpu.memory_space<vmem>>, %arg18: memref<4x20x20xf32, #tpu.memory_space<vmem>>, %arg19: memref<1x20xf32, #tpu.memory_space<vmem>>, %arg20: memref<1x20xf32, #tpu.memory_space<vmem>>, %arg21: memref<1x20xf32, #tpu.memory_space<vmem>>, %arg22: memref<37x20x10xf32, #tpu.memory_space<vmem>>, %arg23: memref<1x10xf32, #tpu.memory_space<vmem>>, %arg24: memref<10x2xf32, #tpu.memory_space<vmem>>, %arg25: memref<1x2xf32, #tpu.memory_space<vmem>>, %arg26: memref<1x1x2xf32, #tpu.memory_space<vmem>>, %arg27: memref<623x3xf32, #tpu.memory_space<vmem>>, %arg28: memref<310x5xf32, #tpu.memory_space<vmem>>, %arg29: memref<154x10xf32, #tpu.memory_space<vmem>>, %arg30: memref<76x20xf32, #tpu.memory_space<vmem>>) attributes {dimension_semantics = [#tpu.dimension_semantics<parallel>], iteration_bounds = array<i64: 2>, scalar_prefetch = 0 : i64, scratch_operands = 4 : i64, tpu.core_type = #tpu.core_type<tc>, window_params = [{transform_indices = @transform_0, window_bounds = array<i64: 1, 1250, 1>}, {pipeline_mode = #tpu.pipeline_mode<synchronous>, transform_indices = @transform_1, window_bounds = array<i64: 6, 1, 3>}, {pipeline_mode = #tpu.pipeline_mode<synchronous>, transform_indices = @transform_2, window_bounds = array<i64: 1, 3>}, {pipeline_mode = #tpu.pipeline_mode<synchronous>, transform_indices = @transform_3, window_bounds = array<i64: 1, 3>}, {pipeline_mode = #tpu.pipeline_mode<synchronous>, transform_indices = @transform_4, window_bounds = array<i64: 1, 3>}, {pipeline_mode = #tpu.pipeline_mode<synchronous>, transform_indices = @transform_5, window_bounds = array<i64: 5, 3, 5>}, {pipeline_mode = #tpu.pipeline_mode<synchronous>, transform_indices = @transform_6, window_bounds = array<i64: 1, 5>}, {pipeline_mode = #tpu.pipeline_mode<synchronous>, transform_indices = @transform_7, window_bounds = array<i64: 1, 5>}, {pipeline_mode = #tpu.pipeline_mode<synchronous>, transform_indices = @transform_8, window_bounds = array<i64: 1, 5>}, {pipeline_mode = #tpu.pipeline_mode<synchronous>, transform_indices = @transform_9, window_bounds = array<i64: 4, 5, 10>}, {pipeline_mode = #tpu.pipeline_mode<synchronous>, transform_indices = @transform_10, window_bounds = array<i64: 1, 10>}, {pipeline_mode = #tpu.pipeline_mode<synchronous>, transform_indices = @transform_11, window_bounds = array<i64: 1, 10>}, {pipeline_mode = #tpu.pipeline_mode<synchronous>, transform_indices = @transform_12, window_bounds = array<i64: 1, 10>}, {pipeline_mode = #tpu.pipeline_mode<synchronous>, transform_indices = @transform_13, window_bounds = array<i64: 4, 10, 20>}, {pipeline_mode = #tpu.pipeline_mode<synchronous>, transform_indices = @transform_14, window_bounds = array<i64: 1, 20>}, {pipeline_mode = #tpu.pipeline_mode<synchronous>, transform_indices = @transform_15, window_bounds = array<i64: 1, 20>}, {pipeline_mode = #tpu.pipeline_mode<synchronous>, transform_indices = @transform_16, window_bounds = array<i64: 1, 20>}, {pipeline_mode = #tpu.pipeline_mode<synchronous>, transform_indices = @transform_17, window_bounds = array<i64: 4, 20, 20>}, {pipeline_mode = #tpu.pipeline_mode<synchronous>, transform_indices = @transform_18, window_bounds = array<i64: 1, 20>}, {pipeline_mode = #tpu.pipeline_mode<synchronous>, transform_indices = @transform_19, window_bounds = array<i64: 1, 20>}, {pipeline_mode = #tpu.pipeline_mode<synchronous>, transform_indices = @transform_20, window_bounds = array<i64: 1, 20>}, {pipeline_mode = #tpu.pipeline_mode<synchronous>, transform_indices = @transform_21, window_bounds = array<i64: 37, 20, 10>}, {pipeline_mode = #tpu.pipeline_mode<synchronous>, transform_indices = @transform_22, window_bounds = array<i64: 1, 10>}, {pipeline_mode = #tpu.pipeline_mode<synchronous>, transform_indices = @transform_23, window_bounds = array<i64: 10, 2>}, {pipeline_mode = #tpu.pipeline_mode<synchronous>, transform_indices = @transform_24, window_bounds = array<i64: 1, 2>}, {transform_indices = @transform_25, window_bounds = array<i64: 1, 1, 2>}]} {
    %c0 = arith.constant 0 : index
    %c0_0 = arith.constant 0 : index
    %c0_1 = arith.constant 0 : index
    %0 = tpu.strided_load %arg1[%c0, %c0_0, %c0_1] {strides = array<i32: 1, 2, 1>} : memref<1x1250x1xf32, #tpu.memory_space<vmem>>, vector<1x623x1xf32>
    %1 = vector.shape_cast %0 : vector<1x623x1xf32> to vector<623x1xf32>
    %c0_2 = arith.constant 0 : index
    %c0_3 = arith.constant 0 : index
    %c0_4 = arith.constant 0 : index
    %2 = vector.load %arg2[%c0_2, %c0_3, %c0_4] : memref<6x1x3xf32, #tpu.memory_space<vmem>>, vector<1x1x3xf32>
    %3 = vector.shape_cast %2 : vector<1x1x3xf32> to vector<1x3xf32>
    %4 = vector.broadcast %1 : vector<623x1xf32> to vector<623x3xf32>
    %5 = vector.broadcast %3 : vector<1x3xf32> to vector<623x3xf32>
    %6 = arith.mulf %4, %5 : vector<623x3xf32>
    %c0_5 = arith.constant 0 : index
    %c1 = arith.constant 1 : index
    %c0_6 = arith.constant 0 : index
    %7 = tpu.strided_load %arg1[%c0_5, %c1, %c0_6] {strides = array<i32: 1, 2, 1>} : memref<1x1250x1xf32, #tpu.memory_space<vmem>>, vector<1x623x1xf32>
    %8 = vector.shape_cast %7 : vector<1x623x1xf32> to vector<623x1xf32>
    %c1_7 = arith.constant 1 : index
    %c0_8 = arith.constant 0 : index
    %c0_9 = arith.constant 0 : index
    %9 = vector.load %arg2[%c1_7, %c0_8, %c0_9] : memref<6x1x3xf32, #tpu.memory_space<vmem>>, vector<1x1x3xf32>
    %10 = vector.shape_cast %9 : vector<1x1x3xf32> to vector<1x3xf32>
    %11 = vector.broadcast %8 : vector<623x1xf32> to vector<623x3xf32>
    %12 = vector.broadcast %10 : vector<1x3xf32> to vector<623x3xf32>
    %13 = arith.mulf %11, %12 : vector<623x3xf32>
    %14 = arith.addf %6, %13 : vector<623x3xf32>
    %c0_10 = arith.constant 0 : index
    %c2 = arith.constant 2 : index
    %c0_11 = arith.constant 0 : index
    %15 = tpu.strided_load %arg1[%c0_10, %c2, %c0_11] {strides = array<i32: 1, 2, 1>} : memref<1x1250x1xf32, #tpu.memory_space<vmem>>, vector<1x623x1xf32>
    %16 = vector.shape_cast %15 : vector<1x623x1xf32> to vector<623x1xf32>
    %c2_12 = arith.constant 2 : index
    %c0_13 = arith.constant 0 : index
    %c0_14 = arith.constant 0 : index
    %17 = vector.load %arg2[%c2_12, %c0_13, %c0_14] : memref<6x1x3xf32, #tpu.memory_space<vmem>>, vector<1x1x3xf32>
    %18 = vector.shape_cast %17 : vector<1x1x3xf32> to vector<1x3xf32>
    %19 = vector.broadcast %16 : vector<623x1xf32> to vector<623x3xf32>
    %20 = vector.broadcast %18 : vector<1x3xf32> to vector<623x3xf32>
    %21 = arith.mulf %19, %20 : vector<623x3xf32>
    %22 = arith.addf %14, %21 : vector<623x3xf32>
    %c0_15 = arith.constant 0 : index
    %c3 = arith.constant 3 : index
    %c0_16 = arith.constant 0 : index
    %23 = tpu.strided_load %arg1[%c0_15, %c3, %c0_16] {strides = array<i32: 1, 2, 1>} : memref<1x1250x1xf32, #tpu.memory_space<vmem>>, vector<1x623x1xf32>
    %24 = vector.shape_cast %23 : vector<1x623x1xf32> to vector<623x1xf32>
    %c3_17 = arith.constant 3 : index
    %c0_18 = arith.constant 0 : index
    %c0_19 = arith.constant 0 : index
    %25 = vector.load %arg2[%c3_17, %c0_18, %c0_19] : memref<6x1x3xf32, #tpu.memory_space<vmem>>, vector<1x1x3xf32>
    %26 = vector.shape_cast %25 : vector<1x1x3xf32> to vector<1x3xf32>
    %27 = vector.broadcast %24 : vector<623x1xf32> to vector<623x3xf32>
    %28 = vector.broadcast %26 : vector<1x3xf32> to vector<623x3xf32>
    %29 = arith.mulf %27, %28 : vector<623x3xf32>
    %30 = arith.addf %22, %29 : vector<623x3xf32>
    %c0_20 = arith.constant 0 : index
    %c4 = arith.constant 4 : index
    %c0_21 = arith.constant 0 : index
    %31 = tpu.strided_load %arg1[%c0_20, %c4, %c0_21] {strides = array<i32: 1, 2, 1>} : memref<1x1250x1xf32, #tpu.memory_space<vmem>>, vector<1x623x1xf32>
    %32 = vector.shape_cast %31 : vector<1x623x1xf32> to vector<623x1xf32>
    %c4_22 = arith.constant 4 : index
    %c0_23 = arith.constant 0 : index
    %c0_24 = arith.constant 0 : index
    %33 = vector.load %arg2[%c4_22, %c0_23, %c0_24] : memref<6x1x3xf32, #tpu.memory_space<vmem>>, vector<1x1x3xf32>
    %34 = vector.shape_cast %33 : vector<1x1x3xf32> to vector<1x3xf32>
    %35 = vector.broadcast %32 : vector<623x1xf32> to vector<623x3xf32>
    %36 = vector.broadcast %34 : vector<1x3xf32> to vector<623x3xf32>
    %37 = arith.mulf %35, %36 : vector<623x3xf32>
    %38 = arith.addf %30, %37 : vector<623x3xf32>
    %c0_25 = arith.constant 0 : index
    %c5 = arith.constant 5 : index
    %c0_26 = arith.constant 0 : index
    %39 = tpu.strided_load %arg1[%c0_25, %c5, %c0_26] {strides = array<i32: 1, 2, 1>} : memref<1x1250x1xf32, #tpu.memory_space<vmem>>, vector<1x623x1xf32>
    %40 = vector.shape_cast %39 : vector<1x623x1xf32> to vector<623x1xf32>
    %c5_27 = arith.constant 5 : index
    %c0_28 = arith.constant 0 : index
    %c0_29 = arith.constant 0 : index
    %41 = vector.load %arg2[%c5_27, %c0_28, %c0_29] : memref<6x1x3xf32, #tpu.memory_space<vmem>>, vector<1x1x3xf32>
    %42 = vector.shape_cast %41 : vector<1x1x3xf32> to vector<1x3xf32>
    %43 = vector.broadcast %40 : vector<623x1xf32> to vector<623x3xf32>
    %44 = vector.broadcast %42 : vector<1x3xf32> to vector<623x3xf32>
    %45 = arith.mulf %43, %44 : vector<623x3xf32>
    %46 = arith.addf %38, %45 : vector<623x3xf32>
    %c0_30 = arith.constant 0 : index
    %c0_31 = arith.constant 0 : index
    %47 = vector.load %arg3[%c0_30, %c0_31] : memref<1x3xf32, #tpu.memory_space<vmem>>, vector<1x3xf32>
    %48 = vector.broadcast %47 : vector<1x3xf32> to vector<623x3xf32>
    %49 = arith.addf %46, %48 : vector<623x3xf32>
    %cst = arith.constant 0.000000e+00 : f32
    %50 = vector.broadcast %cst : f32 to vector<623x3xf32>
    %51 = arith.maximumf %49, %50 : vector<623x3xf32>
    %c0_32 = arith.constant 0 : index
    %c0_33 = arith.constant 0 : index
    %52 = vector.load %arg4[%c0_32, %c0_33] : memref<1x3xf32, #tpu.memory_space<vmem>>, vector<1x3xf32>
    %53 = vector.broadcast %52 : vector<1x3xf32> to vector<623x3xf32>
    %54 = arith.mulf %51, %53 : vector<623x3xf32>
    %c0_34 = arith.constant 0 : index
    %c0_35 = arith.constant 0 : index
    %55 = vector.load %arg5[%c0_34, %c0_35] : memref<1x3xf32, #tpu.memory_space<vmem>>, vector<1x3xf32>
    %56 = vector.broadcast %55 : vector<1x3xf32> to vector<623x3xf32>
    %57 = arith.addf %54, %56 : vector<623x3xf32>
    %c0_36 = arith.constant 0 : index
    %c0_37 = arith.constant 0 : index
    %58 = vector.load %arg27[%c0_36, %c0_37] : memref<623x3xf32, #tpu.memory_space<vmem>>, vector<623x3xf32>
    tpu.vector_store %arg27[%c0_36, %c0_37], %57 {strides = array<i32>} : memref<623x3xf32, #tpu.memory_space<vmem>>, vector<623x3xf32>,
    %c0_38 = arith.constant 0 : index
    %c0_39 = arith.constant 0 : index
    %59 = tpu.strided_load %arg27[%c0_38, %c0_39] {strides = array<i32: 2, 1>} : memref<623x3xf32, #tpu.memory_space<vmem>>, vector<310x3xf32>
    %c0_40 = arith.constant 0 : index
    %c0_41 = arith.constant 0 : index
    %c0_42 = arith.constant 0 : index
    %60 = vector.load %arg6[%c0_40, %c0_41, %c0_42] : memref<5x3x5xf32, #tpu.memory_space<vmem>>, vector<1x3x5xf32>
    %61 = vector.shape_cast %60 : vector<1x3x5xf32> to vector<3x5xf32>
    %cst_43 = arith.constant dense<0.000000e+00> : vector<310x5xf32>
    %62 = tpu.matmul %59, %61, %cst_43 {dimension_numbers = #tpu.dot_dimension_numbers<[1], [0], [0], [1], [0, 0, 1, 1], [], []>} : vector<310x3xf32>, vector<3x5xf32>, vector<310x5xf32> -> vector<310x5xf32>
    %c1_44 = arith.constant 1 : index
    %c0_45 = arith.constant 0 : index
    %63 = tpu.strided_load %arg27[%c1_44, %c0_45] {strides = array<i32: 2, 1>} : memref<623x3xf32, #tpu.memory_space<vmem>>, vector<310x3xf32>
    %c1_46 = arith.constant 1 : index
    %c0_47 = arith.constant 0 : index
    %c0_48 = arith.constant 0 : index
    %64 = vector.load %arg6[%c1_46, %c0_47, %c0_48] : memref<5x3x5xf32, #tpu.memory_space<vmem>>, vector<1x3x5xf32>
    %65 = vector.shape_cast %64 : vector<1x3x5xf32> to vector<3x5xf32>
    %cst_49 = arith.constant dense<0.000000e+00> : vector<310x5xf32>
    %66 = tpu.matmul %63, %65, %cst_49 {dimension_numbers = #tpu.dot_dimension_numbers<[1], [0], [0], [1], [0, 0, 1, 1], [], []>} : vector<310x3xf32>, vector<3x5xf32>, vector<310x5xf32> -> vector<310x5xf32>
    %67 = arith.addf %62, %66 : vector<310x5xf32>
    %c2_50 = arith.constant 2 : index
    %c0_51 = arith.constant 0 : index
    %68 = tpu.strided_load %arg27[%c2_50, %c0_51] {strides = array<i32: 2, 1>} : memref<623x3xf32, #tpu.memory_space<vmem>>, vector<310x3xf32>
    %c2_52 = arith.constant 2 : index
    %c0_53 = arith.constant 0 : index
    %c0_54 = arith.constant 0 : index
    %69 = vector.load %arg6[%c2_52, %c0_53, %c0_54] : memref<5x3x5xf32, #tpu.memory_space<vmem>>, vector<1x3x5xf32>
    %70 = vector.shape_cast %69 : vector<1x3x5xf32> to vector<3x5xf32>
    %cst_55 = arith.constant dense<0.000000e+00> : vector<310x5xf32>
    %71 = tpu.matmul %68, %70, %cst_55 {dimension_numbers = #tpu.dot_dimension_numbers<[1], [0], [0], [1], [0, 0, 1, 1], [], []>} : vector<310x3xf32>, vector<3x5xf32>, vector<310x5xf32> -> vector<310x5xf32>
    %72 = arith.addf %67, %71 : vector<310x5xf32>
    %c3_56 = arith.constant 3 : index
    %c0_57 = arith.constant 0 : index
    %73 = tpu.strided_load %arg27[%c3_56, %c0_57] {strides = array<i32: 2, 1>} : memref<623x3xf32, #tpu.memory_space<vmem>>, vector<310x3xf32>
    %c3_58 = arith.constant 3 : index
    %c0_59 = arith.constant 0 : index
    %c0_60 = arith.constant 0 : index
    %74 = vector.load %arg6[%c3_58, %c0_59, %c0_60] : memref<5x3x5xf32, #tpu.memory_space<vmem>>, vector<1x3x5xf32>
    %75 = vector.shape_cast %74 : vector<1x3x5xf32> to vector<3x5xf32>
    %cst_61 = arith.constant dense<0.000000e+00> : vector<310x5xf32>
    %76 = tpu.matmul %73, %75, %cst_61 {dimension_numbers = #tpu.dot_dimension_numbers<[1], [0], [0], [1], [0, 0, 1, 1], [], []>} : vector<310x3xf32>, vector<3x5xf32>, vector<310x5xf32> -> vector<310x5xf32>
    %77 = arith.addf %72, %76 : vector<310x5xf32>
    %c4_62 = arith.constant 4 : index
    %c0_63 = arith.constant 0 : index
    %78 = tpu.strided_load %arg27[%c4_62, %c0_63] {strides = array<i32: 2, 1>} : memref<623x3xf32, #tpu.memory_space<vmem>>, vector<310x3xf32>
    %c4_64 = arith.constant 4 : index
    %c0_65 = arith.constant 0 : index
    %c0_66 = arith.constant 0 : index
    %79 = vector.load %arg6[%c4_64, %c0_65, %c0_66] : memref<5x3x5xf32, #tpu.memory_space<vmem>>, vector<1x3x5xf32>
    %80 = vector.shape_cast %79 : vector<1x3x5xf32> to vector<3x5xf32>
    %cst_67 = arith.constant dense<0.000000e+00> : vector<310x5xf32>
    %81 = tpu.matmul %78, %80, %cst_67 {dimension_numbers = #tpu.dot_dimension_numbers<[1], [0], [0], [1], [0, 0, 1, 1], [], []>} : vector<310x3xf32>, vector<3x5xf32>, vector<310x5xf32> -> vector<310x5xf32>
    %82 = arith.addf %77, %81 : vector<310x5xf32>
    %c0_68 = arith.constant 0 : index
    %c0_69 = arith.constant 0 : index
    %83 = vector.load %arg7[%c0_68, %c0_69] : memref<1x5xf32, #tpu.memory_space<vmem>>, vector<1x5xf32>
    %84 = vector.broadcast %83 : vector<1x5xf32> to vector<310x5xf32>
    %85 = arith.addf %82, %84 : vector<310x5xf32>
    %cst_70 = arith.constant 0.000000e+00 : f32
    %86 = vector.broadcast %cst_70 : f32 to vector<310x5xf32>
    %87 = arith.maximumf %85, %86 : vector<310x5xf32>
    %c0_71 = arith.constant 0 : index
    %c0_72 = arith.constant 0 : index
    %88 = vector.load %arg8[%c0_71, %c0_72] : memref<1x5xf32, #tpu.memory_space<vmem>>, vector<1x5xf32>
    %89 = vector.broadcast %88 : vector<1x5xf32> to vector<310x5xf32>
    %90 = arith.mulf %87, %89 : vector<310x5xf32>
    %c0_73 = arith.constant 0 : index
    %c0_74 = arith.constant 0 : index
    %91 = vector.load %arg9[%c0_73, %c0_74] : memref<1x5xf32, #tpu.memory_space<vmem>>, vector<1x5xf32>
    %92 = vector.broadcast %91 : vector<1x5xf32> to vector<310x5xf32>
    %93 = arith.addf %90, %92 : vector<310x5xf32>
    %c0_75 = arith.constant 0 : index
    %c0_76 = arith.constant 0 : index
    %94 = vector.load %arg28[%c0_75, %c0_76] : memref<310x5xf32, #tpu.memory_space<vmem>>, vector<310x5xf32>
    tpu.vector_store %arg28[%c0_75, %c0_76], %93 {strides = array<i32>} : memref<310x5xf32, #tpu.memory_space<vmem>>, vector<310x5xf32>,
    %c0_77 = arith.constant 0 : index
    %c0_78 = arith.constant 0 : index
    %95 = tpu.strided_load %arg28[%c0_77, %c0_78] {strides = array<i32: 2, 1>} : memref<310x5xf32, #tpu.memory_space<vmem>>, vector<154x5xf32>
    %c0_79 = arith.constant 0 : index
    %c0_80 = arith.constant 0 : index
    %c0_81 = arith.constant 0 : index
    %96 = vector.load %arg10[%c0_79, %c0_80, %c0_81] : memref<4x5x10xf32, #tpu.memory_space<vmem>>, vector<1x5x10xf32>
    %97 = vector.shape_cast %96 : vector<1x5x10xf32> to vector<5x10xf32>
    %cst_82 = arith.constant dense<0.000000e+00> : vector<154x10xf32>
    %98 = tpu.matmul %95, %97, %cst_82 {dimension_numbers = #tpu.dot_dimension_numbers<[1], [0], [0], [1], [0, 0, 1, 1], [], []>} : vector<154x5xf32>, vector<5x10xf32>, vector<154x10xf32> -> vector<154x10xf32>
    %c1_83 = arith.constant 1 : index
    %c0_84 = arith.constant 0 : index
    %99 = tpu.strided_load %arg28[%c1_83, %c0_84] {strides = array<i32: 2, 1>} : memref<310x5xf32, #tpu.memory_space<vmem>>, vector<154x5xf32>
    %c1_85 = arith.constant 1 : index
    %c0_86 = arith.constant 0 : index
    %c0_87 = arith.constant 0 : index
    %100 = vector.load %arg10[%c1_85, %c0_86, %c0_87] : memref<4x5x10xf32, #tpu.memory_space<vmem>>, vector<1x5x10xf32>
    %101 = vector.shape_cast %100 : vector<1x5x10xf32> to vector<5x10xf32>
    %cst_88 = arith.constant dense<0.000000e+00> : vector<154x10xf32>
    %102 = tpu.matmul %99, %101, %cst_88 {dimension_numbers = #tpu.dot_dimension_numbers<[1], [0], [0], [1], [0, 0, 1, 1], [], []>} : vector<154x5xf32>, vector<5x10xf32>, vector<154x10xf32> -> vector<154x10xf32>
    %103 = arith.addf %98, %102 : vector<154x10xf32>
    %c2_89 = arith.constant 2 : index
    %c0_90 = arith.constant 0 : index
    %104 = tpu.strided_load %arg28[%c2_89, %c0_90] {strides = array<i32: 2, 1>} : memref<310x5xf32, #tpu.memory_space<vmem>>, vector<154x5xf32>
    %c2_91 = arith.constant 2 : index
    %c0_92 = arith.constant 0 : index
    %c0_93 = arith.constant 0 : index
    %105 = vector.load %arg10[%c2_91, %c0_92, %c0_93] : memref<4x5x10xf32, #tpu.memory_space<vmem>>, vector<1x5x10xf32>
    %106 = vector.shape_cast %105 : vector<1x5x10xf32> to vector<5x10xf32>
    %cst_94 = arith.constant dense<0.000000e+00> : vector<154x10xf32>
    %107 = tpu.matmul %104, %106, %cst_94 {dimension_numbers = #tpu.dot_dimension_numbers<[1], [0], [0], [1], [0, 0, 1, 1], [], []>} : vector<154x5xf32>, vector<5x10xf32>, vector<154x10xf32> -> vector<154x10xf32>
    %108 = arith.addf %103, %107 : vector<154x10xf32>
    %c3_95 = arith.constant 3 : index
    %c0_96 = arith.constant 0 : index
    %109 = tpu.strided_load %arg28[%c3_95, %c0_96] {strides = array<i32: 2, 1>} : memref<310x5xf32, #tpu.memory_space<vmem>>, vector<154x5xf32>
    %c3_97 = arith.constant 3 : index
    %c0_98 = arith.constant 0 : index
    %c0_99 = arith.constant 0 : index
    %110 = vector.load %arg10[%c3_97, %c0_98, %c0_99] : memref<4x5x10xf32, #tpu.memory_space<vmem>>, vector<1x5x10xf32>
    %111 = vector.shape_cast %110 : vector<1x5x10xf32> to vector<5x10xf32>
    %cst_100 = arith.constant dense<0.000000e+00> : vector<154x10xf32>
    %112 = tpu.matmul %109, %111, %cst_100 {dimension_numbers = #tpu.dot_dimension_numbers<[1], [0], [0], [1], [0, 0, 1, 1], [], []>} : vector<154x5xf32>, vector<5x10xf32>, vector<154x10xf32> -> vector<154x10xf32>
    %113 = arith.addf %108, %112 : vector<154x10xf32>
    %c0_101 = arith.constant 0 : index
    %c0_102 = arith.constant 0 : index
    %114 = vector.load %arg11[%c0_101, %c0_102] : memref<1x10xf32, #tpu.memory_space<vmem>>, vector<1x10xf32>
    %115 = vector.broadcast %114 : vector<1x10xf32> to vector<154x10xf32>
    %116 = arith.addf %113, %115 : vector<154x10xf32>
    %cst_103 = arith.constant 0.000000e+00 : f32
    %117 = vector.broadcast %cst_103 : f32 to vector<154x10xf32>
    %118 = arith.maximumf %116, %117 : vector<154x10xf32>
    %c0_104 = arith.constant 0 : index
    %c0_105 = arith.constant 0 : index
    %119 = vector.load %arg12[%c0_104, %c0_105] : memref<1x10xf32, #tpu.memory_space<vmem>>, vector<1x10xf32>
    %120 = vector.broadcast %119 : vector<1x10xf32> to vector<154x10xf32>
    %121 = arith.mulf %118, %120 : vector<154x10xf32>
    %c0_106 = arith.constant 0 : index
    %c0_107 = arith.constant 0 : index
    %122 = vector.load %arg13[%c0_106, %c0_107] : memref<1x10xf32, #tpu.memory_space<vmem>>, vector<1x10xf32>
    %123 = vector.broadcast %122 : vector<1x10xf32> to vector<154x10xf32>
    %124 = arith.addf %121, %123 : vector<154x10xf32>
    %c0_108 = arith.constant 0 : index
    %c0_109 = arith.constant 0 : index
    %125 = vector.load %arg29[%c0_108, %c0_109] : memref<154x10xf32, #tpu.memory_space<vmem>>, vector<154x10xf32>
    tpu.vector_store %arg29[%c0_108, %c0_109], %124 {strides = array<i32>} : memref<154x10xf32, #tpu.memory_space<vmem>>, vector<154x10xf32>,
    %c0_110 = arith.constant 0 : index
    %c0_111 = arith.constant 0 : index
    %126 = tpu.strided_load %arg29[%c0_110, %c0_111] {strides = array<i32: 2, 1>} : memref<154x10xf32, #tpu.memory_space<vmem>>, vector<76x10xf32>
    %c0_112 = arith.constant 0 : index
    %c0_113 = arith.constant 0 : index
    %c0_114 = arith.constant 0 : index
    %127 = vector.load %arg14[%c0_112, %c0_113, %c0_114] : memref<4x10x20xf32, #tpu.memory_space<vmem>>, vector<1x10x20xf32>
    %128 = vector.shape_cast %127 : vector<1x10x20xf32> to vector<10x20xf32>
    %cst_115 = arith.constant dense<0.000000e+00> : vector<76x20xf32>
    %129 = tpu.matmul %126, %128, %cst_115 {dimension_numbers = #tpu.dot_dimension_numbers<[1], [0], [0], [1], [0, 0, 1, 1], [], []>} : vector<76x10xf32>, vector<10x20xf32>, vector<76x20xf32> -> vector<76x20xf32>
    %c1_116 = arith.constant 1 : index
    %c0_117 = arith.constant 0 : index
    %130 = tpu.strided_load %arg29[%c1_116, %c0_117] {strides = array<i32: 2, 1>} : memref<154x10xf32, #tpu.memory_space<vmem>>, vector<76x10xf32>
    %c1_118 = arith.constant 1 : index
    %c0_119 = arith.constant 0 : index
    %c0_120 = arith.constant 0 : index
    %131 = vector.load %arg14[%c1_118, %c0_119, %c0_120] : memref<4x10x20xf32, #tpu.memory_space<vmem>>, vector<1x10x20xf32>
    %132 = vector.shape_cast %131 : vector<1x10x20xf32> to vector<10x20xf32>
    %cst_121 = arith.constant dense<0.000000e+00> : vector<76x20xf32>
    %133 = tpu.matmul %130, %132, %cst_121 {dimension_numbers = #tpu.dot_dimension_numbers<[1], [0], [0], [1], [0, 0, 1, 1], [], []>} : vector<76x10xf32>, vector<10x20xf32>, vector<76x20xf32> -> vector<76x20xf32>
    %134 = arith.addf %129, %133 : vector<76x20xf32>
    %c2_122 = arith.constant 2 : index
    %c0_123 = arith.constant 0 : index
    %135 = tpu.strided_load %arg29[%c2_122, %c0_123] {strides = array<i32: 2, 1>} : memref<154x10xf32, #tpu.memory_space<vmem>>, vector<76x10xf32>
    %c2_124 = arith.constant 2 : index
    %c0_125 = arith.constant 0 : index
    %c0_126 = arith.constant 0 : index
    %136 = vector.load %arg14[%c2_124, %c0_125, %c0_126] : memref<4x10x20xf32, #tpu.memory_space<vmem>>, vector<1x10x20xf32>
    %137 = vector.shape_cast %136 : vector<1x10x20xf32> to vector<10x20xf32>
    %cst_127 = arith.constant dense<0.000000e+00> : vector<76x20xf32>
    %138 = tpu.matmul %135, %137, %cst_127 {dimension_numbers = #tpu.dot_dimension_numbers<[1], [0], [0], [1], [0, 0, 1, 1], [], []>} : vector<76x10xf32>, vector<10x20xf32>, vector<76x20xf32> -> vector<76x20xf32>
    %139 = arith.addf %134, %138 : vector<76x20xf32>
    %c3_128 = arith.constant 3 : index
    %c0_129 = arith.constant 0 : index
    %140 = tpu.strided_load %arg29[%c3_128, %c0_129] {strides = array<i32: 2, 1>} : memref<154x10xf32, #tpu.memory_space<vmem>>, vector<76x10xf32>
    %c3_130 = arith.constant 3 : index
    %c0_131 = arith.constant 0 : index
    %c0_132 = arith.constant 0 : index
    %141 = vector.load %arg14[%c3_130, %c0_131, %c0_132] : memref<4x10x20xf32, #tpu.memory_space<vmem>>, vector<1x10x20xf32>
    %142 = vector.shape_cast %141 : vector<1x10x20xf32> to vector<10x20xf32>
    %cst_133 = arith.constant dense<0.000000e+00> : vector<76x20xf32>
    %143 = tpu.matmul %140, %142, %cst_133 {dimension_numbers = #tpu.dot_dimension_numbers<[1], [0], [0], [1], [0, 0, 1, 1], [], []>} : vector<76x10xf32>, vector<10x20xf32>, vector<76x20xf32> -> vector<76x20xf32>
    %144 = arith.addf %139, %143 : vector<76x20xf32>
    %c0_134 = arith.constant 0 : index
    %c0_135 = arith.constant 0 : index
    %145 = vector.load %arg15[%c0_134, %c0_135] : memref<1x20xf32, #tpu.memory_space<vmem>>, vector<1x20xf32>
    %146 = vector.broadcast %145 : vector<1x20xf32> to vector<76x20xf32>
    %147 = arith.addf %144, %146 : vector<76x20xf32>
    %cst_136 = arith.constant 0.000000e+00 : f32
    %148 = vector.broadcast %cst_136 : f32 to vector<76x20xf32>
    %149 = arith.maximumf %147, %148 : vector<76x20xf32>
    %c0_137 = arith.constant 0 : index
    %c0_138 = arith.constant 0 : index
    %150 = vector.load %arg16[%c0_137, %c0_138] : memref<1x20xf32, #tpu.memory_space<vmem>>, vector<1x20xf32>
    %151 = vector.broadcast %150 : vector<1x20xf32> to vector<76x20xf32>
    %152 = arith.mulf %149, %151 : vector<76x20xf32>
    %c0_139 = arith.constant 0 : index
    %c0_140 = arith.constant 0 : index
    %153 = vector.load %arg17[%c0_139, %c0_140] : memref<1x20xf32, #tpu.memory_space<vmem>>, vector<1x20xf32>
    %154 = vector.broadcast %153 : vector<1x20xf32> to vector<76x20xf32>
    %155 = arith.addf %152, %154 : vector<76x20xf32>
    %c0_141 = arith.constant 0 : index
    %c0_142 = arith.constant 0 : index
    %156 = vector.load %arg30[%c0_141, %c0_142] : memref<76x20xf32, #tpu.memory_space<vmem>>, vector<76x20xf32>
    tpu.vector_store %arg30[%c0_141, %c0_142], %155 {strides = array<i32>} : memref<76x20xf32, #tpu.memory_space<vmem>>, vector<76x20xf32>,
    %c0_143 = arith.constant 0 : index
    %c0_144 = arith.constant 0 : index
    %157 = tpu.strided_load %arg30[%c0_143, %c0_144] {strides = array<i32: 2, 1>} : memref<76x20xf32, #tpu.memory_space<vmem>>, vector<37x20xf32>
    %c0_145 = arith.constant 0 : index
    %c0_146 = arith.constant 0 : index
    %c0_147 = arith.constant 0 : index
    %158 = vector.load %arg18[%c0_145, %c0_146, %c0_147] : memref<4x20x20xf32, #tpu.memory_space<vmem>>, vector<1x20x20xf32>
    %159 = vector.shape_cast %158 : vector<1x20x20xf32> to vector<20x20xf32>
    %cst_148 = arith.constant dense<0.000000e+00> : vector<37x20xf32>
    %160 = tpu.matmul %157, %159, %cst_148 {dimension_numbers = #tpu.dot_dimension_numbers<[1], [0], [0], [1], [0, 0, 1, 1], [], []>} : vector<37x20xf32>, vector<20x20xf32>, vector<37x20xf32> -> vector<37x20xf32>
    %c1_149 = arith.constant 1 : index
    %c0_150 = arith.constant 0 : index
    %161 = tpu.strided_load %arg30[%c1_149, %c0_150] {strides = array<i32: 2, 1>} : memref<76x20xf32, #tpu.memory_space<vmem>>, vector<37x20xf32>
    %c1_151 = arith.constant 1 : index
    %c0_152 = arith.constant 0 : index
    %c0_153 = arith.constant 0 : index
    %162 = vector.load %arg18[%c1_151, %c0_152, %c0_153] : memref<4x20x20xf32, #tpu.memory_space<vmem>>, vector<1x20x20xf32>
    %163 = vector.shape_cast %162 : vector<1x20x20xf32> to vector<20x20xf32>
    %cst_154 = arith.constant dense<0.000000e+00> : vector<37x20xf32>
    %164 = tpu.matmul %161, %163, %cst_154 {dimension_numbers = #tpu.dot_dimension_numbers<[1], [0], [0], [1], [0, 0, 1, 1], [], []>} : vector<37x20xf32>, vector<20x20xf32>, vector<37x20xf32> -> vector<37x20xf32>
    %165 = arith.addf %160, %164 : vector<37x20xf32>
    %c2_155 = arith.constant 2 : index
    %c0_156 = arith.constant 0 : index
    %166 = tpu.strided_load %arg30[%c2_155, %c0_156] {strides = array<i32: 2, 1>} : memref<76x20xf32, #tpu.memory_space<vmem>>, vector<37x20xf32>
    %c2_157 = arith.constant 2 : index
    %c0_158 = arith.constant 0 : index
    %c0_159 = arith.constant 0 : index
    %167 = vector.load %arg18[%c2_157, %c0_158, %c0_159] : memref<4x20x20xf32, #tpu.memory_space<vmem>>, vector<1x20x20xf32>
    %168 = vector.shape_cast %167 : vector<1x20x20xf32> to vector<20x20xf32>
    %cst_160 = arith.constant dense<0.000000e+00> : vector<37x20xf32>
    %169 = tpu.matmul %166, %168, %cst_160 {dimension_numbers = #tpu.dot_dimension_numbers<[1], [0], [0], [1], [0, 0, 1, 1], [], []>} : vector<37x20xf32>, vector<20x20xf32>, vector<37x20xf32> -> vector<37x20xf32>
    %170 = arith.addf %165, %169 : vector<37x20xf32>
    %c3_161 = arith.constant 3 : index
    %c0_162 = arith.constant 0 : index
    %171 = tpu.strided_load %arg30[%c3_161, %c0_162] {strides = array<i32: 2, 1>} : memref<76x20xf32, #tpu.memory_space<vmem>>, vector<37x20xf32>
    %c3_163 = arith.constant 3 : index
    %c0_164 = arith.constant 0 : index
    %c0_165 = arith.constant 0 : index
    %172 = vector.load %arg18[%c3_163, %c0_164, %c0_165] : memref<4x20x20xf32, #tpu.memory_space<vmem>>, vector<1x20x20xf32>
    %173 = vector.shape_cast %172 : vector<1x20x20xf32> to vector<20x20xf32>
    %cst_166 = arith.constant dense<0.000000e+00> : vector<37x20xf32>
    %174 = tpu.matmul %171, %173, %cst_166 {dimension_numbers = #tpu.dot_dimension_numbers<[1], [0], [0], [1], [0, 0, 1, 1], [], []>} : vector<37x20xf32>, vector<20x20xf32>, vector<37x20xf32> -> vector<37x20xf32>
    %175 = arith.addf %170, %174 : vector<37x20xf32>
    %c0_167 = arith.constant 0 : index
    %c0_168 = arith.constant 0 : index
    %176 = vector.load %arg19[%c0_167, %c0_168] : memref<1x20xf32, #tpu.memory_space<vmem>>, vector<1x20xf32>
    %177 = vector.broadcast %176 : vector<1x20xf32> to vector<37x20xf32>
    %178 = arith.addf %175, %177 : vector<37x20xf32>
    %cst_169 = arith.constant 0.000000e+00 : f32
    %179 = vector.broadcast %cst_169 : f32 to vector<37x20xf32>
    %180 = arith.maximumf %178, %179 : vector<37x20xf32>
    %c0_170 = arith.constant 0 : index
    %c0_171 = arith.constant 0 : index
    %181 = vector.load %arg20[%c0_170, %c0_171] : memref<1x20xf32, #tpu.memory_space<vmem>>, vector<1x20xf32>
    %182 = vector.broadcast %181 : vector<1x20xf32> to vector<37x20xf32>
    %183 = arith.mulf %180, %182 : vector<37x20xf32>
    %c0_172 = arith.constant 0 : index
    %c0_173 = arith.constant 0 : index
    %184 = vector.load %arg21[%c0_172, %c0_173] : memref<1x20xf32, #tpu.memory_space<vmem>>, vector<1x20xf32>
    %185 = vector.broadcast %184 : vector<1x20xf32> to vector<37x20xf32>
    %186 = arith.addf %183, %185 : vector<37x20xf32>
    %c0_174 = arith.constant 0 : index
    %c0_175 = arith.constant 0 : index
    %187 = vector.load %arg23[%c0_174, %c0_175] : memref<1x10xf32, #tpu.memory_space<vmem>>, vector<1x10xf32>
    %188 = vector.extract_strided_slice %186 {offsets = [0, 0], sizes = [1, 20], strides = [1, 1]} : vector<37x20xf32> to vector<1x20xf32>
    %c0_176 = arith.constant 0 : index
    %c0_177 = arith.constant 0 : index
    %c0_178 = arith.constant 0 : index
    %189 = vector.load %arg22[%c0_176, %c0_177, %c0_178] : memref<37x20x10xf32, #tpu.memory_space<vmem>>, vector<1x20x10xf32>
    %190 = vector.shape_cast %189 : vector<1x20x10xf32> to vector<20x10xf32>
    %cst_179 = arith.constant dense<0.000000e+00> : vector<1x10xf32>
    %191 = tpu.matmul %188, %190, %cst_179 {dimension_numbers = #tpu.dot_dimension_numbers<[1], [0], [0], [1], [0, 0, 1, 1], [], []>} : vector<1x20xf32>, vector<20x10xf32>, vector<1x10xf32> -> vector<1x10xf32>
    %192 = arith.addf %187, %191 : vector<1x10xf32>
    %193 = vector.extract_strided_slice %186 {offsets = [1, 0], sizes = [1, 20], strides = [1, 1]} : vector<37x20xf32> to vector<1x20xf32>
    %c1_180 = arith.constant 1 : index
    %c0_181 = arith.constant 0 : index
    %c0_182 = arith.constant 0 : index
    %194 = vector.load %arg22[%c1_180, %c0_181, %c0_182] : memref<37x20x10xf32, #tpu.memory_space<vmem>>, vector<1x20x10xf32>
    %195 = vector.shape_cast %194 : vector<1x20x10xf32> to vector<20x10xf32>
    %cst_183 = arith.constant dense<0.000000e+00> : vector<1x10xf32>
    %196 = tpu.matmul %193, %195, %cst_183 {dimension_numbers = #tpu.dot_dimension_numbers<[1], [0], [0], [1], [0, 0, 1, 1], [], []>} : vector<1x20xf32>, vector<20x10xf32>, vector<1x10xf32> -> vector<1x10xf32>
    %197 = arith.addf %192, %196 : vector<1x10xf32>
    %198 = vector.extract_strided_slice %186 {offsets = [2, 0], sizes = [1, 20], strides = [1, 1]} : vector<37x20xf32> to vector<1x20xf32>
    %c2_184 = arith.constant 2 : index
    %c0_185 = arith.constant 0 : index
    %c0_186 = arith.constant 0 : index
    %199 = vector.load %arg22[%c2_184, %c0_185, %c0_186] : memref<37x20x10xf32, #tpu.memory_space<vmem>>, vector<1x20x10xf32>
    %200 = vector.shape_cast %199 : vector<1x20x10xf32> to vector<20x10xf32>
    %cst_187 = arith.constant dense<0.000000e+00> : vector<1x10xf32>
    %201 = tpu.matmul %198, %200, %cst_187 {dimension_numbers = #tpu.dot_dimension_numbers<[1], [0], [0], [1], [0, 0, 1, 1], [], []>} : vector<1x20xf32>, vector<20x10xf32>, vector<1x10xf32> -> vector<1x10xf32>
    %202 = arith.addf %197, %201 : vector<1x10xf32>
    %203 = vector.extract_strided_slice %186 {offsets = [3, 0], sizes = [1, 20], strides = [1, 1]} : vector<37x20xf32> to vector<1x20xf32>
    %c3_188 = arith.constant 3 : index
    %c0_189 = arith.constant 0 : index
    %c0_190 = arith.constant 0 : index
    %204 = vector.load %arg22[%c3_188, %c0_189, %c0_190] : memref<37x20x10xf32, #tpu.memory_space<vmem>>, vector<1x20x10xf32>
    %205 = vector.shape_cast %204 : vector<1x20x10xf32> to vector<20x10xf32>
    %cst_191 = arith.constant dense<0.000000e+00> : vector<1x10xf32>
    %206 = tpu.matmul %203, %205, %cst_191 {dimension_numbers = #tpu.dot_dimension_numbers<[1], [0], [0], [1], [0, 0, 1, 1], [], []>} : vector<1x20xf32>, vector<20x10xf32>, vector<1x10xf32> -> vector<1x10xf32>
    %207 = arith.addf %202, %206 : vector<1x10xf32>
    %208 = vector.extract_strided_slice %186 {offsets = [4, 0], sizes = [1, 20], strides = [1, 1]} : vector<37x20xf32> to vector<1x20xf32>
    %c4_192 = arith.constant 4 : index
    %c0_193 = arith.constant 0 : index
    %c0_194 = arith.constant 0 : index
    %209 = vector.load %arg22[%c4_192, %c0_193, %c0_194] : memref<37x20x10xf32, #tpu.memory_space<vmem>>, vector<1x20x10xf32>
    %210 = vector.shape_cast %209 : vector<1x20x10xf32> to vector<20x10xf32>
    %cst_195 = arith.constant dense<0.000000e+00> : vector<1x10xf32>
    %211 = tpu.matmul %208, %210, %cst_195 {dimension_numbers = #tpu.dot_dimension_numbers<[1], [0], [0], [1], [0, 0, 1, 1], [], []>} : vector<1x20xf32>, vector<20x10xf32>, vector<1x10xf32> -> vector<1x10xf32>
    %212 = arith.addf %207, %211 : vector<1x10xf32>
    %213 = vector.extract_strided_slice %186 {offsets = [5, 0], sizes = [1, 20], strides = [1, 1]} : vector<37x20xf32> to vector<1x20xf32>
    %c5_196 = arith.constant 5 : index
    %c0_197 = arith.constant 0 : index
    %c0_198 = arith.constant 0 : index
    %214 = vector.load %arg22[%c5_196, %c0_197, %c0_198] : memref<37x20x10xf32, #tpu.memory_space<vmem>>, vector<1x20x10xf32>
    %215 = vector.shape_cast %214 : vector<1x20x10xf32> to vector<20x10xf32>
    %cst_199 = arith.constant dense<0.000000e+00> : vector<1x10xf32>
    %216 = tpu.matmul %213, %215, %cst_199 {dimension_numbers = #tpu.dot_dimension_numbers<[1], [0], [0], [1], [0, 0, 1, 1], [], []>} : vector<1x20xf32>, vector<20x10xf32>, vector<1x10xf32> -> vector<1x10xf32>
    %217 = arith.addf %212, %216 : vector<1x10xf32>
    %218 = vector.extract_strided_slice %186 {offsets = [6, 0], sizes = [1, 20], strides = [1, 1]} : vector<37x20xf32> to vector<1x20xf32>
    %c6 = arith.constant 6 : index
    %c0_200 = arith.constant 0 : index
    %c0_201 = arith.constant 0 : index
    %219 = vector.load %arg22[%c6, %c0_200, %c0_201] : memref<37x20x10xf32, #tpu.memory_space<vmem>>, vector<1x20x10xf32>
    %220 = vector.shape_cast %219 : vector<1x20x10xf32> to vector<20x10xf32>
    %cst_202 = arith.constant dense<0.000000e+00> : vector<1x10xf32>
    %221 = tpu.matmul %218, %220, %cst_202 {dimension_numbers = #tpu.dot_dimension_numbers<[1], [0], [0], [1], [0, 0, 1, 1], [], []>} : vector<1x20xf32>, vector<20x10xf32>, vector<1x10xf32> -> vector<1x10xf32>
    %222 = arith.addf %217, %221 : vector<1x10xf32>
    %223 = vector.extract_strided_slice %186 {offsets = [7, 0], sizes = [1, 20], strides = [1, 1]} : vector<37x20xf32> to vector<1x20xf32>
    %c7 = arith.constant 7 : index
    %c0_203 = arith.constant 0 : index
    %c0_204 = arith.constant 0 : index
    %224 = vector.load %arg22[%c7, %c0_203, %c0_204] : memref<37x20x10xf32, #tpu.memory_space<vmem>>, vector<1x20x10xf32>
    %225 = vector.shape_cast %224 : vector<1x20x10xf32> to vector<20x10xf32>
    %cst_205 = arith.constant dense<0.000000e+00> : vector<1x10xf32>
    %226 = tpu.matmul %223, %225, %cst_205 {dimension_numbers = #tpu.dot_dimension_numbers<[1], [0], [0], [1], [0, 0, 1, 1], [], []>} : vector<1x20xf32>, vector<20x10xf32>, vector<1x10xf32> -> vector<1x10xf32>
    %227 = arith.addf %222, %226 : vector<1x10xf32>
    %228 = vector.extract_strided_slice %186 {offsets = [8, 0], sizes = [1, 20], strides = [1, 1]} : vector<37x20xf32> to vector<1x20xf32>
    %c8 = arith.constant 8 : index
    %c0_206 = arith.constant 0 : index
    %c0_207 = arith.constant 0 : index
    %229 = vector.load %arg22[%c8, %c0_206, %c0_207] : memref<37x20x10xf32, #tpu.memory_space<vmem>>, vector<1x20x10xf32>
    %230 = vector.shape_cast %229 : vector<1x20x10xf32> to vector<20x10xf32>
    %cst_208 = arith.constant dense<0.000000e+00> : vector<1x10xf32>
    %231 = tpu.matmul %228, %230, %cst_208 {dimension_numbers = #tpu.dot_dimension_numbers<[1], [0], [0], [1], [0, 0, 1, 1], [], []>} : vector<1x20xf32>, vector<20x10xf32>, vector<1x10xf32> -> vector<1x10xf32>
    %232 = arith.addf %227, %231 : vector<1x10xf32>
    %233 = vector.extract_strided_slice %186 {offsets = [9, 0], sizes = [1, 20], strides = [1, 1]} : vector<37x20xf32> to vector<1x20xf32>
    %c9 = arith.constant 9 : index
    %c0_209 = arith.constant 0 : index
    %c0_210 = arith.constant 0 : index
    %234 = vector.load %arg22[%c9, %c0_209, %c0_210] : memref<37x20x10xf32, #tpu.memory_space<vmem>>, vector<1x20x10xf32>
    %235 = vector.shape_cast %234 : vector<1x20x10xf32> to vector<20x10xf32>
    %cst_211 = arith.constant dense<0.000000e+00> : vector<1x10xf32>
    %236 = tpu.matmul %233, %235, %cst_211 {dimension_numbers = #tpu.dot_dimension_numbers<[1], [0], [0], [1], [0, 0, 1, 1], [], []>} : vector<1x20xf32>, vector<20x10xf32>, vector<1x10xf32> -> vector<1x10xf32>
    %237 = arith.addf %232, %236 : vector<1x10xf32>
    %238 = vector.extract_strided_slice %186 {offsets = [10, 0], sizes = [1, 20], strides = [1, 1]} : vector<37x20xf32> to vector<1x20xf32>
    %c10 = arith.constant 10 : index
    %c0_212 = arith.constant 0 : index
    %c0_213 = arith.constant 0 : index
    %239 = vector.load %arg22[%c10, %c0_212, %c0_213] : memref<37x20x10xf32, #tpu.memory_space<vmem>>, vector<1x20x10xf32>
    %240 = vector.shape_cast %239 : vector<1x20x10xf32> to vector<20x10xf32>
    %cst_214 = arith.constant dense<0.000000e+00> : vector<1x10xf32>
    %241 = tpu.matmul %238, %240, %cst_214 {dimension_numbers = #tpu.dot_dimension_numbers<[1], [0], [0], [1], [0, 0, 1, 1], [], []>} : vector<1x20xf32>, vector<20x10xf32>, vector<1x10xf32> -> vector<1x10xf32>
    %242 = arith.addf %237, %241 : vector<1x10xf32>
    %243 = vector.extract_strided_slice %186 {offsets = [11, 0], sizes = [1, 20], strides = [1, 1]} : vector<37x20xf32> to vector<1x20xf32>
    %c11 = arith.constant 11 : index
    %c0_215 = arith.constant 0 : index
    %c0_216 = arith.constant 0 : index
    %244 = vector.load %arg22[%c11, %c0_215, %c0_216] : memref<37x20x10xf32, #tpu.memory_space<vmem>>, vector<1x20x10xf32>
    %245 = vector.shape_cast %244 : vector<1x20x10xf32> to vector<20x10xf32>
    %cst_217 = arith.constant dense<0.000000e+00> : vector<1x10xf32>
    %246 = tpu.matmul %243, %245, %cst_217 {dimension_numbers = #tpu.dot_dimension_numbers<[1], [0], [0], [1], [0, 0, 1, 1], [], []>} : vector<1x20xf32>, vector<20x10xf32>, vector<1x10xf32> -> vector<1x10xf32>
    %247 = arith.addf %242, %246 : vector<1x10xf32>
    %248 = vector.extract_strided_slice %186 {offsets = [12, 0], sizes = [1, 20], strides = [1, 1]} : vector<37x20xf32> to vector<1x20xf32>
    %c12 = arith.constant 12 : index
    %c0_218 = arith.constant 0 : index
    %c0_219 = arith.constant 0 : index
    %249 = vector.load %arg22[%c12, %c0_218, %c0_219] : memref<37x20x10xf32, #tpu.memory_space<vmem>>, vector<1x20x10xf32>
    %250 = vector.shape_cast %249 : vector<1x20x10xf32> to vector<20x10xf32>
    %cst_220 = arith.constant dense<0.000000e+00> : vector<1x10xf32>
    %251 = tpu.matmul %248, %250, %cst_220 {dimension_numbers = #tpu.dot_dimension_numbers<[1], [0], [0], [1], [0, 0, 1, 1], [], []>} : vector<1x20xf32>, vector<20x10xf32>, vector<1x10xf32> -> vector<1x10xf32>
    %252 = arith.addf %247, %251 : vector<1x10xf32>
    %253 = vector.extract_strided_slice %186 {offsets = [13, 0], sizes = [1, 20], strides = [1, 1]} : vector<37x20xf32> to vector<1x20xf32>
    %c13 = arith.constant 13 : index
    %c0_221 = arith.constant 0 : index
    %c0_222 = arith.constant 0 : index
    %254 = vector.load %arg22[%c13, %c0_221, %c0_222] : memref<37x20x10xf32, #tpu.memory_space<vmem>>, vector<1x20x10xf32>
    %255 = vector.shape_cast %254 : vector<1x20x10xf32> to vector<20x10xf32>
    %cst_223 = arith.constant dense<0.000000e+00> : vector<1x10xf32>
    %256 = tpu.matmul %253, %255, %cst_223 {dimension_numbers = #tpu.dot_dimension_numbers<[1], [0], [0], [1], [0, 0, 1, 1], [], []>} : vector<1x20xf32>, vector<20x10xf32>, vector<1x10xf32> -> vector<1x10xf32>
    %257 = arith.addf %252, %256 : vector<1x10xf32>
    %258 = vector.extract_strided_slice %186 {offsets = [14, 0], sizes = [1, 20], strides = [1, 1]} : vector<37x20xf32> to vector<1x20xf32>
    %c14 = arith.constant 14 : index
    %c0_224 = arith.constant 0 : index
    %c0_225 = arith.constant 0 : index
    %259 = vector.load %arg22[%c14, %c0_224, %c0_225] : memref<37x20x10xf32, #tpu.memory_space<vmem>>, vector<1x20x10xf32>
    %260 = vector.shape_cast %259 : vector<1x20x10xf32> to vector<20x10xf32>
    %cst_226 = arith.constant dense<0.000000e+00> : vector<1x10xf32>
    %261 = tpu.matmul %258, %260, %cst_226 {dimension_numbers = #tpu.dot_dimension_numbers<[1], [0], [0], [1], [0, 0, 1, 1], [], []>} : vector<1x20xf32>, vector<20x10xf32>, vector<1x10xf32> -> vector<1x10xf32>
    %262 = arith.addf %257, %261 : vector<1x10xf32>
    %263 = vector.extract_strided_slice %186 {offsets = [15, 0], sizes = [1, 20], strides = [1, 1]} : vector<37x20xf32> to vector<1x20xf32>
    %c15 = arith.constant 15 : index
    %c0_227 = arith.constant 0 : index
    %c0_228 = arith.constant 0 : index
    %264 = vector.load %arg22[%c15, %c0_227, %c0_228] : memref<37x20x10xf32, #tpu.memory_space<vmem>>, vector<1x20x10xf32>
    %265 = vector.shape_cast %264 : vector<1x20x10xf32> to vector<20x10xf32>
    %cst_229 = arith.constant dense<0.000000e+00> : vector<1x10xf32>
    %266 = tpu.matmul %263, %265, %cst_229 {dimension_numbers = #tpu.dot_dimension_numbers<[1], [0], [0], [1], [0, 0, 1, 1], [], []>} : vector<1x20xf32>, vector<20x10xf32>, vector<1x10xf32> -> vector<1x10xf32>
    %267 = arith.addf %262, %266 : vector<1x10xf32>
    %268 = vector.extract_strided_slice %186 {offsets = [16, 0], sizes = [1, 20], strides = [1, 1]} : vector<37x20xf32> to vector<1x20xf32>
    %c16 = arith.constant 16 : index
    %c0_230 = arith.constant 0 : index
    %c0_231 = arith.constant 0 : index
    %269 = vector.load %arg22[%c16, %c0_230, %c0_231] : memref<37x20x10xf32, #tpu.memory_space<vmem>>, vector<1x20x10xf32>
    %270 = vector.shape_cast %269 : vector<1x20x10xf32> to vector<20x10xf32>
    %cst_232 = arith.constant dense<0.000000e+00> : vector<1x10xf32>
    %271 = tpu.matmul %268, %270, %cst_232 {dimension_numbers = #tpu.dot_dimension_numbers<[1], [0], [0], [1], [0, 0, 1, 1], [], []>} : vector<1x20xf32>, vector<20x10xf32>, vector<1x10xf32> -> vector<1x10xf32>
    %272 = arith.addf %267, %271 : vector<1x10xf32>
    %273 = vector.extract_strided_slice %186 {offsets = [17, 0], sizes = [1, 20], strides = [1, 1]} : vector<37x20xf32> to vector<1x20xf32>
    %c17 = arith.constant 17 : index
    %c0_233 = arith.constant 0 : index
    %c0_234 = arith.constant 0 : index
    %274 = vector.load %arg22[%c17, %c0_233, %c0_234] : memref<37x20x10xf32, #tpu.memory_space<vmem>>, vector<1x20x10xf32>
    %275 = vector.shape_cast %274 : vector<1x20x10xf32> to vector<20x10xf32>
    %cst_235 = arith.constant dense<0.000000e+00> : vector<1x10xf32>
    %276 = tpu.matmul %273, %275, %cst_235 {dimension_numbers = #tpu.dot_dimension_numbers<[1], [0], [0], [1], [0, 0, 1, 1], [], []>} : vector<1x20xf32>, vector<20x10xf32>, vector<1x10xf32> -> vector<1x10xf32>
    %277 = arith.addf %272, %276 : vector<1x10xf32>
    %278 = vector.extract_strided_slice %186 {offsets = [18, 0], sizes = [1, 20], strides = [1, 1]} : vector<37x20xf32> to vector<1x20xf32>
    %c18 = arith.constant 18 : index
    %c0_236 = arith.constant 0 : index
    %c0_237 = arith.constant 0 : index
    %279 = vector.load %arg22[%c18, %c0_236, %c0_237] : memref<37x20x10xf32, #tpu.memory_space<vmem>>, vector<1x20x10xf32>
    %280 = vector.shape_cast %279 : vector<1x20x10xf32> to vector<20x10xf32>
    %cst_238 = arith.constant dense<0.000000e+00> : vector<1x10xf32>
    %281 = tpu.matmul %278, %280, %cst_238 {dimension_numbers = #tpu.dot_dimension_numbers<[1], [0], [0], [1], [0, 0, 1, 1], [], []>} : vector<1x20xf32>, vector<20x10xf32>, vector<1x10xf32> -> vector<1x10xf32>
    %282 = arith.addf %277, %281 : vector<1x10xf32>
    %283 = vector.extract_strided_slice %186 {offsets = [19, 0], sizes = [1, 20], strides = [1, 1]} : vector<37x20xf32> to vector<1x20xf32>
    %c19 = arith.constant 19 : index
    %c0_239 = arith.constant 0 : index
    %c0_240 = arith.constant 0 : index
    %284 = vector.load %arg22[%c19, %c0_239, %c0_240] : memref<37x20x10xf32, #tpu.memory_space<vmem>>, vector<1x20x10xf32>
    %285 = vector.shape_cast %284 : vector<1x20x10xf32> to vector<20x10xf32>
    %cst_241 = arith.constant dense<0.000000e+00> : vector<1x10xf32>
    %286 = tpu.matmul %283, %285, %cst_241 {dimension_numbers = #tpu.dot_dimension_numbers<[1], [0], [0], [1], [0, 0, 1, 1], [], []>} : vector<1x20xf32>, vector<20x10xf32>, vector<1x10xf32> -> vector<1x10xf32>
    %287 = arith.addf %282, %286 : vector<1x10xf32>
    %288 = vector.extract_strided_slice %186 {offsets = [20, 0], sizes = [1, 20], strides = [1, 1]} : vector<37x20xf32> to vector<1x20xf32>
    %c20 = arith.constant 20 : index
    %c0_242 = arith.constant 0 : index
    %c0_243 = arith.constant 0 : index
    %289 = vector.load %arg22[%c20, %c0_242, %c0_243] : memref<37x20x10xf32, #tpu.memory_space<vmem>>, vector<1x20x10xf32>
    %290 = vector.shape_cast %289 : vector<1x20x10xf32> to vector<20x10xf32>
    %cst_244 = arith.constant dense<0.000000e+00> : vector<1x10xf32>
    %291 = tpu.matmul %288, %290, %cst_244 {dimension_numbers = #tpu.dot_dimension_numbers<[1], [0], [0], [1], [0, 0, 1, 1], [], []>} : vector<1x20xf32>, vector<20x10xf32>, vector<1x10xf32> -> vector<1x10xf32>
    %292 = arith.addf %287, %291 : vector<1x10xf32>
    %293 = vector.extract_strided_slice %186 {offsets = [21, 0], sizes = [1, 20], strides = [1, 1]} : vector<37x20xf32> to vector<1x20xf32>
    %c21 = arith.constant 21 : index
    %c0_245 = arith.constant 0 : index
    %c0_246 = arith.constant 0 : index
    %294 = vector.load %arg22[%c21, %c0_245, %c0_246] : memref<37x20x10xf32, #tpu.memory_space<vmem>>, vector<1x20x10xf32>
    %295 = vector.shape_cast %294 : vector<1x20x10xf32> to vector<20x10xf32>
    %cst_247 = arith.constant dense<0.000000e+00> : vector<1x10xf32>
    %296 = tpu.matmul %293, %295, %cst_247 {dimension_numbers = #tpu.dot_dimension_numbers<[1], [0], [0], [1], [0, 0, 1, 1], [], []>} : vector<1x20xf32>, vector<20x10xf32>, vector<1x10xf32> -> vector<1x10xf32>
    %297 = arith.addf %292, %296 : vector<1x10xf32>
    %298 = vector.extract_strided_slice %186 {offsets = [22, 0], sizes = [1, 20], strides = [1, 1]} : vector<37x20xf32> to vector<1x20xf32>
    %c22 = arith.constant 22 : index
    %c0_248 = arith.constant 0 : index
    %c0_249 = arith.constant 0 : index
    %299 = vector.load %arg22[%c22, %c0_248, %c0_249] : memref<37x20x10xf32, #tpu.memory_space<vmem>>, vector<1x20x10xf32>
    %300 = vector.shape_cast %299 : vector<1x20x10xf32> to vector<20x10xf32>
    %cst_250 = arith.constant dense<0.000000e+00> : vector<1x10xf32>
    %301 = tpu.matmul %298, %300, %cst_250 {dimension_numbers = #tpu.dot_dimension_numbers<[1], [0], [0], [1], [0, 0, 1, 1], [], []>} : vector<1x20xf32>, vector<20x10xf32>, vector<1x10xf32> -> vector<1x10xf32>
    %302 = arith.addf %297, %301 : vector<1x10xf32>
    %303 = vector.extract_strided_slice %186 {offsets = [23, 0], sizes = [1, 20], strides = [1, 1]} : vector<37x20xf32> to vector<1x20xf32>
    %c23 = arith.constant 23 : index
    %c0_251 = arith.constant 0 : index
    %c0_252 = arith.constant 0 : index
    %304 = vector.load %arg22[%c23, %c0_251, %c0_252] : memref<37x20x10xf32, #tpu.memory_space<vmem>>, vector<1x20x10xf32>
    %305 = vector.shape_cast %304 : vector<1x20x10xf32> to vector<20x10xf32>
    %cst_253 = arith.constant dense<0.000000e+00> : vector<1x10xf32>
    %306 = tpu.matmul %303, %305, %cst_253 {dimension_numbers = #tpu.dot_dimension_numbers<[1], [0], [0], [1], [0, 0, 1, 1], [], []>} : vector<1x20xf32>, vector<20x10xf32>, vector<1x10xf32> -> vector<1x10xf32>
    %307 = arith.addf %302, %306 : vector<1x10xf32>
    %308 = vector.extract_strided_slice %186 {offsets = [24, 0], sizes = [1, 20], strides = [1, 1]} : vector<37x20xf32> to vector<1x20xf32>
    %c24 = arith.constant 24 : index
    %c0_254 = arith.constant 0 : index
    %c0_255 = arith.constant 0 : index
    %309 = vector.load %arg22[%c24, %c0_254, %c0_255] : memref<37x20x10xf32, #tpu.memory_space<vmem>>, vector<1x20x10xf32>
    %310 = vector.shape_cast %309 : vector<1x20x10xf32> to vector<20x10xf32>
    %cst_256 = arith.constant dense<0.000000e+00> : vector<1x10xf32>
    %311 = tpu.matmul %308, %310, %cst_256 {dimension_numbers = #tpu.dot_dimension_numbers<[1], [0], [0], [1], [0, 0, 1, 1], [], []>} : vector<1x20xf32>, vector<20x10xf32>, vector<1x10xf32> -> vector<1x10xf32>
    %312 = arith.addf %307, %311 : vector<1x10xf32>
    %313 = vector.extract_strided_slice %186 {offsets = [25, 0], sizes = [1, 20], strides = [1, 1]} : vector<37x20xf32> to vector<1x20xf32>
    %c25 = arith.constant 25 : index
    %c0_257 = arith.constant 0 : index
    %c0_258 = arith.constant 0 : index
    %314 = vector.load %arg22[%c25, %c0_257, %c0_258] : memref<37x20x10xf32, #tpu.memory_space<vmem>>, vector<1x20x10xf32>
    %315 = vector.shape_cast %314 : vector<1x20x10xf32> to vector<20x10xf32>
    %cst_259 = arith.constant dense<0.000000e+00> : vector<1x10xf32>
    %316 = tpu.matmul %313, %315, %cst_259 {dimension_numbers = #tpu.dot_dimension_numbers<[1], [0], [0], [1], [0, 0, 1, 1], [], []>} : vector<1x20xf32>, vector<20x10xf32>, vector<1x10xf32> -> vector<1x10xf32>
    %317 = arith.addf %312, %316 : vector<1x10xf32>
    %318 = vector.extract_strided_slice %186 {offsets = [26, 0], sizes = [1, 20], strides = [1, 1]} : vector<37x20xf32> to vector<1x20xf32>
    %c26 = arith.constant 26 : index
    %c0_260 = arith.constant 0 : index
    %c0_261 = arith.constant 0 : index
    %319 = vector.load %arg22[%c26, %c0_260, %c0_261] : memref<37x20x10xf32, #tpu.memory_space<vmem>>, vector<1x20x10xf32>
    %320 = vector.shape_cast %319 : vector<1x20x10xf32> to vector<20x10xf32>
    %cst_262 = arith.constant dense<0.000000e+00> : vector<1x10xf32>
    %321 = tpu.matmul %318, %320, %cst_262 {dimension_numbers = #tpu.dot_dimension_numbers<[1], [0], [0], [1], [0, 0, 1, 1], [], []>} : vector<1x20xf32>, vector<20x10xf32>, vector<1x10xf32> -> vector<1x10xf32>
    %322 = arith.addf %317, %321 : vector<1x10xf32>
    %323 = vector.extract_strided_slice %186 {offsets = [27, 0], sizes = [1, 20], strides = [1, 1]} : vector<37x20xf32> to vector<1x20xf32>
    %c27 = arith.constant 27 : index
    %c0_263 = arith.constant 0 : index
    %c0_264 = arith.constant 0 : index
    %324 = vector.load %arg22[%c27, %c0_263, %c0_264] : memref<37x20x10xf32, #tpu.memory_space<vmem>>, vector<1x20x10xf32>
    %325 = vector.shape_cast %324 : vector<1x20x10xf32> to vector<20x10xf32>
    %cst_265 = arith.constant dense<0.000000e+00> : vector<1x10xf32>
    %326 = tpu.matmul %323, %325, %cst_265 {dimension_numbers = #tpu.dot_dimension_numbers<[1], [0], [0], [1], [0, 0, 1, 1], [], []>} : vector<1x20xf32>, vector<20x10xf32>, vector<1x10xf32> -> vector<1x10xf32>
    %327 = arith.addf %322, %326 : vector<1x10xf32>
    %328 = vector.extract_strided_slice %186 {offsets = [28, 0], sizes = [1, 20], strides = [1, 1]} : vector<37x20xf32> to vector<1x20xf32>
    %c28 = arith.constant 28 : index
    %c0_266 = arith.constant 0 : index
    %c0_267 = arith.constant 0 : index
    %329 = vector.load %arg22[%c28, %c0_266, %c0_267] : memref<37x20x10xf32, #tpu.memory_space<vmem>>, vector<1x20x10xf32>
    %330 = vector.shape_cast %329 : vector<1x20x10xf32> to vector<20x10xf32>
    %cst_268 = arith.constant dense<0.000000e+00> : vector<1x10xf32>
    %331 = tpu.matmul %328, %330, %cst_268 {dimension_numbers = #tpu.dot_dimension_numbers<[1], [0], [0], [1], [0, 0, 1, 1], [], []>} : vector<1x20xf32>, vector<20x10xf32>, vector<1x10xf32> -> vector<1x10xf32>
    %332 = arith.addf %327, %331 : vector<1x10xf32>
    %333 = vector.extract_strided_slice %186 {offsets = [29, 0], sizes = [1, 20], strides = [1, 1]} : vector<37x20xf32> to vector<1x20xf32>
    %c29 = arith.constant 29 : index
    %c0_269 = arith.constant 0 : index
    %c0_270 = arith.constant 0 : index
    %334 = vector.load %arg22[%c29, %c0_269, %c0_270] : memref<37x20x10xf32, #tpu.memory_space<vmem>>, vector<1x20x10xf32>
    %335 = vector.shape_cast %334 : vector<1x20x10xf32> to vector<20x10xf32>
    %cst_271 = arith.constant dense<0.000000e+00> : vector<1x10xf32>
    %336 = tpu.matmul %333, %335, %cst_271 {dimension_numbers = #tpu.dot_dimension_numbers<[1], [0], [0], [1], [0, 0, 1, 1], [], []>} : vector<1x20xf32>, vector<20x10xf32>, vector<1x10xf32> -> vector<1x10xf32>
    %337 = arith.addf %332, %336 : vector<1x10xf32>
    %338 = vector.extract_strided_slice %186 {offsets = [30, 0], sizes = [1, 20], strides = [1, 1]} : vector<37x20xf32> to vector<1x20xf32>
    %c30 = arith.constant 30 : index
    %c0_272 = arith.constant 0 : index
    %c0_273 = arith.constant 0 : index
    %339 = vector.load %arg22[%c30, %c0_272, %c0_273] : memref<37x20x10xf32, #tpu.memory_space<vmem>>, vector<1x20x10xf32>
    %340 = vector.shape_cast %339 : vector<1x20x10xf32> to vector<20x10xf32>
    %cst_274 = arith.constant dense<0.000000e+00> : vector<1x10xf32>
    %341 = tpu.matmul %338, %340, %cst_274 {dimension_numbers = #tpu.dot_dimension_numbers<[1], [0], [0], [1], [0, 0, 1, 1], [], []>} : vector<1x20xf32>, vector<20x10xf32>, vector<1x10xf32> -> vector<1x10xf32>
    %342 = arith.addf %337, %341 : vector<1x10xf32>
    %343 = vector.extract_strided_slice %186 {offsets = [31, 0], sizes = [1, 20], strides = [1, 1]} : vector<37x20xf32> to vector<1x20xf32>
    %c31 = arith.constant 31 : index
    %c0_275 = arith.constant 0 : index
    %c0_276 = arith.constant 0 : index
    %344 = vector.load %arg22[%c31, %c0_275, %c0_276] : memref<37x20x10xf32, #tpu.memory_space<vmem>>, vector<1x20x10xf32>
    %345 = vector.shape_cast %344 : vector<1x20x10xf32> to vector<20x10xf32>
    %cst_277 = arith.constant dense<0.000000e+00> : vector<1x10xf32>
    %346 = tpu.matmul %343, %345, %cst_277 {dimension_numbers = #tpu.dot_dimension_numbers<[1], [0], [0], [1], [0, 0, 1, 1], [], []>} : vector<1x20xf32>, vector<20x10xf32>, vector<1x10xf32> -> vector<1x10xf32>
    %347 = arith.addf %342, %346 : vector<1x10xf32>
    %348 = vector.extract_strided_slice %186 {offsets = [32, 0], sizes = [1, 20], strides = [1, 1]} : vector<37x20xf32> to vector<1x20xf32>
    %c32 = arith.constant 32 : index
    %c0_278 = arith.constant 0 : index
    %c0_279 = arith.constant 0 : index
    %349 = vector.load %arg22[%c32, %c0_278, %c0_279] : memref<37x20x10xf32, #tpu.memory_space<vmem>>, vector<1x20x10xf32>
    %350 = vector.shape_cast %349 : vector<1x20x10xf32> to vector<20x10xf32>
    %cst_280 = arith.constant dense<0.000000e+00> : vector<1x10xf32>
    %351 = tpu.matmul %348, %350, %cst_280 {dimension_numbers = #tpu.dot_dimension_numbers<[1], [0], [0], [1], [0, 0, 1, 1], [], []>} : vector<1x20xf32>, vector<20x10xf32>, vector<1x10xf32> -> vector<1x10xf32>
    %352 = arith.addf %347, %351 : vector<1x10xf32>
    %353 = vector.extract_strided_slice %186 {offsets = [33, 0], sizes = [1, 20], strides = [1, 1]} : vector<37x20xf32> to vector<1x20xf32>
    %c33 = arith.constant 33 : index
    %c0_281 = arith.constant 0 : index
    %c0_282 = arith.constant 0 : index
    %354 = vector.load %arg22[%c33, %c0_281, %c0_282] : memref<37x20x10xf32, #tpu.memory_space<vmem>>, vector<1x20x10xf32>
    %355 = vector.shape_cast %354 : vector<1x20x10xf32> to vector<20x10xf32>
    %cst_283 = arith.constant dense<0.000000e+00> : vector<1x10xf32>
    %356 = tpu.matmul %353, %355, %cst_283 {dimension_numbers = #tpu.dot_dimension_numbers<[1], [0], [0], [1], [0, 0, 1, 1], [], []>} : vector<1x20xf32>, vector<20x10xf32>, vector<1x10xf32> -> vector<1x10xf32>
    %357 = arith.addf %352, %356 : vector<1x10xf32>
    %358 = vector.extract_strided_slice %186 {offsets = [34, 0], sizes = [1, 20], strides = [1, 1]} : vector<37x20xf32> to vector<1x20xf32>
    %c34 = arith.constant 34 : index
    %c0_284 = arith.constant 0 : index
    %c0_285 = arith.constant 0 : index
    %359 = vector.load %arg22[%c34, %c0_284, %c0_285] : memref<37x20x10xf32, #tpu.memory_space<vmem>>, vector<1x20x10xf32>
    %360 = vector.shape_cast %359 : vector<1x20x10xf32> to vector<20x10xf32>
    %cst_286 = arith.constant dense<0.000000e+00> : vector<1x10xf32>
    %361 = tpu.matmul %358, %360, %cst_286 {dimension_numbers = #tpu.dot_dimension_numbers<[1], [0], [0], [1], [0, 0, 1, 1], [], []>} : vector<1x20xf32>, vector<20x10xf32>, vector<1x10xf32> -> vector<1x10xf32>
    %362 = arith.addf %357, %361 : vector<1x10xf32>
    %363 = vector.extract_strided_slice %186 {offsets = [35, 0], sizes = [1, 20], strides = [1, 1]} : vector<37x20xf32> to vector<1x20xf32>
    %c35 = arith.constant 35 : index
    %c0_287 = arith.constant 0 : index
    %c0_288 = arith.constant 0 : index
    %364 = vector.load %arg22[%c35, %c0_287, %c0_288] : memref<37x20x10xf32, #tpu.memory_space<vmem>>, vector<1x20x10xf32>
    %365 = vector.shape_cast %364 : vector<1x20x10xf32> to vector<20x10xf32>
    %cst_289 = arith.constant dense<0.000000e+00> : vector<1x10xf32>
    %366 = tpu.matmul %363, %365, %cst_289 {dimension_numbers = #tpu.dot_dimension_numbers<[1], [0], [0], [1], [0, 0, 1, 1], [], []>} : vector<1x20xf32>, vector<20x10xf32>, vector<1x10xf32> -> vector<1x10xf32>
    %367 = arith.addf %362, %366 : vector<1x10xf32>
    %368 = vector.extract_strided_slice %186 {offsets = [36, 0], sizes = [1, 20], strides = [1, 1]} : vector<37x20xf32> to vector<1x20xf32>
    %c36 = arith.constant 36 : index
    %c0_290 = arith.constant 0 : index
    %c0_291 = arith.constant 0 : index
    %369 = vector.load %arg22[%c36, %c0_290, %c0_291] : memref<37x20x10xf32, #tpu.memory_space<vmem>>, vector<1x20x10xf32>
    %370 = vector.shape_cast %369 : vector<1x20x10xf32> to vector<20x10xf32>
    %cst_292 = arith.constant dense<0.000000e+00> : vector<1x10xf32>
    %371 = tpu.matmul %368, %370, %cst_292 {dimension_numbers = #tpu.dot_dimension_numbers<[1], [0], [0], [1], [0, 0, 1, 1], [], []>} : vector<1x20xf32>, vector<20x10xf32>, vector<1x10xf32> -> vector<1x10xf32>
    %372 = arith.addf %367, %371 : vector<1x10xf32>
    %cst_293 = arith.constant 0.000000e+00 : f32
    %373 = vector.broadcast %cst_293 : f32 to vector<1x10xf32>
    %374 = arith.maximumf %372, %373 : vector<1x10xf32>
    %c0_294 = arith.constant 0 : index
    %c0_295 = arith.constant 0 : index
    %375 = vector.load %arg24[%c0_294, %c0_295] : memref<10x2xf32, #tpu.memory_space<vmem>>, vector<10x2xf32>
    %cst_296 = arith.constant dense<0.000000e+00> : vector<1x2xf32>
    %376 = tpu.matmul %374, %375, %cst_296 {dimension_numbers = #tpu.dot_dimension_numbers<[1], [0], [0], [1], [0, 0, 1, 1], [], []>} : vector<1x10xf32>, vector<10x2xf32>, vector<1x2xf32> -> vector<1x2xf32>
    %c0_297 = arith.constant 0 : index
    %c0_298 = arith.constant 0 : index
    %377 = vector.load %arg25[%c0_297, %c0_298] : memref<1x2xf32, #tpu.memory_space<vmem>>, vector<1x2xf32>
    %378 = arith.addf %376, %377 : vector<1x2xf32>
    %c0_299 = arith.constant 0 : index
    %c0_300 = arith.constant 0 : index
    %c0_301 = arith.constant 0 : index
    %379 = vector.load %arg26[%c0_299, %c0_300, %c0_301] : memref<1x1x2xf32, #tpu.memory_space<vmem>>, vector<1x1x2xf32>
    %380 = vector.shape_cast %379 : vector<1x1x2xf32> to vector<1x2xf32>
    %381 = vector.shape_cast %378 : vector<1x2xf32> to vector<1x1x2xf32>
    tpu.vector_store %arg26[%c0_299, %c0_300, %c0_301], %381 {strides = array<i32>} : memref<1x1x2xf32, #tpu.memory_space<vmem>>, vector<1x1x2xf32>,
    return
  }
  func.func @transform_0(%arg0: i32) -> (i32, i32, i32) {
    %c0_i32 = arith.constant 0 : i32
    %c0_i32_0 = arith.constant 0 : i32
    %c0_i32_1 = arith.constant 0 : i32
    return %arg0, %c0_i32, %c0_i32_0 : i32, i32, i32
  }
  func.func @transform_1(%arg0: i32) -> (i32, i32, i32) {
    %c0_i32 = arith.constant 0 : i32
    %c0_i32_0 = arith.constant 0 : i32
    %c0_i32_1 = arith.constant 0 : i32
    %c0_i32_2 = arith.constant 0 : i32
    return %c0_i32, %c0_i32_0, %c0_i32_1 : i32, i32, i32
  }
  func.func @transform_2(%arg0: i32) -> (i32, i32) {
    %c0_i32 = arith.constant 0 : i32
    %c0_i32_0 = arith.constant 0 : i32
    %c0_i32_1 = arith.constant 0 : i32
    return %c0_i32, %c0_i32_0 : i32, i32
  }
  func.func @transform_3(%arg0: i32) -> (i32, i32) {
    %c0_i32 = arith.constant 0 : i32
    %c0_i32_0 = arith.constant 0 : i32
    %c0_i32_1 = arith.constant 0 : i32
    return %c0_i32, %c0_i32_0 : i32, i32
  }
  func.func @transform_4(%arg0: i32) -> (i32, i32) {
    %c0_i32 = arith.constant 0 : i32
    %c0_i32_0 = arith.constant 0 : i32
    %c0_i32_1 = arith.constant 0 : i32
    return %c0_i32, %c0_i32_0 : i32, i32
  }
  func.func @transform_5(%arg0: i32) -> (i32, i32, i32) {
    %c0_i32 = arith.constant 0 : i32
    %c0_i32_0 = arith.constant 0 : i32
    %c0_i32_1 = arith.constant 0 : i32
    %c0_i32_2 = arith.constant 0 : i32
    return %c0_i32, %c0_i32_0, %c0_i32_1 : i32, i32, i32
  }
  func.func @transform_6(%arg0: i32) -> (i32, i32) {
    %c0_i32 = arith.constant 0 : i32
    %c0_i32_0 = arith.constant 0 : i32
    %c0_i32_1 = arith.constant 0 : i32
    return %c0_i32, %c0_i32_0 : i32, i32
  }
  func.func @transform_7(%arg0: i32) -> (i32, i32) {
    %c0_i32 = arith.constant 0 : i32
    %c0_i32_0 = arith.constant 0 : i32
    %c0_i32_1 = arith.constant 0 : i32
    return %c0_i32, %c0_i32_0 : i32, i32
  }
  func.func @transform_8(%arg0: i32) -> (i32, i32) {
    %c0_i32 = arith.constant 0 : i32
    %c0_i32_0 = arith.constant 0 : i32
    %c0_i32_1 = arith.constant 0 : i32
    return %c0_i32, %c0_i32_0 : i32, i32
  }
  func.func @transform_9(%arg0: i32) -> (i32, i32, i32) {
    %c0_i32 = arith.constant 0 : i32
    %c0_i32_0 = arith.constant 0 : i32
    %c0_i32_1 = arith.constant 0 : i32
    %c0_i32_2 = arith.constant 0 : i32
    return %c0_i32, %c0_i32_0, %c0_i32_1 : i32, i32, i32
  }
  func.func @transform_10(%arg0: i32) -> (i32, i32) {
    %c0_i32 = arith.constant 0 : i32
    %c0_i32_0 = arith.constant 0 : i32
    %c0_i32_1 = arith.constant 0 : i32
    return %c0_i32, %c0_i32_0 : i32, i32
  }
  func.func @transform_11(%arg0: i32) -> (i32, i32) {
    %c0_i32 = arith.constant 0 : i32
    %c0_i32_0 = arith.constant 0 : i32
    %c0_i32_1 = arith.constant 0 : i32
    return %c0_i32, %c0_i32_0 : i32, i32
  }
  func.func @transform_12(%arg0: i32) -> (i32, i32) {
    %c0_i32 = arith.constant 0 : i32
    %c0_i32_0 = arith.constant 0 : i32
    %c0_i32_1 = arith.constant 0 : i32
    return %c0_i32, %c0_i32_0 : i32, i32
  }
  func.func @transform_13(%arg0: i32) -> (i32, i32, i32) {
    %c0_i32 = arith.constant 0 : i32
    %c0_i32_0 = arith.constant 0 : i32
    %c0_i32_1 = arith.constant 0 : i32
    %c0_i32_2 = arith.constant 0 : i32
    return %c0_i32, %c0_i32_0, %c0_i32_1 : i32, i32, i32
  }
  func.func @transform_14(%arg0: i32) -> (i32, i32) {
    %c0_i32 = arith.constant 0 : i32
    %c0_i32_0 = arith.constant 0 : i32
    %c0_i32_1 = arith.constant 0 : i32
    return %c0_i32, %c0_i32_0 : i32, i32
  }
  func.func @transform_15(%arg0: i32) -> (i32, i32) {
    %c0_i32 = arith.constant 0 : i32
    %c0_i32_0 = arith.constant 0 : i32
    %c0_i32_1 = arith.constant 0 : i32
    return %c0_i32, %c0_i32_0 : i32, i32
  }
  func.func @transform_16(%arg0: i32) -> (i32, i32) {
    %c0_i32 = arith.constant 0 : i32
    %c0_i32_0 = arith.constant 0 : i32
    %c0_i32_1 = arith.constant 0 : i32
    return %c0_i32, %c0_i32_0 : i32, i32
  }
  func.func @transform_17(%arg0: i32) -> (i32, i32, i32) {
    %c0_i32 = arith.constant 0 : i32
    %c0_i32_0 = arith.constant 0 : i32
    %c0_i32_1 = arith.constant 0 : i32
    %c0_i32_2 = arith.constant 0 : i32
    return %c0_i32, %c0_i32_0, %c0_i32_1 : i32, i32, i32
  }
  func.func @transform_18(%arg0: i32) -> (i32, i32) {
    %c0_i32 = arith.constant 0 : i32
    %c0_i32_0 = arith.constant 0 : i32
    %c0_i32_1 = arith.constant 0 : i32
    return %c0_i32, %c0_i32_0 : i32, i32
  }
  func.func @transform_19(%arg0: i32) -> (i32, i32) {
    %c0_i32 = arith.constant 0 : i32
    %c0_i32_0 = arith.constant 0 : i32
    %c0_i32_1 = arith.constant 0 : i32
    return %c0_i32, %c0_i32_0 : i32, i32
  }
  func.func @transform_20(%arg0: i32) -> (i32, i32) {
    %c0_i32 = arith.constant 0 : i32
    %c0_i32_0 = arith.constant 0 : i32
    %c0_i32_1 = arith.constant 0 : i32
    return %c0_i32, %c0_i32_0 : i32, i32
  }
  func.func @transform_21(%arg0: i32) -> (i32, i32, i32) {
    %c0_i32 = arith.constant 0 : i32
    %c0_i32_0 = arith.constant 0 : i32
    %c0_i32_1 = arith.constant 0 : i32
    %c0_i32_2 = arith.constant 0 : i32
    return %c0_i32, %c0_i32_0, %c0_i32_1 : i32, i32, i32
  }
  func.func @transform_22(%arg0: i32) -> (i32, i32) {
    %c0_i32 = arith.constant 0 : i32
    %c0_i32_0 = arith.constant 0 : i32
    %c0_i32_1 = arith.constant 0 : i32
    return %c0_i32, %c0_i32_0 : i32, i32
  }
  func.func @transform_23(%arg0: i32) -> (i32, i32) {
    %c0_i32 = arith.constant 0 : i32
    %c0_i32_0 = arith.constant 0 : i32
    %c0_i32_1 = arith.constant 0 : i32
    return %c0_i32, %c0_i32_0 : i32, i32
  }
  func.func @transform_24(%arg0: i32) -> (i32, i32) {
    %c0_i32 = arith.constant 0 : i32
    %c0_i32_0 = arith.constant 0 : i32
    %c0_i32_1 = arith.constant 0 : i32
    return %c0_i32, %c0_i32_0 : i32, i32
  }
  func.func @transform_25(%arg0: i32) -> (i32, i32, i32) {
    %c0_i32 = arith.constant 0 : i32
    %c0_i32_0 = arith.constant 0 : i32
    %c0_i32_1 = arith.constant 0 : i32
    return %arg0, %c0_i32, %c0_i32_0 : i32, i32, i32
  }
}

</mosaic_0001>

<bundles_post_ra>
// kernel: squeeze.0
= control target key start
LH: loop header
LB: loop body
LE: loop exit
PB: predicated region body
PF: predicated region fallthrough
CT: control target
= control target key end

     0   :  { %s4666_s0 = inlined_call_operand.vmem [shape: f32[2,1250], index: 0, kind: input, shape index: {}]   ;;  %s4667_s1 = inlined_call_operand.vmem [shape: f32[2,1250,1], index: 1, kind: output, shape index: {}]  }
   0x1   :  { %v16_v0 = vld [vmem:[%s4666_s0] ss:$0 sm:$0xff]  ;;  %v2764_v1 = vld [vmem:[%s4666_s0 + $0x1] ss:$0 sm:$0xff]  ;;  %v2810_v2 = vld [vmem:[%s4666_s0 + $0x3] ss:$0 sm:$0xff] }
   0x2   :  { %19 = vbcast.lane.b32.xlu1 %v16_v0, 264  ;;  %6 = vbcast.lane.b32.xlu0 %v16_v0, 256  ;;  %v2808_v3 = vld [vmem:[%s4666_s0 + $0x2] ss:$0 sm:$0xff]  ;;  %v3415_v10 = vld [vmem:[%s4666_s0 + $0x5] ss:$0 sm:$0xff] }
   0x3   :  { %v3420_v11 = vld [vmem:[%s4666_s0 + $0x4] ss:$0 sm:$0xff]  ;;  %v3553_v44 = vld [vmem:[%s4666_s0 + $0x7] ss:$0 sm:$0xff]  ;;  %v3558_v45 = vld [vmem:[%s4666_s0 + $0x6] ss:$0 sm:$0xff] }
   0x6   :  { %27 = vbcast.lane.b32.xlu1 %v2764_v1, 264  ;;  %12 = vbcast.lane.b32.xlu0 %v2764_v1, 256 }
   0xa   :  { %42 = vbcast.lane.b32.xlu1 %v2764_v1, 272  ;;  %34 = vbcast.lane.b32.xlu0 %v16_v0, 272 }
   0xe   :  { %57 = vbcast.lane.b32.xlu1 %v2764_v1, 280  ;;  %49 = vbcast.lane.b32.xlu0 %v16_v0, 280 }
  0x12   :  { %72 = vbcast.lane.b32.xlu1 %v2764_v1, 288  ;;  %64 = vbcast.lane.b32.xlu0 %v16_v0, 288 }
  0x16   :  { %87 = vbcast.lane.b32.xlu1 %v2764_v1, 296  ;;  %79 = vbcast.lane.b32.xlu0 %v16_v0, 296 }
  0x1a   :  { %102 = vbcast.lane.b32.xlu1 %v2764_v1, 304  ;;  %94 = vbcast.lane.b32.xlu0 %v16_v0, 304 }
  0x1e   :  { %117 = vbcast.lane.b32.xlu1 %v2764_v1, 312  ;;  %109 = vbcast.lane.b32.xlu0 %v16_v0, 312 }
  0x22   :  { %132 = vbcast.lane.b32.xlu1 %v2764_v1, 320  ;;  %124 = vbcast.lane.b32.xlu0 %v16_v0, 320 }
  0x26   :  { %147 = vbcast.lane.b32.xlu1 %v2764_v1, 328  ;;  %139 = vbcast.lane.b32.xlu0 %v16_v0, 328 }
  0x2a   :  { %162 = vbcast.lane.b32.xlu1 %v2764_v1, 336  ;;  %154 = vbcast.lane.b32.xlu0 %v16_v0, 336 }
  0x2e   :  { %177 = vbcast.lane.b32.xlu1 %v2764_v1, 344  ;;  %169 = vbcast.lane.b32.xlu0 %v16_v0, 344 }
  0x32   :  { %192 = vbcast.lane.b32.xlu1 %v2764_v1, 352  ;;  %184 = vbcast.lane.b32.xlu0 %v16_v0, 352 }
  0x36   :  { %207 = vbcast.lane.b32.xlu1 %v2764_v1, 360  ;;  %199 = vbcast.lane.b32.xlu0 %v16_v0, 360 }
  0x3a   :  { %222 = vbcast.lane.b32.xlu1 %v2764_v1, 368  ;;  %214 = vbcast.lane.b32.xlu0 %v16_v0, 368 }
  0x3e   :  { %237 = vbcast.lane.b32.xlu1 %v2764_v1, 376  ;;  %229 = vbcast.lane.b32.xlu0 %v16_v0, 376 }
  0x42   :  { %252 = vbcast.lane.b32.xlu1 %v2810_v2, 256  ;;  %244 = vbcast.lane.b32.xlu0 %v2808_v3, 256 }
  0x46   :  { %269 = vbcast.lane.b32.xlu1 %v2810_v2, 264  ;;  %260 = vbcast.lane.b32.xlu0 %v2808_v3, 264 }
  0x4a   :  { %286 = vbcast.lane.b32.xlu1 %v2810_v2, 272  ;;  %277 = vbcast.lane.b32.xlu0 %v2808_v3, 272 }
  0x4e   :  { %303 = vbcast.lane.b32.xlu1 %v2810_v2, 280  ;;  %294 = vbcast.lane.b32.xlu0 %v2808_v3, 280 }
  0x52   :  { %320 = vbcast.lane.b32.xlu1 %v2810_v2, 288  ;;  %311 = vbcast.lane.b32.xlu0 %v2808_v3, 288 }
  0x56   :  { %337 = vbcast.lane.b32.xlu1 %v2810_v2, 296  ;;  %328 = vbcast.lane.b32.xlu0 %v2808_v3, 296 }
  0x5a   :  { %354 = vbcast.lane.b32.xlu1 %v2810_v2, 304  ;;  %345 = vbcast.lane.b32.xlu0 %v2808_v3, 304 }
  0x5e   :  { %371 = vbcast.lane.b32.xlu1 %v2810_v2, 312  ;;  %362 = vbcast.lane.b32.xlu0 %v2808_v3, 312 }
  0x62   :  { %388 = vbcast.lane.b32.xlu1 %v2810_v2, 320  ;;  %379 = vbcast.lane.b32.xlu0 %v2808_v3, 320 }
  0x66   :  { %405 = vbcast.lane.b32.xlu1 %v2810_v2, 328  ;;  %396 = vbcast.lane.b32.xlu0 %v2808_v3, 328 }
  0x6a   :  { %422 = vbcast.lane.b32.xlu1 %v2810_v2, 336  ;;  %413 = vbcast.lane.b32.xlu0 %v2808_v3, 336 }
  0x6e   :  { %439 = vbcast.lane.b32.xlu1 %v2810_v2, 344  ;;  %430 = vbcast.lane.b32.xlu0 %v2808_v3, 344 }
  0x72   :  { %456 = vbcast.lane.b32.xlu1 %v2810_v2, 352  ;;  %447 = vbcast.lane.b32.xlu0 %v2808_v3, 352 }
  0x74   :  { %v20_v4 = vpop.permute.xlu1 %19  ;;  %v7_v5 = vpop.permute.xlu0 %6 }
  0x75   :  { %2763 = vst [vmem:[%s4667_s1 + $0x8] sm:$0xff] %v20_v4  ;;  %8 = vst [vmem:[%s4667_s1] sm:$0xff] %v7_v5 }
  0x76   :  { %473 = vbcast.lane.b32.xlu1 %v2810_v2, 360  ;;  %464 = vbcast.lane.b32.xlu0 %v2808_v3, 360 }
  0x78   :  { %v28_v6 = vpop.permute.xlu1 %27  ;;  %v13_v7 = vpop.permute.xlu0 %12 }
  0x79   :  { %2765 = vst [vmem:[%s4667_s1 + $0x4f0] sm:$0xff] %v28_v6  ;;  %2762 = vst [vmem:[%s4667_s1 + $0x4e8] sm:$0xff] %v13_v7 }
  0x7a   :  { %490 = vbcast.lane.b32.xlu1 %v2810_v2, 368  ;;  %481 = vbcast.lane.b32.xlu0 %v2808_v3, 368 }
  0x7c   :  { %v43_v8 = vpop.permute.xlu1 %42  ;;  %v35_v9 = vpop.permute.xlu0 %34 }
  0x7d   :  { %2768 = vst [vmem:[%s4667_s1 + $0x4f8] sm:$0xff] %v43_v8  ;;  %2766 = vst [vmem:[%s4667_s1 + $0x10] sm:$0xff] %v35_v9 }
  0x7e   :  { %507 = vbcast.lane.b32.xlu1 %v2810_v2, 376  ;;  %498 = vbcast.lane.b32.xlu0 %v2808_v3, 376 }
  0x80   :  { %v58_v12 = vpop.permute.xlu1 %57  ;;  %v50_v13 = vpop.permute.xlu0 %49 }
  0x81   :  { %2771 = vst [vmem:[%s4667_s1 + $0x500] sm:$0xff] %v58_v12  ;;  %2769 = vst [vmem:[%s4667_s1 + $0x18] sm:$0xff] %v50_v13 }
  0x82   :  { %522 = vbcast.lane.b32.xlu1 %v3415_v10, 256  ;;  %514 = vbcast.lane.b32.xlu0 %v3420_v11, 256 }
  0x84   :  { %v73_v14 = vpop.permute.xlu1 %72  ;;  %v65_v15 = vpop.permute.xlu0 %64 }
  0x85   :  { %2774 = vst [vmem:[%s4667_s1 + $0x508] sm:$0xff] %v73_v14  ;;  %2772 = vst [vmem:[%s4667_s1 + $0x20] sm:$0xff] %v65_v15  ;;  %v3691_v14 = vld [vmem:[%s4666_s0 + $0x9] ss:$0 sm:$0xff]  ;;  %v3696_v15 = vld [vmem:[%s4666_s0 + $0x8] ss:$0 sm:$0xff] }
  0x86   :  { %539 = vbcast.lane.b32.xlu1 %v3415_v10, 264  ;;  %530 = vbcast.lane.b32.xlu0 %v3420_v11, 264 }
  0x88   :  { %v88_v16 = vpop.permute.xlu1 %87  ;;  %v80_v17 = vpop.permute.xlu0 %79 }
  0x89   :  { %2777 = vst [vmem:[%s4667_s1 + $0x510] sm:$0xff] %v88_v16  ;;  %2775 = vst [vmem:[%s4667_s1 + $0x28] sm:$0xff] %v80_v17 }
  0x8a   :  { %556 = vbcast.lane.b32.xlu1 %v3415_v10, 272  ;;  %547 = vbcast.lane.b32.xlu0 %v3420_v11, 272 }
  0x8c   :  { %v103_v18 = vpop.permute.xlu1 %102  ;;  %v95_v19 = vpop.permute.xlu0 %94 }
  0x8d   :  { %2780 = vst [vmem:[%s4667_s1 + $0x518] sm:$0xff] %v103_v18  ;;  %2778 = vst [vmem:[%s4667_s1 + $0x30] sm:$0xff] %v95_v19 }
  0x8e   :  { %573 = vbcast.lane.b32.xlu1 %v3415_v10, 280  ;;  %564 = vbcast.lane.b32.xlu0 %v3420_v11, 280 }
  0x90   :  { %v118_v20 = vpop.permute.xlu1 %117  ;;  %v110_v21 = vpop.permute.xlu0 %109 }
  0x91   :  { %2783 = vst [vmem:[%s4667_s1 + $0x520] sm:$0xff] %v118_v20  ;;  %2781 = vst [vmem:[%s4667_s1 + $0x38] sm:$0xff] %v110_v21 }
  0x92   :  { %590 = vbcast.lane.b32.xlu1 %v3415_v10, 288  ;;  %581 = vbcast.lane.b32.xlu0 %v3420_v11, 288 }
  0x94   :  { %v133_v22 = vpop.permute.xlu1 %132  ;;  %v125_v23 = vpop.permute.xlu0 %124 }
  0x95   :  { %2786 = vst [vmem:[%s4667_s1 + $0x528] sm:$0xff] %v133_v22  ;;  %2784 = vst [vmem:[%s4667_s1 + $0x40] sm:$0xff] %v125_v23 }
  0x96   :  { %607 = vbcast.lane.b32.xlu1 %v3415_v10, 296  ;;  %598 = vbcast.lane.b32.xlu0 %v3420_v11, 296 }
  0x98   :  { %v148_v24 = vpop.permute.xlu1 %147  ;;  %v140_v25 = vpop.permute.xlu0 %139 }
  0x99   :  { %2789 = vst [vmem:[%s4667_s1 + $0x530] sm:$0xff] %v148_v24  ;;  %2787 = vst [vmem:[%s4667_s1 + $0x48] sm:$0xff] %v140_v25 }
  0x9a   :  { %624 = vbcast.lane.b32.xlu1 %v3415_v10, 304  ;;  %615 = vbcast.lane.b32.xlu0 %v3420_v11, 304 }
  0x9c   :  { %v163_v26 = vpop.permute.xlu1 %162  ;;  %v155_v27 = vpop.permute.xlu0 %154 }
  0x9d   :  { %2792 = vst [vmem:[%s4667_s1 + $0x538] sm:$0xff] %v163_v26  ;;  %2790 = vst [vmem:[%s4667_s1 + $0x50] sm:$0xff] %v155_v27 }
  0x9e   :  { %641 = vbcast.lane.b32.xlu1 %v3415_v10, 312  ;;  %632 = vbcast.lane.b32.xlu0 %v3420_v11, 312 }
  0xa0   :  { %v178_v28 = vpop.permute.xlu1 %177  ;;  %v170_v29 = vpop.permute.xlu0 %169 }
  0xa1   :  { %2795 = vst [vmem:[%s4667_s1 + $0x540] sm:$0xff] %v178_v28  ;;  %2793 = vst [vmem:[%s4667_s1 + $0x58] sm:$0xff] %v170_v29 }
  0xa2   :  { %658 = vbcast.lane.b32.xlu1 %v3415_v10, 320  ;;  %649 = vbcast.lane.b32.xlu0 %v3420_v11, 320 }
  0xa4   :  { %v193_v30 = vpop.permute.xlu1 %192  ;;  %v185_v31 = vpop.permute.xlu0 %184 }
  0xa5   :  { %2798 = vst [vmem:[%s4667_s1 + $0x548] sm:$0xff] %v193_v30  ;;  %2796 = vst [vmem:[%s4667_s1 + $0x60] sm:$0xff] %v185_v31 }
  0xa6   :  { %675 = vbcast.lane.b32.xlu1 %v3415_v10, 328  ;;  %666 = vbcast.lane.b32.xlu0 %v3420_v11, 328 }
  0xa8   :  { %v208_v32 = vpop.permute.xlu1 %207  ;;  %v200_v33 = vpop.permute.xlu0 %199 }
  0xa9   :  { %2801 = vst [vmem:[%s4667_s1 + $0x550] sm:$0xff] %v208_v32  ;;  %2799 = vst [vmem:[%s4667_s1 + $0x68] sm:$0xff] %v200_v33 }
  0xaa   :  { %692 = vbcast.lane.b32.xlu1 %v3415_v10, 336  ;;  %683 = vbcast.lane.b32.xlu0 %v3420_v11, 336 }
  0xac   :  { %v223_v34 = vpop.permute.xlu1 %222  ;;  %v215_v35 = vpop.permute.xlu0 %214 }
  0xad   :  { %2804 = vst [vmem:[%s4667_s1 + $0x558] sm:$0xff] %v223_v34  ;;  %2802 = vst [vmem:[%s4667_s1 + $0x70] sm:$0xff] %v215_v35 }
  0xae   :  { %709 = vbcast.lane.b32.xlu1 %v3415_v10, 344  ;;  %700 = vbcast.lane.b32.xlu0 %v3420_v11, 344 }
  0xb0   :  { %v238_v36 = vpop.permute.xlu1 %237  ;;  %v230_v37 = vpop.permute.xlu0 %229 }
  0xb1   :  { %2807 = vst [vmem:[%s4667_s1 + $0x560] sm:$0xff] %v238_v36  ;;  %2805 = vst [vmem:[%s4667_s1 + $0x78] sm:$0xff] %v230_v37 }
  0xb2   :  { %726 = vbcast.lane.b32.xlu1 %v3415_v10, 352  ;;  %717 = vbcast.lane.b32.xlu0 %v3420_v11, 352 }
  0xb4   :  { %v253_v38 = vpop.permute.xlu1 %252  ;;  %v245_v39 = vpop.permute.xlu0 %244 }
  0xb5   :  { %2811 = vst [vmem:[%s4667_s1 + $0x568] sm:$0xff] %v253_v38  ;;  %2809 = vst [vmem:[%s4667_s1 + $0x80] sm:$0xff] %v245_v39 }
  0xb6   :  { %743 = vbcast.lane.b32.xlu1 %v3415_v10, 360  ;;  %734 = vbcast.lane.b32.xlu0 %v3420_v11, 360 }
  0xb8   :  { %v270_v40 = vpop.permute.xlu1 %269  ;;  %v261_v41 = vpop.permute.xlu0 %260 }
  0xb9   :  { %2815 = vst [vmem:[%s4667_s1 + $0x570] sm:$0xff] %v270_v40  ;;  %2813 = vst [vmem:[%s4667_s1 + $0x88] sm:$0xff] %v261_v41 }
  0xba   :  { %760 = vbcast.lane.b32.xlu1 %v3415_v10, 368  ;;  %751 = vbcast.lane.b32.xlu0 %v3420_v11, 368 }
  0xbc   :  { %v287_v42 = vpop.permute.xlu1 %286  ;;  %v278_v43 = vpop.permute.xlu0 %277 }
  0xbd   :  { %2819 = vst [vmem:[%s4667_s1 + $0x578] sm:$0xff] %v287_v42  ;;  %2817 = vst [vmem:[%s4667_s1 + $0x90] sm:$0xff] %v278_v43 }
  0xbe   :  { %777 = vbcast.lane.b32.xlu1 %v3415_v10, 376  ;;  %768 = vbcast.lane.b32.xlu0 %v3420_v11, 376 }
  0xc0   :  { %v304_v46 = vpop.permute.xlu1 %303  ;;  %v295_v47 = vpop.permute.xlu0 %294 }
  0xc1   :  { %2823 = vst [vmem:[%s4667_s1 + $0x580] sm:$0xff] %v304_v46  ;;  %2821 = vst [vmem:[%s4667_s1 + $0x98] sm:$0xff] %v295_v47 }
  0xc2   :  { %792 = vbcast.lane.b32.xlu1 %v3553_v44, 256  ;;  %784 = vbcast.lane.b32.xlu0 %v3558_v45, 256 }
  0xc4   :  { %v321_v48 = vpop.permute.xlu1 %320  ;;  %v312_v49 = vpop.permute.xlu0 %311 }
  0xc5   :  { %2827 = vst [vmem:[%s4667_s1 + $0x588] sm:$0xff] %v321_v48  ;;  %2825 = vst [vmem:[%s4667_s1 + $0xa0] sm:$0xff] %v312_v49  ;;  %v3829_v48 = vld [vmem:[%s4666_s0 + $0xb] ss:$0 sm:$0xff]  ;;  %v3834_v49 = vld [vmem:[%s4666_s0 + $0xa] ss:$0 sm:$0xff] }
  0xc6   :  { %809 = vbcast.lane.b32.xlu1 %v3553_v44, 264  ;;  %800 = vbcast.lane.b32.xlu0 %v3558_v45, 264 }
  0xc8   :  { %v338_v50 = vpop.permute.xlu1 %337  ;;  %v329_v51 = vpop.permute.xlu0 %328 }
  0xc9   :  { %2831 = vst [vmem:[%s4667_s1 + $0x590] sm:$0xff] %v338_v50  ;;  %2829 = vst [vmem:[%s4667_s1 + $0xa8] sm:$0xff] %v329_v51 }
  0xca   :  { %826 = vbcast.lane.b32.xlu1 %v3553_v44, 272  ;;  %817 = vbcast.lane.b32.xlu0 %v3558_v45, 272 }
  0xcc   :  { %v355_v52 = vpop.permute.xlu1 %354  ;;  %v346_v53 = vpop.permute.xlu0 %345 }
  0xcd   :  { %2835 = vst [vmem:[%s4667_s1 + $0x598] sm:$0xff] %v355_v52  ;;  %2833 = vst [vmem:[%s4667_s1 + $0xb0] sm:$0xff] %v346_v53 }
  0xce   :  { %843 = vbcast.lane.b32.xlu1 %v3553_v44, 280  ;;  %834 = vbcast.lane.b32.xlu0 %v3558_v45, 280 }
  0xd0   :  { %v372_v54 = vpop.permute.xlu1 %371  ;;  %v363_v55 = vpop.permute.xlu0 %362 }
  0xd1   :  { %2839 = vst [vmem:[%s4667_s1 + $0x5a0] sm:$0xff] %v372_v54  ;;  %2837 = vst [vmem:[%s4667_s1 + $0xb8] sm:$0xff] %v363_v55 }
  0xd2   :  { %860 = vbcast.lane.b32.xlu1 %v3553_v44, 288  ;;  %851 = vbcast.lane.b32.xlu0 %v3558_v45, 288 }
  0xd4   :  { %v389_v56 = vpop.permute.xlu1 %388  ;;  %v380_v57 = vpop.permute.xlu0 %379 }
  0xd5   :  { %2843 = vst [vmem:[%s4667_s1 + $0x5a8] sm:$0xff] %v389_v56  ;;  %2841 = vst [vmem:[%s4667_s1 + $0xc0] sm:$0xff] %v380_v57 }
  0xd6   :  { %877 = vbcast.lane.b32.xlu1 %v3553_v44, 296  ;;  %868 = vbcast.lane.b32.xlu0 %v3558_v45, 296 }
  0xd8   :  { %v406_v58 = vpop.permute.xlu1 %405  ;;  %v397_v59 = vpop.permute.xlu0 %396 }
  0xd9   :  { %2847 = vst [vmem:[%s4667_s1 + $0x5b0] sm:$0xff] %v406_v58  ;;  %2845 = vst [vmem:[%s4667_s1 + $0xc8] sm:$0xff] %v397_v59 }
  0xda   :  { %894 = vbcast.lane.b32.xlu1 %v3553_v44, 304  ;;  %885 = vbcast.lane.b32.xlu0 %v3558_v45, 304 }
  0xdc   :  { %v423_v60 = vpop.permute.xlu1 %422  ;;  %v414_v61 = vpop.permute.xlu0 %413 }
  0xdd   :  { %2851 = vst [vmem:[%s4667_s1 + $0x5b8] sm:$0xff] %v423_v60  ;;  %2849 = vst [vmem:[%s4667_s1 + $0xd0] sm:$0xff] %v414_v61 }
  0xde   :  { %911 = vbcast.lane.b32.xlu1 %v3553_v44, 312  ;;  %902 = vbcast.lane.b32.xlu0 %v3558_v45, 312 }
  0xe0   :  { %v440_v62 = vpop.permute.xlu1 %439  ;;  %v431_v63 = vpop.permute.xlu0 %430 }
  0xe1   :  { %2855 = vst [vmem:[%s4667_s1 + $0x5c0] sm:$0xff] %v440_v62  ;;  %2853 = vst [vmem:[%s4667_s1 + $0xd8] sm:$0xff] %v431_v63 }
  0xe2   :  { %928 = vbcast.lane.b32.xlu1 %v3553_v44, 320  ;;  %919 = vbcast.lane.b32.xlu0 %v3558_v45, 320 }
  0xe4   :  { %v457_v0 = vpop.permute.xlu1 %456  ;;  %v448_v1 = vpop.permute.xlu0 %447 }
  0xe5   :  { %2859 = vst [vmem:[%s4667_s1 + $0x5c8] sm:$0xff] %v457_v0  ;;  %2857 = vst [vmem:[%s4667_s1 + $0xe0] sm:$0xff] %v448_v1 }
  0xe6   :  { %945 = vbcast.lane.b32.xlu1 %v3553_v44, 328  ;;  %936 = vbcast.lane.b32.xlu0 %v3558_v45, 328 }
  0xe8   :  { %v474_v2 = vpop.permute.xlu1 %473  ;;  %v465_v3 = vpop.permute.xlu0 %464 }
  0xe9   :  { %2863 = vst [vmem:[%s4667_s1 + $0x5d0] sm:$0xff] %v474_v2  ;;  %2861 = vst [vmem:[%s4667_s1 + $0xe8] sm:$0xff] %v465_v3 }
  0xea   :  { %962 = vbcast.lane.b32.xlu1 %v3553_v44, 336  ;;  %953 = vbcast.lane.b32.xlu0 %v3558_v45, 336 }
  0xec   :  { %v491_v4 = vpop.permute.xlu1 %490  ;;  %v482_v5 = vpop.permute.xlu0 %481 }
  0xed   :  { %2867 = vst [vmem:[%s4667_s1 + $0x5d8] sm:$0xff] %v491_v4  ;;  %2865 = vst [vmem:[%s4667_s1 + $0xf0] sm:$0xff] %v482_v5 }
  0xee   :  { %979 = vbcast.lane.b32.xlu1 %v3553_v44, 344  ;;  %970 = vbcast.lane.b32.xlu0 %v3558_v45, 344 }
  0xf0   :  { %v508_v6 = vpop.permute.xlu1 %507  ;;  %v499_v7 = vpop.permute.xlu0 %498 }
  0xf1   :  { %2871 = vst [vmem:[%s4667_s1 + $0x5e0] sm:$0xff] %v508_v6  ;;  %2869 = vst [vmem:[%s4667_s1 + $0xf8] sm:$0xff] %v499_v7 }
  0xf2   :  { %996 = vbcast.lane.b32.xlu1 %v3553_v44, 352  ;;  %987 = vbcast.lane.b32.xlu0 %v3558_v45, 352 }
  0xf4   :  { %v523_v8 = vpop.permute.xlu1 %522  ;;  %v515_v9 = vpop.permute.xlu0 %514 }
  0xf5   :  { %2875 = vst [vmem:[%s4667_s1 + $0x5e8] sm:$0xff] %v523_v8  ;;  %2873 = vst [vmem:[%s4667_s1 + $0x100] sm:$0xff] %v515_v9 }
  0xf6   :  { %1013 = vbcast.lane.b32.xlu1 %v3553_v44, 360  ;;  %1004 = vbcast.lane.b32.xlu0 %v3558_v45, 360 }
  0xf8   :  { %v540_v10 = vpop.permute.xlu1 %539  ;;  %v531_v11 = vpop.permute.xlu0 %530 }
  0xf9   :  { %2879 = vst [vmem:[%s4667_s1 + $0x5f0] sm:$0xff] %v540_v10  ;;  %2877 = vst [vmem:[%s4667_s1 + $0x108] sm:$0xff] %v531_v11 }
  0xfa   :  { %1030 = vbcast.lane.b32.xlu1 %v3553_v44, 368  ;;  %1021 = vbcast.lane.b32.xlu0 %v3558_v45, 368 }
  0xfc   :  { %v557_v12 = vpop.permute.xlu1 %556  ;;  %v548_v13 = vpop.permute.xlu0 %547 }
  0xfd   :  { %2883 = vst [vmem:[%s4667_s1 + $0x5f8] sm:$0xff] %v557_v12  ;;  %2881 = vst [vmem:[%s4667_s1 + $0x110] sm:$0xff] %v548_v13 }
  0xfe   :  { %1047 = vbcast.lane.b32.xlu1 %v3553_v44, 376  ;;  %1038 = vbcast.lane.b32.xlu0 %v3558_v45, 376 }
 0x100   :  { %v574_v16 = vpop.permute.xlu1 %573  ;;  %v565_v17 = vpop.permute.xlu0 %564 }
 0x101   :  { %2887 = vst [vmem:[%s4667_s1 + $0x600] sm:$0xff] %v574_v16  ;;  %2885 = vst [vmem:[%s4667_s1 + $0x118] sm:$0xff] %v565_v17 }
 0x102   :  { %1062 = vbcast.lane.b32.xlu1 %v3691_v14, 256  ;;  %1054 = vbcast.lane.b32.xlu0 %v3696_v15, 256 }
 0x104   :  { %v591_v18 = vpop.permute.xlu1 %590  ;;  %v582_v19 = vpop.permute.xlu0 %581 }
 0x105   :  { %2891 = vst [vmem:[%s4667_s1 + $0x608] sm:$0xff] %v591_v18  ;;  %2889 = vst [vmem:[%s4667_s1 + $0x120] sm:$0xff] %v582_v19  ;;  %v3967_v18 = vld [vmem:[%s4666_s0 + $0xd] ss:$0 sm:$0xff]  ;;  %v3972_v19 = vld [vmem:[%s4666_s0 + $0xc] ss:$0 sm:$0xff] }
 0x106   :  { %1079 = vbcast.lane.b32.xlu1 %v3691_v14, 264  ;;  %1070 = vbcast.lane.b32.xlu0 %v3696_v15, 264 }
 0x108   :  { %v608_v20 = vpop.permute.xlu1 %607  ;;  %v599_v21 = vpop.permute.xlu0 %598 }
 0x109   :  { %2895 = vst [vmem:[%s4667_s1 + $0x610] sm:$0xff] %v608_v20  ;;  %2893 = vst [vmem:[%s4667_s1 + $0x128] sm:$0xff] %v599_v21 }
 0x10a   :  { %1096 = vbcast.lane.b32.xlu1 %v3691_v14, 272  ;;  %1087 = vbcast.lane.b32.xlu0 %v3696_v15, 272 }
 0x10c   :  { %v625_v22 = vpop.permute.xlu1 %624  ;;  %v616_v23 = vpop.permute.xlu0 %615 }
 0x10d   :  { %2899 = vst [vmem:[%s4667_s1 + $0x618] sm:$0xff] %v625_v22  ;;  %2897 = vst [vmem:[%s4667_s1 + $0x130] sm:$0xff] %v616_v23 }
 0x10e   :  { %1113 = vbcast.lane.b32.xlu1 %v3691_v14, 280  ;;  %1104 = vbcast.lane.b32.xlu0 %v3696_v15, 280 }
 0x110   :  { %v642_v24 = vpop.permute.xlu1 %641  ;;  %v633_v25 = vpop.permute.xlu0 %632 }
 0x111   :  { %2903 = vst [vmem:[%s4667_s1 + $0x620] sm:$0xff] %v642_v24  ;;  %2901 = vst [vmem:[%s4667_s1 + $0x138] sm:$0xff] %v633_v25 }
 0x112   :  { %1130 = vbcast.lane.b32.xlu1 %v3691_v14, 288  ;;  %1121 = vbcast.lane.b32.xlu0 %v3696_v15, 288 }
 0x114   :  { %v659_v26 = vpop.permute.xlu1 %658  ;;  %v650_v27 = vpop.permute.xlu0 %649 }
 0x115   :  { %2907 = vst [vmem:[%s4667_s1 + $0x628] sm:$0xff] %v659_v26  ;;  %2905 = vst [vmem:[%s4667_s1 + $0x140] sm:$0xff] %v650_v27 }
 0x116   :  { %1147 = vbcast.lane.b32.xlu1 %v3691_v14, 296  ;;  %1138 = vbcast.lane.b32.xlu0 %v3696_v15, 296 }
 0x118   :  { %v676_v28 = vpop.permute.xlu1 %675  ;;  %v667_v29 = vpop.permute.xlu0 %666 }
 0x119   :  { %2911 = vst [vmem:[%s4667_s1 + $0x630] sm:$0xff] %v676_v28  ;;  %2909 = vst [vmem:[%s4667_s1 + $0x148] sm:$0xff] %v667_v29 }
 0x11a   :  { %1164 = vbcast.lane.b32.xlu1 %v3691_v14, 304  ;;  %1155 = vbcast.lane.b32.xlu0 %v3696_v15, 304 }
 0x11c   :  { %v693_v30 = vpop.permute.xlu1 %692  ;;  %v684_v31 = vpop.permute.xlu0 %683 }
 0x11d   :  { %2915 = vst [vmem:[%s4667_s1 + $0x638] sm:$0xff] %v693_v30  ;;  %2913 = vst [vmem:[%s4667_s1 + $0x150] sm:$0xff] %v684_v31 }
 0x11e   :  { %1181 = vbcast.lane.b32.xlu1 %v3691_v14, 312  ;;  %1172 = vbcast.lane.b32.xlu0 %v3696_v15, 312 }
 0x120   :  { %v710_v32 = vpop.permute.xlu1 %709  ;;  %v701_v33 = vpop.permute.xlu0 %700 }
 0x121   :  { %2919 = vst [vmem:[%s4667_s1 + $0x640] sm:$0xff] %v710_v32  ;;  %2917 = vst [vmem:[%s4667_s1 + $0x158] sm:$0xff] %v701_v33 }
 0x122   :  { %1198 = vbcast.lane.b32.xlu1 %v3691_v14, 320  ;;  %1189 = vbcast.lane.b32.xlu0 %v3696_v15, 320 }
 0x124   :  { %v727_v34 = vpop.permute.xlu1 %726  ;;  %v718_v35 = vpop.permute.xlu0 %717 }
 0x125   :  { %2923 = vst [vmem:[%s4667_s1 + $0x648] sm:$0xff] %v727_v34  ;;  %2921 = vst [vmem:[%s4667_s1 + $0x160] sm:$0xff] %v718_v35 }
 0x126   :  { %1215 = vbcast.lane.b32.xlu1 %v3691_v14, 328  ;;  %1206 = vbcast.lane.b32.xlu0 %v3696_v15, 328 }
 0x128   :  { %v744_v36 = vpop.permute.xlu1 %743  ;;  %v735_v37 = vpop.permute.xlu0 %734 }
 0x129   :  { %2927 = vst [vmem:[%s4667_s1 + $0x650] sm:$0xff] %v744_v36  ;;  %2925 = vst [vmem:[%s4667_s1 + $0x168] sm:$0xff] %v735_v37 }
 0x12a   :  { %1232 = vbcast.lane.b32.xlu1 %v3691_v14, 336  ;;  %1223 = vbcast.lane.b32.xlu0 %v3696_v15, 336 }
 0x12c   :  { %v761_v38 = vpop.permute.xlu1 %760  ;;  %v752_v39 = vpop.permute.xlu0 %751 }
 0x12d   :  { %2931 = vst [vmem:[%s4667_s1 + $0x658] sm:$0xff] %v761_v38  ;;  %2929 = vst [vmem:[%s4667_s1 + $0x170] sm:$0xff] %v752_v39 }
 0x12e   :  { %1249 = vbcast.lane.b32.xlu1 %v3691_v14, 344  ;;  %1240 = vbcast.lane.b32.xlu0 %v3696_v15, 344 }
 0x130   :  { %v778_v40 = vpop.permute.xlu1 %777  ;;  %v769_v41 = vpop.permute.xlu0 %768 }
 0x131   :  { %2935 = vst [vmem:[%s4667_s1 + $0x660] sm:$0xff] %v778_v40  ;;  %2933 = vst [vmem:[%s4667_s1 + $0x178] sm:$0xff] %v769_v41 }
 0x132   :  { %1266 = vbcast.lane.b32.xlu1 %v3691_v14, 352  ;;  %1257 = vbcast.lane.b32.xlu0 %v3696_v15, 352 }
 0x134   :  { %v793_v42 = vpop.permute.xlu1 %792  ;;  %v785_v43 = vpop.permute.xlu0 %784 }
 0x135   :  { %2939 = vst [vmem:[%s4667_s1 + $0x668] sm:$0xff] %v793_v42  ;;  %2937 = vst [vmem:[%s4667_s1 + $0x180] sm:$0xff] %v785_v43 }
 0x136   :  { %1283 = vbcast.lane.b32.xlu1 %v3691_v14, 360  ;;  %1274 = vbcast.lane.b32.xlu0 %v3696_v15, 360 }
 0x138   :  { %v810_v44 = vpop.permute.xlu1 %809  ;;  %v801_v45 = vpop.permute.xlu0 %800 }
 0x139   :  { %2943 = vst [vmem:[%s4667_s1 + $0x670] sm:$0xff] %v810_v44  ;;  %2941 = vst [vmem:[%s4667_s1 + $0x188] sm:$0xff] %v801_v45 }
 0x13a   :  { %1300 = vbcast.lane.b32.xlu1 %v3691_v14, 368  ;;  %1291 = vbcast.lane.b32.xlu0 %v3696_v15, 368 }
 0x13c   :  { %v827_v46 = vpop.permute.xlu1 %826  ;;  %v818_v47 = vpop.permute.xlu0 %817 }
 0x13d   :  { %2947 = vst [vmem:[%s4667_s1 + $0x678] sm:$0xff] %v827_v46  ;;  %2945 = vst [vmem:[%s4667_s1 + $0x190] sm:$0xff] %v818_v47 }
 0x13e   :  { %1317 = vbcast.lane.b32.xlu1 %v3691_v14, 376  ;;  %1308 = vbcast.lane.b32.xlu0 %v3696_v15, 376 }
 0x140   :  { %v844_v50 = vpop.permute.xlu1 %843  ;;  %v835_v51 = vpop.permute.xlu0 %834 }
 0x141   :  { %2951 = vst [vmem:[%s4667_s1 + $0x680] sm:$0xff] %v844_v50  ;;  %2949 = vst [vmem:[%s4667_s1 + $0x198] sm:$0xff] %v835_v51 }
 0x142   :  { %1332 = vbcast.lane.b32.xlu1 %v3829_v48, 256  ;;  %1324 = vbcast.lane.b32.xlu0 %v3834_v49, 256 }
 0x144   :  { %v861_v52 = vpop.permute.xlu1 %860  ;;  %v852_v53 = vpop.permute.xlu0 %851 }
 0x145   :  { %2955 = vst [vmem:[%s4667_s1 + $0x688] sm:$0xff] %v861_v52  ;;  %2953 = vst [vmem:[%s4667_s1 + $0x1a0] sm:$0xff] %v852_v53  ;;  %v4105_v52 = vld [vmem:[%s4666_s0 + $0xf] ss:$0 sm:$0xff]  ;;  %v4110_v53 = vld [vmem:[%s4666_s0 + $0xe] ss:$0 sm:$0xff] }
 0x146   :  { %1349 = vbcast.lane.b32.xlu1 %v3829_v48, 264  ;;  %1340 = vbcast.lane.b32.xlu0 %v3834_v49, 264 }
 0x148   :  { %v878_v54 = vpop.permute.xlu1 %877  ;;  %v869_v55 = vpop.permute.xlu0 %868 }
 0x149   :  { %2959 = vst [vmem:[%s4667_s1 + $0x690] sm:$0xff] %v878_v54  ;;  %2957 = vst [vmem:[%s4667_s1 + $0x1a8] sm:$0xff] %v869_v55 }
 0x14a   :  { %1366 = vbcast.lane.b32.xlu1 %v3829_v48, 272  ;;  %1357 = vbcast.lane.b32.xlu0 %v3834_v49, 272 }
 0x14c   :  { %v895_v56 = vpop.permute.xlu1 %894  ;;  %v886_v57 = vpop.permute.xlu0 %885 }
 0x14d   :  { %2963 = vst [vmem:[%s4667_s1 + $0x698] sm:$0xff] %v895_v56  ;;  %2961 = vst [vmem:[%s4667_s1 + $0x1b0] sm:$0xff] %v886_v57 }
 0x14e   :  { %1383 = vbcast.lane.b32.xlu1 %v3829_v48, 280  ;;  %1374 = vbcast.lane.b32.xlu0 %v3834_v49, 280 }
 0x150   :  { %v912_v58 = vpop.permute.xlu1 %911  ;;  %v903_v59 = vpop.permute.xlu0 %902 }
 0x151   :  { %2967 = vst [vmem:[%s4667_s1 + $0x6a0] sm:$0xff] %v912_v58  ;;  %2965 = vst [vmem:[%s4667_s1 + $0x1b8] sm:$0xff] %v903_v59 }
 0x152   :  { %1400 = vbcast.lane.b32.xlu1 %v3829_v48, 288  ;;  %1391 = vbcast.lane.b32.xlu0 %v3834_v49, 288 }
 0x154   :  { %v929_v60 = vpop.permute.xlu1 %928  ;;  %v920_v61 = vpop.permute.xlu0 %919 }
 0x155   :  { %2971 = vst [vmem:[%s4667_s1 + $0x6a8] sm:$0xff] %v929_v60  ;;  %2969 = vst [vmem:[%s4667_s1 + $0x1c0] sm:$0xff] %v920_v61 }
 0x156   :  { %1417 = vbcast.lane.b32.xlu1 %v3829_v48, 296  ;;  %1408 = vbcast.lane.b32.xlu0 %v3834_v49, 296 }
 0x158   :  { %v946_v62 = vpop.permute.xlu1 %945  ;;  %v937_v63 = vpop.permute.xlu0 %936 }
 0x159   :  { %2975 = vst [vmem:[%s4667_s1 + $0x6b0] sm:$0xff] %v946_v62  ;;  %2973 = vst [vmem:[%s4667_s1 + $0x1c8] sm:$0xff] %v937_v63 }
 0x15a   :  { %1434 = vbcast.lane.b32.xlu1 %v3829_v48, 304  ;;  %1425 = vbcast.lane.b32.xlu0 %v3834_v49, 304 }
 0x15c   :  { %v963_v0 = vpop.permute.xlu1 %962  ;;  %v954_v1 = vpop.permute.xlu0 %953 }
 0x15d   :  { %2979 = vst [vmem:[%s4667_s1 + $0x6b8] sm:$0xff] %v963_v0  ;;  %2977 = vst [vmem:[%s4667_s1 + $0x1d0] sm:$0xff] %v954_v1 }
 0x15e   :  { %1451 = vbcast.lane.b32.xlu1 %v3829_v48, 312  ;;  %1442 = vbcast.lane.b32.xlu0 %v3834_v49, 312 }
 0x160   :  { %v980_v2 = vpop.permute.xlu1 %979  ;;  %v971_v3 = vpop.permute.xlu0 %970 }
 0x161   :  { %2983 = vst [vmem:[%s4667_s1 + $0x6c0] sm:$0xff] %v980_v2  ;;  %2981 = vst [vmem:[%s4667_s1 + $0x1d8] sm:$0xff] %v971_v3 }
 0x162   :  { %1468 = vbcast.lane.b32.xlu1 %v3829_v48, 320  ;;  %1459 = vbcast.lane.b32.xlu0 %v3834_v49, 320 }
 0x164   :  { %v997_v4 = vpop.permute.xlu1 %996  ;;  %v988_v5 = vpop.permute.xlu0 %987 }
 0x165   :  { %2987 = vst [vmem:[%s4667_s1 + $0x6c8] sm:$0xff] %v997_v4  ;;  %2985 = vst [vmem:[%s4667_s1 + $0x1e0] sm:$0xff] %v988_v5 }
 0x166   :  { %1485 = vbcast.lane.b32.xlu1 %v3829_v48, 328  ;;  %1476 = vbcast.lane.b32.xlu0 %v3834_v49, 328 }
 0x168   :  { %v1014_v6 = vpop.permute.xlu1 %1013  ;;  %v1005_v7 = vpop.permute.xlu0 %1004 }
 0x169   :  { %2991 = vst [vmem:[%s4667_s1 + $0x6d0] sm:$0xff] %v1014_v6  ;;  %2989 = vst [vmem:[%s4667_s1 + $0x1e8] sm:$0xff] %v1005_v7 }
 0x16a   :  { %1502 = vbcast.lane.b32.xlu1 %v3829_v48, 336  ;;  %1493 = vbcast.lane.b32.xlu0 %v3834_v49, 336 }
 0x16c   :  { %v1031_v8 = vpop.permute.xlu1 %1030  ;;  %v1022_v9 = vpop.permute.xlu0 %1021 }
 0x16d   :  { %2995 = vst [vmem:[%s4667_s1 + $0x6d8] sm:$0xff] %v1031_v8  ;;  %2993 = vst [vmem:[%s4667_s1 + $0x1f0] sm:$0xff] %v1022_v9 }
 0x16e   :  { %1519 = vbcast.lane.b32.xlu1 %v3829_v48, 344  ;;  %1510 = vbcast.lane.b32.xlu0 %v3834_v49, 344 }
 0x170   :  { %v1048_v10 = vpop.permute.xlu1 %1047  ;;  %v1039_v11 = vpop.permute.xlu0 %1038 }
 0x171   :  { %2999 = vst [vmem:[%s4667_s1 + $0x6e0] sm:$0xff] %v1048_v10  ;;  %2997 = vst [vmem:[%s4667_s1 + $0x1f8] sm:$0xff] %v1039_v11 }
 0x172   :  { %1536 = vbcast.lane.b32.xlu1 %v3829_v48, 352  ;;  %1527 = vbcast.lane.b32.xlu0 %v3834_v49, 352 }
 0x174   :  { %v1063_v12 = vpop.permute.xlu1 %1062  ;;  %v1055_v13 = vpop.permute.xlu0 %1054 }
 0x175   :  { %3003 = vst [vmem:[%s4667_s1 + $0x6e8] sm:$0xff] %v1063_v12  ;;  %3001 = vst [vmem:[%s4667_s1 + $0x200] sm:$0xff] %v1055_v13 }
 0x176   :  { %1553 = vbcast.lane.b32.xlu1 %v3829_v48, 360  ;;  %1544 = vbcast.lane.b32.xlu0 %v3834_v49, 360 }
 0x178   :  { %v1080_v14 = vpop.permute.xlu1 %1079  ;;  %v1071_v15 = vpop.permute.xlu0 %1070 }
 0x179   :  { %3007 = vst [vmem:[%s4667_s1 + $0x6f0] sm:$0xff] %v1080_v14  ;;  %3005 = vst [vmem:[%s4667_s1 + $0x208] sm:$0xff] %v1071_v15 }
 0x17a   :  { %1570 = vbcast.lane.b32.xlu1 %v3829_v48, 368  ;;  %1561 = vbcast.lane.b32.xlu0 %v3834_v49, 368 }
 0x17c   :  { %v1097_v16 = vpop.permute.xlu1 %1096  ;;  %v1088_v17 = vpop.permute.xlu0 %1087 }
 0x17d   :  { %3011 = vst [vmem:[%s4667_s1 + $0x6f8] sm:$0xff] %v1097_v16  ;;  %3009 = vst [vmem:[%s4667_s1 + $0x210] sm:$0xff] %v1088_v17 }
 0x17e   :  { %1587 = vbcast.lane.b32.xlu1 %v3829_v48, 376  ;;  %1578 = vbcast.lane.b32.xlu0 %v3834_v49, 376 }
 0x180   :  { %v1114_v20 = vpop.permute.xlu1 %1113  ;;  %v1105_v21 = vpop.permute.xlu0 %1104 }
 0x181   :  { %3015 = vst [vmem:[%s4667_s1 + $0x700] sm:$0xff] %v1114_v20  ;;  %3013 = vst [vmem:[%s4667_s1 + $0x218] sm:$0xff] %v1105_v21 }
 0x182   :  { %1602 = vbcast.lane.b32.xlu1 %v3967_v18, 256  ;;  %1594 = vbcast.lane.b32.xlu0 %v3972_v19, 256 }
 0x184   :  { %v1131_v22 = vpop.permute.xlu1 %1130  ;;  %v1122_v23 = vpop.permute.xlu0 %1121 }
 0x185   :  { %3019 = vst [vmem:[%s4667_s1 + $0x708] sm:$0xff] %v1131_v22  ;;  %3017 = vst [vmem:[%s4667_s1 + $0x220] sm:$0xff] %v1122_v23  ;;  %v4243_v22 = vld [vmem:[%s4666_s0 + $0x11] ss:$0 sm:$0xff]  ;;  %v4248_v23 = vld [vmem:[%s4666_s0 + $0x10] ss:$0 sm:$0xff] }
 0x186   :  { %1619 = vbcast.lane.b32.xlu1 %v3967_v18, 264  ;;  %1610 = vbcast.lane.b32.xlu0 %v3972_v19, 264 }
 0x188   :  { %v1148_v24 = vpop.permute.xlu1 %1147  ;;  %v1139_v25 = vpop.permute.xlu0 %1138 }
 0x189   :  { %3023 = vst [vmem:[%s4667_s1 + $0x710] sm:$0xff] %v1148_v24  ;;  %3021 = vst [vmem:[%s4667_s1 + $0x228] sm:$0xff] %v1139_v25 }
 0x18a   :  { %1636 = vbcast.lane.b32.xlu1 %v3967_v18, 272  ;;  %1627 = vbcast.lane.b32.xlu0 %v3972_v19, 272 }
 0x18c   :  { %v1165_v26 = vpop.permute.xlu1 %1164  ;;  %v1156_v27 = vpop.permute.xlu0 %1155 }
 0x18d   :  { %3027 = vst [vmem:[%s4667_s1 + $0x718] sm:$0xff] %v1165_v26  ;;  %3025 = vst [vmem:[%s4667_s1 + $0x230] sm:$0xff] %v1156_v27 }
 0x18e   :  { %1653 = vbcast.lane.b32.xlu1 %v3967_v18, 280  ;;  %1644 = vbcast.lane.b32.xlu0 %v3972_v19, 280 }
 0x190   :  { %v1182_v28 = vpop.permute.xlu1 %1181  ;;  %v1173_v29 = vpop.permute.xlu0 %1172 }
 0x191   :  { %3031 = vst [vmem:[%s4667_s1 + $0x720] sm:$0xff] %v1182_v28  ;;  %3029 = vst [vmem:[%s4667_s1 + $0x238] sm:$0xff] %v1173_v29 }
 0x192   :  { %1670 = vbcast.lane.b32.xlu1 %v3967_v18, 288  ;;  %1661 = vbcast.lane.b32.xlu0 %v3972_v19, 288 }
 0x194   :  { %v1199_v30 = vpop.permute.xlu1 %1198  ;;  %v1190_v31 = vpop.permute.xlu0 %1189 }
 0x195   :  { %3035 = vst [vmem:[%s4667_s1 + $0x728] sm:$0xff] %v1199_v30  ;;  %3033 = vst [vmem:[%s4667_s1 + $0x240] sm:$0xff] %v1190_v31 }
 0x196   :  { %1687 = vbcast.lane.b32.xlu1 %v3967_v18, 296  ;;  %1678 = vbcast.lane.b32.xlu0 %v3972_v19, 296 }
 0x198   :  { %v1216_v32 = vpop.permute.xlu1 %1215  ;;  %v1207_v33 = vpop.permute.xlu0 %1206 }
 0x199   :  { %3039 = vst [vmem:[%s4667_s1 + $0x730] sm:$0xff] %v1216_v32  ;;  %3037 = vst [vmem:[%s4667_s1 + $0x248] sm:$0xff] %v1207_v33 }
 0x19a   :  { %1704 = vbcast.lane.b32.xlu1 %v3967_v18, 304  ;;  %1695 = vbcast.lane.b32.xlu0 %v3972_v19, 304 }
 0x19c   :  { %v1233_v34 = vpop.permute.xlu1 %1232  ;;  %v1224_v35 = vpop.permute.xlu0 %1223 }
 0x19d   :  { %3043 = vst [vmem:[%s4667_s1 + $0x738] sm:$0xff] %v1233_v34  ;;  %3041 = vst [vmem:[%s4667_s1 + $0x250] sm:$0xff] %v1224_v35 }
 0x19e   :  { %1721 = vbcast.lane.b32.xlu1 %v3967_v18, 312  ;;  %1712 = vbcast.lane.b32.xlu0 %v3972_v19, 312 }
 0x1a0   :  { %v1250_v36 = vpop.permute.xlu1 %1249  ;;  %v1241_v37 = vpop.permute.xlu0 %1240 }
 0x1a1   :  { %3047 = vst [vmem:[%s4667_s1 + $0x740] sm:$0xff] %v1250_v36  ;;  %3045 = vst [vmem:[%s4667_s1 + $0x258] sm:$0xff] %v1241_v37 }
 0x1a2   :  { %1738 = vbcast.lane.b32.xlu1 %v3967_v18, 320  ;;  %1729 = vbcast.lane.b32.xlu0 %v3972_v19, 320 }
 0x1a4   :  { %v1267_v38 = vpop.permute.xlu1 %1266  ;;  %v1258_v39 = vpop.permute.xlu0 %1257 }
 0x1a5   :  { %3051 = vst [vmem:[%s4667_s1 + $0x748] sm:$0xff] %v1267_v38  ;;  %3049 = vst [vmem:[%s4667_s1 + $0x260] sm:$0xff] %v1258_v39 }
 0x1a6   :  { %1755 = vbcast.lane.b32.xlu1 %v3967_v18, 328  ;;  %1746 = vbcast.lane.b32.xlu0 %v3972_v19, 328 }
 0x1a8   :  { %v1284_v40 = vpop.permute.xlu1 %1283  ;;  %v1275_v41 = vpop.permute.xlu0 %1274 }
 0x1a9   :  { %3055 = vst [vmem:[%s4667_s1 + $0x750] sm:$0xff] %v1284_v40  ;;  %3053 = vst [vmem:[%s4667_s1 + $0x268] sm:$0xff] %v1275_v41 }
 0x1aa   :  { %1772 = vbcast.lane.b32.xlu1 %v3967_v18, 336  ;;  %1763 = vbcast.lane.b32.xlu0 %v3972_v19, 336 }
 0x1ac   :  { %v1301_v42 = vpop.permute.xlu1 %1300  ;;  %v1292_v43 = vpop.permute.xlu0 %1291 }
 0x1ad   :  { %3059 = vst [vmem:[%s4667_s1 + $0x758] sm:$0xff] %v1301_v42  ;;  %3057 = vst [vmem:[%s4667_s1 + $0x270] sm:$0xff] %v1292_v43 }
 0x1ae   :  { %1789 = vbcast.lane.b32.xlu1 %v3967_v18, 344  ;;  %1780 = vbcast.lane.b32.xlu0 %v3972_v19, 344 }
 0x1b0   :  { %v1318_v44 = vpop.permute.xlu1 %1317  ;;  %v1309_v45 = vpop.permute.xlu0 %1308 }
 0x1b1   :  { %3063 = vst [vmem:[%s4667_s1 + $0x760] sm:$0xff] %v1318_v44  ;;  %3061 = vst [vmem:[%s4667_s1 + $0x278] sm:$0xff] %v1309_v45 }
 0x1b2   :  { %1806 = vbcast.lane.b32.xlu1 %v3967_v18, 352  ;;  %1797 = vbcast.lane.b32.xlu0 %v3972_v19, 352 }
 0x1b4   :  { %v1333_v46 = vpop.permute.xlu1 %1332  ;;  %v1325_v47 = vpop.permute.xlu0 %1324 }
 0x1b5   :  { %3067 = vst [vmem:[%s4667_s1 + $0x768] sm:$0xff] %v1333_v46  ;;  %3065 = vst [vmem:[%s4667_s1 + $0x280] sm:$0xff] %v1325_v47 }
 0x1b6   :  { %1823 = vbcast.lane.b32.xlu1 %v3967_v18, 360  ;;  %1814 = vbcast.lane.b32.xlu0 %v3972_v19, 360 }
 0x1b8   :  { %v1350_v48 = vpop.permute.xlu1 %1349  ;;  %v1341_v49 = vpop.permute.xlu0 %1340 }
 0x1b9   :  { %3071 = vst [vmem:[%s4667_s1 + $0x770] sm:$0xff] %v1350_v48  ;;  %3069 = vst [vmem:[%s4667_s1 + $0x288] sm:$0xff] %v1341_v49 }
 0x1ba   :  { %1840 = vbcast.lane.b32.xlu1 %v3967_v18, 368  ;;  %1831 = vbcast.lane.b32.xlu0 %v3972_v19, 368 }
 0x1bc   :  { %v1367_v50 = vpop.permute.xlu1 %1366  ;;  %v1358_v51 = vpop.permute.xlu0 %1357 }
 0x1bd   :  { %3075 = vst [vmem:[%s4667_s1 + $0x778] sm:$0xff] %v1367_v50  ;;  %3073 = vst [vmem:[%s4667_s1 + $0x290] sm:$0xff] %v1358_v51 }
 0x1be   :  { %1857 = vbcast.lane.b32.xlu1 %v3967_v18, 376  ;;  %1848 = vbcast.lane.b32.xlu0 %v3972_v19, 376 }
 0x1c0   :  { %v1384_v54 = vpop.permute.xlu1 %1383  ;;  %v1375_v55 = vpop.permute.xlu0 %1374 }
 0x1c1   :  { %3079 = vst [vmem:[%s4667_s1 + $0x780] sm:$0xff] %v1384_v54  ;;  %3077 = vst [vmem:[%s4667_s1 + $0x298] sm:$0xff] %v1375_v55 }
 0x1c2   :  { %1872 = vbcast.lane.b32.xlu1 %v4105_v52, 256  ;;  %1864 = vbcast.lane.b32.xlu0 %v4110_v53, 256 }
 0x1c4   :  { %v1401_v56 = vpop.permute.xlu1 %1400  ;;  %v1392_v57 = vpop.permute.xlu0 %1391 }
 0x1c5   :  { %3083 = vst [vmem:[%s4667_s1 + $0x788] sm:$0xff] %v1401_v56  ;;  %3081 = vst [vmem:[%s4667_s1 + $0x2a0] sm:$0xff] %v1392_v57  ;;  %v4381_v56 = vld [vmem:[%s4666_s0 + $0x13] ss:$0 sm:$0xff]  ;;  %v4386_v57 = vld [vmem:[%s4666_s0 + $0x12] ss:$0 sm:$0xff] }
 0x1c6   :  { %1889 = vbcast.lane.b32.xlu1 %v4105_v52, 264  ;;  %1880 = vbcast.lane.b32.xlu0 %v4110_v53, 264 }
 0x1c8   :  { %v1418_v58 = vpop.permute.xlu1 %1417  ;;  %v1409_v59 = vpop.permute.xlu0 %1408 }
 0x1c9   :  { %3087 = vst [vmem:[%s4667_s1 + $0x790] sm:$0xff] %v1418_v58  ;;  %3085 = vst [vmem:[%s4667_s1 + $0x2a8] sm:$0xff] %v1409_v59 }
 0x1ca   :  { %1906 = vbcast.lane.b32.xlu1 %v4105_v52, 272  ;;  %1897 = vbcast.lane.b32.xlu0 %v4110_v53, 272 }
 0x1cc   :  { %v1435_v60 = vpop.permute.xlu1 %1434  ;;  %v1426_v61 = vpop.permute.xlu0 %1425 }
 0x1cd   :  { %3091 = vst [vmem:[%s4667_s1 + $0x798] sm:$0xff] %v1435_v60  ;;  %3089 = vst [vmem:[%s4667_s1 + $0x2b0] sm:$0xff] %v1426_v61 }
 0x1ce   :  { %1923 = vbcast.lane.b32.xlu1 %v4105_v52, 280  ;;  %1914 = vbcast.lane.b32.xlu0 %v4110_v53, 280 }
 0x1d0   :  { %v1452_v62 = vpop.permute.xlu1 %1451  ;;  %v1443_v63 = vpop.permute.xlu0 %1442 }
 0x1d1   :  { %3095 = vst [vmem:[%s4667_s1 + $0x7a0] sm:$0xff] %v1452_v62  ;;  %3093 = vst [vmem:[%s4667_s1 + $0x2b8] sm:$0xff] %v1443_v63 }
 0x1d2   :  { %1940 = vbcast.lane.b32.xlu1 %v4105_v52, 288  ;;  %1931 = vbcast.lane.b32.xlu0 %v4110_v53, 288 }
 0x1d4   :  { %v1469_v0 = vpop.permute.xlu1 %1468  ;;  %v1460_v1 = vpop.permute.xlu0 %1459 }
 0x1d5   :  { %3099 = vst [vmem:[%s4667_s1 + $0x7a8] sm:$0xff] %v1469_v0  ;;  %3097 = vst [vmem:[%s4667_s1 + $0x2c0] sm:$0xff] %v1460_v1 }
 0x1d6   :  { %1957 = vbcast.lane.b32.xlu1 %v4105_v52, 296  ;;  %1948 = vbcast.lane.b32.xlu0 %v4110_v53, 296 }
 0x1d8   :  { %v1486_v2 = vpop.permute.xlu1 %1485  ;;  %v1477_v3 = vpop.permute.xlu0 %1476 }
 0x1d9   :  { %3103 = vst [vmem:[%s4667_s1 + $0x7b0] sm:$0xff] %v1486_v2  ;;  %3101 = vst [vmem:[%s4667_s1 + $0x2c8] sm:$0xff] %v1477_v3 }
 0x1da   :  { %1974 = vbcast.lane.b32.xlu1 %v4105_v52, 304  ;;  %1965 = vbcast.lane.b32.xlu0 %v4110_v53, 304 }
 0x1dc   :  { %v1503_v4 = vpop.permute.xlu1 %1502  ;;  %v1494_v5 = vpop.permute.xlu0 %1493 }
 0x1dd   :  { %3107 = vst [vmem:[%s4667_s1 + $0x7b8] sm:$0xff] %v1503_v4  ;;  %3105 = vst [vmem:[%s4667_s1 + $0x2d0] sm:$0xff] %v1494_v5 }
 0x1de   :  { %1991 = vbcast.lane.b32.xlu1 %v4105_v52, 312  ;;  %1982 = vbcast.lane.b32.xlu0 %v4110_v53, 312 }
 0x1e0   :  { %v1520_v6 = vpop.permute.xlu1 %1519  ;;  %v1511_v7 = vpop.permute.xlu0 %1510 }
 0x1e1   :  { %3111 = vst [vmem:[%s4667_s1 + $0x7c0] sm:$0xff] %v1520_v6  ;;  %3109 = vst [vmem:[%s4667_s1 + $0x2d8] sm:$0xff] %v1511_v7 }
 0x1e2   :  { %2008 = vbcast.lane.b32.xlu1 %v4105_v52, 320  ;;  %1999 = vbcast.lane.b32.xlu0 %v4110_v53, 320 }
 0x1e4   :  { %v1537_v8 = vpop.permute.xlu1 %1536  ;;  %v1528_v9 = vpop.permute.xlu0 %1527 }
 0x1e5   :  { %3115 = vst [vmem:[%s4667_s1 + $0x7c8] sm:$0xff] %v1537_v8  ;;  %3113 = vst [vmem:[%s4667_s1 + $0x2e0] sm:$0xff] %v1528_v9 }
 0x1e6   :  { %2025 = vbcast.lane.b32.xlu1 %v4105_v52, 328  ;;  %2016 = vbcast.lane.b32.xlu0 %v4110_v53, 328 }
 0x1e8   :  { %v1554_v10 = vpop.permute.xlu1 %1553  ;;  %v1545_v11 = vpop.permute.xlu0 %1544 }
 0x1e9   :  { %3119 = vst [vmem:[%s4667_s1 + $0x7d0] sm:$0xff] %v1554_v10  ;;  %3117 = vst [vmem:[%s4667_s1 + $0x2e8] sm:$0xff] %v1545_v11 }
 0x1ea   :  { %2042 = vbcast.lane.b32.xlu1 %v4105_v52, 336  ;;  %2033 = vbcast.lane.b32.xlu0 %v4110_v53, 336 }
 0x1ec   :  { %v1571_v12 = vpop.permute.xlu1 %1570  ;;  %v1562_v13 = vpop.permute.xlu0 %1561 }
 0x1ed   :  { %3123 = vst [vmem:[%s4667_s1 + $0x7d8] sm:$0xff] %v1571_v12  ;;  %3121 = vst [vmem:[%s4667_s1 + $0x2f0] sm:$0xff] %v1562_v13 }
 0x1ee   :  { %2059 = vbcast.lane.b32.xlu1 %v4105_v52, 344  ;;  %2050 = vbcast.lane.b32.xlu0 %v4110_v53, 344 }
 0x1f0   :  { %v1588_v14 = vpop.permute.xlu1 %1587  ;;  %v1579_v15 = vpop.permute.xlu0 %1578 }
 0x1f1   :  { %3127 = vst [vmem:[%s4667_s1 + $0x7e0] sm:$0xff] %v1588_v14  ;;  %3125 = vst [vmem:[%s4667_s1 + $0x2f8] sm:$0xff] %v1579_v15 }
 0x1f2   :  { %2076 = vbcast.lane.b32.xlu1 %v4105_v52, 352  ;;  %2067 = vbcast.lane.b32.xlu0 %v4110_v53, 352 }
 0x1f4   :  { %v1603_v16 = vpop.permute.xlu1 %1602  ;;  %v1595_v17 = vpop.permute.xlu0 %1594 }
 0x1f5   :  { %3131 = vst [vmem:[%s4667_s1 + $0x7e8] sm:$0xff] %v1603_v16  ;;  %3129 = vst [vmem:[%s4667_s1 + $0x300] sm:$0xff] %v1595_v17 }
 0x1f6   :  { %2093 = vbcast.lane.b32.xlu1 %v4105_v52, 360  ;;  %2084 = vbcast.lane.b32.xlu0 %v4110_v53, 360 }
 0x1f8   :  { %v1620_v18 = vpop.permute.xlu1 %1619  ;;  %v1611_v19 = vpop.permute.xlu0 %1610 }
 0x1f9   :  { %3135 = vst [vmem:[%s4667_s1 + $0x7f0] sm:$0xff] %v1620_v18  ;;  %3133 = vst [vmem:[%s4667_s1 + $0x308] sm:$0xff] %v1611_v19 }
 0x1fa   :  { %2110 = vbcast.lane.b32.xlu1 %v4105_v52, 368  ;;  %2101 = vbcast.lane.b32.xlu0 %v4110_v53, 368 }
 0x1fc   :  { %v1637_v20 = vpop.permute.xlu1 %1636  ;;  %v1628_v21 = vpop.permute.xlu0 %1627 }
 0x1fd   :  { %3139 = vst [vmem:[%s4667_s1 + $0x7f8] sm:$0xff] %v1637_v20  ;;  %3137 = vst [vmem:[%s4667_s1 + $0x310] sm:$0xff] %v1628_v21 }
 0x1fe   :  { %2127 = vbcast.lane.b32.xlu1 %v4105_v52, 376  ;;  %2118 = vbcast.lane.b32.xlu0 %v4110_v53, 376 }
 0x200   :  { %v1654_v24 = vpop.permute.xlu1 %1653  ;;  %v1645_v25 = vpop.permute.xlu0 %1644 }
 0x201   :  { %3143 = vst [vmem:[%s4667_s1 + $0x800] sm:$0xff] %v1654_v24  ;;  %3141 = vst [vmem:[%s4667_s1 + $0x318] sm:$0xff] %v1645_v25 }
 0x202   :  { %2142 = vbcast.lane.b32.xlu1 %v4243_v22, 256  ;;  %2134 = vbcast.lane.b32.xlu0 %v4248_v23, 256 }
 0x204   :  { %v1671_v26 = vpop.permute.xlu1 %1670  ;;  %v1662_v27 = vpop.permute.xlu0 %1661 }
 0x205   :  { %3147 = vst [vmem:[%s4667_s1 + $0x808] sm:$0xff] %v1671_v26  ;;  %3145 = vst [vmem:[%s4667_s1 + $0x320] sm:$0xff] %v1662_v27 }
 0x206   :  { %2159 = vbcast.lane.b32.xlu1 %v4243_v22, 264  ;;  %2150 = vbcast.lane.b32.xlu0 %v4248_v23, 264 }
 0x208   :  { %v1688_v28 = vpop.permute.xlu1 %1687  ;;  %v1679_v29 = vpop.permute.xlu0 %1678 }
 0x209   :  { %3151 = vst [vmem:[%s4667_s1 + $0x810] sm:$0xff] %v1688_v28  ;;  %3149 = vst [vmem:[%s4667_s1 + $0x328] sm:$0xff] %v1679_v29 }
 0x20a   :  { %2176 = vbcast.lane.b32.xlu1 %v4243_v22, 272  ;;  %2167 = vbcast.lane.b32.xlu0 %v4248_v23, 272 }
 0x20c   :  { %v1705_v30 = vpop.permute.xlu1 %1704  ;;  %v1696_v31 = vpop.permute.xlu0 %1695 }
 0x20d   :  { %3155 = vst [vmem:[%s4667_s1 + $0x818] sm:$0xff] %v1705_v30  ;;  %3153 = vst [vmem:[%s4667_s1 + $0x330] sm:$0xff] %v1696_v31 }
 0x20e   :  { %2193 = vbcast.lane.b32.xlu1 %v4243_v22, 280  ;;  %2184 = vbcast.lane.b32.xlu0 %v4248_v23, 280 }
 0x210   :  { %v1722_v32 = vpop.permute.xlu1 %1721  ;;  %v1713_v33 = vpop.permute.xlu0 %1712 }
 0x211   :  { %3159 = vst [vmem:[%s4667_s1 + $0x820] sm:$0xff] %v1722_v32  ;;  %3157 = vst [vmem:[%s4667_s1 + $0x338] sm:$0xff] %v1713_v33 }
 0x212   :  { %2210 = vbcast.lane.b32.xlu1 %v4243_v22, 288  ;;  %2201 = vbcast.lane.b32.xlu0 %v4248_v23, 288 }
 0x214   :  { %v1739_v34 = vpop.permute.xlu1 %1738  ;;  %v1730_v35 = vpop.permute.xlu0 %1729 }
 0x215   :  { %3163 = vst [vmem:[%s4667_s1 + $0x828] sm:$0xff] %v1739_v34  ;;  %3161 = vst [vmem:[%s4667_s1 + $0x340] sm:$0xff] %v1730_v35 }
 0x216   :  { %2227 = vbcast.lane.b32.xlu1 %v4243_v22, 296  ;;  %2218 = vbcast.lane.b32.xlu0 %v4248_v23, 296 }
 0x218   :  { %v1756_v36 = vpop.permute.xlu1 %1755  ;;  %v1747_v37 = vpop.permute.xlu0 %1746 }
 0x219   :  { %3167 = vst [vmem:[%s4667_s1 + $0x830] sm:$0xff] %v1756_v36  ;;  %3165 = vst [vmem:[%s4667_s1 + $0x348] sm:$0xff] %v1747_v37 }
 0x21a   :  { %2244 = vbcast.lane.b32.xlu1 %v4243_v22, 304  ;;  %2235 = vbcast.lane.b32.xlu0 %v4248_v23, 304 }
 0x21c   :  { %v1773_v38 = vpop.permute.xlu1 %1772  ;;  %v1764_v39 = vpop.permute.xlu0 %1763 }
 0x21d   :  { %3171 = vst [vmem:[%s4667_s1 + $0x838] sm:$0xff] %v1773_v38  ;;  %3169 = vst [vmem:[%s4667_s1 + $0x350] sm:$0xff] %v1764_v39 }
 0x21e   :  { %2261 = vbcast.lane.b32.xlu1 %v4243_v22, 312  ;;  %2252 = vbcast.lane.b32.xlu0 %v4248_v23, 312 }
 0x220   :  { %v1790_v40 = vpop.permute.xlu1 %1789  ;;  %v1781_v41 = vpop.permute.xlu0 %1780 }
 0x221   :  { %3175 = vst [vmem:[%s4667_s1 + $0x840] sm:$0xff] %v1790_v40  ;;  %3173 = vst [vmem:[%s4667_s1 + $0x358] sm:$0xff] %v1781_v41 }
 0x222   :  { %2278 = vbcast.lane.b32.xlu1 %v4243_v22, 320  ;;  %2269 = vbcast.lane.b32.xlu0 %v4248_v23, 320 }
 0x224   :  { %v1807_v42 = vpop.permute.xlu1 %1806  ;;  %v1798_v43 = vpop.permute.xlu0 %1797 }
 0x225   :  { %3179 = vst [vmem:[%s4667_s1 + $0x848] sm:$0xff] %v1807_v42  ;;  %3177 = vst [vmem:[%s4667_s1 + $0x360] sm:$0xff] %v1798_v43 }
 0x226   :  { %2295 = vbcast.lane.b32.xlu1 %v4243_v22, 328  ;;  %2286 = vbcast.lane.b32.xlu0 %v4248_v23, 328 }
 0x228   :  { %v1824_v44 = vpop.permute.xlu1 %1823  ;;  %v1815_v45 = vpop.permute.xlu0 %1814 }
 0x229   :  { %3183 = vst [vmem:[%s4667_s1 + $0x850] sm:$0xff] %v1824_v44  ;;  %3181 = vst [vmem:[%s4667_s1 + $0x368] sm:$0xff] %v1815_v45 }
 0x22a   :  { %2312 = vbcast.lane.b32.xlu1 %v4243_v22, 336  ;;  %2303 = vbcast.lane.b32.xlu0 %v4248_v23, 336 }
 0x22c   :  { %v1841_v46 = vpop.permute.xlu1 %1840  ;;  %v1832_v47 = vpop.permute.xlu0 %1831 }
 0x22d   :  { %3187 = vst [vmem:[%s4667_s1 + $0x858] sm:$0xff] %v1841_v46  ;;  %3185 = vst [vmem:[%s4667_s1 + $0x370] sm:$0xff] %v1832_v47 }
 0x22e   :  { %2329 = vbcast.lane.b32.xlu1 %v4243_v22, 344  ;;  %2320 = vbcast.lane.b32.xlu0 %v4248_v23, 344 }
 0x230   :  { %v1858_v48 = vpop.permute.xlu1 %1857  ;;  %v1849_v49 = vpop.permute.xlu0 %1848 }
 0x231   :  { %3191 = vst [vmem:[%s4667_s1 + $0x860] sm:$0xff] %v1858_v48  ;;  %3189 = vst [vmem:[%s4667_s1 + $0x378] sm:$0xff] %v1849_v49 }
 0x232   :  { %2346 = vbcast.lane.b32.xlu1 %v4243_v22, 352  ;;  %2337 = vbcast.lane.b32.xlu0 %v4248_v23, 352 }
 0x234   :  { %v1873_v50 = vpop.permute.xlu1 %1872  ;;  %v1865_v51 = vpop.permute.xlu0 %1864 }
 0x235   :  { %3195 = vst [vmem:[%s4667_s1 + $0x868] sm:$0xff] %v1873_v50  ;;  %3193 = vst [vmem:[%s4667_s1 + $0x380] sm:$0xff] %v1865_v51 }
 0x236   :  { %2363 = vbcast.lane.b32.xlu1 %v4243_v22, 360  ;;  %2354 = vbcast.lane.b32.xlu0 %v4248_v23, 360 }
 0x238   :  { %v1890_v52 = vpop.permute.xlu1 %1889  ;;  %v1881_v53 = vpop.permute.xlu0 %1880 }
 0x239   :  { %3199 = vst [vmem:[%s4667_s1 + $0x870] sm:$0xff] %v1890_v52  ;;  %3197 = vst [vmem:[%s4667_s1 + $0x388] sm:$0xff] %v1881_v53 }
 0x23a   :  { %2380 = vbcast.lane.b32.xlu1 %v4243_v22, 368  ;;  %2371 = vbcast.lane.b32.xlu0 %v4248_v23, 368 }
 0x23c   :  { %v1907_v54 = vpop.permute.xlu1 %1906  ;;  %v1898_v55 = vpop.permute.xlu0 %1897 }
 0x23d   :  { %3203 = vst [vmem:[%s4667_s1 + $0x878] sm:$0xff] %v1907_v54  ;;  %3201 = vst [vmem:[%s4667_s1 + $0x390] sm:$0xff] %v1898_v55 }
 0x23e   :  { %2397 = vbcast.lane.b32.xlu1 %v4243_v22, 376  ;;  %2388 = vbcast.lane.b32.xlu0 %v4248_v23, 376 }
 0x240   :  { %v1924_v58 = vpop.permute.xlu1 %1923  ;;  %v1915_v59 = vpop.permute.xlu0 %1914 }
 0x241   :  { %3207 = vst [vmem:[%s4667_s1 + $0x880] sm:$0xff] %v1924_v58  ;;  %3205 = vst [vmem:[%s4667_s1 + $0x398] sm:$0xff] %v1915_v59 }
 0x242   :  { %2412 = vbcast.lane.b32.xlu1 %v4381_v56, 256  ;;  %2404 = vbcast.lane.b32.xlu0 %v4386_v57, 256 }
 0x244   :  { %v1941_v60 = vpop.permute.xlu1 %1940  ;;  %v1932_v61 = vpop.permute.xlu0 %1931 }
 0x245   :  { %3211 = vst [vmem:[%s4667_s1 + $0x888] sm:$0xff] %v1941_v60  ;;  %3209 = vst [vmem:[%s4667_s1 + $0x3a0] sm:$0xff] %v1932_v61 }
 0x246   :  { %2429 = vbcast.lane.b32.xlu1 %v4381_v56, 264  ;;  %2420 = vbcast.lane.b32.xlu0 %v4386_v57, 264 }
 0x248   :  { %v1958_v62 = vpop.permute.xlu1 %1957  ;;  %v1949_v63 = vpop.permute.xlu0 %1948 }
 0x249   :  { %3215 = vst [vmem:[%s4667_s1 + $0x890] sm:$0xff] %v1958_v62  ;;  %3213 = vst [vmem:[%s4667_s1 + $0x3a8] sm:$0xff] %v1949_v63 }
 0x24a   :  { %2446 = vbcast.lane.b32.xlu1 %v4381_v56, 272  ;;  %2437 = vbcast.lane.b32.xlu0 %v4386_v57, 272 }
 0x24c   :  { %v1975_v0 = vpop.permute.xlu1 %1974  ;;  %v1966_v1 = vpop.permute.xlu0 %1965 }
 0x24d   :  { %3219 = vst [vmem:[%s4667_s1 + $0x898] sm:$0xff] %v1975_v0  ;;  %3217 = vst [vmem:[%s4667_s1 + $0x3b0] sm:$0xff] %v1966_v1 }
 0x24e   :  { %2463 = vbcast.lane.b32.xlu1 %v4381_v56, 280  ;;  %2454 = vbcast.lane.b32.xlu0 %v4386_v57, 280 }
 0x250   :  { %v1992_v2 = vpop.permute.xlu1 %1991  ;;  %v1983_v3 = vpop.permute.xlu0 %1982 }
 0x251   :  { %3223 = vst [vmem:[%s4667_s1 + $0x8a0] sm:$0xff] %v1992_v2  ;;  %3221 = vst [vmem:[%s4667_s1 + $0x3b8] sm:$0xff] %v1983_v3 }
 0x252   :  { %2480 = vbcast.lane.b32.xlu1 %v4381_v56, 288  ;;  %2471 = vbcast.lane.b32.xlu0 %v4386_v57, 288 }
 0x254   :  { %v2009_v4 = vpop.permute.xlu1 %2008  ;;  %v2000_v5 = vpop.permute.xlu0 %1999 }
 0x255   :  { %3227 = vst [vmem:[%s4667_s1 + $0x8a8] sm:$0xff] %v2009_v4  ;;  %3225 = vst [vmem:[%s4667_s1 + $0x3c0] sm:$0xff] %v2000_v5 }
 0x256   :  { %2497 = vbcast.lane.b32.xlu1 %v4381_v56, 296  ;;  %2488 = vbcast.lane.b32.xlu0 %v4386_v57, 296 }
 0x258   :  { %v2026_v6 = vpop.permute.xlu1 %2025  ;;  %v2017_v7 = vpop.permute.xlu0 %2016 }
 0x259   :  { %3231 = vst [vmem:[%s4667_s1 + $0x8b0] sm:$0xff] %v2026_v6  ;;  %3229 = vst [vmem:[%s4667_s1 + $0x3c8] sm:$0xff] %v2017_v7 }
 0x25a   :  { %2514 = vbcast.lane.b32.xlu1 %v4381_v56, 304  ;;  %2505 = vbcast.lane.b32.xlu0 %v4386_v57, 304 }
 0x25c   :  { %v2043_v8 = vpop.permute.xlu1 %2042  ;;  %v2034_v9 = vpop.permute.xlu0 %2033 }
 0x25d   :  { %3235 = vst [vmem:[%s4667_s1 + $0x8b8] sm:$0xff] %v2043_v8  ;;  %3233 = vst [vmem:[%s4667_s1 + $0x3d0] sm:$0xff] %v2034_v9 }
 0x25e   :  { %2531 = vbcast.lane.b32.xlu1 %v4381_v56, 312  ;;  %2522 = vbcast.lane.b32.xlu0 %v4386_v57, 312 }
 0x260   :  { %v2060_v10 = vpop.permute.xlu1 %2059  ;;  %v2051_v11 = vpop.permute.xlu0 %2050 }
 0x261   :  { %3239 = vst [vmem:[%s4667_s1 + $0x8c0] sm:$0xff] %v2060_v10  ;;  %3237 = vst [vmem:[%s4667_s1 + $0x3d8] sm:$0xff] %v2051_v11 }
 0x262   :  { %2548 = vbcast.lane.b32.xlu1 %v4381_v56, 320  ;;  %2539 = vbcast.lane.b32.xlu0 %v4386_v57, 320 }
 0x264   :  { %v2077_v12 = vpop.permute.xlu1 %2076  ;;  %v2068_v13 = vpop.permute.xlu0 %2067 }
 0x265   :  { %3243 = vst [vmem:[%s4667_s1 + $0x8c8] sm:$0xff] %v2077_v12  ;;  %3241 = vst [vmem:[%s4667_s1 + $0x3e0] sm:$0xff] %v2068_v13 }
 0x266   :  { %2565 = vbcast.lane.b32.xlu1 %v4381_v56, 328  ;;  %2556 = vbcast.lane.b32.xlu0 %v4386_v57, 328 }
 0x268   :  { %v2094_v14 = vpop.permute.xlu1 %2093  ;;  %v2085_v15 = vpop.permute.xlu0 %2084 }
 0x269   :  { %3247 = vst [vmem:[%s4667_s1 + $0x8d0] sm:$0xff] %v2094_v14  ;;  %3245 = vst [vmem:[%s4667_s1 + $0x3e8] sm:$0xff] %v2085_v15 }
 0x26a   :  { %2582 = vbcast.lane.b32.xlu1 %v4381_v56, 336  ;;  %2573 = vbcast.lane.b32.xlu0 %v4386_v57, 336 }
 0x26c   :  { %v2111_v16 = vpop.permute.xlu1 %2110  ;;  %v2102_v17 = vpop.permute.xlu0 %2101 }
 0x26d   :  { %3251 = vst [vmem:[%s4667_s1 + $0x8d8] sm:$0xff] %v2111_v16  ;;  %3249 = vst [vmem:[%s4667_s1 + $0x3f0] sm:$0xff] %v2102_v17 }
 0x26e   :  { %2599 = vbcast.lane.b32.xlu1 %v4381_v56, 344  ;;  %2590 = vbcast.lane.b32.xlu0 %v4386_v57, 344 }
 0x270   :  { %v2128_v18 = vpop.permute.xlu1 %2127  ;;  %v2119_v19 = vpop.permute.xlu0 %2118 }
 0x271   :  { %3255 = vst [vmem:[%s4667_s1 + $0x8e0] sm:$0xff] %v2128_v18  ;;  %3253 = vst [vmem:[%s4667_s1 + $0x3f8] sm:$0xff] %v2119_v19 }
 0x272   :  { %2616 = vbcast.lane.b32.xlu1 %v4381_v56, 352  ;;  %2607 = vbcast.lane.b32.xlu0 %v4386_v57, 352 }
 0x274   :  { %v2143_v20 = vpop.permute.xlu1 %2142  ;;  %v2135_v21 = vpop.permute.xlu0 %2134 }
 0x275   :  { %3259 = vst [vmem:[%s4667_s1 + $0x8e8] sm:$0xff] %v2143_v20  ;;  %3257 = vst [vmem:[%s4667_s1 + $0x400] sm:$0xff] %v2135_v21 }
 0x278   :  { %v2160_v22 = vpop.permute.xlu1 %2159  ;;  %v2151_v23 = vpop.permute.xlu0 %2150 }
 0x279   :  { %3263 = vst [vmem:[%s4667_s1 + $0x8f0] sm:$0xff] %v2160_v22  ;;  %3261 = vst [vmem:[%s4667_s1 + $0x408] sm:$0xff] %v2151_v23 }
 0x27c   :  { %v2177_v24 = vpop.permute.xlu1 %2176  ;;  %v2168_v25 = vpop.permute.xlu0 %2167 }
 0x27d   :  { %3267 = vst [vmem:[%s4667_s1 + $0x8f8] sm:$0xff] %v2177_v24  ;;  %3265 = vst [vmem:[%s4667_s1 + $0x410] sm:$0xff] %v2168_v25 }
 0x280   :  { %v2194_v26 = vpop.permute.xlu1 %2193  ;;  %v2185_v27 = vpop.permute.xlu0 %2184 }
 0x281   :  { %3271 = vst [vmem:[%s4667_s1 + $0x900] sm:$0xff] %v2194_v26  ;;  %3269 = vst [vmem:[%s4667_s1 + $0x418] sm:$0xff] %v2185_v27 }
 0x284   :  { %v2211_v28 = vpop.permute.xlu1 %2210  ;;  %v2202_v29 = vpop.permute.xlu0 %2201 }
 0x285   :  { %3275 = vst [vmem:[%s4667_s1 + $0x908] sm:$0xff] %v2211_v28  ;;  %3273 = vst [vmem:[%s4667_s1 + $0x420] sm:$0xff] %v2202_v29 }
 0x288   :  { %v2228_v30 = vpop.permute.xlu1 %2227  ;;  %v2219_v31 = vpop.permute.xlu0 %2218 }
 0x289   :  { %3279 = vst [vmem:[%s4667_s1 + $0x910] sm:$0xff] %v2228_v30  ;;  %3277 = vst [vmem:[%s4667_s1 + $0x428] sm:$0xff] %v2219_v31 }
 0x28c   :  { %v2245_v32 = vpop.permute.xlu1 %2244  ;;  %v2236_v33 = vpop.permute.xlu0 %2235 }
 0x28d   :  { %3283 = vst [vmem:[%s4667_s1 + $0x918] sm:$0xff] %v2245_v32  ;;  %3281 = vst [vmem:[%s4667_s1 + $0x430] sm:$0xff] %v2236_v33 }
 0x290   :  { %v2262_v34 = vpop.permute.xlu1 %2261  ;;  %v2253_v35 = vpop.permute.xlu0 %2252 }
 0x291   :  { %3287 = vst [vmem:[%s4667_s1 + $0x920] sm:$0xff] %v2262_v34  ;;  %3285 = vst [vmem:[%s4667_s1 + $0x438] sm:$0xff] %v2253_v35 }
 0x294   :  { %v2279_v36 = vpop.permute.xlu1 %2278  ;;  %v2270_v37 = vpop.permute.xlu0 %2269 }
 0x295   :  { %3291 = vst [vmem:[%s4667_s1 + $0x928] sm:$0xff] %v2279_v36  ;;  %3289 = vst [vmem:[%s4667_s1 + $0x440] sm:$0xff] %v2270_v37 }
 0x298   :  { %v2296_v38 = vpop.permute.xlu1 %2295  ;;  %v2287_v39 = vpop.permute.xlu0 %2286 }
 0x299   :  { %3295 = vst [vmem:[%s4667_s1 + $0x930] sm:$0xff] %v2296_v38  ;;  %3293 = vst [vmem:[%s4667_s1 + $0x448] sm:$0xff] %v2287_v39 }
 0x29c   :  { %v2313_v40 = vpop.permute.xlu1 %2312  ;;  %v2304_v41 = vpop.permute.xlu0 %2303 }
 0x29d   :  { %3299 = vst [vmem:[%s4667_s1 + $0x938] sm:$0xff] %v2313_v40  ;;  %3297 = vst [vmem:[%s4667_s1 + $0x450] sm:$0xff] %v2304_v41 }
 0x2a0   :  { %v2330_v42 = vpop.permute.xlu1 %2329  ;;  %v2321_v43 = vpop.permute.xlu0 %2320 }
 0x2a1   :  { %3303 = vst [vmem:[%s4667_s1 + $0x940] sm:$0xff] %v2330_v42  ;;  %3301 = vst [vmem:[%s4667_s1 + $0x458] sm:$0xff] %v2321_v43 }
 0x2a4   :  { %v2347_v44 = vpop.permute.xlu1 %2346  ;;  %v2338_v45 = vpop.permute.xlu0 %2337 }
 0x2a5   :  { %3307 = vst [vmem:[%s4667_s1 + $0x948] sm:$0xff] %v2347_v44  ;;  %3305 = vst [vmem:[%s4667_s1 + $0x460] sm:$0xff] %v2338_v45 }
 0x2a8   :  { %v2364_v46 = vpop.permute.xlu1 %2363  ;;  %v2355_v47 = vpop.permute.xlu0 %2354 }
 0x2a9   :  { %3311 = vst [vmem:[%s4667_s1 + $0x950] sm:$0xff] %v2364_v46  ;;  %3309 = vst [vmem:[%s4667_s1 + $0x468] sm:$0xff] %v2355_v47 }
 0x2ac   :  { %v2381_v48 = vpop.permute.xlu1 %2380  ;;  %v2372_v49 = vpop.permute.xlu0 %2371 }
 0x2ad   :  { %3315 = vst [vmem:[%s4667_s1 + $0x958] sm:$0xff] %v2381_v48  ;;  %3313 = vst [vmem:[%s4667_s1 + $0x470] sm:$0xff] %v2372_v49 }
 0x2b0   :  { %v2398_v50 = vpop.permute.xlu1 %2397  ;;  %v2389_v51 = vpop.permute.xlu0 %2388 }
 0x2b1   :  { %3319 = vst [vmem:[%s4667_s1 + $0x960] sm:$0xff] %v2398_v50  ;;  %3317 = vst [vmem:[%s4667_s1 + $0x478] sm:$0xff] %v2389_v51 }
 0x2b4   :  { %v2413_v52 = vpop.permute.xlu1 %2412  ;;  %v2405_v53 = vpop.permute.xlu0 %2404 }
 0x2b5   :  { %3323 = vst [vmem:[%s4667_s1 + $0x968] sm:$0xff] %v2413_v52  ;;  %3321 = vst [vmem:[%s4667_s1 + $0x480] sm:$0xff] %v2405_v53 }
 0x2b8   :  { %v2430_v54 = vpop.permute.xlu1 %2429  ;;  %v2421_v55 = vpop.permute.xlu0 %2420 }
 0x2b9   :  { %3327 = vst [vmem:[%s4667_s1 + $0x970] sm:$0xff] %v2430_v54  ;;  %3325 = vst [vmem:[%s4667_s1 + $0x488] sm:$0xff] %v2421_v55 }
 0x2bc   :  { %v2447_v56 = vpop.permute.xlu1 %2446  ;;  %v2438_v57 = vpop.permute.xlu0 %2437 }
 0x2bd   :  { %3331 = vst [vmem:[%s4667_s1 + $0x978] sm:$0xff] %v2447_v56  ;;  %3329 = vst [vmem:[%s4667_s1 + $0x490] sm:$0xff] %v2438_v57 }
 0x2c0   :  { %v2464_v58 = vpop.permute.xlu1 %2463  ;;  %v2455_v59 = vpop.permute.xlu0 %2454 }
 0x2c1   :  { %3335 = vst [vmem:[%s4667_s1 + $0x980] sm:$0xff] %v2464_v58  ;;  %3333 = vst [vmem:[%s4667_s1 + $0x498] sm:$0xff] %v2455_v59 }
 0x2c4   :  { %v2481_v60 = vpop.permute.xlu1 %2480  ;;  %v2472_v61 = vpop.permute.xlu0 %2471 }
 0x2c5   :  { %3339 = vst [vmem:[%s4667_s1 + $0x988] sm:$0xff] %v2481_v60  ;;  %3337 = vst [vmem:[%s4667_s1 + $0x4a0] sm:$0xff] %v2472_v61 }
 0x2c8   :  { %v2498_v62 = vpop.permute.xlu1 %2497  ;;  %v2489_v63 = vpop.permute.xlu0 %2488 }
 0x2c9   :  { %3343 = vst [vmem:[%s4667_s1 + $0x990] sm:$0xff] %v2498_v62  ;;  %3341 = vst [vmem:[%s4667_s1 + $0x4a8] sm:$0xff] %v2489_v63 }
 0x2cc   :  { %v2515_v0 = vpop.permute.xlu1 %2514  ;;  %v2506_v1 = vpop.permute.xlu0 %2505 }
 0x2cd   :  { %3347 = vst [vmem:[%s4667_s1 + $0x998] sm:$0xff] %v2515_v0  ;;  %3345 = vst [vmem:[%s4667_s1 + $0x4b0] sm:$0xff] %v2506_v1 }
 0x2d0   :  { %v2532_v2 = vpop.permute.xlu1 %2531  ;;  %v2523_v3 = vpop.permute.xlu0 %2522 }
 0x2d1   :  { %3351 = vst [vmem:[%s4667_s1 + $0x9a0] sm:$0xff] %v2532_v2  ;;  %3349 = vst [vmem:[%s4667_s1 + $0x4b8] sm:$0xff] %v2523_v3 }
 0x2d4   :  { %v2549_v4 = vpop.permute.xlu1 %2548  ;;  %v2540_v5 = vpop.permute.xlu0 %2539 }
 0x2d5   :  { %3355 = vst [vmem:[%s4667_s1 + $0x9a8] sm:$0xff] %v2549_v4  ;;  %3353 = vst [vmem:[%s4667_s1 + $0x4c0] sm:$0xff] %v2540_v5 }
 0x2d8   :  { %v2566_v6 = vpop.permute.xlu1 %2565  ;;  %v2557_v7 = vpop.permute.xlu0 %2556 }
 0x2d9   :  { %3359 = vst [vmem:[%s4667_s1 + $0x9b0] sm:$0xff] %v2566_v6  ;;  %3357 = vst [vmem:[%s4667_s1 + $0x4c8] sm:$0xff] %v2557_v7 }
 0x2dc   :  { %v2583_v8 = vpop.permute.xlu1 %2582  ;;  %v2574_v9 = vpop.permute.xlu0 %2573 }
 0x2dd   :  { %3363 = vst [vmem:[%s4667_s1 + $0x9b8] sm:$0xff] %v2583_v8  ;;  %3361 = vst [vmem:[%s4667_s1 + $0x4d0] sm:$0xff] %v2574_v9 }
 0x2e0   :  { %v2600_v10 = vpop.permute.xlu1 %2599  ;;  %v2591_v11 = vpop.permute.xlu0 %2590 }
 0x2e1   :  { %3367 = vst [vmem:[%s4667_s1 + $0x9c0] sm:$0xff] %v2600_v10  ;;  %3365 = vst [vmem:[%s4667_s1 + $0x4d8] sm:$0xff] %v2591_v11 }
 0x2e4   :  { %v2617_v12 = vpop.permute.xlu1 %2616  ;;  %v2608_v13 = vpop.permute.xlu0 %2607 }
 0x2e5   :  { %3371 = vst [vmem:[%s4667_s1 + $0x9c8] sm:$0xff] %v2617_v12  ;;  %3369 = vst [vmem:[%s4667_s1 + $0x4e0] sm:$0xff] %v2608_v13 }

// kernel: iegm_forward.1
= control target key start
LH: loop header
LB: loop body
LE: loop exit
PB: predicated region body
PF: predicated region fallthrough
CT: control target
= control target key end

     0   :  { %s21731_s0 = inlined_call_operand.vmem [shape: f32[2,1250,1], index: 0, kind: input, shape index: {}]   ;;  %s21732_s1 = inlined_call_operand.vmem [shape: f32[6,1,3], index: 1, kind: input, shape index: {}]   ;;  %s21733_s2 = inlined_call_operand.vmem [shape: f32[1,3], index: 2, kind: input, shape index: {}]   ;;  %s21734_s3 = inlined_call_operand.vmem [shape: f32[1,3], index: 3, kind: input, shape index: {}]   ;;  %s21735_s4 = inlined_call_operand.vmem [shape: f32[1,3], index: 4, kind: input, shape index: {}]   ;;  %s21736_s5 = inlined_call_operand.vmem [shape: f32[5,3,5], index: 5, kind: input, shape index: {}]   ;;  %s21737_s6 = inlined_call_operand.vmem [shape: f32[1,5], index: 6, kind: input, shape index: {}]   ;;  %s21738_s7 = inlined_call_operand.vmem [shape: f32[1,5], index: 7, kind: input, shape index: {}]   ;;  %s21739_s8 = inlined_call_operand.vmem [shape: f32[1,5], index: 8, kind: input, shape index: {}]   ;;  %s21740_s9 = inlined_call_operand.vmem [shape: f32[4,5,10], index: 9, kind: input, shape index: {}]   ;;  %s21741_s10 = inlined_call_operand.vmem [shape: f32[1,10], index: 10, kind: input, shape index: {}]   ;;  %s21742_s11 = inlined_call_operand.vmem [shape: f32[1,10], index: 11, kind: input, shape index: {}]   ;;  %s21743_s12 = inlined_call_operand.vmem [shape: f32[1,10], index: 12, kind: input, shape index: {}]   ;;  %s21744_s13 = inlined_call_operand.vmem [shape: f32[4,10,20], index: 13, kind: input, shape index: {}]   ;;  %s21745_s14 = inlined_call_operand.vmem [shape: f32[1,20], index: 14, kind: input, shape index: {}]   ;;  %s21746_s15 = inlined_call_operand.vmem [shape: f32[1,20], index: 15, kind: input, shape index: {}]   ;;  %s21747_s16 = inlined_call_operand.vmem [shape: f32[1,20], index: 16, kind: input, shape index: {}]   ;;  %s21748_s17 = inlined_call_operand.vmem [shape: f32[4,20,20], index: 17, kind: input, shape index: {}]   ;;  %s21749_s18 = inlined_call_operand.vmem [shape: f32[1,20], index: 18, kind: input, shape index: {}]   ;;  %s21750_s19 = inlined_call_operand.vmem [shape: f32[1,20], index: 19, kind: input, shape index: {}]   ;;  %s21751_s20 = inlined_call_operand.vmem [shape: f32[1,20], index: 20, kind: input, shape index: {}]   ;;  %s21752_s21 = inlined_call_operand.vmem [shape: f32[37,20,10], index: 21, kind: input, shape index: {}]   ;;  %s21753_s22 = inlined_call_operand.vmem [shape: f32[1,10], index: 22, kind: input, shape index: {}]   ;;  %s21754_s23 = inlined_call_operand.vmem [shape: f32[10,2], index: 23, kind: input, shape index: {}]   ;;  %s21755_s24 = inlined_call_operand.vmem [shape: f32[1,2], index: 24, kind: input, shape index: {}]   ;;  %s21756_s25 = inlined_call_operand.hbm [shape: f32[2,1,2], index: 25, kind: output, shape index: {}]  }
   0x1   :  { %21773 = sst [smem:[#allocation26_spill]] %s21731_s0 }
   0x2   :  { %21774 = sst [smem:[#allocation27_spill]] %s21732_s1 }
   0x3   :  { %21775 = sst [smem:[#allocation28_spill]] %s21733_s2 }
   0x4   :  { %21776 = sst [smem:[#allocation29_spill]] %s21734_s3 }
   0x5   :  { %21777 = sst [smem:[#allocation30_spill]] %s21735_s4 }
   0x6   :  { %21778 = sst [smem:[#allocation31_spill]] %s21736_s5 }
   0x7   :  { %21779 = sst [smem:[#allocation32_spill]] %s21737_s6 }
   0x8   :  { %21780 = sst [smem:[#allocation33_spill]] %s21738_s7 }
   0x9   :  { %21781 = sst [smem:[#allocation34_spill]] %s21739_s8 }
   0xa   :  { %21782 = sst [smem:[#allocation35_spill]] %s21740_s9 }
   0xb   :  { %21783 = sst [smem:[#allocation36_spill]] %s21741_s10 }
   0xc   :  { %21784 = sst [smem:[#allocation37_spill]] %s21742_s11 }
   0xd   :  { %21785 = sst [smem:[#allocation38_spill]] %s21743_s12 }
   0xe   :  { %30 = vsyncpa [#allocation7], 0 }
   0xf   :  { %32 = vsyncpa [#allocation7 + $0x1], 0  ;;  %s17088_s29 = smov 0   ;;  %s17090_s2 = smov 0  }
  0x10   :  { %s17092_s6 = smov 0   ;;  %s17094_s30 = smov 0  }
  0x11 LB: > { %21786 = sst [smem:[#allocation9_spill]] %s16946_s6  ;;  %s17109_s7 = sadd.s32 4294967295, %s16950_s30   ;;  %s16950_s30 = sphi %s17094_s30, %s21836_s30   ;;  %s16946_s6 = sphi %s17092_s6, %s21838_s6   ;;  %s16942_s2 = sphi %s17090_s2, %s21840_s2   ;;  %s16938_s29 = sphi %s17088_s29, %s21839_s29  }
  0x12   : > { %s13692_s3 = sadd.s32 4294967294, %s16950_s30   ;;  %s17113_s26 = sadd.s32 1, %s16950_s30  }
  0x13   : > { %21787 = sst [smem:[#allocation10_spill]] %s17113_s26  ;;  %s575_s1 = sadd.s32 1, %s16946_s6 }
  0x14   : > { %s572_s8 = ssub.s32 %s16950_s30, %s17113_s26  ;;  %p585_p0 = scmp.ne.s32.totalorder %s16946_s6, %s16942_s2 }
  0x15   : > { %p573_p1 = scmp.eq.s32.totalorder %s572_s8, 0  ;;  %p586_p2 = scmp.eq.s32.totalorder %s17109_s7, 1 }
  0x16   : > { %p591_p3 = scmp.ne.s32.totalorder %s16942_s2, %s16938_s29  ;;  %p592_p4 = scmp.eq.s32.totalorder %s13692_s3, 1 }
  0x17   : > { %s17124_s27 = scalar_select %p573_p1, %s16946_s6, %s575_s1  }
  0x18   : > { %p17126_p5 = por %p586_p2, %p585_p0  ;;  %p17130_p6 = por %p592_p4, %p591_p3 }
  0x19   : > { %21788 = sst [smem:[#allocation11_spill]] %s17124_s27  ;;  %p13695_p7 = scmp.ge.s32.totalorder %s16950_s30, 1 }
  0x1a   : > { %s21790_s28 = scalar_select %p17130_p6, 1, 0 }
  0x1b   : > { %p690_p8 = scmp.lt.s32.totalorder %s16950_s30, 3 }
  0x1c   : > { %21791 = sst [smem:[#allocation12_spill]] %s21790_s28 }
  0x1d   : > { %p691_p9 = pnand %p13695_p7, %p690_p8 }
  0x1f   : > { %694 = sbr.rel (%p691_p9) target bundleno = 3305 (0xce9), region = 120 }
  0x26   : > { %p757_p10 = scmp.lt.s32.totalorder %s17109_s7, 1  ;;  %v16952_v0 = vmov 0   ;;  %s21792_s1 = sld [smem:[#allocation26_spill]]  ;;  %vm5630_vm0 = vcmask 1042432   ;;  %v21767_v36 = vmov 0.0   ;;  %vm16954_vm1 = vmmov 0  }
  0x27   : > { %16851 = vset.pattern.permute.xlu1 %v16952_v0  ;;  %16850 = vset.pattern.permute.xlu0 %v16952_v0  ;;  %s21793_s0 = sld [smem:[#allocation31_spill]]  ;;  %s21795_s6 = sld [smem:[#allocation28_spill]]  ;;  %vm5275_vm2 = vcmask 23552   ;;  %vm5353_vm3 = vcmask 22528   ;;  %vm8131_vm4 = vcmask 1044480   ;;  %vm7948_vm5 = vcmask 39936  }
  0x28   : > { %s758_s9 = scalar_select %p757_p10, %s17109_s7, 1  ;;  %16640 = vmatprep.subr.mxu1 %v21767_v36  ;;  %15307 = vmatprep.mubr.msk.f32.mxu1 %vm16954_vm1, %v21767_v36  ;;  %vm7987_vm6 = vcmask 37888   ;;  %vm9305_vm7 = vcmask 1041408   ;;  %vm16955_vm8 = vmmov 1   ;;  %vm10048_vm10 = vcmask 1043456  }
  0x29   : > { %15266 = vmatprep.subr.mxu0 %v21767_v36  ;;  %15268 = vmatprep.mubr.msk.f32.mxu0 %vm16954_vm1, %v21767_v36  ;;  %s21797_s27 = sld [smem:[#allocation29_spill]]  ;;  %s21798_s28 = sld [smem:[#allocation30_spill]]  ;;  %vm20656_vm9 = vmpackc.low %vm9305_vm7, %vm16955_vm8  ;;  %vm9209_vm11 = vcmask 80896   ;;  %vm9229_vm12 = vcmask 74752   ;;  %vm9995_vm13 = vcmask 162816   ;;  %vm10005_vm14 = vcmask 158720  }
  0x2a   : > { %s16805_s5 = smul.u32 1256, %s758_s9  ;;  %s21794_s9 = sld [smem:[#allocation27_spill]]  ;;  %vm13622_vm15 = vcmask 8192  }
  0x2b   : > { %s21832_s10 = sld [smem:[#allocation36_spill]]  ;;  %s21833_s11 = sld [smem:[#allocation37_spill]] }
  0x2c   : > { %s17141_s8 = scalar_lea.vmem %s21792_s1, %s16805_s5  ;;  %s21813_s1 = sld [smem:[#allocation35_spill]] }
  0x2d   : > { %v13801_v1 = vld [vmem:[%s17141_s8 + $0x1a1] ss:$2 sm:$0xff]  ;;  %v13722_v2 = vld [vmem:[%s17141_s8 + $0x1a0] ss:$2 sm:$0xff]  ;;  %v13802_v3 = vld [vmem:[%s17141_s8 + $0x1b1] ss:$2 sm:$0xff]  ;;  %s21796_s26 = smov %s21795_s6 }
  0x2e   : > { %1682 = vperm.xlu1 %16851, %v13801_v1   ;;  %1050 = vperm.xlu0 %16850, %v13722_v2   ;;  %v13723_v4 = vld [vmem:[%s17141_s8 + $0x1b0] ss:$2 sm:$0xff]  ;;  %v13724_v8 = vld [vmem:[%s17141_s8 + $0x1c0] ss:$2 sm:$0xff]  ;;  %v13804_v9 = vld [vmem:[%s17141_s8 + $0x1d1] ss:$2 sm:$0xff] }
  0x2f   : > { %v13882_v5 = vld [vmem:[%s17141_s8 + $0x1b2] ss:$2 sm:$0xff]  ;;  %v13881_v6 = vld [vmem:[%s17141_s8 + $0x1a2] ss:$2 sm:$0xff]  ;;  %v13803_v10 = vld [vmem:[%s17141_s8 + $0x1c1] ss:$2 sm:$0xff] }
  0x30   : > { %v13725_v7 = vld [vmem:[%s17141_s8 + $0x1d0] ss:$2 sm:$0xff]  ;;  %v13962_v11 = vld [vmem:[%s17141_s8 + $0x1b3] ss:$2 sm:$0xff]  ;;  %v13961_v12 = vld [vmem:[%s17141_s8 + $0x1a3] ss:$2 sm:$0xff] }
  0x31   : > { %v13884_v13 = vld [vmem:[%s17141_s8 + $0x1d2] ss:$2 sm:$0xff]  ;;  %v13883_v14 = vld [vmem:[%s17141_s8 + $0x1c2] ss:$2 sm:$0xff]  ;;  %v13806_v19 = vld [vmem:[%s17141_s8 + $0x1f1] ss:$2 sm:$0xff] }
  0x32   : > { %1687 = vperm.xlu1 %16851, %v13802_v3   ;;  %1055 = vperm.xlu0 %16850, %v13723_v4   ;;  %v14042_v15 = vld [vmem:[%s17141_s8 + $0x1b4] ss:$2 sm:$0xff]  ;;  %v14041_v16 = vld [vmem:[%s17141_s8 + $0x1a4] ss:$2 sm:$0xff]  ;;  %v13805_v20 = vld [vmem:[%s17141_s8 + $0x1e1] ss:$2 sm:$0xff] }
  0x33   : > { %v13727_v17 = vld [vmem:[%s17141_s8 + $0x1f0] ss:$2 sm:$0xff]  ;;  %v13726_v18 = vld [vmem:[%s17141_s8 + $0x1e0] ss:$2 sm:$0xff]  ;;  %v13964_v21 = vld [vmem:[%s17141_s8 + $0x1d3] ss:$2 sm:$0xff] }
  0x34   : > { %v13963_v22 = vld [vmem:[%s17141_s8 + $0x1c3] ss:$2 sm:$0xff]  ;;  %v13886_v25 = vld [vmem:[%s17141_s8 + $0x1f2] ss:$2 sm:$0xff]  ;;  %v13885_v26 = vld [vmem:[%s17141_s8 + $0x1e2] ss:$2 sm:$0xff] }
  0x35   : > { %v14122_v23 = vld [vmem:[%s17141_s8 + $0x1b5] ss:$2 sm:$0xff]  ;;  %v14121_v24 = vld [vmem:[%s17141_s8 + $0x1a5] ss:$2 sm:$0xff]  ;;  %v14044_v27 = vld [vmem:[%s17141_s8 + $0x1d4] ss:$2 sm:$0xff] }
  0x36   : > { %2397 = vperm.xlu1 %16851, %v13882_v5   ;;  %2392 = vperm.xlu0 %16850, %v13881_v6   ;;  %v14043_v28 = vld [vmem:[%s17141_s8 + $0x1c4] ss:$2 sm:$0xff]  ;;  %v13808_v31 = vld [vmem:[%s17141_s8 + $0x211] ss:$2 sm:$0xff]  ;;  %v13807_v32 = vld [vmem:[%s17141_s8 + $0x201] ss:$2 sm:$0xff] }
  0x37   : > { %v13729_v29 = vld [vmem:[%s17141_s8 + $0x210] ss:$2 sm:$0xff]  ;;  %v13728_v30 = vld [vmem:[%s17141_s8 + $0x200] ss:$2 sm:$0xff]  ;;  %v13966_v33 = vld [vmem:[%s17141_s8 + $0x1f3] ss:$2 sm:$0xff] }
  0x38   : > { %v13965_v34 = vld [vmem:[%s17141_s8 + $0x1e3] ss:$2 sm:$0xff]  ;;  %v13888_v39 = vld [vmem:[%s17141_s8 + $0x212] ss:$2 sm:$0xff]  ;;  %v13887_v40 = vld [vmem:[%s17141_s8 + $0x202] ss:$2 sm:$0xff] }
  0x39   : > { %v14178_v35 = vld [vmem:[%s21793_s0 + $0x4] sm:$0x7]  ;;  %v14124_v37 = vld [vmem:[%s17141_s8 + $0x1d5] ss:$2 sm:$0xff]  ;;  %v14046_v41 = vld [vmem:[%s17141_s8 + $0x1f4] ss:$2 sm:$0xff] }
  0x3a   : > { %1065 = vperm.xlu1 %16851, %v13725_v7   ;;  %1060 = vperm.xlu0 %16850, %v13724_v8   ;;  %v14123_v38 = vld [vmem:[%s17141_s8 + $0x1c5] ss:$2 sm:$0xff]  ;;  %v14045_v42 = vld [vmem:[%s17141_s8 + $0x1e4] ss:$2 sm:$0xff]  ;;  %v14126_v49 = vld [vmem:[%s17141_s8 + $0x1f5] ss:$2 sm:$0xff] }
  0x3b   : > { %16641 = vmatpush3.msk.msra.mxu1 %vm5630_vm0, %v14178_v35  ;;  %15267 = vmatpush3.msk.msra.mxu0 %vm5630_vm0, %v14178_v35  ;;  %v13731_v43 = vld [vmem:[%s17141_s8 + $0x230] ss:$2 sm:$0xff]  ;;  %v13730_v44 = vld [vmem:[%s17141_s8 + $0x220] ss:$2 sm:$0xff]  ;;  %v13810_v45 = vld [vmem:[%s17141_s8 + $0x231] ss:$2 sm:$0xff] }
  0x3c   : > { %15385 = vmatprep.subr.mxu1 %v21767_v36  ;;  %15504 = vmatprep.subr.mxu0 %v21767_v36  ;;  %v13809_v46 = vld [vmem:[%s17141_s8 + $0x221] ss:$2 sm:$0xff]  ;;  %v13890_v51 = vld [vmem:[%s17141_s8 + $0x232] ss:$2 sm:$0xff]  ;;  %v13889_v52 = vld [vmem:[%s17141_s8 + $0x222] ss:$2 sm:$0xff] }
  0x3d   : > { %v13968_v47 = vld [vmem:[%s17141_s8 + $0x213] ss:$2 sm:$0xff]  ;;  %v13967_v48 = vld [vmem:[%s17141_s8 + $0x203] ss:$2 sm:$0xff]  ;;  %v14048_v53 = vld [vmem:[%s17141_s8 + $0x214] ss:$2 sm:$0xff] }
  0x3e   : > { %1697 = vperm.xlu1 %16851, %v13804_v9   ;;  %1692 = vperm.xlu0 %16850, %v13803_v10   ;;  %v14125_v50 = vld [vmem:[%s17141_s8 + $0x1e5] ss:$2 sm:$0xff]  ;;  %v14047_v54 = vld [vmem:[%s17141_s8 + $0x204] ss:$2 sm:$0xff]  ;;  %v14128_v61 = vld [vmem:[%s17141_s8 + $0x215] ss:$2 sm:$0xff] }
  0x3f   : > { %v13733_v55 = vld [vmem:[%s17141_s8 + $0x250] ss:$2 sm:$0xff]  ;;  %v13732_v56 = vld [vmem:[%s17141_s8 + $0x240] ss:$2 sm:$0xff]  ;;  %v13812_v57 = vld [vmem:[%s17141_s8 + $0x251] ss:$2 sm:$0xff] }
  0x40   : > { %v13811_v58 = vld [vmem:[%s17141_s8 + $0x241] ss:$2 sm:$0xff]  ;;  %v13892_v63 = vld [vmem:[%s17141_s8 + $0x252] ss:$2 sm:$0xff]  ;;  %v13891_v0 = vld [vmem:[%s17141_s8 + $0x242] ss:$2 sm:$0xff] }
  0x41   : > { %v13970_v59 = vld [vmem:[%s17141_s8 + $0x233] ss:$2 sm:$0xff]  ;;  %v13969_v60 = vld [vmem:[%s17141_s8 + $0x223] ss:$2 sm:$0xff]  ;;  %v14050_v1 = vld [vmem:[%s17141_s8 + $0x234] ss:$2 sm:$0xff] }
  0x42   : > { %3107 = vperm.xlu1 %16851, %v13962_v11   ;;  %3102 = vperm.xlu0 %16850, %v13961_v12   ;;  %v14127_v62 = vld [vmem:[%s17141_s8 + $0x205] ss:$2 sm:$0xff]  ;;  %v14049_v2 = vld [vmem:[%s17141_s8 + $0x224] ss:$2 sm:$0xff]  ;;  %s21834_s12 = sld [smem:[#allocation38_spill]] }
  0x43   : > { %v13735_v3 = vld [vmem:[%s17141_s8 + $0x270] ss:$2 sm:$0xff]  ;;  %v13734_v4 = vld [vmem:[%s17141_s8 + $0x260] ss:$2 sm:$0xff]  ;;  %v13814_v7 = vld [vmem:[%s17141_s8 + $0x271] ss:$2 sm:$0xff] }
  0x44   : > { %v13813_v8 = vld [vmem:[%s17141_s8 + $0x261] ss:$2 sm:$0xff] }
  0x45   : > { %v13972_v11 = vld [vmem:[%s17141_s8 + $0x253] ss:$2 sm:$0xff]  ;;  %v13971_v12 = vld [vmem:[%s17141_s8 + $0x243] ss:$2 sm:$0xff] }
  0x46   : > { %2407 = vperm.xlu1 %16851, %v13884_v13   ;;  %2402 = vperm.xlu0 %16850, %v13883_v14   ;;  %v13974_v35 = vld [vmem:[%s17141_s8 + $0x273] ss:$2 sm:$0xff] }
  0x4a   : > { %3817 = vperm.xlu1 %16851, %v14042_v15   ;;  %3812 = vperm.xlu0 %16850, %v14041_v16   ;;  %v14130_v15 = vld [vmem:[%s17141_s8 + $0x235] ss:$2 sm:$0xff]  ;;  %v14129_v16 = vld [vmem:[%s17141_s8 + $0x225] ss:$2 sm:$0xff] }
  0x4e   : > { %1075 = vperm.xlu1 %16851, %v13727_v17   ;;  %1070 = vperm.xlu0 %16850, %v13726_v18  }
  0x52   : > { %1707 = vperm.xlu1 %16851, %v13806_v19   ;;  %1702 = vperm.xlu0 %16850, %v13805_v20   ;;  %v13894_v19 = vld [vmem:[%s17141_s8 + $0x272] ss:$2 sm:$0xff]  ;;  %v13893_v20 = vld [vmem:[%s17141_s8 + $0x262] ss:$2 sm:$0xff] }
  0x56   : > { %3117 = vperm.xlu1 %16851, %v13964_v21   ;;  %3112 = vperm.xlu0 %16850, %v13963_v22  }
  0x5a   : > { %4527 = vperm.xlu1 %16851, %v14122_v23   ;;  %4522 = vperm.xlu0 %16850, %v14121_v24   ;;  %v14052_v23 = vld [vmem:[%s17141_s8 + $0x254] ss:$2 sm:$0xff]  ;;  %v14051_v24 = vld [vmem:[%s17141_s8 + $0x244] ss:$2 sm:$0xff] }
  0x5e   : > { %2417 = vperm.xlu1 %16851, %v13886_v25   ;;  %2412 = vperm.xlu0 %16850, %v13885_v26  }
  0x62   : > { %3827 = vperm.xlu1 %16851, %v14044_v27   ;;  %3822 = vperm.xlu0 %16850, %v14043_v28   ;;  %v13737_v27 = vld [vmem:[%s17141_s8 + $0x290] ss:$2 sm:$0xff]  ;;  %v13736_v28 = vld [vmem:[%s17141_s8 + $0x280] ss:$2 sm:$0xff] }
  0x66   : > { %1085 = vperm.xlu1 %16851, %v13729_v29   ;;  %1080 = vperm.xlu0 %16850, %v13728_v30  }
  0x6a   : > { %1717 = vperm.xlu1 %16851, %v13808_v31   ;;  %1712 = vperm.xlu0 %16850, %v13807_v32   ;;  %v13816_v31 = vld [vmem:[%s17141_s8 + $0x291] ss:$2 sm:$0xff]  ;;  %v13815_v32 = vld [vmem:[%s17141_s8 + $0x281] ss:$2 sm:$0xff] }
  0x6e   : > { %3127 = vperm.xlu1 %16851, %v13966_v33   ;;  %3122 = vperm.xlu0 %16850, %v13965_v34  }
  0x72   : > { %4537 = vperm.xlu1 %16851, %v14124_v37   ;;  %4532 = vperm.xlu0 %16850, %v14123_v38   ;;  %v13973_v37 = vld [vmem:[%s17141_s8 + $0x263] ss:$2 sm:$0xff]  ;;  %v17253_v38 = vld [vmem:[%s21794_s9 + $0x1] ss:$0 sm:$0xff] }
  0x76   : > { %2427 = vperm.xlu1 %16851, %v13888_v39   ;;  %2422 = vperm.xlu0 %16850, %v13887_v40   ;;  %v17258_v39 = vld [vmem:[%s21794_s9] ss:$0 sm:$0xff] }
  0x7a   : > { %3837 = vperm.xlu1 %16851, %v14046_v41   ;;  %3832 = vperm.xlu0 %16850, %v14045_v42   ;;  %v17267_v42 = vld [vmem:[%s21794_s9 + $0x2] ss:$0 sm:$0xff] }
  0x7e   : > { %1095 = vperm.xlu1 %16851, %v13731_v43   ;;  %1090 = vperm.xlu0 %16850, %v13730_v44  }
  0x82   : > { %1727 = vperm.xlu1 %16851, %v13810_v45   ;;  %1722 = vperm.xlu0 %16850, %v13809_v46   ;;  %v14132_v45 = vld [vmem:[%s17141_s8 + $0x255] ss:$2 sm:$0xff]  ;;  %v14131_v46 = vld [vmem:[%s17141_s8 + $0x245] ss:$2 sm:$0xff] }
  0x86   : > { %3137 = vperm.xlu1 %16851, %v13968_v47   ;;  %3132 = vperm.xlu0 %16850, %v13967_v48  }
  0x8a   : > { %4547 = vperm.xlu1 %16851, %v14126_v49   ;;  %4542 = vperm.xlu0 %16850, %v14125_v50   ;;  %v17278_v49 = vld [vmem:[%s21794_s9 + $0x3] ss:$0 sm:$0xff] }
  0x8e   : > { %2437 = vperm.xlu1 %16851, %v13890_v51   ;;  %2432 = vperm.xlu0 %16850, %v13889_v52  }
  0x92   : > { %3847 = vperm.xlu1 %16851, %v14048_v53   ;;  %3842 = vperm.xlu0 %16850, %v14047_v54   ;;  %v17289_v54 = vld [vmem:[%s21794_s9 + $0x4] ss:$0 sm:$0xff] }
  0x96   : > { %1105 = vperm.xlu1 %16851, %v13733_v55   ;;  %1100 = vperm.xlu0 %16850, %v13732_v56  }
  0x9a   : > { %1737 = vperm.xlu1 %16851, %v13812_v57   ;;  %1732 = vperm.xlu0 %16850, %v13811_v58   ;;  %v13896_v57 = vld [vmem:[%s17141_s8 + $0x292] ss:$2 sm:$0xff]  ;;  %v13895_v58 = vld [vmem:[%s17141_s8 + $0x282] ss:$2 sm:$0xff] }
  0x9e   : > { %3147 = vperm.xlu1 %16851, %v13970_v59   ;;  %3142 = vperm.xlu0 %16850, %v13969_v60  }
  0xa2   : > { %4557 = vperm.xlu1 %16851, %v14128_v61   ;;  %4552 = vperm.xlu0 %16850, %v14127_v62  }
  0xa6   : > { %2447 = vperm.xlu1 %16851, %v13892_v63   ;;  %2442 = vperm.xlu0 %16850, %v13891_v0  }
  0xaa   : > { %3857 = vperm.xlu1 %16851, %v14050_v1   ;;  %3852 = vperm.xlu0 %16850, %v14049_v2  }
  0xad   : > { %v1683_v5 = vpop.permute.xlu1 %1682  ;;  %v1051_v6 = vpop.permute.xlu0 %1050 }
  0xae   : > { %1115 = vperm.xlu1 %16851, %v13735_v3   ;;  %1110 = vperm.xlu0 %16850, %v13734_v4   ;;  %v1972_v47 = vmul.f32 %v17253_v38, %v1683_v5  ;;  %v1340_v48 = vmul.f32 %v17258_v39, %v1051_v6  ;;  %v17304_v4 = vld [vmem:[%s21794_s9 + $0x5] ss:$0 sm:$0xff]  ;;  %v14054_v5 = vld [vmem:[%s17141_s8 + $0x274] ss:$2 sm:$0xff]  ;;  %v14053_v6 = vld [vmem:[%s17141_s8 + $0x264] ss:$2 sm:$0xff] }
  0xb0   : > { %v2050_v59 = vadd.f32 %v1972_v47, %v1340_v48  ;;  %v13975_v48 = vld [vmem:[%s17141_s8 + $0x283] ss:$2 sm:$0xff] }
  0xb1   : > { %v1688_v9 = vpop.permute.xlu1 %1687  ;;  %v1056_v10 = vpop.permute.xlu0 %1055 }
  0xb2   : > { %1747 = vperm.xlu1 %16851, %v13814_v7   ;;  %1742 = vperm.xlu0 %16850, %v13813_v8   ;;  %v1973_v43 = vmul.f32 %v17253_v38, %v1688_v9  ;;  %v1341_v44 = vmul.f32 %v17258_v39, %v1056_v10 }
  0xb4   : > { %v2051_v55 = vadd.f32 %v1973_v43, %v1341_v44 }
  0xb5   : > { %v2398_v13 = vpop.permute.xlu1 %2397  ;;  %v2393_v14 = vpop.permute.xlu0 %2392 }
  0xb6   : > { %3157 = vperm.xlu1 %16851, %v13972_v11   ;;  %3152 = vperm.xlu0 %16850, %v13971_v12   ;;  %v2683_v50 = vmul.f32 %v17267_v42, %v2398_v13  ;;  %v2682_v53 = vmul.f32 %v17267_v42, %v2393_v14  ;;  %v17313_v14 = vld [vmem:[%s21795_s6] ss:$0 sm:$0xff]  ;;  %s21827_s6 = sld [smem:[#allocation32_spill]] }
  0xb8   : > { %v2761_v61 = vadd.f32 %v2683_v50, %v2051_v55  ;;  %v2760_v1 = vadd.f32 %v2682_v53, %v2050_v59 }
  0xb9   : > { %v17228_v17 = vpop.permute.xlu1 %1065  ;;  %v17230_v18 = vpop.permute.xlu0 %1060 }
  0xba   : > { %4567 = vperm.xlu1 %16851, %v14130_v15   ;;  %4562 = vperm.xlu0 %16850, %v14129_v16   ;;  %v13739_v15 = vld [vmem:[%s17141_s8 + $0x2b0] ss:$2 sm:$0xff]  ;;  %v1343_v59 = vmul.f32 %v17258_v39, %v17228_v17 }
  0xbd   : > { %v17234_v21 = vpop.permute.xlu1 %1697  ;;  %v17236_v22 = vpop.permute.xlu0 %1692 }
  0xbe   : > { %2457 = vperm.xlu1 %16851, %v13894_v19   ;;  %2452 = vperm.xlu0 %16850, %v13893_v20   ;;  %v13738_v20 = vld [vmem:[%s17141_s8 + $0x2a0] ss:$2 sm:$0xff]  ;;  %v1975_v55 = vmul.f32 %v17253_v38, %v17234_v21  ;;  %v1342_v21 = vmul.f32 %v17258_v39, %v17230_v18 }
  0xc1   : > { %v3108_v25 = vpop.permute.xlu1 %3107  ;;  %v3103_v26 = vpop.permute.xlu0 %3102 }
  0xc2   : > { %3867 = vperm.xlu1 %16851, %v14052_v23   ;;  %3862 = vperm.xlu0 %16850, %v14051_v24   ;;  %v3393_v56 = vmul.f32 %v17278_v49, %v3108_v25  ;;  %v3392_v60 = vmul.f32 %v17278_v49, %v3103_v26 }
  0xc4   : > { %v3471_v3 = vadd.f32 %v3393_v56, %v2761_v61  ;;  %v3470_v7 = vadd.f32 %v3392_v60, %v2760_v1  ;;  %v14134_v56 = vld [vmem:[%s17141_s8 + $0x275] ss:$2 sm:$0xff] }
  0xc5   : > { %v17242_v29 = vpop.permute.xlu1 %2407  ;;  %v17244_v30 = vpop.permute.xlu0 %2402 }
  0xc6   : > { %1125 = vperm.xlu1 %16851, %v13737_v27   ;;  %1120 = vperm.xlu0 %16850, %v13736_v28   ;;  %v17326_v27 = vld [vmem:[%s21797_s27] ss:$0 sm:$0xff]  ;;  %v13818_v28 = vld [vmem:[%s17141_s8 + $0x2b1] ss:$2 sm:$0xff]  ;;  %v2685_v60 = vmul.f32 %v17267_v42, %v17242_v29  ;;  %v2684_v1 = vmul.f32 %v17267_v42, %v17244_v30 }
  0xc9   : > { %v3818_v33 = vpop.permute.xlu1 %3817  ;;  %v3813_v34 = vpop.permute.xlu0 %3812 }
  0xca   : > { %1757 = vperm.xlu1 %16851, %v13816_v31   ;;  %1752 = vperm.xlu0 %16850, %v13815_v32   ;;  %v4103_v62 = vmul.f32 %v17289_v54, %v3818_v33  ;;  %v4102_v2 = vmul.f32 %v17289_v54, %v3813_v34  ;;  %v13817_v33 = vld [vmem:[%s17141_s8 + $0x2a1] ss:$2 sm:$0xff]  ;;  %v17333_v34 = vld [vmem:[%s21798_s28] ss:$0 sm:$0xff] }
  0xcc   : > { %v4181_v8 = vadd.f32 %v4103_v62, %v3471_v3  ;;  %v4180_v11 = vadd.f32 %v4102_v2, %v3470_v7  ;;  %v2053_v2 = vadd.f32 %v1975_v55, %v1343_v59 }
  0xcd   : > { %v17260_v40 = vpop.permute.xlu1 %1075  ;;  %v17262_v41 = vpop.permute.xlu0 %1070 }
  0xce   : > { %3167 = vperm.xlu1 %16851, %v13974_v35   ;;  %3162 = vperm.xlu0 %16850, %v13973_v37  }
  0xd1   : > { %v17281_v51 = vpop.permute.xlu1 %1707  ;;  %v17283_v52 = vpop.permute.xlu0 %1702 }
  0xd2   : > { %4577 = vperm.xlu1 %16851, %v14132_v45   ;;  %4572 = vperm.xlu0 %16850, %v14131_v46   ;;  %v13976_v45 = vld [vmem:[%s17141_s8 + $0x293] ss:$2 sm:$0xff] }
  0xd5   : > { %v17296_v63 = vpop.permute.xlu1 %3117  ;;  %v17298_v0 = vpop.permute.xlu0 %3112 }
  0xd6   : > { %2467 = vperm.xlu1 %16851, %v13896_v57   ;;  %2462 = vperm.xlu0 %16850, %v13895_v58   ;;  %v1974_v57 = vmul.f32 %v17253_v38, %v17236_v22  ;;  %v14133_v58 = vld [vmem:[%s17141_s8 + $0x265] ss:$2 sm:$0xff]  ;;  %v13898_v22 = vld [vmem:[%s17141_s8 + $0x2b2] ss:$2 sm:$0xff]  ;;  %v3395_v17 = vmul.f32 %v17278_v49, %v17296_v63  ;;  %v3394_v29 = vmul.f32 %v17278_v49, %v17298_v0 }
  0xd7   : > { %v14056_v63 = vld [vmem:[%s17141_s8 + $0x294] ss:$2 sm:$0xff] }
  0xd8   : > { %v2052_v3 = vadd.f32 %v1974_v57, %v1342_v21  ;;  %v13977_v21 = vld [vmem:[%s17141_s8 + $0x2a3] ss:$2 sm:$0xff] }
  0xd9   : > { %v4528_v9 = vpop.permute.xlu1 %4527  ;;  %v4523_v10 = vpop.permute.xlu0 %4522 }
  0xda   : > { %v4813_v12 = vmul.f32 %v17304_v4, %v4528_v9  ;;  %v4812_v13 = vmul.f32 %v17304_v4, %v4523_v10  ;;  %3877 = vperm.xlu1 %16851, %v14054_v5   ;;  %3872 = vperm.xlu0 %16850, %v14053_v6   ;;  %v13897_v5 = vld [vmem:[%s17141_s8 + $0x2a2] ss:$2 sm:$0xff]  ;;  %v2763_v6 = vadd.f32 %v2685_v60, %v2053_v2 }
  0xdc   : > { %v4891_v16 = vadd.f32 %v4813_v12, %v4181_v8  ;;  %v4890_v19 = vadd.f32 %v4812_v13, %v4180_v11  ;;  %v2762_v8 = vadd.f32 %v2684_v1, %v2052_v3  ;;  %v3473_v0 = vadd.f32 %v3395_v17, %v2763_v6  ;;  %v14055_v12 = vld [vmem:[%s17141_s8 + $0x284] ss:$2 sm:$0xff]  ;;  %v14136_v3 = vld [vmem:[%s17141_s8 + $0x295] ss:$2 sm:$0xff] }
  0xdd   : > { %v17317_v23 = vpop.permute.xlu1 %2417  ;;  %v17319_v24 = vpop.permute.xlu0 %2412  ;;  %v1976_v17 = vmul.f32 %v17253_v38, %v17283_v52  ;;  %v13900_v52 = vld [vmem:[%s17141_s8 + $0x2d2] ss:$2 sm:$0xff] }
  0xde   : > { %v4976_v25 = vadd.f32 %v17313_v14, %v4891_v16  ;;  %v4975_v26 = vadd.f32 %v17313_v14, %v4890_v19  ;;  %1135 = vperm.xlu1 %16851, %v13739_v15   ;;  %1130 = vperm.xlu0 %16850, %v13738_v20   ;;  %v3472_v11 = vadd.f32 %v3394_v29, %v2762_v8  ;;  %v14135_v29 = vld [vmem:[%s17141_s8 + $0x285] ss:$2 sm:$0xff] }
  0xdf   : > { %v2687_v6 = vmul.f32 %v17267_v42, %v17317_v23 }
  0xe0   : > { %v5054_v31 = vmax.f32 %v4976_v25, 0.0  ;;  %v5053_v32 = vmax.f32 %v4975_v26, 0.0  ;;  %v13741_v26 = vld [vmem:[%s17141_s8 + $0x2d0] ss:$2 sm:$0xff] }
  0xe1   : > { %v3828_v35 = vpop.permute.xlu1 %3827  ;;  %v3823_v37 = vpop.permute.xlu0 %3822 }
  0xe2   : > { %v5139_v43 = vmul.f32 %v17326_v27, %v5054_v31  ;;  %v5138_v44 = vmul.f32 %v17326_v27, %v5053_v32  ;;  %1767 = vperm.xlu1 %16851, %v13818_v28   ;;  %1762 = vperm.xlu0 %16850, %v13817_v33   ;;  %v4105_v9 = vmul.f32 %v17289_v54, %v3828_v35  ;;  %v13740_v32 = vld [vmem:[%s17141_s8 + $0x2c0] ss:$2 sm:$0xff] }
  0xe3   : > { %v4104_v10 = vmul.f32 %v17289_v54, %v3823_v37 }
  0xe4   : > { %v5224_v46 = vadd.f32 %v17333_v34, %v5139_v43  ;;  %v5223_v47 = vadd.f32 %v17333_v34, %v5138_v44  ;;  %v4183_v16 = vadd.f32 %v4105_v9, %v3473_v0  ;;  %v13820_v44 = vld [vmem:[%s17141_s8 + $0x2d1] ss:$2 sm:$0xff]  ;;  %v2686_v9 = vmul.f32 %v17267_v42, %v17319_v24  ;;  %v13899_v0 = vld [vmem:[%s17141_s8 + $0x2c2] ss:$2 sm:$0xff] }
  0xe5   : > { %v17341_v50 = vpop.permute.xlu1 %1085  ;;  %v17343_v53 = vpop.permute.xlu0 %1080  ;;  %v4182_v19 = vadd.f32 %v4104_v10, %v3472_v11 }
  0xe6   : > { %5303 = vst.msk [vmem:[#allocation2 + $0xd8] sm:$0xff] %vm5275_vm2, %v5224_v46  ;;  %5302 = vst.msk [vmem:[#allocation2 + $0xd0] sm:$0xff] %vm5275_vm2, %v5223_v47  ;;  %3177 = vperm.xlu1 %16851, %v13976_v45   ;;  %3172 = vperm.xlu0 %16850, %v13975_v48   ;;  %v13819_v47 = vld [vmem:[%s17141_s8 + $0x2c1] ss:$2 sm:$0xff] }
  0xe9   : > { %v17357_v61 = vpop.permute.xlu1 %1717  ;;  %v17359_v62 = vpop.permute.xlu0 %1712 }
  0xea   : > { %4587 = vperm.xlu1 %16851, %v14134_v56   ;;  %4582 = vperm.xlu0 %16850, %v14133_v58   ;;  %v13978_v58 = vld [vmem:[%s17141_s8 + $0x2b3] ss:$2 sm:$0xff] }
  0xed   : > { %v17371_v7 = vpop.permute.xlu1 %3127  ;;  %v17373_v18 = vpop.permute.xlu0 %3122  ;;  %v5460_v30 = vld [vmem:[#allocation2 + $0xd1] ss:$2 sm:$0xff] }
  0xee   : > { %2477 = vperm.xlu1 %16851, %v13898_v22   ;;  %15308 = vmatmul.mubr.msk.f32.vlgmr.msra.gmra.mrb[0].mxu1 %vm5275_vm2, %v5460_v30  ;;  %v1977_v22 = vmul.f32 %v17253_v38, %v17281_v51  ;;  %v1344_v51 = vmul.f32 %v17258_v39, %v17262_v41  ;;  %v3396_v23 = vmul.f32 %v17278_v49, %v17373_v18 }
  0xef   : > { %2472 = vperm.xlu0 %16850, %v13897_v5   ;;  %15310 = vmatprep.mubr.msk.f32.mxu1 %vm16954_vm1, %v21767_v36  ;;  %v1345_v5 = vmul.f32 %v17258_v39, %v17260_v40  ;;  %v3397_v40 = vmul.f32 %v17278_v49, %v17371_v7  ;;  %v14058_v7 = vld [vmem:[%s17141_s8 + $0x2b4] ss:$2 sm:$0xff] }
  0xf1   : > { %v4538_v13 = vpop.permute.xlu1 %4537  ;;  %v4533_v15 = vpop.permute.xlu0 %4532  ;;  %v2055_v10 = vadd.f32 %v1977_v22, %v1345_v5 }
  0xf2   : > { %v4815_v20 = vmul.f32 %v17304_v4, %v4538_v13  ;;  %v4814_v25 = vmul.f32 %v17304_v4, %v4533_v15  ;;  %3887 = vperm.xlu1 %16851, %v14056_v63   ;;  %v2054_v63 = vadd.f32 %v1976_v17, %v1344_v51  ;;  %v13979_v51 = vld [vmem:[%s17141_s8 + $0x2c3] ss:$2 sm:$0xff] }
  0xf3   : > { %3882 = vperm.xlu0 %16850, %v14055_v12   ;;  %v2765_v11 = vadd.f32 %v2687_v6, %v2055_v10 }
  0xf4   : > { %v4893_v28 = vadd.f32 %v4815_v20, %v4183_v16  ;;  %v4892_v31 = vadd.f32 %v4814_v25, %v4182_v19  ;;  %v2764_v13 = vadd.f32 %v2686_v9, %v2054_v63  ;;  %v14057_v20 = vld [vmem:[%s17141_s8 + $0x2a4] ss:$2 sm:$0xff]  ;;  %v14138_v63 = vld [vmem:[%s17141_s8 + $0x2b5] ss:$2 sm:$0xff] }
  0xf5   : > { %v17386_v33 = vpop.permute.xlu1 %2427  ;;  %v17388_v35 = vpop.permute.xlu0 %2422  ;;  %v3475_v18 = vadd.f32 %v3397_v40, %v2765_v11  ;;  %v1978_v40 = vmul.f32 %v17253_v38, %v17359_v62  ;;  %v13902_v62 = vld [vmem:[%s17141_s8 + $0x2f2] ss:$2 sm:$0xff] }
  0xf6   : > { %v4978_v37 = vadd.f32 %v17313_v14, %v4893_v28  ;;  %v4977_v43 = vadd.f32 %v17313_v14, %v4892_v31  ;;  %1145 = vperm.xlu1 %16851, %v13741_v26   ;;  %v3474_v19 = vadd.f32 %v3396_v23, %v2764_v13  ;;  %v14137_v23 = vld [vmem:[%s17141_s8 + $0x2a5] ss:$2 sm:$0xff]  ;;  %v2689_v11 = vmul.f32 %v17267_v42, %v17386_v33 }
  0xf7   : > { %1140 = vperm.xlu0 %16850, %v13740_v32  }
  0xf8   : > { %v5056_v45 = vmax.f32 %v4978_v37, 0.0  ;;  %v5055_v46 = vmax.f32 %v4977_v43, 0.0  ;;  %v13743_v43 = vld [vmem:[%s17141_s8 + $0x2f0] ss:$2 sm:$0xff] }
  0xf9   : > { %v3838_v48 = vpop.permute.xlu1 %3837  ;;  %v3833_v55 = vpop.permute.xlu0 %3832 }
  0xfa   : > { %v5141_v56 = vmul.f32 %v17326_v27, %v5056_v45  ;;  %v5140_v57 = vmul.f32 %v17326_v27, %v5055_v46  ;;  %1777 = vperm.xlu1 %16851, %v13820_v44   ;;  %v4107_v15 = vmul.f32 %v17289_v54, %v3838_v48  ;;  %v4106_v16 = vmul.f32 %v17289_v54, %v3833_v55  ;;  %v13742_v46 = vld [vmem:[%s17141_s8 + $0x2e0] ss:$2 sm:$0xff] }
  0xfb   : > { %1772 = vperm.xlu0 %16850, %v13819_v47  }
  0xfc   : > { %v5226_v59 = vadd.f32 %v17333_v34, %v5141_v56  ;;  %v5225_v60 = vadd.f32 %v17333_v34, %v5140_v57  ;;  %v4185_v28 = vadd.f32 %v4107_v15, %v3475_v18  ;;  %v4184_v31 = vadd.f32 %v4106_v16, %v3474_v19  ;;  %v13822_v57 = vld [vmem:[%s17141_s8 + $0x2f1] ss:$2 sm:$0xff]  ;;  %v13901_v18 = vld [vmem:[%s17141_s8 + $0x2e2] ss:$2 sm:$0xff] }
  0xfd   : > { %v17400_v1 = vpop.permute.xlu1 %1095  ;;  %v17402_v2 = vpop.permute.xlu0 %1090  ;;  %v2688_v15 = vmul.f32 %v17267_v42, %v17388_v35 }
  0xfe   : > { %5305 = vst.msk [vmem:[#allocation2 + $0xe8] sm:$0xff] %vm5275_vm2, %v5226_v59  ;;  %5304 = vst.msk [vmem:[#allocation2 + $0xe0] sm:$0xff] %vm5275_vm2, %v5225_v60  ;;  %3187 = vperm.xlu1 %16851, %v13978_v58   ;;  %v13821_v60 = vld [vmem:[%s17141_s8 + $0x2e1] ss:$2 sm:$0xff] }
  0xff   : > { %3182 = vperm.xlu0 %16850, %v13977_v21  }
 0x101   : > { %v17416_v30 = vpop.permute.xlu1 %1727  ;;  %v17418_v8 = vpop.permute.xlu0 %1722 }
 0x102   : > { %4597 = vperm.xlu1 %16851, %v14136_v3  }
 0x103   : > { %4592 = vperm.xlu0 %16850, %v14135_v29   ;;  %v13980_v29 = vld [vmem:[%s17141_s8 + $0x2d3] ss:$2 sm:$0xff] }
 0x105   : > { %v17430_v12 = vpop.permute.xlu1 %3137  ;;  %v17432_v41 = vpop.permute.xlu0 %3132  ;;  %v5462_v24 = vld [vmem:[#allocation2 + $0xe1] ss:$2 sm:$0xff] }
 0x106   : > { %2487 = vperm.xlu1 %16851, %v13900_v52   ;;  %15311 = vmatmul.mubr.msk.f32.gmra.mrb[2].mxu1 %vm5275_vm2, %v5462_v24  ;;  %v1979_v52 = vmul.f32 %v17253_v38, %v17357_v61  ;;  %v1346_v61 = vmul.f32 %v17258_v39, %v17343_v53  ;;  %v3398_v33 = vmul.f32 %v17278_v49, %v17432_v41 }
 0x107   : > { %2482 = vperm.xlu0 %16850, %v13899_v0   ;;  %15313 = vmatprep.mubr.msk.f32.mxu1 %vm16954_vm1, %v21767_v36  ;;  %v1347_v0 = vmul.f32 %v17258_v39, %v17341_v50  ;;  %v3399_v50 = vmul.f32 %v17278_v49, %v17430_v12  ;;  %v14060_v12 = vld [vmem:[%s17141_s8 + $0x2d4] ss:$2 sm:$0xff] }
 0x109   : > { %v4548_v25 = vpop.permute.xlu1 %4547  ;;  %v4543_v26 = vpop.permute.xlu0 %4542  ;;  %v2057_v16 = vadd.f32 %v1979_v52, %v1347_v0 }
 0x10a   : > { %v4817_v32 = vmul.f32 %v17304_v4, %v4548_v25  ;;  %v4816_v37 = vmul.f32 %v17304_v4, %v4543_v26  ;;  %3897 = vperm.xlu1 %16851, %v14058_v7   ;;  %v2056_v7 = vadd.f32 %v1978_v40, %v1346_v61  ;;  %v13981_v61 = vld [vmem:[%s17141_s8 + $0x2e3] ss:$2 sm:$0xff] }
 0x10b   : > { %3892 = vperm.xlu0 %16850, %v14057_v20   ;;  %v2767_v19 = vadd.f32 %v2689_v11, %v2057_v16 }
 0x10c   : > { %v4895_v44 = vadd.f32 %v4817_v32, %v4185_v28  ;;  %v4894_v45 = vadd.f32 %v4816_v37, %v4184_v31  ;;  %v2766_v25 = vadd.f32 %v2688_v15, %v2056_v7  ;;  %v14059_v32 = vld [vmem:[%s17141_s8 + $0x2c4] ss:$2 sm:$0xff]  ;;  %v14140_v7 = vld [vmem:[%s17141_s8 + $0x2d5] ss:$2 sm:$0xff] }
 0x10d   : > { %v17445_v47 = vpop.permute.xlu1 %2437  ;;  %v17447_v48 = vpop.permute.xlu0 %2432  ;;  %v3477_v41 = vadd.f32 %v3399_v50, %v2767_v19  ;;  %v1980_v50 = vmul.f32 %v17253_v38, %v17418_v8  ;;  %v13904_v8 = vld [vmem:[%s17141_s8 + $0x312] ss:$2 sm:$0xff] }
 0x10e   : > { %v4980_v55 = vadd.f32 %v17313_v14, %v4895_v44  ;;  %v4979_v56 = vadd.f32 %v17313_v14, %v4894_v45  ;;  %1155 = vperm.xlu1 %16851, %v13743_v43   ;;  %v3476_v31 = vadd.f32 %v3398_v33, %v2766_v25  ;;  %v14139_v33 = vld [vmem:[%s17141_s8 + $0x2c5] ss:$2 sm:$0xff]  ;;  %v2691_v19 = vmul.f32 %v17267_v42, %v17445_v47 }
 0x10f   : > { %1150 = vperm.xlu0 %16850, %v13742_v46  }
 0x110   : > { %v5058_v58 = vmax.f32 %v4980_v55, 0.0  ;;  %v5057_v59 = vmax.f32 %v4979_v56, 0.0  ;;  %v13745_v56 = vld [vmem:[%s17141_s8 + $0x310] ss:$2 sm:$0xff] }
 0x111   : > { %v3848_v21 = vpop.permute.xlu1 %3847  ;;  %v3843_v22 = vpop.permute.xlu0 %3842 }
 0x112   : > { %v5143_v3 = vmul.f32 %v17326_v27, %v5058_v58  ;;  %v5142_v17 = vmul.f32 %v17326_v27, %v5057_v59  ;;  %1787 = vperm.xlu1 %16851, %v13822_v57   ;;  %v4109_v26 = vmul.f32 %v17289_v54, %v3848_v21  ;;  %v4108_v28 = vmul.f32 %v17289_v54, %v3843_v22  ;;  %v13744_v59 = vld [vmem:[%s17141_s8 + $0x300] ss:$2 sm:$0xff] }
 0x113   : > { %1782 = vperm.xlu0 %16850, %v13821_v60  }
 0x114   : > { %v5228_v5 = vadd.f32 %v17333_v34, %v5143_v3  ;;  %v5227_v6 = vadd.f32 %v17333_v34, %v5142_v17  ;;  %v4187_v44 = vadd.f32 %v4109_v26, %v3477_v41  ;;  %v4186_v45 = vadd.f32 %v4108_v28, %v3476_v31  ;;  %v13824_v17 = vld [vmem:[%s17141_s8 + $0x311] ss:$2 sm:$0xff]  ;;  %v13903_v41 = vld [vmem:[%s17141_s8 + $0x302] ss:$2 sm:$0xff] }
 0x115   : > { %v17459_v9 = vpop.permute.xlu1 %1105  ;;  %v17461_v10 = vpop.permute.xlu0 %1100  ;;  %v2690_v26 = vmul.f32 %v17267_v42, %v17447_v48 }
 0x116   : > { %5307 = vst.msk [vmem:[#allocation2 + $0xf8] sm:$0xff] %vm5275_vm2, %v5228_v5  ;;  %5306 = vst.msk [vmem:[#allocation2 + $0xf0] sm:$0xff] %vm5275_vm2, %v5227_v6  ;;  %3197 = vperm.xlu1 %16851, %v13980_v29   ;;  %v13823_v6 = vld [vmem:[%s17141_s8 + $0x301] ss:$2 sm:$0xff] }
 0x117   : > { %3192 = vperm.xlu0 %16850, %v13979_v51  }
 0x119   : > { %v17475_v24 = vpop.permute.xlu1 %1737  ;;  %v17477_v13 = vpop.permute.xlu0 %1732 }
 0x11a   : > { %4607 = vperm.xlu1 %16851, %v14138_v63  }
 0x11b   : > { %4602 = vperm.xlu0 %16850, %v14137_v23   ;;  %v13982_v23 = vld [vmem:[%s17141_s8 + $0x2f3] ss:$2 sm:$0xff] }
 0x11d   : > { %v17489_v20 = vpop.permute.xlu1 %3147  ;;  %v17491_v53 = vpop.permute.xlu0 %3142  ;;  %v5464_v35 = vld [vmem:[#allocation2 + $0xf1] ss:$2 sm:$0xff] }
 0x11e   : > { %2497 = vperm.xlu1 %16851, %v13902_v62   ;;  %15314 = vmatmul.mubr.msk.f32.gmra.mrb[4].mxu1 %vm5275_vm2, %v5464_v35  ;;  %v1981_v62 = vmul.f32 %v17253_v38, %v17416_v30  ;;  %v1348_v30 = vmul.f32 %v17258_v39, %v17402_v2  ;;  %v3400_v47 = vmul.f32 %v17278_v49, %v17491_v53 }
 0x11f   : > { %2492 = vperm.xlu0 %16850, %v13901_v18   ;;  %15316 = vmatprep.mubr.msk.f32.mxu1 %vm16954_vm1, %v21767_v36  ;;  %v1349_v18 = vmul.f32 %v17258_v39, %v17400_v1  ;;  %v3401_v1 = vmul.f32 %v17278_v49, %v17489_v20  ;;  %v14062_v20 = vld [vmem:[%s17141_s8 + $0x2f4] ss:$2 sm:$0xff] }
 0x121   : > { %v4558_v37 = vpop.permute.xlu1 %4557  ;;  %v4553_v43 = vpop.permute.xlu0 %4552  ;;  %v2059_v28 = vadd.f32 %v1981_v62, %v1349_v18 }
 0x122   : > { %v4819_v46 = vmul.f32 %v17304_v4, %v4558_v37  ;;  %v4818_v55 = vmul.f32 %v17304_v4, %v4553_v43  ;;  %3907 = vperm.xlu1 %16851, %v14060_v12   ;;  %v2058_v12 = vadd.f32 %v1980_v50, %v1348_v30  ;;  %v13983_v30 = vld [vmem:[%s17141_s8 + $0x303] ss:$2 sm:$0xff] }
 0x123   : > { %3902 = vperm.xlu0 %16850, %v14059_v32   ;;  %v2769_v31 = vadd.f32 %v2691_v19, %v2059_v28 }
 0x124   : > { %v4897_v57 = vadd.f32 %v4819_v46, %v4187_v44  ;;  %v4896_v58 = vadd.f32 %v4818_v55, %v4186_v45  ;;  %v2768_v37 = vadd.f32 %v2690_v26, %v2058_v12  ;;  %v14061_v46 = vld [vmem:[%s17141_s8 + $0x2e4] ss:$2 sm:$0xff]  ;;  %v14142_v12 = vld [vmem:[%s17141_s8 + $0x2f5] ss:$2 sm:$0xff] }
 0x125   : > { %v17504_v60 = vpop.permute.xlu1 %2447  ;;  %v17506_v21 = vpop.permute.xlu0 %2442  ;;  %v3479_v53 = vadd.f32 %v3401_v1, %v2769_v31  ;;  %v1982_v1 = vmul.f32 %v17253_v38, %v17477_v13  ;;  %v13906_v13 = vld [vmem:[%s17141_s8 + $0x332] ss:$2 sm:$0xff] }
 0x126   : > { %v4982_v22 = vadd.f32 %v17313_v14, %v4897_v57  ;;  %v4981_v3 = vadd.f32 %v17313_v14, %v4896_v58  ;;  %1165 = vperm.xlu1 %16851, %v13745_v56   ;;  %v3478_v45 = vadd.f32 %v3400_v47, %v2768_v37  ;;  %v14141_v47 = vld [vmem:[%s17141_s8 + $0x2e5] ss:$2 sm:$0xff]  ;;  %v2693_v31 = vmul.f32 %v17267_v42, %v17504_v60 }
 0x127   : > { %1160 = vperm.xlu0 %16850, %v13744_v59  }
 0x128   : > { %v5060_v29 = vmax.f32 %v4982_v22, 0.0  ;;  %v5059_v5 = vmax.f32 %v4981_v3, 0.0  ;;  %v13747_v3 = vld [vmem:[%s17141_s8 + $0x330] ss:$2 sm:$0xff] }
 0x129   : > { %v3858_v51 = vpop.permute.xlu1 %3857  ;;  %v3853_v52 = vpop.permute.xlu0 %3852 }
 0x12a   : > { %v5145_v63 = vmul.f32 %v17326_v27, %v5060_v29  ;;  %v5144_v40 = vmul.f32 %v17326_v27, %v5059_v5  ;;  %1797 = vperm.xlu1 %16851, %v13824_v17   ;;  %v4111_v43 = vmul.f32 %v17289_v54, %v3858_v51  ;;  %v4110_v44 = vmul.f32 %v17289_v54, %v3853_v52  ;;  %v13746_v5 = vld [vmem:[%s17141_s8 + $0x320] ss:$2 sm:$0xff] }
 0x12b   : > { %1792 = vperm.xlu0 %16850, %v13823_v6  }
 0x12c   : > { %v5230_v0 = vadd.f32 %v17333_v34, %v5145_v63  ;;  %v5229_v11 = vadd.f32 %v17333_v34, %v5144_v40  ;;  %v4189_v57 = vadd.f32 %v4111_v43, %v3479_v53  ;;  %v4188_v58 = vadd.f32 %v4110_v44, %v3478_v45  ;;  %v13826_v40 = vld [vmem:[%s17141_s8 + $0x331] ss:$2 sm:$0xff]  ;;  %v13905_v53 = vld [vmem:[%s17141_s8 + $0x322] ss:$2 sm:$0xff] }
 0x12d   : > { %v17518_v15 = vpop.permute.xlu1 %1115  ;;  %v17520_v16 = vpop.permute.xlu0 %1110  ;;  %v2692_v43 = vmul.f32 %v17267_v42, %v17506_v21 }
 0x12e   : > { %5309 = vst.msk [vmem:[#allocation2 + $0x108] sm:$0xff] %vm5275_vm2, %v5230_v0  ;;  %5308 = vst.msk [vmem:[#allocation2 + $0x100] sm:$0xff] %vm5275_vm2, %v5229_v11  ;;  %3207 = vperm.xlu1 %16851, %v13982_v23   ;;  %v13825_v11 = vld [vmem:[%s17141_s8 + $0x321] ss:$2 sm:$0xff] }
 0x12f   : > { %3202 = vperm.xlu0 %16850, %v13981_v61  }
 0x131   : > { %v17534_v35 = vpop.permute.xlu1 %1747  ;;  %v17536_v25 = vpop.permute.xlu0 %1742 }
 0x132   : > { %4617 = vperm.xlu1 %16851, %v14140_v7  }
 0x133   : > { %4612 = vperm.xlu0 %16850, %v14139_v33   ;;  %v13984_v33 = vld [vmem:[%s17141_s8 + $0x313] ss:$2 sm:$0xff] }
 0x135   : > { %v17548_v32 = vpop.permute.xlu1 %3157  ;;  %v17550_v2 = vpop.permute.xlu0 %3152  ;;  %v5466_v48 = vld [vmem:[#allocation2 + $0x101] ss:$2 sm:$0xff] }
 0x136   : > { %2507 = vperm.xlu1 %16851, %v13904_v8   ;;  %15317 = vmatmul.mubr.msk.f32.gmra.mrb[6].mxu1 %vm5275_vm2, %v5466_v48  ;;  %v1983_v8 = vmul.f32 %v17253_v38, %v17475_v24  ;;  %v1350_v24 = vmul.f32 %v17258_v39, %v17461_v10  ;;  %v3402_v60 = vmul.f32 %v17278_v49, %v17550_v2 }
 0x137   : > { %2502 = vperm.xlu0 %16850, %v13903_v41   ;;  %15319 = vmatprep.mubr.msk.f32.mxu1 %vm16954_vm1, %v21767_v36  ;;  %v1351_v41 = vmul.f32 %v17258_v39, %v17459_v9  ;;  %v3403_v9 = vmul.f32 %v17278_v49, %v17548_v32  ;;  %v14064_v32 = vld [vmem:[%s17141_s8 + $0x314] ss:$2 sm:$0xff] }
 0x139   : > { %v4568_v55 = vpop.permute.xlu1 %4567  ;;  %v4563_v56 = vpop.permute.xlu0 %4562  ;;  %v2061_v44 = vadd.f32 %v1983_v8, %v1351_v41 }
 0x13a   : > { %v4821_v59 = vmul.f32 %v17304_v4, %v4568_v55  ;;  %v4820_v22 = vmul.f32 %v17304_v4, %v4563_v56  ;;  %3917 = vperm.xlu1 %16851, %v14062_v20   ;;  %v2060_v20 = vadd.f32 %v1982_v1, %v1350_v24  ;;  %v13985_v24 = vld [vmem:[%s17141_s8 + $0x323] ss:$2 sm:$0xff] }
 0x13b   : > { %3912 = vperm.xlu0 %16850, %v14061_v46   ;;  %v2771_v45 = vadd.f32 %v2693_v31, %v2061_v44 }
 0x13c   : > { %v4899_v17 = vadd.f32 %v4821_v59, %v4189_v57  ;;  %v4898_v29 = vadd.f32 %v4820_v22, %v4188_v58  ;;  %v2770_v55 = vadd.f32 %v2692_v43, %v2060_v20  ;;  %v14063_v59 = vld [vmem:[%s17141_s8 + $0x304] ss:$2 sm:$0xff]  ;;  %v1985_v20 = vmul.f32 %v17253_v38, %v17534_v35 }
 0x13d   : > { %v17563_v6 = vpop.permute.xlu1 %2457  ;;  %v17565_v51 = vpop.permute.xlu0 %2452  ;;  %v3481_v2 = vadd.f32 %v3403_v9, %v2771_v45  ;;  %v14143_v9 = vld [vmem:[%s17141_s8 + $0x305] ss:$2 sm:$0xff]  ;;  %v1353_v45 = vmul.f32 %v17258_v39, %v17518_v15  ;;  %v762_v15 = vld [vmem:[%s17141_s8] ss:$2 sm:$0xff] }
 0x13e   : > { %v4984_v52 = vadd.f32 %v17313_v14, %v4899_v17  ;;  %v4983_v63 = vadd.f32 %v17313_v14, %v4898_v29  ;;  %1175 = vperm.xlu1 %16851, %v13747_v3   ;;  %v3480_v58 = vadd.f32 %v3402_v60, %v2770_v55  ;;  %v1984_v60 = vmul.f32 %v17253_v38, %v17536_v25 }
 0x13f   : > { %1170 = vperm.xlu0 %16850, %v13746_v5   ;;  %v2694_v35 = vmul.f32 %v17267_v42, %v17565_v51  ;;  %v2063_v25 = vadd.f32 %v1985_v20, %v1353_v45  ;;  %v13750_v45 = vld [vmem:[%s17141_s8 + $0x360] ss:$2 sm:$0xff] }
 0x140   : > { %v5062_v23 = vmax.f32 %v4984_v52, 0.0  ;;  %v5061_v0 = vmax.f32 %v4983_v63, 0.0  ;;  %v13749_v63 = vld [vmem:[%s17141_s8 + $0x350] ss:$2 sm:$0xff] }
 0x141   : > { %v3868_v61 = vpop.permute.xlu1 %3867  ;;  %v3863_v62 = vpop.permute.xlu0 %3862 }
 0x142   : > { %v5147_v7 = vmul.f32 %v17326_v27, %v5062_v23  ;;  %v5146_v50 = vmul.f32 %v17326_v27, %v5061_v0  ;;  %1807 = vperm.xlu1 %16851, %v13826_v40   ;;  %v4113_v56 = vmul.f32 %v17289_v54, %v3868_v61  ;;  %v4112_v57 = vmul.f32 %v17289_v54, %v3863_v62  ;;  %v13748_v0 = vld [vmem:[%s17141_s8 + $0x340] ss:$2 sm:$0xff] }
 0x143   : > { %1802 = vperm.xlu0 %16850, %v13825_v11  }
 0x144   : > { %v5232_v18 = vadd.f32 %v17333_v34, %v5147_v7  ;;  %v5231_v19 = vadd.f32 %v17333_v34, %v5146_v50  ;;  %v4191_v17 = vadd.f32 %v4113_v56, %v3481_v2  ;;  %v4190_v29 = vadd.f32 %v4112_v57, %v3480_v58  ;;  %v13828_v50 = vld [vmem:[%s17141_s8 + $0x351] ss:$2 sm:$0xff]  ;;  %v13697_v57 = vld [vmem:[%s17141_s8 + $0x10] ss:$2 sm:$0xff] }
 0x145   : > { %v17577_v26 = vpop.permute.xlu1 %1125  ;;  %v17579_v28 = vpop.permute.xlu0 %1120  ;;  %v1352_v56 = vmul.f32 %v17258_v39, %v17520_v16 }
 0x146   : > { %5311 = vst.msk [vmem:[#allocation2 + $0x118] sm:$0xff] %vm5275_vm2, %v5232_v18  ;;  %5310 = vst.msk [vmem:[#allocation2 + $0x110] sm:$0xff] %vm5275_vm2, %v5231_v19  ;;  %3217 = vperm.xlu1 %16851, %v13984_v33   ;;  %v13827_v19 = vld [vmem:[%s17141_s8 + $0x341] ss:$2 sm:$0xff] }
 0x147   : > { %3212 = vperm.xlu0 %16850, %v13983_v30   ;;  %v2062_v2 = vadd.f32 %v1984_v60, %v1352_v56 }
 0x149   : > { %v17593_v48 = vpop.permute.xlu1 %1757  ;;  %v17595_v37 = vpop.permute.xlu0 %1752 }
 0x14a   : > { %4627 = vperm.xlu1 %16851, %v14142_v12  }
 0x14b   : > { %4622 = vperm.xlu0 %16850, %v14141_v47   ;;  %v13986_v47 = vld [vmem:[%s17141_s8 + $0x333] ss:$2 sm:$0xff] }
 0x14d   : > { %v17607_v46 = vpop.permute.xlu1 %3167  ;;  %v17609_v10 = vpop.permute.xlu0 %3162  ;;  %v5468_v21 = vld [vmem:[#allocation2 + $0x111] ss:$2 sm:$0xff] }
 0x14e   : > { %2517 = vperm.xlu1 %16851, %v13906_v13   ;;  %15320 = vmatmul.mubr.msk.f32.gmra.mrb[8].mxu1 %vm5275_vm2, %v5468_v21  ;;  %v14144_v13 = vld [vmem:[%s17141_s8 + $0x315] ss:$2 sm:$0xff]  ;;  %v2695_v21 = vmul.f32 %v17267_v42, %v17563_v6  ;;  %v3404_v6 = vmul.f32 %v17278_v49, %v17609_v10 }
 0x14f   : > { %2512 = vperm.xlu0 %16850, %v13905_v53   ;;  %15322 = vmatprep.mubr.msk.f32.mxu1 %vm16954_vm1, %v21767_v36 }
 0x150   : > { %v2773_v39 = vadd.f32 %v2695_v21, %v2063_v25  ;;  %v1987_v25 = vmul.f32 %v17253_v38, %v17593_v48 }
 0x151   : > { %v4578_v22 = vpop.permute.xlu1 %4577  ;;  %v4573_v3 = vpop.permute.xlu0 %4572 }
 0x152   : > { %v4823_v5 = vmul.f32 %v17304_v4, %v4578_v22  ;;  %v4822_v52 = vmul.f32 %v17304_v4, %v4573_v3  ;;  %3927 = vperm.xlu1 %16851, %v14064_v32   ;;  %v3405_v32 = vmul.f32 %v17278_v49, %v17607_v46  ;;  %v2772_v22 = vadd.f32 %v2694_v35, %v2062_v2  ;;  %v13776_v3 = vld [vmem:[%s17141_s8 + $0x11] ss:$2 sm:$0xff] }
 0x153   : > { %3922 = vperm.xlu0 %16850, %v14063_v59  }
 0x154   : > { %v4901_v40 = vadd.f32 %v4823_v5, %v4191_v17  ;;  %v4900_v23 = vadd.f32 %v4822_v52, %v4190_v29  ;;  %v3483_v10 = vadd.f32 %v3405_v32, %v2773_v39  ;;  %v13775_v17 = vld [vmem:[%s17141_s8 + $0x1] ss:$2 sm:$0xff]  ;;  %v3482_v29 = vadd.f32 %v3404_v6, %v2772_v22  ;;  %v17712_v6 = vld [vmem:[%s21794_s9] ss:$0 sm:$0xff] }
 0x155   : > { %v17622_v11 = vpop.permute.xlu1 %2467  ;;  %v17624_v61 = vpop.permute.xlu0 %2462  ;;  %v13829_v32 = vld [vmem:[%s17141_s8 + $0x361] ss:$2 sm:$0xff]  ;;  %v1354_v48 = vmul.f32 %v17712_v6, %v17579_v28  ;;  %v13856_v22 = vld [vmem:[%s17141_s8 + $0x12] ss:$2 sm:$0xff] }
 0x156   : > { %v4986_v62 = vadd.f32 %v17313_v14, %v4901_v40  ;;  %v4985_v7 = vadd.f32 %v17313_v14, %v4900_v23  ;;  %1185 = vperm.xlu1 %16851, %v13749_v63   ;;  %v2697_v39 = vmul.f32 %v17267_v42, %v17622_v11  ;;  %v13855_v11 = vld [vmem:[%s17141_s8 + $0x2] ss:$2 sm:$0xff]  ;;  %v17736_v28 = vld [vmem:[%s21794_s9 + $0x3] ss:$0 sm:$0xff] }
 0x157   : > { %1180 = vperm.xlu0 %16850, %v13748_v0  }
 0x158   : > { %v5064_v33 = vmax.f32 %v4986_v62, 0.0  ;;  %v5063_v18 = vmax.f32 %v4985_v7, 0.0  ;;  %v13908_v62 = vld [vmem:[%s17141_s8 + $0x352] ss:$2 sm:$0xff] }
 0x159   : > { %v3878_v30 = vpop.permute.xlu1 %3877  ;;  %v3873_v8 = vpop.permute.xlu0 %3872 }
 0x15a   : > { %v5149_v12 = vmul.f32 %v17326_v27, %v5064_v33  ;;  %v5148_v1 = vmul.f32 %v17326_v27, %v5063_v18  ;;  %1817 = vperm.xlu1 %16851, %v13828_v50   ;;  %v4115_v16 = vmul.f32 %v17289_v54, %v3878_v30  ;;  %v4114_v46 = vmul.f32 %v17289_v54, %v3873_v8  ;;  %v13907_v50 = vld [vmem:[%s17141_s8 + $0x342] ss:$2 sm:$0xff] }
 0x15b   : > { %1812 = vperm.xlu0 %16850, %v13827_v19  }
 0x15c   : > { %v5234_v41 = vadd.f32 %v17333_v34, %v5149_v12  ;;  %v5233_v31 = vadd.f32 %v17333_v34, %v5148_v1  ;;  %v4193_v52 = vadd.f32 %v4115_v16, %v3483_v10  ;;  %v4192_v23 = vadd.f32 %v4114_v46, %v3482_v29  ;;  %v14066_v12 = vld [vmem:[%s17141_s8 + $0x334] ss:$2 sm:$0xff] }
 0x15d   : > { %v17636_v43 = vpop.permute.xlu1 %1135  ;;  %v17640_v44 = vpop.permute.xlu0 %1130 }
 0x15e   : > { %5313 = vst.msk [vmem:[#allocation2 + $0x128] sm:$0xff] %vm5275_vm2, %v5234_v41  ;;  %5312 = vst.msk [vmem:[#allocation2 + $0x120] sm:$0xff] %vm5275_vm2, %v5233_v31  ;;  %3227 = vperm.xlu1 %16851, %v13986_v47   ;;  %v14065_v47 = vld [vmem:[%s17141_s8 + $0x324] ss:$2 sm:$0xff] }
 0x15f   : > { %3222 = vperm.xlu0 %16850, %v13985_v24  }
 0x161   : > { %v17648_v53 = vpop.permute.xlu1 %1767  ;;  %v17654_v55 = vpop.permute.xlu0 %1762 }
 0x162   : > { %4637 = vperm.xlu1 %16851, %v14144_v13  }
 0x163   : > { %4632 = vperm.xlu0 %16850, %v14143_v9   ;;  %v13751_v9 = vld [vmem:[%s17141_s8 + $0x370] ss:$2 sm:$0xff] }
 0x165   : > { %v17666_v58 = vpop.permute.xlu1 %3177  ;;  %v5470_v59 = vld [vmem:[#allocation2 + $0x121] ss:$2 sm:$0xff]  ;;  %v17669_v51 = vpop.permute.xlu0 %3172 }
 0x166   : > { %15323 = vmatmul.mubr.msk.f32.gmra.mrb[10].mxu1 %vm5275_vm2, %v5470_v59  ;;  %925 = vperm.xlu1 %16851, %v13697_v57   ;;  %v13830_v57 = vld [vmem:[%s17141_s8 + $0x371] ss:$2 sm:$0xff]  ;;  %v1355_v59 = vmul.f32 %v17712_v6, %v17577_v26  ;;  %v3407_v42 = vmul.f32 %v17278_v49, %v17666_v58 }
 0x167   : > { %920 = vperm.xlu0 %16850, %v762_v15   ;;  %15325 = vmatprep.mubr.msk.f32.mxu1 %vm16954_vm1, %v21767_v36  ;;  %v1986_v15 = vmul.f32 %v17253_v38, %v17595_v37  ;;  %v17725_v38 = vld [vmem:[%s21794_s9 + $0x2] ss:$0 sm:$0xff] }
 0x168   : > { %v2696_v37 = vmul.f32 %v17725_v38, %v17624_v61  ;;  %v2065_v26 = vadd.f32 %v1987_v25, %v1355_v59  ;;  %v13778_v25 = vld [vmem:[%s17141_s8 + $0x31] ss:$2 sm:$0xff] }
 0x169   : > { %v4588_v5 = vpop.permute.xlu1 %4587  ;;  %v4583_v40 = vpop.permute.xlu0 %4582  ;;  %v2064_v46 = vadd.f32 %v1986_v15, %v1354_v48  ;;  %v13777_v15 = vld [vmem:[%s17141_s8 + $0x21] ss:$2 sm:$0xff]  ;;  %v13910_v48 = vld [vmem:[%s17141_s8 + $0x372] ss:$2 sm:$0xff] }
 0x16a   : > { %v4825_v63 = vmul.f32 %v17304_v4, %v4588_v5  ;;  %1557 = vperm.xlu1 %16851, %v13776_v3   ;;  %v4824_v0 = vmul.f32 %v17304_v4, %v4583_v40  ;;  %v3406_v3 = vmul.f32 %v17736_v28, %v17669_v51  ;;  %v2775_v61 = vadd.f32 %v2697_v39, %v2065_v26  ;;  %v17748_v5 = vld [vmem:[%s21794_s9 + $0x4] ss:$0 sm:$0xff]  ;;  %v13988_v51 = vld [vmem:[%s17141_s8 + $0x353] ss:$2 sm:$0xff] }
 0x16b   : > { %1552 = vperm.xlu0 %16850, %v13775_v17   ;;  %v2774_v58 = vadd.f32 %v2696_v37, %v2064_v46  ;;  %v13909_v37 = vld [vmem:[%s17141_s8 + $0x362] ss:$2 sm:$0xff] }
 0x16c   : > { %v4903_v7 = vadd.f32 %v4825_v63, %v4193_v52  ;;  %v4902_v33 = vadd.f32 %v4824_v0, %v4192_v23  ;;  %v3485_v63 = vadd.f32 %v3407_v42, %v2775_v61  ;;  %v1357_v42 = vmul.f32 %v17712_v6, %v17636_v43  ;;  %v13936_v61 = vld [vmem:[%s17141_s8 + $0x13] ss:$2 sm:$0xff]  ;;  %v13935_v43 = vld [vmem:[%s17141_s8 + $0x3] ss:$2 sm:$0xff] }
 0x16d   : > { %v17681_v18 = vpop.permute.xlu1 %2477  ;;  %v3484_v40 = vadd.f32 %v3406_v3, %v2774_v58  ;;  %v1356_v3 = vmul.f32 %v17712_v6, %v17640_v44 }
 0x16e   : > { %v4988_v19 = vadd.f32 %v17313_v14, %v4903_v7  ;;  %v17684_v30 = vpop.permute.xlu0 %2472  ;;  %2527 = vperm.xlu1 %16851, %v13908_v62   ;;  %v4987_v8 = vadd.f32 %v17313_v14, %v4902_v33 }
 0x16f   : > { %2522 = vperm.xlu0 %16850, %v13907_v50  }
 0x170   : > { %v5066_v1 = vmax.f32 %v4988_v19, 0.0  ;;  %v5065_v41 = vmax.f32 %v4987_v8, 0.0  ;;  %v14146_v19 = vld [vmem:[%s17141_s8 + $0x335] ss:$2 sm:$0xff] }
 0x171   : > { %v3888_v31 = vpop.permute.xlu1 %3887 }
 0x172   : > { %v5151_v24 = vmul.f32 %v17326_v27, %v5066_v1  ;;  %v3883_v13 = vpop.permute.xlu0 %3882  ;;  %3937 = vperm.xlu1 %16851, %v14066_v12   ;;  %v5150_v20 = vmul.f32 %v17326_v27, %v5065_v41  ;;  %v4117_v17 = vmul.f32 %v17289_v54, %v3888_v31  ;;  %v13987_v54 = vld [vmem:[%s17141_s8 + $0x343] ss:$2 sm:$0xff] }
 0x173   : > { %3932 = vperm.xlu0 %16850, %v14065_v47   ;;  %v4116_v52 = vmul.f32 %v17748_v5, %v3883_v13  ;;  %v14145_v12 = vld [vmem:[%s17141_s8 + $0x325] ss:$2 sm:$0xff]  ;;  %v13699_v13 = vld [vmem:[%s17141_s8 + $0x30] ss:$2 sm:$0xff] }
 0x174   : > { %v5236_v60 = vadd.f32 %v17333_v34, %v5151_v24  ;;  %v5235_v21 = vadd.f32 %v17333_v34, %v5150_v20  ;;  %v4195_v0 = vadd.f32 %v4117_v17, %v3485_v63 }
 0x175   : > { %v17695_v56 = vpop.permute.xlu1 %1145  ;;  %v4194_v50 = vadd.f32 %v4116_v52, %v3484_v40 }
 0x176   : > { %5315 = vst.msk [vmem:[#allocation2 + $0x138] sm:$0xff] %vm5275_vm2, %v5236_v60  ;;  %v17698_v35 = vpop.permute.xlu0 %1140  ;;  %1195 = vperm.xlu1 %16851, %v13751_v9   ;;  %5314 = vst.msk [vmem:[#allocation2 + $0x130] sm:$0xff] %vm5275_vm2, %v5235_v21 }
 0x177   : > { %1190 = vperm.xlu0 %16850, %v13750_v45  }
 0x179   : > { %v17707_v2 = vpop.permute.xlu1 %1777 }
 0x17a   : > { %v17718_v16 = vpop.permute.xlu0 %1772  ;;  %1827 = vperm.xlu1 %16851, %v13830_v57  }
 0x17b   : > { %1822 = vperm.xlu0 %16850, %v13829_v32  }
 0x17d   : > { %v17740_v10 = vpop.permute.xlu1 %3187  ;;  %v5472_v49 = vld [vmem:[#allocation2 + $0x131] ss:$2 sm:$0xff] }
 0x17e   : > { %v17743_v29 = vpop.permute.xlu0 %3182  ;;  %2267 = vperm.xlu1 %16851, %v13856_v22   ;;  %15326 = vmatmul.mubr.msk.f32.gmra.mrb[12].mxu1 %vm5275_vm2, %v5472_v49  ;;  %v3409_v17 = vmul.f32 %v17736_v28, %v17740_v10  ;;  %v14068_v10 = vld [vmem:[%s17141_s8 + $0x354] ss:$2 sm:$0xff] }
 0x17f   : > { %2262 = vperm.xlu0 %16850, %v13855_v11   ;;  %15328 = vmatprep.mubr.msk.f32.mxu1 %vm16954_vm1, %v21767_v36  ;;  %v2699_v11 = vmul.f32 %v17725_v38, %v17681_v18  ;;  %v3408_v18 = vmul.f32 %v17736_v28, %v17743_v29  ;;  %v14067_v29 = vld [vmem:[%s17141_s8 + $0x344] ss:$2 sm:$0xff] }
 0x181   : > { %v4598_v23 = vpop.permute.xlu1 %4597 }
 0x182   : > { %v4827_v62 = vmul.f32 %v17304_v4, %v4598_v23  ;;  %v4593_v7 = vpop.permute.xlu0 %4592  ;;  %3237 = vperm.xlu1 %16851, %v13988_v51  }
 0x183   : > { %v4826_v33 = vmul.f32 %v17304_v4, %v4593_v7  ;;  %3232 = vperm.xlu0 %16850, %v13987_v54   ;;  %v13698_v4 = vld [vmem:[%s17141_s8 + $0x20] ss:$2 sm:$0xff]  ;;  %v17823_v7 = vld [vmem:[%s21794_s9 + $0x5] ss:$0 sm:$0xff] }
 0x184   : > { %v4905_v8 = vadd.f32 %v4827_v62, %v4195_v0 }
 0x185   : > { %v4904_v1 = vadd.f32 %v4826_v33, %v4194_v50  ;;  %v17760_v47 = vpop.permute.xlu1 %2487 }
 0x186   : > { %v4990_v41 = vadd.f32 %v17313_v14, %v4905_v8  ;;  %v17763_v31 = vpop.permute.xlu0 %2482  ;;  %4647 = vperm.xlu1 %16851, %v14146_v19  }
 0x187   : > { %v4989_v24 = vadd.f32 %v17313_v14, %v4904_v1  ;;  %4642 = vperm.xlu0 %16850, %v14145_v12   ;;  %v13753_v12 = vld [vmem:[%s17141_s8 + $0x390] ss:$2 sm:$0xff] }
 0x188   : > { %v5068_v20 = vmax.f32 %v4990_v41, 0.0  ;;  %v13752_v41 = vld [vmem:[%s17141_s8 + $0x380] ss:$2 sm:$0xff] }
 0x189   : > { %v5067_v9 = vmax.f32 %v4989_v24, 0.0  ;;  %v3898_v60 = vpop.permute.xlu1 %3897 }
 0x18a   : > { %v5153_v45 = vmul.f32 %v17326_v27, %v5068_v20  ;;  %v3893_v21 = vpop.permute.xlu0 %3892  ;;  %935 = vperm.xlu1 %16851, %v13699_v13   ;;  %v4119_v44 = vmul.f32 %v17748_v5, %v3898_v60  ;;  %v17834_v20 = vld [vmem:[%s21796_s26] ss:$0 sm:$0xff] }
 0x18b   : > { %v5152_v57 = vmul.f32 %v17326_v27, %v5067_v9  ;;  %930 = vperm.xlu0 %16850, %v13698_v4   ;;  %v17784_v27 = vld [vmem:[%s21794_s9 + $0x1] ss:$0 sm:$0xff]  ;;  %v4118_v54 = vmul.f32 %v17748_v5, %v3893_v21 }
 0x18c   : > { %v5238_v32 = vadd.f32 %v17333_v34, %v5153_v45  ;;  %v1988_v22 = vmul.f32 %v17784_v27, %v17654_v55  ;;  %v13832_v45 = vld [vmem:[%s17141_s8 + $0x391] ss:$2 sm:$0xff] }
 0x18d   : > { %v5237_v14 = vadd.f32 %v17333_v34, %v5152_v57  ;;  %v17774_v59 = vpop.permute.xlu1 %1155  ;;  %v1989_v34 = vmul.f32 %v17784_v27, %v17648_v53  ;;  %v2698_v53 = vmul.f32 %v17725_v38, %v17684_v30  ;;  %v13831_v57 = vld [vmem:[%s17141_s8 + $0x381] ss:$2 sm:$0xff] }
 0x18e   : > { %5317 = vst.msk [vmem:[#allocation2 + $0x148] sm:$0xff] %vm5275_vm2, %v5238_v32  ;;  %v17777_v39 = vpop.permute.xlu0 %1150  ;;  %1567 = vperm.xlu1 %16851, %v13778_v25   ;;  %v2066_v49 = vadd.f32 %v1988_v22, %v1356_v3  ;;  %v17853_v22 = vld [vmem:[%s21798_s28] ss:$0 sm:$0xff] }
 0x18f   : > { %5316 = vst.msk [vmem:[#allocation2 + $0x140] sm:$0xff] %vm5275_vm2, %v5237_v14  ;;  %1562 = vperm.xlu0 %16850, %v13777_v15   ;;  %v2067_v55 = vadd.f32 %v1989_v34, %v1357_v42  ;;  %v17845_v15 = vld [vmem:[%s21797_s27] ss:$0 sm:$0xff] }
 0x190   : > { %v2776_v63 = vadd.f32 %v2698_v53, %v2066_v49  ;;  %v1990_v49 = vmul.f32 %v17784_v27, %v17718_v16 }
 0x191   : > { %v17791_v26 = vpop.permute.xlu1 %1787  ;;  %v2777_v52 = vadd.f32 %v2699_v11, %v2067_v55  ;;  %v13857_v11 = vld [vmem:[%s17141_s8 + $0x22] ss:$2 sm:$0xff]  ;;  %v13990_v55 = vld [vmem:[%s17141_s8 + $0x373] ss:$2 sm:$0xff] }
 0x192   : > { %v17797_v46 = vpop.permute.xlu0 %1782  ;;  %2537 = vperm.xlu1 %16851, %v13910_v48   ;;  %v3486_v23 = vadd.f32 %v3408_v18, %v2776_v63  ;;  %v1358_v63 = vmul.f32 %v17712_v6, %v17698_v35 }
 0x193   : > { %2532 = vperm.xlu0 %16850, %v13909_v37   ;;  %v3487_v40 = vadd.f32 %v3409_v17, %v2777_v52  ;;  %v13858_v37 = vld [vmem:[%s17141_s8 + $0x32] ss:$2 sm:$0xff]  ;;  %v1991_v17 = vmul.f32 %v17784_v27, %v17707_v2  ;;  %v1359_v52 = vmul.f32 %v17712_v6, %v17695_v56  ;;  %v2700_v2 = vmul.f32 %v17725_v38, %v17763_v31 }
 0x194   : > { %v4196_v19 = vadd.f32 %v4118_v54, %v3486_v23  ;;  %v14016_v54 = vld [vmem:[%s17141_s8 + $0x14] ss:$2 sm:$0xff]  ;;  %v14015_v56 = vld [vmem:[%s17141_s8 + $0x4] ss:$2 sm:$0xff] }
 0x195   : > { %v17809_v58 = vpop.permute.xlu1 %3197  ;;  %v4197_v62 = vadd.f32 %v4119_v44, %v3487_v40  ;;  %v2701_v44 = vmul.f32 %v17725_v38, %v17760_v47  ;;  %v2069_v16 = vadd.f32 %v1991_v17, %v1359_v52  ;;  %v2068_v40 = vadd.f32 %v1990_v49, %v1358_v63  ;;  %v13912_v49 = vld [vmem:[%s17141_s8 + $0x392] ss:$2 sm:$0xff] }
 0x196   : > { %v17812_v51 = vpop.permute.xlu0 %3192  ;;  %v5474_v30 = vld [vmem:[#allocation2 + $0x141] ss:$2 sm:$0xff]  ;;  %2977 = vperm.xlu1 %16851, %v13936_v61  }
 0x197   : > { %15329 = vmatmul.mubr.msk.f32.gmra.mrb[14].mxu1 %vm5275_vm2, %v5474_v30  ;;  %2972 = vperm.xlu0 %16850, %v13935_v43   ;;  %v13989_v43 = vld [vmem:[%s17141_s8 + $0x363] ss:$2 sm:$0xff]  ;;  %v3410_v47 = vmul.f32 %v17736_v28, %v17812_v51  ;;  %v2779_v23 = vadd.f32 %v2701_v44, %v2069_v16  ;;  %v13911_v44 = vld [vmem:[%s17141_s8 + $0x382] ss:$2 sm:$0xff]  ;;  %v13938_v16 = vld [vmem:[%s17141_s8 + $0x33] ss:$2 sm:$0xff] }
 0x198   : > { %15331 = vmatprep.mubr.msk.f32.mxu1 %vm16954_vm1, %v21767_v36  ;;  %v14147_v51 = vld [vmem:[%s17141_s8 + $0x345] ss:$2 sm:$0xff] }
 0x199   : > { %v4608_v0 = vpop.permute.xlu1 %4607 }
 0x19a   : > { %v4829_v50 = vmul.f32 %v17823_v7, %v4608_v0  ;;  %v4603_v33 = vpop.permute.xlu0 %4602  ;;  %3947 = vperm.xlu1 %16851, %v14068_v10   ;;  %v3411_v10 = vmul.f32 %v17736_v28, %v17809_v58  ;;  %v14148_v58 = vld [vmem:[%s17141_s8 + $0x355] ss:$2 sm:$0xff] }
 0x19b   : > { %v4828_v8 = vmul.f32 %v17823_v7, %v4603_v33  ;;  %3942 = vperm.xlu0 %16850, %v14067_v29  }
 0x19c   : > { %v4907_v1 = vadd.f32 %v4829_v50, %v4197_v62  ;;  %v2778_v62 = vadd.f32 %v2700_v2, %v2068_v40  ;;  %v3489_v33 = vadd.f32 %v3411_v10, %v2779_v23  ;;  %v1993_v10 = vmul.f32 %v17784_v27, %v17791_v26 }
 0x19d   : > { %v4906_v24 = vadd.f32 %v4828_v8, %v4196_v19  ;;  %v17829_v13 = vpop.permute.xlu1 %2497  ;;  %v1992_v40 = vmul.f32 %v17784_v27, %v17797_v46  ;;  %v1360_v26 = vmul.f32 %v17712_v6, %v17777_v39 }
 0x19e   : > { %v4992_v4 = vadd.f32 %v17834_v20, %v4907_v1  ;;  %v17837_v9 = vpop.permute.xlu0 %2492  ;;  %1205 = vperm.xlu1 %16851, %v13753_v12   ;;  %v3488_v19 = vadd.f32 %v3410_v47, %v2778_v62 }
 0x19f   : > { %v4991_v60 = vadd.f32 %v17834_v20, %v4906_v24  ;;  %1200 = vperm.xlu0 %16850, %v13752_v41   ;;  %v2702_v46 = vmul.f32 %v17725_v38, %v17837_v9 }
 0x1a0   : > { %v5070_v21 = vmax.f32 %v4992_v4, 0.0 }
 0x1a1   : > { %v5069_v25 = vmax.f32 %v4991_v60, 0.0  ;;  %v3908_v32 = vpop.permute.xlu1 %3907  ;;  %v13701_v60 = vld [vmem:[%s17141_s8 + $0x50] ss:$2 sm:$0xff] }
 0x1a2   : > { %v5155_v14 = vmul.f32 %v17845_v15, %v5070_v21  ;;  %v3903_v48 = vpop.permute.xlu0 %3902  ;;  %1837 = vperm.xlu1 %16851, %v13832_v45   ;;  %v4121_v35 = vmul.f32 %v17748_v5, %v3908_v32  ;;  %v13700_v21 = vld [vmem:[%s17141_s8 + $0x40] ss:$2 sm:$0xff] }
 0x1a3   : > { %v5154_v34 = vmul.f32 %v17845_v15, %v5069_v25  ;;  %1832 = vperm.xlu0 %16850, %v13831_v57   ;;  %v4120_v50 = vmul.f32 %v17748_v5, %v3903_v48 }
 0x1a4   : > { %v5240_v42 = vadd.f32 %v17853_v22, %v5155_v14  ;;  %v4199_v12 = vadd.f32 %v4121_v35, %v3489_v33  ;;  %v1361_v35 = vmul.f32 %v17712_v6, %v17774_v59 }
 0x1a5   : > { %v5239_v3 = vadd.f32 %v17853_v22, %v5154_v34  ;;  %v17858_v53 = vpop.permute.xlu1 %1165  ;;  %v4198_v24 = vadd.f32 %v4120_v50, %v3488_v19  ;;  %v13780_v34 = vld [vmem:[%s17141_s8 + $0x51] ss:$2 sm:$0xff] }
 0x1a6   : > { %5319 = vst.msk [vmem:[#allocation2 + $0x158] sm:$0xff] %vm5275_vm2, %v5240_v42  ;;  %v17861_v61 = vpop.permute.xlu0 %1160  ;;  %2277 = vperm.xlu1 %16851, %v13858_v37   ;;  %v13779_v42 = vld [vmem:[%s17141_s8 + $0x41] ss:$2 sm:$0xff]  ;;  %v2071_v33 = vadd.f32 %v1993_v10, %v1361_v35 }
 0x1a7   : > { %5318 = vst.msk [vmem:[#allocation2 + $0x150] sm:$0xff] %vm5275_vm2, %v5239_v3  ;;  %2272 = vperm.xlu0 %16850, %v13857_v11  }
 0x1a9   : > { %v17870_v18 = vpop.permute.xlu1 %1797 }
 0x1aa   : > { %v17876_v30 = vpop.permute.xlu0 %1792  ;;  %3247 = vperm.xlu1 %16851, %v13990_v55  }
 0x1ab   : > { %3242 = vperm.xlu0 %16850, %v13989_v43  }
 0x1ad   : > { %v17888_v29 = vpop.permute.xlu1 %3207 }
 0x1ae   : > { %v17891_v0 = vpop.permute.xlu0 %3202  ;;  %v5476_v31 = vld [vmem:[#allocation2 + $0x151] ss:$2 sm:$0xff]  ;;  %3687 = vperm.xlu1 %16851, %v14016_v54   ;;  %v3413_v59 = vmul.f32 %v17736_v28, %v17888_v29 }
 0x1af   : > { %15332 = vmatmul.mubr.msk.f32.gmra.mrb[16].mxu1 %vm5275_vm2, %v5476_v31  ;;  %3682 = vperm.xlu0 %16850, %v14015_v56   ;;  %v13937_v56 = vld [vmem:[%s17141_s8 + $0x23] ss:$2 sm:$0xff]  ;;  %v2703_v31 = vmul.f32 %v17725_v38, %v17829_v13  ;;  %v2070_v13 = vadd.f32 %v1992_v40, %v1360_v26  ;;  %v3412_v19 = vmul.f32 %v17736_v28, %v17891_v0  ;;  %v13859_v26 = vld [vmem:[%s17141_s8 + $0x42] ss:$2 sm:$0xff] }
 0x1b0   : > { %15334 = vmatprep.mubr.msk.f32.mxu1 %vm16954_vm1, %v21767_v36  ;;  %v14096_v29 = vld [vmem:[%s17141_s8 + $0x15] ss:$2 sm:$0xff]  ;;  %v14095_v0 = vld [vmem:[%s17141_s8 + $0x5] ss:$2 sm:$0xff] }
 0x1b1   : > { %v4618_v8 = vpop.permute.xlu1 %4617 }
 0x1b2   : > { %v4831_v1 = vmul.f32 %v17823_v7, %v4618_v8  ;;  %v4613_v41 = vpop.permute.xlu0 %4612  ;;  %4657 = vperm.xlu1 %16851, %v14148_v58   ;;  %v14070_v58 = vld [vmem:[%s17141_s8 + $0x374] ss:$2 sm:$0xff] }
 0x1b3   : > { %v4830_v4 = vmul.f32 %v17823_v7, %v4613_v41  ;;  %4652 = vperm.xlu0 %16850, %v14147_v51   ;;  %v14069_v51 = vld [vmem:[%s17141_s8 + $0x364] ss:$2 sm:$0xff]  ;;  %v2780_v41 = vadd.f32 %v2702_v46, %v2070_v13  ;;  %v13991_v13 = vld [vmem:[%s17141_s8 + $0x383] ss:$2 sm:$0xff] }
 0x1b4   : > { %v4909_v45 = vadd.f32 %v4831_v1, %v4199_v12  ;;  %v2781_v12 = vadd.f32 %v2703_v31, %v2071_v33  ;;  %v13860_v31 = vld [vmem:[%s17141_s8 + $0x52] ss:$2 sm:$0xff] }
 0x1b5   : > { %v4908_v57 = vadd.f32 %v4830_v4, %v4198_v24  ;;  %v17903_v25 = vpop.permute.xlu1 %2507 }
 0x1b6   : > { %v4994_v32 = vadd.f32 %v17834_v20, %v4909_v45  ;;  %v17906_v14 = vpop.permute.xlu0 %2502  ;;  %945 = vperm.xlu1 %16851, %v13701_v60   ;;  %v3491_v4 = vadd.f32 %v3413_v59, %v2781_v12  ;;  %v3490_v60 = vadd.f32 %v3412_v19, %v2780_v41  ;;  %v13992_v59 = vld [vmem:[%s17141_s8 + $0x393] ss:$2 sm:$0xff]  ;;  %v1994_v19 = vmul.f32 %v17784_v27, %v17876_v30 }
 0x1b7   : > { %v4993_v48 = vadd.f32 %v17834_v20, %v4908_v57  ;;  %940 = vperm.xlu0 %16850, %v13700_v21   ;;  %v2705_v41 = vmul.f32 %v17725_v38, %v17903_v25  ;;  %v2704_v30 = vmul.f32 %v17725_v38, %v17906_v14 }
 0x1b8   : > { %v5072_v37 = vmax.f32 %v4994_v32, 0.0 }
 0x1b9   : > { %v5071_v11 = vmax.f32 %v4993_v48, 0.0  ;;  %v3918_v3 = vpop.permute.xlu1 %3917 }
 0x1ba   : > { %v5157_v55 = vmul.f32 %v17845_v15, %v5072_v37  ;;  %v3913_v17 = vpop.permute.xlu0 %3912  ;;  %1577 = vperm.xlu1 %16851, %v13780_v34   ;;  %v4123_v39 = vmul.f32 %v17748_v5, %v3918_v3  ;;  %v13755_v37 = vld [vmem:[%s17141_s8 + $0x3b0] ss:$2 sm:$0xff] }
 0x1bb   : > { %v5156_v43 = vmul.f32 %v17845_v15, %v5071_v11  ;;  %1572 = vperm.xlu0 %16850, %v13779_v42   ;;  %v4122_v24 = vmul.f32 %v17748_v5, %v3913_v17  ;;  %v13754_v11 = vld [vmem:[%s17141_s8 + $0x3a0] ss:$2 sm:$0xff] }
 0x1bc   : > { %v5242_v52 = vadd.f32 %v17853_v22, %v5157_v55  ;;  %v4201_v21 = vadd.f32 %v4123_v39, %v3491_v4  ;;  %v14018_v4 = vld [vmem:[%s17141_s8 + $0x34] ss:$2 sm:$0xff] }
 0x1bd   : > { %v5241_v63 = vadd.f32 %v17853_v22, %v5156_v43  ;;  %v17917_v2 = vpop.permute.xlu1 %1175  ;;  %v4200_v48 = vadd.f32 %v4122_v24, %v3490_v60  ;;  %v14017_v60 = vld [vmem:[%s17141_s8 + $0x24] ss:$2 sm:$0xff] }
 0x1be   : > { %5321 = vst.msk [vmem:[#allocation2 + $0x168] sm:$0xff] %vm5275_vm2, %v5242_v52  ;;  %v17920_v54 = vpop.permute.xlu0 %1170  ;;  %2547 = vperm.xlu1 %16851, %v13912_v49   ;;  %v13834_v52 = vld [vmem:[%s17141_s8 + $0x3b1] ss:$2 sm:$0xff] }
 0x1bf   : > { %5320 = vst.msk [vmem:[#allocation2 + $0x160] sm:$0xff] %vm5275_vm2, %v5241_v63  ;;  %2542 = vperm.xlu0 %16850, %v13911_v44   ;;  %v13833_v63 = vld [vmem:[%s17141_s8 + $0x3a1] ss:$2 sm:$0xff] }
 0x1c1   : > { %v17929_v47 = vpop.permute.xlu1 %1807  ;;  %v17931_v23 = vpop.f32.mrb[0].mxu1 }
 0x1c2   : > { %v17937_v62 = vpop.permute.xlu0 %1802  ;;  %v15309_v50 = vpop.f32.mrb[1].mxu1  ;;  %2987 = vperm.xlu1 %16851, %v13938_v16  }
 0x1c3   : > { %2982 = vperm.xlu0 %16850, %v13937_v56  }
 0x1c5   : > { %v17949_v8 = vpop.permute.xlu1 %3217 }
 0x1c6   : > { %v17952_v1 = vpop.permute.xlu0 %3212  ;;  %v5478_v9 = vld [vmem:[#allocation2 + $0x161] ss:$2 sm:$0xff]  ;;  %3957 = vperm.xlu1 %16851, %v14070_v58  }
 0x1c7   : > { %15335 = vmatmul.mubr.msk.f32.gmra.mrb[18].mxu1 %vm5275_vm2, %v5478_v9  ;;  %3952 = vperm.xlu0 %16850, %v14069_v51   ;;  %v1995_v51 = vmul.f32 %v17784_v27, %v17870_v18  ;;  %v1363_v9 = vmul.f32 %v17712_v6, %v17858_v53  ;;  %v1362_v18 = vmul.f32 %v17712_v6, %v17861_v61 }
 0x1c8   : > { %15337 = vmatprep.mubr.msk.f32.mxu1 %vm16954_vm1, %v21767_v36  ;;  %v3415_v53 = vmul.f32 %v17736_v28, %v17949_v8  ;;  %v14150_v8 = vld [vmem:[%s17141_s8 + $0x375] ss:$2 sm:$0xff] }
 0x1c9   : > { %v4628_v45 = vpop.permute.xlu1 %4627  ;;  %v2072_v25 = vadd.f32 %v1994_v19, %v1362_v18 }
 0x1ca   : > { %v4833_v57 = vmul.f32 %v17823_v7, %v4628_v45  ;;  %v4623_v32 = vpop.permute.xlu0 %4622  ;;  %4397 = vperm.xlu1 %16851, %v14096_v29   ;;  %v3414_v45 = vmul.f32 %v17736_v28, %v17952_v1  ;;  %v14149_v1 = vld [vmem:[%s17141_s8 + $0x365] ss:$2 sm:$0xff] }
 0x1cb   : > { %v4832_v34 = vmul.f32 %v17823_v7, %v4623_v32  ;;  %4392 = vperm.xlu0 %16850, %v14095_v0   ;;  %v2073_v0 = vadd.f32 %v1995_v51, %v1363_v9 }
 0x1cc   : > { %v4911_v42 = vadd.f32 %v4833_v57, %v4201_v21 }
 0x1cd   : > { %v4910_v3 = vadd.f32 %v4832_v34, %v4200_v48  ;;  %v17964_v55 = vpop.permute.xlu1 %2517  ;;  %v2783_v57 = vadd.f32 %v2705_v41, %v2073_v0  ;;  %v2782_v48 = vadd.f32 %v2704_v30, %v2072_v25  ;;  %v13913_v30 = vld [vmem:[%s17141_s8 + $0x3a2] ss:$2 sm:$0xff]  ;;  %v13939_v25 = vld [vmem:[%s17141_s8 + $0x43] ss:$2 sm:$0xff] }
 0x1ce   : > { %v4996_v17 = vadd.f32 %v17834_v20, %v4911_v42  ;;  %v17967_v43 = vpop.permute.xlu0 %2512  ;;  %1215 = vperm.xlu1 %16851, %v13755_v37  }
 0x1cf   : > { %v4995_v49 = vadd.f32 %v17834_v20, %v4910_v3  ;;  %1210 = vperm.xlu0 %16850, %v13754_v11   ;;  %v3493_v37 = vadd.f32 %v3415_v53, %v2783_v57  ;;  %v3492_v42 = vadd.f32 %v3414_v45, %v2782_v48  ;;  %v14072_v48 = vld [vmem:[%s17141_s8 + $0x394] ss:$2 sm:$0xff] }
 0x1d0   : > { %v5074_v44 = vmax.f32 %v4996_v17, 0.0 }
 0x1d1   : > { %v5073_v16 = vmax.f32 %v4995_v49, 0.0  ;;  %v3928_v10 = vpop.permute.xlu1 %3927 }
 0x1d2   : > { %v5159_v56 = vmul.f32 %v17845_v15, %v5074_v44  ;;  %v3923_v40 = vpop.permute.xlu0 %3922  ;;  %1847 = vperm.xlu1 %16851, %v13834_v52   ;;  %v4125_v61 = vmul.f32 %v17748_v5, %v3928_v10  ;;  %v13702_v10 = vld [vmem:[%s17141_s8 + $0x60] ss:$2 sm:$0xff] }
 0x1d3   : > { %v5158_v35 = vmul.f32 %v17845_v15, %v5073_v16  ;;  %1842 = vperm.xlu0 %16850, %v13833_v63   ;;  %v4124_v34 = vmul.f32 %v17748_v5, %v3923_v40  ;;  %v13703_v63 = vld [vmem:[%s17141_s8 + $0x70] ss:$2 sm:$0xff] }
 0x1d4   : > { %v5244_v50 = vadd.f32 %v17853_v22, %v5159_v56  ;;  %v4203_v3 = vadd.f32 %v4125_v61, %v3493_v37 }
 0x1d5   : > { %v5243_v46 = vadd.f32 %v17853_v22, %v5158_v35  ;;  %v17978_v58 = vpop.permute.xlu1 %1185  ;;  %v4202_v52 = vadd.f32 %v4124_v34, %v3492_v42  ;;  %v14071_v34 = vld [vmem:[%s17141_s8 + $0x384] ss:$2 sm:$0xff]  ;;  %v14098_v42 = vld [vmem:[%s17141_s8 + $0x35] ss:$2 sm:$0xff] }
 0x1d6   : > { %5323 = vst.msk [vmem:[#allocation2 + $0x178] sm:$0xff] %vm5275_vm2, %v5244_v50  ;;  %v17981_v33 = vpop.permute.xlu0 %1180  ;;  %2287 = vperm.xlu1 %16851, %v13860_v31  }
 0x1d7   : > { %5322 = vst.msk [vmem:[#allocation2 + $0x170] sm:$0xff] %vm5275_vm2, %v5243_v46  ;;  %2282 = vperm.xlu0 %16850, %v13859_v26   ;;  %v13782_v26 = vld [vmem:[%s17141_s8 + $0x71] ss:$2 sm:$0xff] }
 0x1d9   : > { %v17990_v12 = vpop.permute.xlu1 %1817  ;;  %v17992_v39 = vpop.f32.mrb[2].mxu1 }
 0x1da   : > { %v17998_v24 = vpop.permute.xlu0 %1812  ;;  %v15312_v29 = vpop.f32.mrb[3].mxu1  ;;  %3257 = vperm.xlu1 %16851, %v13992_v59   ;;  %v13781_v59 = vld [vmem:[%s17141_s8 + $0x61] ss:$2 sm:$0xff] }
 0x1db   : > { %3252 = vperm.xlu0 %16850, %v13991_v13   ;;  %v13914_v29 = vld [vmem:[%s17141_s8 + $0x3b2] ss:$2 sm:$0xff] }
 0x1dd   : > { %v18010_v21 = vpop.permute.xlu1 %3227 }
 0x1de   : > { %v18013_v32 = vpop.permute.xlu0 %3222  ;;  %v5480_v14 = vld [vmem:[#allocation2 + $0x171] ss:$2 sm:$0xff]  ;;  %3697 = vperm.xlu1 %16851, %v14018_v4  }
 0x1df   : > { %15338 = vmatmul.mubr.msk.f32.gmra.mrb[20].mxu1 %vm5275_vm2, %v5480_v14  ;;  %3692 = vperm.xlu0 %16850, %v14017_v60   ;;  %v13940_v60 = vld [vmem:[%s17141_s8 + $0x53] ss:$2 sm:$0xff] }
 0x1e0   : > { %15340 = vmatprep.mubr.msk.f32.mxu1 %vm16954_vm1, %v21767_v36 }
 0x1e1   : > { %v4638_v11 = vpop.permute.xlu1 %4637 }
 0x1e2   : > { %v4835_v17 = vmul.f32 %v17823_v7, %v4638_v11  ;;  %v4633_v49 = vpop.permute.xlu0 %4632  ;;  %4667 = vperm.xlu1 %16851, %v14150_v8   ;;  %v14097_v11 = vld [vmem:[%s17141_s8 + $0x25] ss:$2 sm:$0xff] }
 0x1e3   : > { %v4834_v44 = vmul.f32 %v17823_v7, %v4633_v49  ;;  %4662 = vperm.xlu0 %16850, %v14149_v1   ;;  %v13757_v49 = vld [vmem:[%s17141_s8 + $0x3d0] ss:$2 sm:$0xff] }
 0x1e4   : > { %v4913_v16 = vadd.f32 %v4835_v17, %v4203_v3 }
 0x1e5   : > { %v4912_v56 = vadd.f32 %v4834_v44, %v4202_v52  ;;  %v18025_v40 = vpop.permute.xlu1 %925  ;;  %v1997_v52 = vmul.f32 %v17784_v27, %v17929_v47  ;;  %v13756_v44 = vld [vmem:[%s17141_s8 + $0x3c0] ss:$2 sm:$0xff]  ;;  %v2706_v47 = vmul.f32 %v17725_v38, %v17967_v43 }
 0x1e6   : > { %v4998_v35 = vadd.f32 %v17834_v20, %v4913_v16  ;;  %v18028_v31 = vpop.permute.xlu0 %920  ;;  %955 = vperm.xlu1 %16851, %v13703_v63   ;;  %v1996_v63 = vmul.f32 %v17784_v27, %v17937_v62  ;;  %v13836_v62 = vld [vmem:[%s17141_s8 + $0x3d1] ss:$2 sm:$0xff] }
 0x1e7   : > { %v4997_v50 = vadd.f32 %v17834_v20, %v4912_v56  ;;  %950 = vperm.xlu0 %16850, %v13702_v10   ;;  %v1365_v10 = vmul.f32 %v17712_v6, %v17917_v2  ;;  %v2707_v56 = vmul.f32 %v17725_v38, %v17964_v55  ;;  %v3417_v2 = vmul.f32 %v17736_v28, %v18010_v21  ;;  %v13862_v21 = vld [vmem:[%s17141_s8 + $0x72] ss:$2 sm:$0xff] }
 0x1e8   : > { %v5076_v46 = vmax.f32 %v4998_v35, 0.0  ;;  %v3416_v55 = vmul.f32 %v17736_v28, %v18013_v32 }
 0x1e9   : > { %v5075_v51 = vmax.f32 %v4997_v50, 0.0  ;;  %v18033_v13 = vpop.permute.xlu1 %1557  ;;  %v1364_v50 = vmul.f32 %v17712_v6, %v17920_v54 }
 0x1ea   : > { %v5161_v19 = vmul.f32 %v17845_v15, %v5076_v46  ;;  %v18036_v9 = vpop.permute.xlu0 %1552  ;;  %1587 = vperm.xlu1 %16851, %v13782_v26   ;;  %v2075_v26 = vadd.f32 %v1997_v52, %v1365_v10  ;;  %v13835_v46 = vld [vmem:[%s17141_s8 + $0x3c1] ss:$2 sm:$0xff] }
 0x1eb   : > { %v5160_v41 = vmul.f32 %v17845_v15, %v5075_v51  ;;  %1582 = vperm.xlu0 %16850, %v13781_v59   ;;  %v2074_v59 = vadd.f32 %v1996_v63, %v1364_v50 }
 0x1ec   : > { %v5246_v18 = vadd.f32 %v17853_v22, %v5161_v19  ;;  %v2785_v19 = vadd.f32 %v2707_v56, %v2075_v26  ;;  %v14020_v56 = vld [vmem:[%s17141_s8 + $0x54] ss:$2 sm:$0xff] }
 0x1ed   : > { %v5245_v4 = vadd.f32 %v17853_v22, %v5160_v41  ;;  %v18043_v0 = vpop.permute.xlu1 %2527  ;;  %v2784_v43 = vadd.f32 %v2706_v47, %v2074_v59  ;;  %v14019_v47 = vld [vmem:[%s17141_s8 + $0x44] ss:$2 sm:$0xff] }
 0x1ee   : > { %5325 = vst.msk [vmem:[#allocation2 + $0x188] sm:$0xff] %vm5275_vm2, %v5246_v18  ;;  %v18046_v53 = vpop.permute.xlu0 %2522  ;;  %2557 = vperm.xlu1 %16851, %v13914_v29   ;;  %v3495_v18 = vadd.f32 %v3417_v2, %v2785_v19 }
 0x1ef   : > { %5324 = vst.msk [vmem:[#allocation2 + $0x180] sm:$0xff] %vm5275_vm2, %v5245_v4  ;;  %2552 = vperm.xlu0 %16850, %v13913_v30   ;;  %v13861_v30 = vld [vmem:[%s17141_s8 + $0x62] ss:$2 sm:$0xff]  ;;  %v3494_v4 = vadd.f32 %v3416_v55, %v2784_v43  ;;  %v14152_v55 = vld [vmem:[%s17141_s8 + $0x395] ss:$2 sm:$0xff] }
 0x1f1   : > { %v18051_v45 = vpop.f32.mrb[4].mxu1  ;;  %v3938_v57 = vpop.permute.xlu1 %3937 }
 0x1f2   : > { %v3933_v61 = vpop.permute.xlu0 %3932  ;;  %v15315_v14 = vpop.f32.mrb[5].mxu1  ;;  %2997 = vperm.xlu1 %16851, %v13940_v60   ;;  %v4127_v54 = vmul.f32 %v17748_v5, %v3938_v57 }
 0x1f3   : > { %2992 = vperm.xlu0 %16850, %v13939_v25   ;;  %v4126_v29 = vmul.f32 %v17748_v5, %v3933_v61 }
 0x1f4   : > { %v4205_v32 = vadd.f32 %v4127_v54, %v3495_v18  ;;  %v14151_v54 = vld [vmem:[%s17141_s8 + $0x385] ss:$2 sm:$0xff]  ;;  %v13705_v18 = vld [vmem:[%s17141_s8 + $0x90] ss:$2 sm:$0xff] }
 0x1f5   : > { %v18055_v8 = vpop.permute.xlu1 %1195  ;;  %v4204_v57 = vadd.f32 %v4126_v29, %v3494_v4 }
 0x1f6   : > { %v18057_v37 = vpop.permute.xlu0 %1190  ;;  %v5482_v1 = vld [vmem:[#allocation2 + $0x181] ss:$2 sm:$0xff]  ;;  %3967 = vperm.xlu1 %16851, %v14072_v48  }
 0x1f7   : > { %15341 = vmatmul.mubr.msk.f32.gmra.mrb[22].mxu1 %vm5275_vm2, %v5482_v1  ;;  %3962 = vperm.xlu0 %16850, %v14071_v34   ;;  %v13994_v34 = vld [vmem:[%s17141_s8 + $0x3b3] ss:$2 sm:$0xff]  ;;  %v13993_v1 = vld [vmem:[%s17141_s8 + $0x3a3] ss:$2 sm:$0xff] }
 0x1f8   : > { %15343 = vmatprep.mubr.msk.f32.mxu1 %vm16954_vm1, %v21767_v36 }
 0x1f9   : > { %v18064_v3 = vpop.permute.xlu1 %1827 }
 0x1fa   : > { %v18066_v17 = vpop.permute.xlu0 %1822  ;;  %4407 = vperm.xlu1 %16851, %v14098_v42  }
 0x1fb   : > { %4402 = vperm.xlu0 %16850, %v14097_v11  }
 0x1fd   : > { %v18074_v16 = vpop.permute.xlu1 %2267 }
 0x1fe   : > { %v18080_v35 = vpop.permute.xlu0 %2262  ;;  %1225 = vperm.xlu1 %16851, %v13757_v49  }
 0x1ff   : > { %1220 = vperm.xlu0 %16850, %v13756_v44  }
 0x201   : > { %v18092_v51 = vpop.permute.xlu1 %3237 }
 0x202   : > { %v18095_v41 = vpop.permute.xlu0 %3232  ;;  %1857 = vperm.xlu1 %16851, %v13836_v62  }
 0x203   : > { %1852 = vperm.xlu0 %16850, %v13835_v46  }
 0x205   : > { %v4648_v60 = vpop.permute.xlu1 %4647 }
 0x206   : > { %v4837_v25 = vmul.f32 %v17823_v7, %v4648_v60  ;;  %v4643_v14 = vpop.permute.xlu0 %4642  ;;  %2297 = vperm.xlu1 %16851, %v13862_v21  }
 0x207   : > { %v4836_v48 = vmul.f32 %v17823_v7, %v4643_v14  ;;  %2292 = vperm.xlu0 %16850, %v13861_v30   ;;  %v13704_v30 = vld [vmem:[%s17141_s8 + $0x80] ss:$2 sm:$0xff] }
 0x208   : > { %v4915_v61 = vadd.f32 %v4837_v25, %v4205_v32  ;;  %v13784_v32 = vld [vmem:[%s17141_s8 + $0x91] ss:$2 sm:$0xff]  ;;  %v13783_v25 = vld [vmem:[%s17141_s8 + $0x81] ss:$2 sm:$0xff] }
 0x209   : > { %v4914_v42 = vadd.f32 %v4836_v48, %v4204_v57  ;;  %v18104_v11 = vpop.f32.mrb[6].mxu1  ;;  %v18106_v49 = vpop.permute.xlu1 %935 }
 0x20a   : > { %21799 = vst [vmem:[#allocation13_spill] sm:$0xff] %v18104_v11  ;;  %v5000_v52 = vadd.f32 %v17834_v20, %v4915_v61  ;;  %v18109_v44 = vpop.permute.xlu0 %930  ;;  %v15318_v63 = vpop.f32.mrb[7].mxu1  ;;  %3267 = vperm.xlu1 %16851, %v13994_v34   ;;  %v13916_v34 = vld [vmem:[%s17141_s8 + $0x3d2] ss:$2 sm:$0xff]  ;;  %v13915_v61 = vld [vmem:[%s17141_s8 + $0x3c2] ss:$2 sm:$0xff] }
 0x20b   : > { %v4999_v10 = vadd.f32 %v17834_v20, %v4914_v42  ;;  %3262 = vperm.xlu0 %16850, %v13993_v1   ;;  %v13941_v63 = vld [vmem:[%s17141_s8 + $0x63] ss:$2 sm:$0xff] }
 0x20c   : > { %v5078_v50 = vmax.f32 %v5000_v52, 0.0  ;;  %v13942_v52 = vld [vmem:[%s17141_s8 + $0x73] ss:$2 sm:$0xff] }
 0x20d   : > { %v5077_v62 = vmax.f32 %v4999_v10, 0.0  ;;  %v18114_v26 = vpop.permute.xlu1 %1567 }
 0x20e   : > { %v5163_v2 = vmul.f32 %v17845_v15, %v5078_v50  ;;  %v18117_v46 = vpop.permute.xlu0 %1562  ;;  %3707 = vperm.xlu1 %16851, %v14020_v56  }
 0x20f   : > { %v5162_v59 = vmul.f32 %v17845_v15, %v5077_v62  ;;  %3702 = vperm.xlu0 %16850, %v14019_v47   ;;  %v14074_v62 = vld [vmem:[%s17141_s8 + $0x3b4] ss:$2 sm:$0xff] }
 0x210   : > { %v5248_v19 = vadd.f32 %v17853_v22, %v5163_v2  ;;  %v14073_v2 = vld [vmem:[%s17141_s8 + $0x3a4] ss:$2 sm:$0xff] }
 0x211   : > { %v5247_v43 = vadd.f32 %v17853_v22, %v5162_v59  ;;  %v18124_v29 = vpop.permute.xlu1 %2537 }
 0x212   : > { %5327 = vst.msk [vmem:[#allocation2 + $0x198] sm:$0xff] %vm5275_vm2, %v5248_v19  ;;  %v18127_v21 = vpop.permute.xlu0 %2532  ;;  %4677 = vperm.xlu1 %16851, %v14152_v55   ;;  %v14100_v19 = vld [vmem:[%s17141_s8 + $0x55] ss:$2 sm:$0xff] }
 0x213   : > { %5326 = vst.msk [vmem:[#allocation2 + $0x190] sm:$0xff] %vm5275_vm2, %v5247_v43  ;;  %4672 = vperm.xlu0 %16850, %v14151_v54   ;;  %v1999_v54 = vmul.f32 %v17784_v27, %v17990_v12  ;;  %v14099_v43 = vld [vmem:[%s17141_s8 + $0x45] ss:$2 sm:$0xff]  ;;  %v2708_v12 = vmul.f32 %v17725_v38, %v18046_v53 }
 0x215   : > { %v18132_v4 = vpop.permute.xlu1 %2977 }
 0x216   : > { %v18134_v60 = vpop.permute.xlu0 %2972  ;;  %965 = vperm.xlu1 %16851, %v13705_v18   ;;  %v1998_v18 = vmul.f32 %v17784_v27, %v17998_v24  ;;  %v13759_v24 = vld [vmem:[%s17141_s8 + $0x3f0] ss:$2 sm:$0xff] }
 0x217   : > { %960 = vperm.xlu0 %16850, %v13704_v30  }
 0x219   : > { %v3948_v14 = vpop.permute.xlu1 %3947 }
 0x21a   : > { %v3943_v57 = vpop.permute.xlu0 %3942  ;;  %1597 = vperm.xlu1 %16851, %v13784_v32   ;;  %v5484_v48 = vld [vmem:[#allocation2 + $0x191] ss:$2 sm:$0xff]  ;;  %v1367_v32 = vmul.f32 %v17712_v6, %v17978_v58  ;;  %v3419_v58 = vmul.f32 %v17736_v28, %v18092_v51 }
 0x21b   : > { %1592 = vperm.xlu0 %16850, %v13783_v25   ;;  %15344 = vmatmul.mubr.msk.f32.gmra.mrb[24].mxu1 %vm5275_vm2, %v5484_v48  ;;  %v2709_v25 = vmul.f32 %v17725_v38, %v18043_v0  ;;  %v3418_v0 = vmul.f32 %v17736_v28, %v18095_v41  ;;  %v4128_v53 = vmul.f32 %v17748_v5, %v3943_v57  ;;  %v13838_v51 = vld [vmem:[%s17141_s8 + $0x3f1] ss:$2 sm:$0xff]  ;;  %v13863_v57 = vld [vmem:[%s17141_s8 + $0x82] ss:$2 sm:$0xff] }
 0x21c   : > { %15346 = vmatprep.mubr.msk.f32.mxu1 %vm16954_vm1, %v21767_v36 }
 0x21d   : > { %v18143_v1 = vpop.permute.xlu1 %1205 }
 0x21e   : > { %v18145_v42 = vpop.permute.xlu0 %1200  ;;  %2567 = vperm.xlu1 %16851, %v13916_v34   ;;  %v1366_v34 = vmul.f32 %v17712_v6, %v17981_v33  ;;  %v4129_v6 = vmul.f32 %v17748_v5, %v3948_v14 }
 0x21f   : > { %2562 = vperm.xlu0 %16850, %v13915_v61   ;;  %v2077_v61 = vadd.f32 %v1999_v54, %v1367_v32 }
 0x221   : > { %v18149_v10 = vpop.f32.mrb[8].mxu1  ;;  %v18151_v56 = vpop.permute.xlu1 %1837 }
 0x222   : > { %21800 = vst [vmem:[#allocation14_spill] sm:$0xff] %v18149_v10  ;;  %v18153_v50 = vpop.permute.xlu0 %1832  ;;  %v15321_v47 = vpop.f32.mrb[9].mxu1  ;;  %3007 = vperm.xlu1 %16851, %v13942_v52   ;;  %v13758_v52 = vld [vmem:[%s17141_s8 + $0x3e0] ss:$2 sm:$0xff] }
 0x223   : > { %3002 = vperm.xlu0 %16850, %v13941_v63   ;;  %v2076_v63 = vadd.f32 %v1998_v18, %v1366_v34 }
 0x225   : > { %v18157_v59 = vpop.permute.xlu1 %2277  ;;  %v2786_v38 = vadd.f32 %v2708_v12, %v2076_v63 }
 0x226   : > { %v18159_v55 = vpop.permute.xlu0 %2272  ;;  %3977 = vperm.xlu1 %16851, %v14074_v62   ;;  %v2787_v62 = vadd.f32 %v2709_v25, %v2077_v61  ;;  %v13864_v25 = vld [vmem:[%s17141_s8 + $0x92] ss:$2 sm:$0xff] }
 0x227   : > { %3972 = vperm.xlu0 %16850, %v14073_v2   ;;  %v3496_v54 = vadd.f32 %v3418_v0, %v2786_v38  ;;  %v13995_v0 = vld [vmem:[%s17141_s8 + $0x3c3] ss:$2 sm:$0xff] }
 0x228   : > { %v3497_v2 = vadd.f32 %v3419_v58, %v2787_v62 }
 0x229   : > { %v18167_v30 = vpop.permute.xlu1 %3247  ;;  %v4206_v14 = vadd.f32 %v4128_v53, %v3496_v54  ;;  %v14022_v54 = vld [vmem:[%s17141_s8 + $0x74] ss:$2 sm:$0xff] }
 0x22a   : > { %v18173_v48 = vpop.permute.xlu0 %3242  ;;  %4417 = vperm.xlu1 %16851, %v14100_v19   ;;  %v13837_v19 = vld [vmem:[%s17141_s8 + $0x3e1] ss:$2 sm:$0xff]  ;;  %v4207_v28 = vadd.f32 %v4129_v6, %v3497_v2 }
 0x22b   : > { %4412 = vperm.xlu0 %16850, %v14099_v43  }
 0x22d   : > { %v18185_v47 = vpop.permute.xlu1 %3687 }
 0x22e   : > { %v18188_v33 = vpop.permute.xlu0 %3682  ;;  %1235 = vperm.xlu1 %16851, %v13759_v24  }
 0x22f   : > { %1230 = vperm.xlu0 %16850, %v13758_v52   ;;  %v13996_v52 = vld [vmem:[%s17141_s8 + $0x3d3] ss:$2 sm:$0xff] }
 0x231   : > { %v4658_v43 = vpop.permute.xlu1 %4657 }
 0x232   : > { %v4839_v41 = vmul.f32 %v17823_v7, %v4658_v43  ;;  %v4653_v18 = vpop.permute.xlu0 %4652  ;;  %1867 = vperm.xlu1 %16851, %v13838_v51  }
 0x233   : > { %v4838_v32 = vmul.f32 %v17823_v7, %v4653_v18  ;;  %1862 = vperm.xlu0 %16850, %v13837_v19  }
 0x234   : > { %v4917_v5 = vadd.f32 %v4839_v41, %v4207_v28  ;;  %v14021_v28 = vld [vmem:[%s17141_s8 + $0x64] ss:$2 sm:$0xff] }
 0x235   : > { %v4916_v34 = vadd.f32 %v4838_v32, %v4206_v14  ;;  %v18197_v12 = vpop.permute.xlu1 %945  ;;  %v14154_v32 = vld [vmem:[%s17141_s8 + $0x3b5] ss:$2 sm:$0xff] }
 0x236   : > { %v5002_v24 = vadd.f32 %v17834_v20, %v4917_v5  ;;  %v18200_v61 = vpop.permute.xlu0 %940  ;;  %2307 = vperm.xlu1 %16851, %v13864_v25   ;;  %v1947_v25 = vmul.f32 %v17784_v27, %v18033_v13  ;;  %v14153_v5 = vld [vmem:[%s17141_s8 + $0x3a5] ss:$2 sm:$0xff] }
 0x237   : > { %v5001_v58 = vadd.f32 %v17834_v20, %v4916_v34  ;;  %2302 = vperm.xlu0 %16850, %v13863_v57   ;;  %v1946_v57 = vmul.f32 %v17784_v27, %v18036_v9 }
 0x238   : > { %v5080_v63 = vmax.f32 %v5002_v24, 0.0  ;;  %v18234_v24 = vld [vmem:[%s21794_s9] ss:$0 sm:$0xff] }
 0x239   : > { %v5079_v62 = vmax.f32 %v5001_v58, 0.0  ;;  %v18205_v6 = vpop.f32.mrb[10].mxu1  ;;  %v18207_v38 = vpop.permute.xlu1 %1577  ;;  %v1315_v58 = vmul.f32 %v18234_v24, %v18025_v40  ;;  %v1314_v27 = vmul.f32 %v18234_v24, %v18028_v31 }
 0x23a   : > { %21801 = vst [vmem:[#allocation15_spill] sm:$0xff] %v18205_v6  ;;  %v5165_v53 = vmul.f32 %v17845_v15, %v5080_v63  ;;  %v18210_v51 = vpop.permute.xlu0 %1572  ;;  %v15324_v2 = vpop.f32.mrb[11].mxu1  ;;  %3277 = vperm.xlu1 %16851, %v13996_v52   ;;  %v18241_v52 = vld [vmem:[%s21794_s9 + $0x2] ss:$0 sm:$0xff] }
 0x23b   : > { %v5164_v19 = vmul.f32 %v17845_v15, %v5079_v62  ;;  %3272 = vperm.xlu0 %16850, %v13995_v0   ;;  %v2657_v13 = vmul.f32 %v18241_v52, %v18074_v16  ;;  %v2656_v9 = vmul.f32 %v18241_v52, %v18080_v35  ;;  %v13707_v0 = vld [vmem:[%s17141_s8 + $0xb0] ss:$2 sm:$0xff]  ;;  %v2025_v40 = vadd.f32 %v1947_v25, %v1315_v58  ;;  %v18255_v62 = vld [vmem:[%s21794_s9 + $0x3] ss:$0 sm:$0xff] }
 0x23c   : > { %v5250_v43 = vadd.f32 %v17853_v22, %v5165_v53  ;;  %v3367_v16 = vmul.f32 %v18255_v62, %v18132_v4  ;;  %v13706_v53 = vld [vmem:[%s17141_s8 + $0xa0] ss:$2 sm:$0xff]  ;;  %v2024_v2 = vadd.f32 %v1946_v57, %v1314_v27  ;;  %v3366_v31 = vmul.f32 %v18255_v62, %v18134_v60  ;;  %v13786_v60 = vld [vmem:[%s17141_s8 + $0xb1] ss:$2 sm:$0xff] }
 0x23d   : > { %v5249_v41 = vadd.f32 %v17853_v22, %v5164_v19  ;;  %v18217_v18 = vpop.permute.xlu1 %2547  ;;  %v2735_v35 = vadd.f32 %v2657_v13, %v2025_v40 }
 0x23e   : > { %5329 = vst.msk [vmem:[#allocation2 + $0x1a8] sm:$0xff] %vm5275_vm2, %v5250_v43  ;;  %v18220_v14 = vpop.permute.xlu0 %2542  ;;  %3717 = vperm.xlu1 %16851, %v14022_v54   ;;  %v18267_v54 = vld [vmem:[%s21794_s9 + $0x4] ss:$0 sm:$0xff] }
 0x23f   : > { %5328 = vst.msk [vmem:[#allocation2 + $0x1a0] sm:$0xff] %vm5275_vm2, %v5249_v41  ;;  %3712 = vperm.xlu0 %16850, %v14021_v28   ;;  %v4077_v43 = vmul.f32 %v18267_v54, %v18185_v47  ;;  %v2734_v41 = vadd.f32 %v2656_v9, %v2024_v2  ;;  %v3445_v25 = vadd.f32 %v3367_v16, %v2735_v35  ;;  %v13917_v16 = vld [vmem:[%s17141_s8 + $0x3e2] ss:$2 sm:$0xff] }
 0x241   : > { %v18229_v34 = vpop.permute.xlu1 %2987  ;;  %v3444_v47 = vadd.f32 %v3366_v31, %v2734_v41  ;;  %v4155_v58 = vadd.f32 %v4077_v43, %v3445_v25 }
 0x242   : > { %v18245_v63 = vpop.permute.xlu0 %2982  ;;  %4687 = vperm.xlu1 %16851, %v14154_v32   ;;  %v4076_v32 = vmul.f32 %v18267_v54, %v18188_v33 }
 0x243   : > { %4682 = vperm.xlu0 %16850, %v14153_v5   ;;  %v13785_v5 = vld [vmem:[%s17141_s8 + $0xa1] ss:$2 sm:$0xff] }
 0x244   : > { %v4154_v33 = vadd.f32 %v4076_v32, %v3444_v47 }
 0x245   : > { %v18262_v19 = vpop.permute.xlu1 %3957 }
 0x246   : > { %v18271_v28 = vpop.permute.xlu0 %3952  ;;  %975 = vperm.xlu1 %16851, %v13707_v0   ;;  %v5486_v4 = vld [vmem:[#allocation2 + $0x1a1] ss:$2 sm:$0xff]  ;;  %v13918_v0 = vld [vmem:[%s17141_s8 + $0x3f2] ss:$2 sm:$0xff] }
 0x247   : > { %970 = vperm.xlu0 %16850, %v13706_v53   ;;  %15347 = vmatmul.mubr.msk.f32.gmra.mrb[26].mxu1 %vm5275_vm2, %v5486_v4  ;;  %v13944_v4 = vld [vmem:[%s17141_s8 + $0x93] ss:$2 sm:$0xff] }
 0x248   : > { %15349 = vmatprep.mubr.msk.f32.mxu1 %vm16954_vm1, %v21767_v36 }
 0x249   : > { %v4398_v57 = vpop.permute.xlu1 %4397 }
 0x24a   : > { %v4787_v13 = vmul.f32 %v17823_v7, %v4398_v57  ;;  %v4393_v27 = vpop.permute.xlu0 %4392  ;;  %1607 = vperm.xlu1 %16851, %v13786_v60  }
 0x24b   : > { %v4786_v9 = vmul.f32 %v17823_v7, %v4393_v27  ;;  %1602 = vperm.xlu0 %16850, %v13785_v5   ;;  %v13943_v7 = vld [vmem:[%s17141_s8 + $0x83] ss:$2 sm:$0xff]  ;;  %v14075_v27 = vld [vmem:[%s17141_s8 + $0x3c4] ss:$2 sm:$0xff] }
 0x24c   : > { %v4865_v40 = vadd.f32 %v4787_v13, %v4155_v58  ;;  %v14076_v58 = vld [vmem:[%s17141_s8 + $0x3d4] ss:$2 sm:$0xff] }
 0x24d   : > { %v4864_v53 = vadd.f32 %v4786_v9, %v4154_v33  ;;  %v18284_v2 = vpop.permute.xlu1 %1215 }
 0x24e   : > { %v4950_v31 = vadd.f32 %v17834_v20, %v4865_v40  ;;  %v18287_v35 = vpop.permute.xlu0 %1210  ;;  %2577 = vperm.xlu1 %16851, %v13918_v0   ;;  %v18314_v40 = vld [vmem:[%s21794_s9 + $0x1] ss:$0 sm:$0xff] }
 0x24f   : > { %v4949_v43 = vadd.f32 %v17834_v20, %v4864_v53  ;;  %2572 = vperm.xlu0 %16850, %v13917_v16   ;;  %v14101_v16 = vld [vmem:[%s17141_s8 + $0x65] ss:$2 sm:$0xff]  ;;  %v2000_v53 = vmul.f32 %v18314_v40, %v18066_v17 }
 0x250   : > { %v5028_v41 = vmax.f32 %v4950_v31, 0.0 }
 0x251   : > { %v5027_v32 = vmax.f32 %v4949_v43, 0.0  ;;  %v18292_v60 = vpop.permute.xlu1 %1847  ;;  %v18295_v5 = vpop.f32.mrb[12].mxu1  ;;  %v1369_v43 = vmul.f32 %v18234_v24, %v18055_v8  ;;  %v13760_v8 = vld [vmem:[%s17141_s8 + $0x400] ss:$2 sm:$0xff] }
 0x252   : > { %v5113_v25 = vmul.f32 %v17845_v15, %v5028_v41  ;;  %21802 = vst [vmem:[#allocation16_spill] sm:$0xff] %v18295_v5  ;;  %v18297_v47 = vpop.permute.xlu0 %1842  ;;  %3017 = vperm.xlu1 %16851, %v13944_v4   ;;  %v15327_v20 = vpop.f32.mrb[13].mxu1  ;;  %v2711_v4 = vmul.f32 %v18241_v52, %v18124_v29  ;;  %v3420_v29 = vmul.f32 %v18255_v62, %v18173_v48 }
 0x253   : > { %v5112_v57 = vmul.f32 %v17845_v15, %v5027_v32  ;;  %3012 = vperm.xlu0 %16850, %v13943_v7   ;;  %v14102_v15 = vld [vmem:[%s17141_s8 + $0x75] ss:$2 sm:$0xff]  ;;  %v1368_v7 = vmul.f32 %v18234_v24, %v18057_v37  ;;  %v13761_v32 = vld [vmem:[%s17141_s8 + $0x410] ss:$2 sm:$0xff]  ;;  %v4131_v37 = vmul.f32 %v18267_v54, %v18262_v19 }
 0x254   : > { %v5198_v13 = vadd.f32 %v17853_v22, %v5113_v25  ;;  %v3421_v25 = vmul.f32 %v18255_v62, %v18167_v30  ;;  %v4130_v30 = vmul.f32 %v18267_v54, %v18271_v28 }
 0x255   : > { %v5197_v33 = vadd.f32 %v17853_v22, %v5112_v57  ;;  %v18304_v9 = vpop.permute.xlu1 %2287  ;;  %v2001_v22 = vmul.f32 %v18314_v40, %v18064_v3  ;;  %v2710_v3 = vmul.f32 %v18241_v52, %v18127_v21  ;;  %v2078_v57 = vadd.f32 %v2000_v53, %v1368_v7  ;;  %v18355_v53 = vld [vmem:[%s21794_s9 + $0x5] ss:$0 sm:$0xff] }
 0x256   : > { %5277 = vst.msk [vmem:[#allocation2 + $0x8] sm:$0xff] %vm5275_vm2, %v5198_v13  ;;  %v18307_v0 = vpop.permute.xlu0 %2282  ;;  %3987 = vperm.xlu1 %16851, %v14076_v58  }
 0x257   : > { %5276 = vst.msk [vmem:[#allocation2] sm:$0xff] %vm5275_vm2, %v5197_v33  ;;  %3982 = vperm.xlu0 %16850, %v14075_v27   ;;  %v2079_v17 = vadd.f32 %v2001_v22, %v1369_v43  ;;  %v2788_v27 = vadd.f32 %v2710_v3, %v2078_v57  ;;  %v13840_v33 = vld [vmem:[%s17141_s8 + $0x411] ss:$2 sm:$0xff]  ;;  %v13866_v3 = vld [vmem:[%s17141_s8 + $0xb2] ss:$2 sm:$0xff] }
 0x258   : > { %v18366_v57 = vld [vmem:[%s21796_s26] ss:$0 sm:$0xff] }
 0x259   : > { %v18321_v31 = vpop.permute.xlu1 %3257  ;;  %v2789_v58 = vadd.f32 %v2711_v4, %v2079_v17  ;;  %v3498_v19 = vadd.f32 %v3420_v29, %v2788_v27  ;;  %v13865_v17 = vld [vmem:[%s17141_s8 + $0xa2] ss:$2 sm:$0xff] }
 0x25a   : > { %v18327_v41 = vpop.permute.xlu0 %3252  ;;  %4427 = vperm.xlu1 %16851, %v14102_v15   ;;  %v13839_v15 = vld [vmem:[%s17141_s8 + $0x401] ss:$2 sm:$0xff] }
 0x25b   : > { %4422 = vperm.xlu0 %16850, %v14101_v16   ;;  %v3499_v48 = vadd.f32 %v3421_v25, %v2789_v58  ;;  %v4208_v4 = vadd.f32 %v4130_v30, %v3498_v19  ;;  %v13997_v30 = vld [vmem:[%s17141_s8 + $0x3e3] ss:$2 sm:$0xff] }
 0x25d   : > { %v18339_v20 = vpop.permute.xlu1 %3697  ;;  %v4209_v16 = vadd.f32 %v4131_v37, %v3499_v48 }
 0x25e   : > { %v18343_v21 = vpop.permute.xlu0 %3692  ;;  %1245 = vperm.xlu1 %16851, %v13761_v32   ;;  %v5434_v13 = vld [vmem:[#allocation2 + $0x1] ss:$2 sm:$0xff] }
 0x25f   : > { %1240 = vperm.xlu0 %16850, %v13760_v8   ;;  %15269 = vmatmul.mubr.msk.f32.vlgmr.msra.gmra.mrb[0].mxu0 %vm5275_vm2, %v5434_v13  ;;  %v13998_v13 = vld [vmem:[%s17141_s8 + $0x3f3] ss:$2 sm:$0xff] }
 0x260   : > { %15271 = vmatprep.mubr.msk.f32.mxu0 %vm16954_vm1, %v21767_v36 }
 0x261   : > { %v4668_v22 = vpop.permute.xlu1 %4667 }
 0x262   : > { %v4841_v28 = vmul.f32 %v18355_v53, %v4668_v22  ;;  %v4663_v43 = vpop.permute.xlu0 %4662  ;;  %1877 = vperm.xlu1 %16851, %v13840_v33  }
 0x263   : > { %v4840_v7 = vmul.f32 %v18355_v53, %v4663_v43  ;;  %1872 = vperm.xlu0 %16850, %v13839_v15   ;;  %v18379_v15 = vld [vmem:[%s21797_s27] ss:$0 sm:$0xff] }
 0x264   : > { %v4919_v32 = vadd.f32 %v4841_v28, %v4209_v16 }
 0x265   : > { %v4918_v25 = vadd.f32 %v4840_v7, %v4208_v4  ;;  %v18361_v8 = vpop.permute.xlu1 %955  ;;  %v14024_v4 = vld [vmem:[%s17141_s8 + $0x94] ss:$2 sm:$0xff] }
 0x266   : > { %v5004_v29 = vadd.f32 %v18366_v57, %v4919_v32  ;;  %v18369_v58 = vpop.permute.xlu0 %950  ;;  %2317 = vperm.xlu1 %16851, %v13866_v3   ;;  %v18391_v7 = vld [vmem:[%s21798_s28] ss:$0 sm:$0xff]  ;;  %v14023_v32 = vld [vmem:[%s17141_s8 + $0x84] ss:$2 sm:$0xff] }
 0x267   : > { %v5003_v37 = vadd.f32 %v18366_v57, %v4918_v25  ;;  %2312 = vperm.xlu0 %16850, %v13865_v17  }
 0x268   : > { %v5082_v27 = vmax.f32 %v5004_v29, 0.0 }
 0x269   : > { %v5081_v33 = vmax.f32 %v5003_v37, 0.0  ;;  %v18374_v48 = vpop.permute.xlu1 %1587  ;;  %v14156_v37 = vld [vmem:[%s17141_s8 + $0x3d5] ss:$2 sm:$0xff] }
 0x26a   : > { %v5167_v19 = vmul.f32 %v18379_v15, %v5082_v27  ;;  %v18382_v22 = vpop.f32.mrb[14].mxu1  ;;  %v18384_v16 = vpop.permute.xlu0 %1582  ;;  %3287 = vperm.xlu1 %16851, %v13998_v13   ;;  %v1949_v13 = vmul.f32 %v18314_v40, %v18114_v26  ;;  %v14155_v27 = vld [vmem:[%s17141_s8 + $0x3c5] ss:$2 sm:$0xff]  ;;  %v2658_v26 = vmul.f32 %v18241_v52, %v18159_v55 }
 0x26b   : > { %21803 = vst [vmem:[#allocation17_spill] sm:$0xff] %v18382_v22  ;;  %v5166_v28 = vmul.f32 %v18379_v15, %v5081_v33  ;;  %v15330_v43 = vpop.f32.mrb[15].mxu1  ;;  %3282 = vperm.xlu0 %16850, %v13997_v30   ;;  %v1948_v30 = vmul.f32 %v18314_v40, %v18117_v46 }
 0x26c   : > { %v5252_v3 = vadd.f32 %v18391_v7, %v5167_v19  ;;  %v1317_v19 = vmul.f32 %v18234_v24, %v18106_v49  ;;  %v13708_v49 = vld [vmem:[%s17141_s8 + $0xc0] ss:$2 sm:$0xff] }
 0x26d   : > { %v5251_v17 = vadd.f32 %v18391_v7, %v5166_v28  ;;  %v18396_v25 = vpop.permute.xlu1 %2557  ;;  %v2659_v28 = vmul.f32 %v18241_v52, %v18157_v59  ;;  %v3368_v59 = vmul.f32 %v18255_v62, %v18245_v63  ;;  %v13788_v63 = vld [vmem:[%s17141_s8 + $0xd1] ss:$2 sm:$0xff] }
 0x26e   : > { %5331 = vst.msk [vmem:[#allocation2 + $0x1b8] sm:$0xff] %vm5275_vm2, %v5252_v3  ;;  %v18399_v29 = vpop.permute.xlu0 %2552  ;;  %3727 = vperm.xlu1 %16851, %v14024_v4   ;;  %v1316_v4 = vmul.f32 %v18234_v24, %v18109_v44  ;;  %v13709_v3 = vld [vmem:[%s17141_s8 + $0xd0] ss:$2 sm:$0xff]  ;;  %v2027_v46 = vadd.f32 %v1949_v13, %v1317_v19  ;;  %v4079_v44 = vmul.f32 %v18267_v54, %v18339_v20  ;;  %v13787_v19 = vld [vmem:[%s17141_s8 + $0xc1] ss:$2 sm:$0xff] }
 0x26f   : > { %5330 = vst.msk [vmem:[#allocation2 + $0x1b0] sm:$0xff] %vm5275_vm2, %v5251_v17  ;;  %3722 = vperm.xlu0 %16850, %v14023_v32   ;;  %v3369_v32 = vmul.f32 %v18255_v62, %v18229_v34  ;;  %v4078_v34 = vmul.f32 %v18267_v54, %v18343_v21 }
 0x270   : > { %v2026_v17 = vadd.f32 %v1948_v30, %v1316_v4  ;;  %v2737_v36 = vadd.f32 %v2659_v28, %v2027_v46  ;;  %v21804_v28 = vmov 0.0  }
 0x271   : > { %v18408_v33 = vpop.permute.xlu1 %2997 }
 0x272   : > { %v18414_v43 = vpop.permute.xlu0 %2992  ;;  %4697 = vperm.xlu1 %16851, %v14156_v37   ;;  %v2736_v13 = vadd.f32 %v2658_v26, %v2026_v17  ;;  %v3447_v30 = vadd.f32 %v3369_v32, %v2737_v36  ;;  %v13920_v17 = vld [vmem:[%s17141_s8 + $0x412] ss:$2 sm:$0xff]  ;;  %v13919_v36 = vld [vmem:[%s17141_s8 + $0x402] ss:$2 sm:$0xff] }
 0x273   : > { %4692 = vperm.xlu0 %16850, %v14155_v27  }
 0x274   : > { %v3446_v20 = vadd.f32 %v3368_v59, %v2736_v13  ;;  %v4157_v46 = vadd.f32 %v4079_v44, %v3447_v30  ;;  %v13945_v30 = vld [vmem:[%s17141_s8 + $0xa3] ss:$2 sm:$0xff] }
 0x275   : > { %v18426_v37 = vpop.permute.xlu1 %3967 }
 0x276   : > { %v18430_v55 = vpop.permute.xlu0 %3962  ;;  %985 = vperm.xlu1 %16851, %v13709_v3   ;;  %v5488_v27 = vld [vmem:[#allocation2 + $0x1b1] ss:$2 sm:$0xff]  ;;  %v4156_v21 = vadd.f32 %v4078_v34, %v3446_v20 }
 0x277   : > { %980 = vperm.xlu0 %16850, %v13708_v49   ;;  %15350 = vmatmul.mubr.msk.f32.gmra.mrb[28].mxu1 %vm5275_vm2, %v5488_v27  ;;  %v13946_v34 = vld [vmem:[%s17141_s8 + $0xb3] ss:$2 sm:$0xff] }
 0x278   : > { %15352 = vmatprep.mubr.msk.f32.mxu1 %vm16954_vm1, %v21804_v28 }
 0x279   : > { %v4408_v4 = vpop.permute.xlu1 %4407 }
 0x27a   : > { %v4789_v3 = vmul.f32 %v18355_v53, %v4408_v4  ;;  %v4403_v26 = vpop.permute.xlu0 %4402  ;;  %1617 = vperm.xlu1 %16851, %v13788_v63  }
 0x27b   : > { %v4788_v49 = vmul.f32 %v18355_v53, %v4403_v26  ;;  %1612 = vperm.xlu0 %16850, %v13787_v19  }
 0x27c   : > { %v4867_v27 = vadd.f32 %v4789_v3, %v4157_v46 }
 0x27d   : > { %v4866_v32 = vadd.f32 %v4788_v49, %v4156_v21  ;;  %v18443_v22 = vpop.permute.xlu1 %1225  ;;  %v14078_v49 = vld [vmem:[%s17141_s8 + $0x3f4] ss:$2 sm:$0xff] }
 0x27e   : > { %v4952_v59 = vadd.f32 %v18366_v57, %v4867_v27  ;;  %v18446_v13 = vpop.permute.xlu0 %1220  ;;  %2587 = vperm.xlu1 %16851, %v13920_v17   ;;  %v14077_v27 = vld [vmem:[%s17141_s8 + $0x3e4] ss:$2 sm:$0xff] }
 0x27f   : > { %v4951_v44 = vadd.f32 %v18366_v57, %v4866_v32  ;;  %2582 = vperm.xlu0 %16850, %v13919_v36  }
 0x280   : > { %v5030_v63 = vmax.f32 %v4952_v59, 0.0 }
 0x281   : > { %v5029_v19 = vmax.f32 %v4951_v44, 0.0  ;;  %v18451_v20 = vpop.permute.xlu1 %1857  ;;  %v14104_v44 = vld [vmem:[%s17141_s8 + $0x95] ss:$2 sm:$0xff] }
 0x282   : > { %v5115_v4 = vmul.f32 %v18379_v15, %v5030_v63  ;;  %v18454_v46 = vpop.f32.mrb[16].mxu1  ;;  %v18456_v3 = vpop.permute.xlu0 %1852  ;;  %3027 = vperm.xlu1 %16851, %v13946_v34   ;;  %v2003_v34 = vmul.f32 %v18314_v40, %v18151_v56  ;;  %v14103_v63 = vld [vmem:[%s17141_s8 + $0x85] ss:$2 sm:$0xff]  ;;  %v2712_v56 = vmul.f32 %v18241_v52, %v18220_v14 }
 0x283   : > { %21805 = vst [vmem:[#allocation18_spill] sm:$0xff] %v18454_v46  ;;  %v5114_v26 = vmul.f32 %v18379_v15, %v5029_v19  ;;  %v15333_v21 = vpop.f32.mrb[17].mxu1  ;;  %3022 = vperm.xlu0 %16850, %v13945_v30   ;;  %v2002_v30 = vmul.f32 %v18314_v40, %v18153_v50 }
 0x284   : > { %v5200_v17 = vadd.f32 %v18391_v7, %v5115_v4  ;;  %v1371_v4 = vmul.f32 %v18234_v24, %v18143_v1  ;;  %v13762_v1 = vld [vmem:[%s17141_s8 + $0x420] ss:$2 sm:$0xff] }
 0x285   : > { %v5199_v36 = vadd.f32 %v18391_v7, %v5114_v26  ;;  %v18463_v32 = vpop.permute.xlu1 %2297  ;;  %v2713_v26 = vmul.f32 %v18241_v52, %v18217_v18  ;;  %v3422_v18 = vmul.f32 %v18255_v62, %v18327_v41  ;;  %v13842_v41 = vld [vmem:[%s17141_s8 + $0x431] ss:$2 sm:$0xff] }
 0x286   : > { %5279 = vst.msk [vmem:[#allocation2 + $0x18] sm:$0xff] %vm5275_vm2, %v5200_v17  ;;  %v18466_v59 = vpop.permute.xlu0 %2292  ;;  %3997 = vperm.xlu1 %16851, %v14078_v49   ;;  %v1370_v49 = vmul.f32 %v18234_v24, %v18145_v42  ;;  %v13763_v17 = vld [vmem:[%s17141_s8 + $0x430] ss:$2 sm:$0xff]  ;;  %v2081_v50 = vadd.f32 %v2003_v34, %v1371_v4  ;;  %v4133_v42 = vmul.f32 %v18267_v54, %v18426_v37  ;;  %v13841_v4 = vld [vmem:[%s17141_s8 + $0x421] ss:$2 sm:$0xff] }
 0x287   : > { %5278 = vst.msk [vmem:[#allocation2 + $0x10] sm:$0xff] %vm5275_vm2, %v5199_v36  ;;  %3992 = vperm.xlu0 %16850, %v14077_v27   ;;  %v3423_v27 = vmul.f32 %v18255_v62, %v18321_v31  ;;  %v4132_v31 = vmul.f32 %v18267_v54, %v18430_v55 }
 0x288   : > { %v2080_v36 = vadd.f32 %v2002_v30, %v1370_v49  ;;  %v2791_v46 = vadd.f32 %v2713_v26, %v2081_v50 }
 0x289   : > { %v18475_v19 = vpop.permute.xlu1 %3267 }
 0x28a   : > { %v18481_v21 = vpop.permute.xlu0 %3262  ;;  %4437 = vperm.xlu1 %16851, %v14104_v44   ;;  %v2790_v34 = vadd.f32 %v2712_v56, %v2080_v36  ;;  %v3501_v30 = vadd.f32 %v3423_v27, %v2791_v46  ;;  %v13867_v46 = vld [vmem:[%s17141_s8 + $0xc2] ss:$2 sm:$0xff] }
 0x28b   : > { %4432 = vperm.xlu0 %16850, %v14103_v63  }
 0x28c   : > { %v3500_v37 = vadd.f32 %v3422_v18, %v2790_v34  ;;  %v4211_v49 = vadd.f32 %v4133_v42, %v3501_v30  ;;  %v13999_v30 = vld [vmem:[%s17141_s8 + $0x403] ss:$2 sm:$0xff] }
 0x28d   : > { %v18493_v44 = vpop.permute.xlu1 %3707 }
 0x28e   : > { %v18497_v14 = vpop.permute.xlu0 %3702  ;;  %1255 = vperm.xlu1 %16851, %v13763_v17   ;;  %v5436_v63 = vld [vmem:[#allocation2 + $0x11] ss:$2 sm:$0xff]  ;;  %v4210_v55 = vadd.f32 %v4132_v31, %v3500_v37 }
 0x28f   : > { %1250 = vperm.xlu0 %16850, %v13762_v1   ;;  %15272 = vmatmul.mubr.msk.f32.gmra.mrb[2].mxu0 %vm5275_vm2, %v5436_v63  ;;  %v13868_v1 = vld [vmem:[%s17141_s8 + $0xd2] ss:$2 sm:$0xff]  ;;  %v14000_v31 = vld [vmem:[%s17141_s8 + $0x413] ss:$2 sm:$0xff] }
 0x290   : > { %15274 = vmatprep.mubr.msk.f32.mxu0 %vm16954_vm1, %v21804_v28 }
 0x291   : > { %v4678_v26 = vpop.permute.xlu1 %4677 }
 0x292   : > { %v4843_v17 = vmul.f32 %v18355_v53, %v4678_v26  ;;  %v4673_v56 = vpop.permute.xlu0 %4672  ;;  %1887 = vperm.xlu1 %16851, %v13842_v41  }
 0x293   : > { %v4842_v50 = vmul.f32 %v18355_v53, %v4673_v56  ;;  %1882 = vperm.xlu0 %16850, %v13841_v4  }
 0x294   : > { %v4921_v36 = vadd.f32 %v4843_v17, %v4211_v49 }
 0x295   : > { %v4920_v27 = vadd.f32 %v4842_v50, %v4210_v55  ;;  %v18510_v63 = vpop.permute.xlu1 %965  ;;  %v14026_v50 = vld [vmem:[%s17141_s8 + $0xb4] ss:$2 sm:$0xff] }
 0x296   : > { %v5006_v18 = vadd.f32 %v18366_v57, %v4921_v36  ;;  %v18513_v34 = vpop.permute.xlu0 %960  ;;  %2327 = vperm.xlu1 %16851, %v13868_v1   ;;  %v14025_v36 = vld [vmem:[%s17141_s8 + $0xa4] ss:$2 sm:$0xff] }
 0x297   : > { %v5005_v42 = vadd.f32 %v18366_v57, %v4920_v27  ;;  %2322 = vperm.xlu0 %16850, %v13867_v46  }
 0x298   : > { %v5084_v41 = vmax.f32 %v5006_v18, 0.0 }
 0x299   : > { %v5083_v4 = vmax.f32 %v5005_v42, 0.0  ;;  %v18518_v37 = vpop.permute.xlu1 %1597  ;;  %v14158_v42 = vld [vmem:[%s17141_s8 + $0x3f5] ss:$2 sm:$0xff] }
 0x29a   : > { %v5169_v26 = vmul.f32 %v18379_v15, %v5084_v41  ;;  %v18521_v49 = vpop.f32.mrb[18].mxu1  ;;  %v18523_v17 = vpop.permute.xlu0 %1592  ;;  %3297 = vperm.xlu1 %16851, %v14000_v31   ;;  %v1951_v31 = vmul.f32 %v18314_v40, %v18207_v38  ;;  %v14157_v41 = vld [vmem:[%s17141_s8 + $0x3e5] ss:$2 sm:$0xff]  ;;  %v2660_v38 = vmul.f32 %v18241_v52, %v18307_v0 }
 0x29b   : > { %21806 = vst [vmem:[#allocation19_spill] sm:$0xff] %v18521_v49  ;;  %v5168_v56 = vmul.f32 %v18379_v15, %v5083_v4  ;;  %v15336_v55 = vpop.f32.mrb[19].mxu1  ;;  %3292 = vperm.xlu0 %16850, %v13999_v30   ;;  %v1950_v30 = vmul.f32 %v18314_v40, %v18210_v51 }
 0x29c   : > { %v5254_v1 = vadd.f32 %v18391_v7, %v5169_v26  ;;  %v1319_v26 = vmul.f32 %v18234_v24, %v18197_v12  ;;  %v13710_v12 = vld [vmem:[%s17141_s8 + $0xe0] ss:$2 sm:$0xff] }
 0x29d   : > { %v5253_v46 = vadd.f32 %v18391_v7, %v5168_v56  ;;  %v18530_v27 = vpop.permute.xlu1 %2567  ;;  %v2661_v56 = vmul.f32 %v18241_v52, %v18304_v9  ;;  %v3370_v9 = vmul.f32 %v18255_v62, %v18414_v43  ;;  %v13790_v43 = vld [vmem:[%s17141_s8 + $0xf1] ss:$2 sm:$0xff] }
 0x29e   : > { %5333 = vst.msk [vmem:[#allocation2 + $0x1c8] sm:$0xff] %vm5275_vm2, %v5254_v1  ;;  %v18533_v18 = vpop.permute.xlu0 %2562  ;;  %3737 = vperm.xlu1 %16851, %v14026_v50   ;;  %v1318_v50 = vmul.f32 %v18234_v24, %v18200_v61  ;;  %v13711_v1 = vld [vmem:[%s17141_s8 + $0xf0] ss:$2 sm:$0xff]  ;;  %v2029_v51 = vadd.f32 %v1951_v31, %v1319_v26  ;;  %v4081_v61 = vmul.f32 %v18267_v54, %v18493_v44  ;;  %v13789_v26 = vld [vmem:[%s17141_s8 + $0xe1] ss:$2 sm:$0xff] }
 0x29f   : > { %5332 = vst.msk [vmem:[#allocation2 + $0x1c0] sm:$0xff] %vm5275_vm2, %v5253_v46  ;;  %3732 = vperm.xlu0 %16850, %v14025_v36   ;;  %v3371_v36 = vmul.f32 %v18255_v62, %v18408_v33  ;;  %v4080_v33 = vmul.f32 %v18267_v54, %v18497_v14 }
 0x2a0   : > { %v2028_v46 = vadd.f32 %v1950_v30, %v1318_v50  ;;  %v2739_v49 = vadd.f32 %v2661_v56, %v2029_v51 }
 0x2a1   : > { %v18542_v4 = vpop.permute.xlu1 %3007 }
 0x2a2   : > { %v18548_v55 = vpop.permute.xlu0 %3002  ;;  %4707 = vperm.xlu1 %16851, %v14158_v42   ;;  %v2738_v31 = vadd.f32 %v2660_v38, %v2028_v46  ;;  %v3449_v30 = vadd.f32 %v3371_v36, %v2739_v49  ;;  %v13921_v49 = vld [vmem:[%s17141_s8 + $0x422] ss:$2 sm:$0xff] }
 0x2a3   : > { %4702 = vperm.xlu0 %16850, %v14157_v41  }
 0x2a4   : > { %v3448_v44 = vadd.f32 %v3370_v9, %v2738_v31  ;;  %v4159_v50 = vadd.f32 %v4081_v61, %v3449_v30  ;;  %v13947_v30 = vld [vmem:[%s17141_s8 + $0xc3] ss:$2 sm:$0xff] }
 0x2a5   : > { %v18560_v42 = vpop.permute.xlu1 %3977 }
 0x2a6   : > { %v18564_v0 = vpop.permute.xlu0 %3972  ;;  %995 = vperm.xlu1 %16851, %v13711_v1   ;;  %v5490_v41 = vld [vmem:[#allocation2 + $0x1c1] ss:$2 sm:$0xff]  ;;  %v4158_v14 = vadd.f32 %v4080_v33, %v3448_v44 }
 0x2a7   : > { %990 = vperm.xlu0 %16850, %v13710_v12   ;;  %15353 = vmatmul.mubr.msk.f32.gmra.mrb[30].mxu1 %vm5275_vm2, %v5490_v41  ;;  %v13922_v12 = vld [vmem:[%s17141_s8 + $0x432] ss:$2 sm:$0xff]  ;;  %v13948_v33 = vld [vmem:[%s17141_s8 + $0xd3] ss:$2 sm:$0xff] }
 0x2a8   : > { %15355 = vmatprep.mubr.msk.f32.mxu1 %vm16954_vm1, %v21804_v28 }
 0x2a9   : > { %v4418_v56 = vpop.permute.xlu1 %4417 }
 0x2aa   : > { %v4791_v1 = vmul.f32 %v18355_v53, %v4418_v56  ;;  %v4413_v38 = vpop.permute.xlu0 %4412  ;;  %1627 = vperm.xlu1 %16851, %v13790_v43  }
 0x2ab   : > { %v4790_v51 = vmul.f32 %v18355_v53, %v4413_v38  ;;  %1622 = vperm.xlu0 %16850, %v13789_v26  }
 0x2ac   : > { %v4869_v46 = vadd.f32 %v4791_v1, %v4159_v50 }
 0x2ad   : > { %v4868_v36 = vadd.f32 %v4790_v51, %v4158_v14  ;;  %v18577_v41 = vpop.permute.xlu1 %1235  ;;  %v14080_v51 = vld [vmem:[%s17141_s8 + $0x414] ss:$2 sm:$0xff] }
 0x2ae   : > { %v4954_v9 = vadd.f32 %v18366_v57, %v4869_v46  ;;  %v18580_v31 = vpop.permute.xlu0 %1230  ;;  %2597 = vperm.xlu1 %16851, %v13922_v12   ;;  %v14079_v46 = vld [vmem:[%s17141_s8 + $0x404] ss:$2 sm:$0xff] }
 0x2af   : > { %v4953_v61 = vadd.f32 %v18366_v57, %v4868_v36  ;;  %2592 = vperm.xlu0 %16850, %v13921_v49  }
 0x2b0   : > { %v5032_v43 = vmax.f32 %v4954_v9, 0.0 }
 0x2b1   : > { %v5031_v26 = vmax.f32 %v4953_v61, 0.0  ;;  %v18585_v44 = vpop.permute.xlu1 %1867  ;;  %v14106_v61 = vld [vmem:[%s17141_s8 + $0xb5] ss:$2 sm:$0xff] }
 0x2b2   : > { %v5117_v56 = vmul.f32 %v18379_v15, %v5032_v43  ;;  %v18588_v50 = vpop.f32.mrb[20].mxu1  ;;  %v18590_v1 = vpop.permute.xlu0 %1862  ;;  %3037 = vperm.xlu1 %16851, %v13948_v33   ;;  %v2005_v33 = vmul.f32 %v18314_v40, %v18292_v60  ;;  %v14105_v43 = vld [vmem:[%s17141_s8 + $0xa5] ss:$2 sm:$0xff]  ;;  %v2714_v60 = vmul.f32 %v18241_v52, %v18399_v29 }
 0x2b3   : > { %21807 = vst [vmem:[#allocation20_spill] sm:$0xff] %v18588_v50  ;;  %v5116_v38 = vmul.f32 %v18379_v15, %v5031_v26  ;;  %v15339_v14 = vpop.f32.mrb[21].mxu1  ;;  %3032 = vperm.xlu0 %16850, %v13947_v30   ;;  %v2004_v30 = vmul.f32 %v18314_v40, %v18297_v47 }
 0x2b4   : > { %v5202_v12 = vadd.f32 %v18391_v7, %v5117_v56  ;;  %v1373_v56 = vmul.f32 %v18234_v24, %v18284_v2  ;;  %v13764_v2 = vld [vmem:[%s17141_s8 + $0x440] ss:$2 sm:$0xff] }
 0x2b5   : > { %v5201_v49 = vadd.f32 %v18391_v7, %v5116_v38  ;;  %v18597_v36 = vpop.permute.xlu1 %2307  ;;  %v2715_v38 = vmul.f32 %v18241_v52, %v18396_v25  ;;  %v3424_v25 = vmul.f32 %v18255_v62, %v18481_v21  ;;  %v13844_v21 = vld [vmem:[%s17141_s8 + $0x451] ss:$2 sm:$0xff] }
 0x2b6   : > { %5281 = vst.msk [vmem:[#allocation2 + $0x28] sm:$0xff] %vm5275_vm2, %v5202_v12  ;;  %v18600_v9 = vpop.permute.xlu0 %2302  ;;  %4007 = vperm.xlu1 %16851, %v14080_v51   ;;  %v1372_v51 = vmul.f32 %v18234_v24, %v18287_v35  ;;  %v13765_v12 = vld [vmem:[%s17141_s8 + $0x450] ss:$2 sm:$0xff]  ;;  %v2083_v47 = vadd.f32 %v2005_v33, %v1373_v56  ;;  %v4135_v35 = vmul.f32 %v18267_v54, %v18560_v42  ;;  %v13843_v56 = vld [vmem:[%s17141_s8 + $0x441] ss:$2 sm:$0xff] }
 0x2b7   : > { %5280 = vst.msk [vmem:[#allocation2 + $0x20] sm:$0xff] %vm5275_vm2, %v5201_v49  ;;  %4002 = vperm.xlu0 %16850, %v14079_v46   ;;  %v3425_v46 = vmul.f32 %v18255_v62, %v18475_v19  ;;  %v4134_v19 = vmul.f32 %v18267_v54, %v18564_v0 }
 0x2b8   : > { %v2082_v49 = vadd.f32 %v2004_v30, %v1372_v51  ;;  %v2793_v50 = vadd.f32 %v2715_v38, %v2083_v47 }
 0x2b9   : > { %v18609_v26 = vpop.permute.xlu1 %3277 }
 0x2ba   : > { %v18615_v14 = vpop.permute.xlu0 %3272  ;;  %4447 = vperm.xlu1 %16851, %v14106_v61   ;;  %v2792_v33 = vadd.f32 %v2714_v60, %v2082_v49  ;;  %v3503_v30 = vadd.f32 %v3425_v46, %v2793_v50  ;;  %v13869_v50 = vld [vmem:[%s17141_s8 + $0xe2] ss:$2 sm:$0xff] }
 0x2bb   : > { %4442 = vperm.xlu0 %16850, %v14105_v43  }
 0x2bc   : > { %v3502_v42 = vadd.f32 %v3424_v25, %v2792_v33  ;;  %v4213_v51 = vadd.f32 %v4135_v35, %v3503_v30  ;;  %v14001_v30 = vld [vmem:[%s17141_s8 + $0x423] ss:$2 sm:$0xff] }
 0x2bd   : > { %v18627_v61 = vpop.permute.xlu1 %3717 }
 0x2be   : > { %v18631_v29 = vpop.permute.xlu0 %3712  ;;  %1265 = vperm.xlu1 %16851, %v13765_v12   ;;  %v5438_v43 = vld [vmem:[#allocation2 + $0x21] ss:$2 sm:$0xff]  ;;  %v4212_v0 = vadd.f32 %v4134_v19, %v3502_v42 }
 0x2bf   : > { %1260 = vperm.xlu0 %16850, %v13764_v2   ;;  %15275 = vmatmul.mubr.msk.f32.gmra.mrb[4].mxu0 %vm5275_vm2, %v5438_v43  ;;  %v13870_v2 = vld [vmem:[%s17141_s8 + $0xf2] ss:$2 sm:$0xff]  ;;  %v14002_v19 = vld [vmem:[%s17141_s8 + $0x433] ss:$2 sm:$0xff] }
 0x2c0   : > { %15277 = vmatprep.mubr.msk.f32.mxu0 %vm16954_vm1, %v21804_v28 }
 0x2c1   : > { %v4688_v38 = vpop.permute.xlu1 %4687 }
 0x2c2   : > { %v4845_v12 = vmul.f32 %v18355_v53, %v4688_v38  ;;  %v4683_v60 = vpop.permute.xlu0 %4682  ;;  %1897 = vperm.xlu1 %16851, %v13844_v21  }
 0x2c3   : > { %v4844_v47 = vmul.f32 %v18355_v53, %v4683_v60  ;;  %1892 = vperm.xlu0 %16850, %v13843_v56  }
 0x2c4   : > { %v4923_v49 = vadd.f32 %v4845_v12, %v4213_v51 }
 0x2c5   : > { %v4922_v46 = vadd.f32 %v4844_v47, %v4212_v0  ;;  %v18644_v43 = vpop.permute.xlu1 %975  ;;  %v14028_v47 = vld [vmem:[%s17141_s8 + $0xd4] ss:$2 sm:$0xff] }
 0x2c6   : > { %v5008_v25 = vadd.f32 %v18366_v57, %v4923_v49  ;;  %v18647_v33 = vpop.permute.xlu0 %970  ;;  %2337 = vperm.xlu1 %16851, %v13870_v2   ;;  %v14027_v49 = vld [vmem:[%s17141_s8 + $0xc4] ss:$2 sm:$0xff] }
 0x2c7   : > { %v5007_v35 = vadd.f32 %v18366_v57, %v4922_v46  ;;  %2332 = vperm.xlu0 %16850, %v13869_v50  }
 0x2c8   : > { %v5086_v21 = vmax.f32 %v5008_v25, 0.0 }
 0x2c9   : > { %v5085_v56 = vmax.f32 %v5007_v35, 0.0  ;;  %v18652_v42 = vpop.permute.xlu1 %1607  ;;  %v14160_v35 = vld [vmem:[%s17141_s8 + $0x415] ss:$2 sm:$0xff] }
 0x2ca   : > { %v5171_v38 = vmul.f32 %v18379_v15, %v5086_v21  ;;  %v18655_v51 = vpop.f32.mrb[22].mxu1  ;;  %v18657_v12 = vpop.permute.xlu0 %1602  ;;  %3307 = vperm.xlu1 %16851, %v14002_v19   ;;  %v1953_v19 = vmul.f32 %v18314_v40, %v18374_v48  ;;  %v14159_v21 = vld [vmem:[%s17141_s8 + $0x405] ss:$2 sm:$0xff]  ;;  %v2662_v48 = vmul.f32 %v18241_v52, %v18466_v59 }
 0x2cb   : > { %21808 = vst [vmem:[#allocation21_spill] sm:$0xff] %v18655_v51  ;;  %v5170_v60 = vmul.f32 %v18379_v15, %v5085_v56  ;;  %v15342_v0 = vpop.f32.mrb[23].mxu1  ;;  %3302 = vperm.xlu0 %16850, %v14001_v30   ;;  %v1952_v30 = vmul.f32 %v18314_v40, %v18384_v16 }
 0x2cc   : > { %v5256_v2 = vadd.f32 %v18391_v7, %v5171_v38  ;;  %v1321_v38 = vmul.f32 %v18234_v24, %v18361_v8  ;;  %v13712_v8 = vld [vmem:[%s17141_s8 + $0x100] ss:$2 sm:$0xff] }
 0x2cd   : > { %v5255_v50 = vadd.f32 %v18391_v7, %v5170_v60  ;;  %v18664_v46 = vpop.permute.xlu1 %2577  ;;  %v2663_v60 = vmul.f32 %v18241_v52, %v18463_v32  ;;  %v3372_v32 = vmul.f32 %v18255_v62, %v18548_v55  ;;  %v13792_v55 = vld [vmem:[%s17141_s8 + $0x111] ss:$2 sm:$0xff] }
 0x2ce   : > { %5335 = vst.msk [vmem:[#allocation2 + $0x1d8] sm:$0xff] %vm5275_vm2, %v5256_v2  ;;  %v18667_v25 = vpop.permute.xlu0 %2572  ;;  %3747 = vperm.xlu1 %16851, %v14028_v47   ;;  %v1320_v47 = vmul.f32 %v18234_v24, %v18369_v58  ;;  %v13713_v2 = vld [vmem:[%s17141_s8 + $0x110] ss:$2 sm:$0xff]  ;;  %v2031_v16 = vadd.f32 %v1953_v19, %v1321_v38  ;;  %v4083_v58 = vmul.f32 %v18267_v54, %v18627_v61  ;;  %v13791_v38 = vld [vmem:[%s17141_s8 + $0x101] ss:$2 sm:$0xff] }
 0x2cf   : > { %5334 = vst.msk [vmem:[#allocation2 + $0x1d0] sm:$0xff] %vm5275_vm2, %v5255_v50  ;;  %3742 = vperm.xlu0 %16850, %v14027_v49   ;;  %v3373_v49 = vmul.f32 %v18255_v62, %v18542_v4  ;;  %v4082_v4 = vmul.f32 %v18267_v54, %v18631_v29 }
 0x2d0   : > { %v2030_v50 = vadd.f32 %v1952_v30, %v1320_v47  ;;  %v2741_v51 = vadd.f32 %v2663_v60, %v2031_v16 }
 0x2d1   : > { %v18676_v56 = vpop.permute.xlu1 %3017 }
 0x2d2   : > { %v18682_v0 = vpop.permute.xlu0 %3012  ;;  %4717 = vperm.xlu1 %16851, %v14160_v35   ;;  %v2740_v19 = vadd.f32 %v2662_v48, %v2030_v50  ;;  %v3451_v30 = vadd.f32 %v3373_v49, %v2741_v51  ;;  %v13923_v51 = vld [vmem:[%s17141_s8 + $0x442] ss:$2 sm:$0xff] }
 0x2d3   : > { %4712 = vperm.xlu0 %16850, %v14159_v21  }
 0x2d4   : > { %v3450_v61 = vadd.f32 %v3372_v32, %v2740_v19  ;;  %v4161_v47 = vadd.f32 %v4083_v58, %v3451_v30  ;;  %v13949_v30 = vld [vmem:[%s17141_s8 + $0xe3] ss:$2 sm:$0xff] }
 0x2d5   : > { %v18694_v35 = vpop.permute.xlu1 %3987 }
 0x2d6   : > { %v18698_v59 = vpop.permute.xlu0 %3982  ;;  %1005 = vperm.xlu1 %16851, %v13713_v2   ;;  %v5492_v21 = vld [vmem:[#allocation2 + $0x1d1] ss:$2 sm:$0xff]  ;;  %v4160_v29 = vadd.f32 %v4082_v4, %v3450_v61 }
 0x2d7   : > { %1000 = vperm.xlu0 %16850, %v13712_v8   ;;  %15356 = vmatmul.mubr.msk.f32.gmra.mrb[32].mxu1 %vm5275_vm2, %v5492_v21  ;;  %v13924_v8 = vld [vmem:[%s17141_s8 + $0x452] ss:$2 sm:$0xff]  ;;  %v13950_v4 = vld [vmem:[%s17141_s8 + $0xf3] ss:$2 sm:$0xff] }
 0x2d8   : > { %15358 = vmatprep.mubr.msk.f32.mxu1 %vm16954_vm1, %v21804_v28 }
 0x2d9   : > { %v4428_v60 = vpop.permute.xlu1 %4427 }
 0x2da   : > { %v4793_v2 = vmul.f32 %v18355_v53, %v4428_v60  ;;  %v4423_v48 = vpop.permute.xlu0 %4422  ;;  %1637 = vperm.xlu1 %16851, %v13792_v55  }
 0x2db   : > { %v4792_v16 = vmul.f32 %v18355_v53, %v4423_v48  ;;  %1632 = vperm.xlu0 %16850, %v13791_v38   ;;  %v14082_v48 = vld [vmem:[%s17141_s8 + $0x434] ss:$2 sm:$0xff] }
 0x2dc   : > { %v4871_v50 = vadd.f32 %v4793_v2, %v4161_v47 }
 0x2dd   : > { %v4870_v49 = vadd.f32 %v4792_v16, %v4160_v29  ;;  %v18711_v21 = vpop.permute.xlu1 %1245  ;;  %v14081_v16 = vld [vmem:[%s17141_s8 + $0x424] ss:$2 sm:$0xff] }
 0x2de   : > { %v4956_v32 = vadd.f32 %v18366_v57, %v4871_v50  ;;  %v18714_v58 = vpop.permute.xlu0 %1240  ;;  %2607 = vperm.xlu1 %16851, %v13924_v8  }
 0x2df   : > { %v4955_v19 = vadd.f32 %v18366_v57, %v4870_v49  ;;  %2602 = vperm.xlu0 %16850, %v13923_v51   ;;  %v14108_v49 = vld [vmem:[%s17141_s8 + $0xd5] ss:$2 sm:$0xff] }
 0x2e0   : > { %v5034_v55 = vmax.f32 %v4956_v32, 0.0  ;;  %v2007_v32 = vmul.f32 %v18314_v40, %v18451_v20  ;;  %v18752_v20 = vld [vmem:[%s21794_s9] ss:$0 sm:$0xff] }
 0x2e1   : > { %v5033_v38 = vmax.f32 %v4955_v19, 0.0  ;;  %v18719_v61 = vpop.permute.xlu1 %1877  ;;  %v14107_v19 = vld [vmem:[%s17141_s8 + $0xc5] ss:$2 sm:$0xff] }
 0x2e2   : > { %v5119_v60 = vmul.f32 %v18379_v15, %v5034_v55  ;;  %v18722_v47 = vpop.permute.xlu0 %1872  ;;  %3047 = vperm.xlu1 %16851, %v13950_v4   ;;  %v2006_v4 = vmul.f32 %v18314_v40, %v18456_v3  ;;  %v18759_v3 = vld [vmem:[%s21794_s9 + $0x2] ss:$0 sm:$0xff] }
 0x2e3   : > { %v5118_v2 = vmul.f32 %v18379_v15, %v5033_v38  ;;  %3042 = vperm.xlu0 %16850, %v13949_v30   ;;  %v1375_v30 = vmul.f32 %v18234_v24, %v18443_v22  ;;  %v2717_v38 = vmul.f32 %v18241_v52, %v18530_v27  ;;  %v2716_v24 = vmul.f32 %v18759_v3, %v18533_v18  ;;  %v13767_v52 = vld [vmem:[%s17141_s8 + $0x470] ss:$2 sm:$0xff] }
 0x2e4   : > { %v5204_v29 = vadd.f32 %v18391_v7, %v5119_v60  ;;  %v3427_v27 = vmul.f32 %v18255_v62, %v18609_v26 }
 0x2e5   : > { %v5203_v8 = vadd.f32 %v18391_v7, %v5118_v2  ;;  %v18729_v50 = vpop.permute.xlu1 %2317  ;;  %v1374_v2 = vmul.f32 %v18752_v20, %v18446_v13  ;;  %v2085_v22 = vadd.f32 %v2007_v32, %v1375_v30  ;;  %v18770_v13 = vld [vmem:[%s21794_s9 + $0x3] ss:$0 sm:$0xff] }
 0x2e6   : > { %5283 = vst.msk [vmem:[#allocation2 + $0x38] sm:$0xff] %vm5275_vm2, %v5204_v29  ;;  %v18732_v51 = vpop.permute.xlu0 %2312  ;;  %4017 = vperm.xlu1 %16851, %v14082_v48   ;;  %v13766_v48 = vld [vmem:[%s17141_s8 + $0x460] ss:$2 sm:$0xff] }
 0x2e7   : > { %5282 = vst.msk [vmem:[#allocation2 + $0x30] sm:$0xff] %vm5275_vm2, %v5203_v8  ;;  %4012 = vperm.xlu0 %16850, %v14081_v16   ;;  %v2084_v29 = vadd.f32 %v2006_v4, %v1374_v2  ;;  %v3426_v16 = vmul.f32 %v18770_v13, %v18615_v14  ;;  %v2795_v18 = vadd.f32 %v2717_v38, %v2085_v22  ;;  %v18785_v4 = vld [vmem:[%s21794_s9 + $0x4] ss:$0 sm:$0xff]  ;;  %v13845_v38 = vld [vmem:[%s17141_s8 + $0x461] ss:$2 sm:$0xff] }
 0x2e8   : > { %v4136_v14 = vmul.f32 %v18785_v4, %v18698_v59 }
 0x2e9   : > { %v18741_v55 = vpop.permute.xlu1 %3287 }
 0x2ea   : > { %v18747_v60 = vpop.permute.xlu0 %3282  ;;  %4457 = vperm.xlu1 %16851, %v14108_v49   ;;  %v4137_v49 = vmul.f32 %v18267_v54, %v18694_v35  ;;  %v13846_v54 = vld [vmem:[%s17141_s8 + $0x471] ss:$2 sm:$0xff]  ;;  %v3505_v35 = vadd.f32 %v3427_v27, %v2795_v18  ;;  %v13871_v27 = vld [vmem:[%s17141_s8 + $0x102] ss:$2 sm:$0xff] }
 0x2eb   : > { %4452 = vperm.xlu0 %16850, %v14107_v19   ;;  %v2794_v19 = vadd.f32 %v2716_v24, %v2084_v29 }
 0x2ed   : > { %v18774_v8 = vpop.permute.xlu1 %3727  ;;  %v3504_v2 = vadd.f32 %v3426_v16, %v2794_v19 }
 0x2ee   : > { %v18778_v32 = vpop.f32.mrb[24].mxu1  ;;  %v18780_v62 = vpop.permute.xlu0 %3722  ;;  %1275 = vperm.xlu1 %16851, %v13767_v52   ;;  %v5440_v26 = vld [vmem:[#allocation2 + $0x31] ss:$2 sm:$0xff]  ;;  %v4215_v52 = vadd.f32 %v4137_v49, %v3505_v35 }
 0x2ef   : > { %21809 = vst [vmem:[#allocation22_spill] sm:$0xff] %v18778_v32  ;;  %v15345_v30 = vpop.f32.mrb[25].mxu1  ;;  %1270 = vperm.xlu0 %16850, %v13766_v48   ;;  %15278 = vmatmul.mubr.msk.f32.gmra.mrb[6].mxu0 %vm5275_vm2, %v5440_v26  ;;  %v4214_v59 = vadd.f32 %v4136_v14, %v3504_v2  ;;  %v13872_v26 = vld [vmem:[%s17141_s8 + $0x112] ss:$2 sm:$0xff]  ;;  %v14004_v14 = vld [vmem:[%s17141_s8 + $0x453] ss:$2 sm:$0xff] }
 0x2f0   : > { %15280 = vmatprep.mubr.msk.f32.mxu0 %vm16954_vm1, %v21804_v28  ;;  %v14003_v35 = vld [vmem:[%s17141_s8 + $0x443] ss:$2 sm:$0xff] }
 0x2f1   : > { %v4698_v24 = vpop.permute.xlu1 %4697 }
 0x2f2   : > { %v4847_v22 = vmul.f32 %v18355_v53, %v4698_v24  ;;  %v4693_v29 = vpop.permute.xlu0 %4692  ;;  %1907 = vperm.xlu1 %16851, %v13846_v54  }
 0x2f3   : > { %v4846_v48 = vmul.f32 %v18355_v53, %v4693_v29  ;;  %1902 = vperm.xlu0 %16850, %v13845_v38   ;;  %v14030_v29 = vld [vmem:[%s17141_s8 + $0xf4] ss:$2 sm:$0xff] }
 0x2f4   : > { %v4925_v30 = vadd.f32 %v4847_v22, %v4215_v52 }
 0x2f5   : > { %v4924_v18 = vadd.f32 %v4846_v48, %v4214_v59  ;;  %v18798_v32 = vpop.permute.xlu1 %985  ;;  %v14029_v48 = vld [vmem:[%s17141_s8 + $0xe4] ss:$2 sm:$0xff] }
 0x2f6   : > { %v5010_v16 = vadd.f32 %v18366_v57, %v4925_v30  ;;  %v18801_v49 = vpop.permute.xlu0 %980  ;;  %2347 = vperm.xlu1 %16851, %v13872_v26  }
 0x2f7   : > { %v5009_v19 = vadd.f32 %v18366_v57, %v4924_v18  ;;  %2342 = vperm.xlu0 %16850, %v13871_v27   ;;  %v14162_v18 = vld [vmem:[%s17141_s8 + $0x435] ss:$2 sm:$0xff] }
 0x2f8   : > { %v5088_v54 = vmax.f32 %v5010_v16, 0.0  ;;  %v1955_v16 = vmul.f32 %v18314_v40, %v18518_v37  ;;  %v2664_v37 = vmul.f32 %v18759_v3, %v18600_v9 }
 0x2f9   : > { %v5087_v38 = vmax.f32 %v5009_v19, 0.0  ;;  %v18806_v2 = vpop.permute.xlu1 %1617  ;;  %v14161_v19 = vld [vmem:[%s17141_s8 + $0x425] ss:$2 sm:$0xff] }
 0x2fa   : > { %v5173_v24 = vmul.f32 %v18379_v15, %v5088_v54  ;;  %v18809_v52 = vpop.permute.xlu0 %1612  ;;  %3317 = vperm.xlu1 %16851, %v14004_v14   ;;  %v1954_v14 = vmul.f32 %v18314_v40, %v18523_v17  ;;  %v3375_v17 = vmul.f32 %v18770_v13, %v18676_v56  ;;  %v4084_v56 = vmul.f32 %v18785_v4, %v18780_v62 }
 0x2fb   : > { %v5172_v22 = vmul.f32 %v18379_v15, %v5087_v38  ;;  %3312 = vperm.xlu0 %16850, %v14003_v35   ;;  %v1323_v35 = vmul.f32 %v18752_v20, %v18510_v63  ;;  %v2665_v38 = vmul.f32 %v18759_v3, %v18597_v36  ;;  %v13714_v63 = vld [vmem:[%s17141_s8 + $0x120] ss:$2 sm:$0xff]  ;;  %v3374_v36 = vmul.f32 %v18770_v13, %v18682_v0 }
 0x2fc   : > { %v5258_v59 = vadd.f32 %v18391_v7, %v5173_v24 }
 0x2fd   : > { %v5257_v26 = vadd.f32 %v18391_v7, %v5172_v22  ;;  %v18816_v30 = vpop.permute.xlu1 %2587  ;;  %v1322_v22 = vmul.f32 %v18752_v20, %v18513_v34  ;;  %v2033_v40 = vadd.f32 %v1955_v16, %v1323_v35  ;;  %v4085_v34 = vmul.f32 %v18785_v4, %v18774_v8 }
 0x2fe   : > { %5337 = vst.msk [vmem:[#allocation2 + $0x1e8] sm:$0xff] %vm5275_vm2, %v5258_v59  ;;  %v18819_v27 = vpop.permute.xlu0 %2582  ;;  %3757 = vperm.xlu1 %16851, %v14030_v29   ;;  %v13715_v29 = vld [vmem:[%s17141_s8 + $0x130] ss:$2 sm:$0xff] }
 0x2ff   : > { %5336 = vst.msk [vmem:[#allocation2 + $0x1e0] sm:$0xff] %vm5275_vm2, %v5257_v26  ;;  %3752 = vperm.xlu0 %16850, %v14029_v48   ;;  %v2032_v59 = vadd.f32 %v1954_v14, %v1322_v22  ;;  %v2743_v26 = vadd.f32 %v2665_v38, %v2033_v40  ;;  %v13793_v14 = vld [vmem:[%s17141_s8 + $0x121] ss:$2 sm:$0xff] }
 0x301   : > { %v18828_v54 = vpop.permute.xlu1 %3027  ;;  %v2742_v16 = vadd.f32 %v2664_v37, %v2032_v59  ;;  %v3453_v0 = vadd.f32 %v3375_v17, %v2743_v26  ;;  %v13926_v17 = vld [vmem:[%s17141_s8 + $0x472] ss:$2 sm:$0xff]  ;;  %v13925_v59 = vld [vmem:[%s17141_s8 + $0x462] ss:$2 sm:$0xff] }
 0x302   : > { %v18834_v24 = vpop.permute.xlu0 %3022  ;;  %4727 = vperm.xlu1 %16851, %v14162_v18  }
 0x303   : > { %4722 = vperm.xlu0 %16850, %v14161_v19   ;;  %v13794_v19 = vld [vmem:[%s17141_s8 + $0x131] ss:$2 sm:$0xff]  ;;  %v3452_v8 = vadd.f32 %v3374_v36, %v2742_v16  ;;  %v4163_v38 = vadd.f32 %v4085_v34, %v3453_v0 }
 0x304   : > { %v13951_v0 = vld [vmem:[%s17141_s8 + $0x103] ss:$2 sm:$0xff] }
 0x305   : > { %v18846_v48 = vpop.permute.xlu1 %3997  ;;  %v4162_v62 = vadd.f32 %v4084_v56, %v3452_v8  ;;  %v13952_v56 = vld [vmem:[%s17141_s8 + $0x113] ss:$2 sm:$0xff] }
 0x306   : > { %v18850_v9 = vpop.permute.xlu0 %3992  ;;  %1015 = vperm.xlu1 %16851, %v13715_v29   ;;  %v5494_v18 = vld [vmem:[#allocation2 + $0x1e1] ss:$2 sm:$0xff] }
 0x307   : > { %1010 = vperm.xlu0 %16850, %v13714_v63   ;;  %15359 = vmatmul.mubr.msk.f32.gmra.mrb[34].mxu1 %vm5275_vm2, %v5494_v18  ;;  %v18863_v29 = vld [vmem:[%s21794_s9 + $0x5] ss:$0 sm:$0xff]  ;;  %v18876_v18 = vld [vmem:[%s21796_s26] ss:$0 sm:$0xff] }
 0x308   : > { %15361 = vmatprep.mubr.msk.f32.mxu1 %vm16954_vm1, %v21804_v28 }
 0x309   : > { %v4438_v35 = vpop.permute.xlu1 %4437 }
 0x30a   : > { %v4795_v22 = vmul.f32 %v18355_v53, %v4438_v35  ;;  %v4433_v37 = vpop.permute.xlu0 %4432  ;;  %1647 = vperm.xlu1 %16851, %v13794_v19  }
 0x30b   : > { %v4794_v40 = vmul.f32 %v18863_v29, %v4433_v37  ;;  %1642 = vperm.xlu0 %16850, %v13793_v14   ;;  %v14084_v37 = vld [vmem:[%s17141_s8 + $0x454] ss:$2 sm:$0xff] }
 0x30c   : > { %v4873_v63 = vadd.f32 %v4795_v22, %v4163_v38  ;;  %v18889_v38 = vld [vmem:[%s21797_s27] ss:$0 sm:$0xff] }
 0x30d   : > { %v4872_v36 = vadd.f32 %v4794_v40, %v4162_v62  ;;  %v18868_v26 = vpop.permute.xlu1 %1255  ;;  %v14083_v40 = vld [vmem:[%s17141_s8 + $0x444] ss:$2 sm:$0xff] }
 0x30e   : > { %v4958_v53 = vadd.f32 %v18366_v57, %v4873_v63  ;;  %v18871_v34 = vpop.permute.xlu0 %1250  ;;  %2617 = vperm.xlu1 %16851, %v13926_v17  }
 0x30f   : > { %v4957_v16 = vadd.f32 %v18876_v18, %v4872_v36  ;;  %2612 = vperm.xlu0 %16850, %v13925_v59   ;;  %v14110_v59 = vld [vmem:[%s17141_s8 + $0xf5] ss:$2 sm:$0xff] }
 0x310   : > { %v5036_v19 = vmax.f32 %v4958_v53, 0.0  ;;  %v18906_v36 = vld [vmem:[%s21794_s9 + $0x1] ss:$0 sm:$0xff]  ;;  %v14109_v53 = vld [vmem:[%s17141_s8 + $0xe5] ss:$2 sm:$0xff] }
 0x311   : > { %v5035_v14 = vmax.f32 %v4957_v16, 0.0  ;;  %v18881_v8 = vpop.permute.xlu1 %1887  ;;  %v2008_v16 = vmul.f32 %v18906_v36, %v18590_v1 }
 0x312   : > { %v5121_v57 = vmul.f32 %v18379_v15, %v5036_v19  ;;  %v18884_v35 = vpop.permute.xlu0 %1882  ;;  %3057 = vperm.xlu1 %16851, %v13952_v56   ;;  %v1377_v19 = vmul.f32 %v18752_v20, %v18577_v41  ;;  %v3429_v41 = vmul.f32 %v18770_v13, %v18741_v55  ;;  %v4138_v55 = vmul.f32 %v18785_v4, %v18850_v9 }
 0x313   : > { %v5120_v22 = vmul.f32 %v18889_v38, %v5035_v14  ;;  %3052 = vperm.xlu0 %16850, %v13951_v0   ;;  %v2719_v0 = vmul.f32 %v18759_v3, %v18664_v46  ;;  %v13768_v46 = vld [vmem:[%s17141_s8 + $0x480] ss:$2 sm:$0xff] }
 0x314   : > { %v5206_v62 = vadd.f32 %v18391_v7, %v5121_v57 }
 0x315   : > { %v5205_v17 = vadd.f32 %v18391_v7, %v5120_v22  ;;  %v18896_v15 = vpop.permute.xlu1 %2327  ;;  %v2009_v7 = vmul.f32 %v18906_v36, %v18585_v44  ;;  %v1376_v44 = vmul.f32 %v18752_v20, %v18580_v31  ;;  %v2718_v22 = vmul.f32 %v18759_v3, %v18667_v25 }
 0x316   : > { %5285 = vst.msk [vmem:[#allocation2 + $0x48] sm:$0xff] %vm5275_vm2, %v5206_v62  ;;  %v18899_v63 = vpop.permute.xlu0 %2322  ;;  %4027 = vperm.xlu1 %16851, %v14084_v37   ;;  %v13769_v37 = vld [vmem:[%s17141_s8 + $0x490] ss:$2 sm:$0xff]  ;;  %v4139_v25 = vmul.f32 %v18785_v4, %v18846_v48 }
 0x317   : > { %5284 = vst.msk [vmem:[#allocation2 + $0x40] sm:$0xff] %vm5275_vm2, %v5205_v17  ;;  %4022 = vperm.xlu0 %16850, %v14083_v40   ;;  %v2087_v62 = vadd.f32 %v2009_v7, %v1377_v19  ;;  %v2086_v40 = vadd.f32 %v2008_v16, %v1376_v44  ;;  %v3428_v17 = vmul.f32 %v18770_v13, %v18747_v60  ;;  %v13848_v60 = vld [vmem:[%s17141_s8 + $0x491] ss:$2 sm:$0xff]  ;;  %v13847_v19 = vld [vmem:[%s17141_s8 + $0x481] ss:$2 sm:$0xff] }
 0x319   : > { %v18913_v56 = vpop.permute.xlu1 %3297  ;;  %v2797_v31 = vadd.f32 %v2719_v0, %v2087_v62  ;;  %v2796_v7 = vadd.f32 %v2718_v22, %v2086_v40 }
 0x31a   : > { %v18919_v14 = vpop.f32.mrb[26].mxu1  ;;  %v18921_v57 = vpop.permute.xlu0 %3292  ;;  %4467 = vperm.xlu1 %16851, %v14110_v59  }
 0x31b   : > { %21810 = vst [vmem:[#allocation23_spill] sm:$0xff] %v18919_v14  ;;  %v15348_v1 = vpop.f32.mrb[27].mxu1  ;;  %4462 = vperm.xlu0 %16850, %v14109_v53   ;;  %v3507_v16 = vadd.f32 %v3429_v41, %v2797_v31  ;;  %v3506_v48 = vadd.f32 %v3428_v17, %v2796_v7  ;;  %v13873_v41 = vld [vmem:[%s17141_s8 + $0x122] ss:$2 sm:$0xff] }
 0x31d   : > { %v18933_v59 = vpop.permute.xlu1 %3737  ;;  %v4217_v44 = vadd.f32 %v4139_v25, %v3507_v16  ;;  %v4216_v9 = vadd.f32 %v4138_v55, %v3506_v48  ;;  %v14006_v55 = vld [vmem:[%s17141_s8 + $0x473] ss:$2 sm:$0xff]  ;;  %v14005_v16 = vld [vmem:[%s17141_s8 + $0x463] ss:$2 sm:$0xff] }
 0x31e   : > { %v18937_v1 = vpop.permute.xlu0 %3732  ;;  %1285 = vperm.xlu1 %16851, %v13769_v37   ;;  %v5442_v53 = vld [vmem:[#allocation2 + $0x41] ss:$2 sm:$0xff] }
 0x31f   : > { %1280 = vperm.xlu0 %16850, %v13768_v46   ;;  %15281 = vmatmul.mubr.msk.f32.gmra.mrb[8].mxu0 %vm5275_vm2, %v5442_v53  ;;  %v13874_v46 = vld [vmem:[%s17141_s8 + $0x132] ss:$2 sm:$0xff] }
 0x320   : > { %15283 = vmatprep.mubr.msk.f32.mxu0 %vm16954_vm1, %v21804_v28 }
 0x321   : > { %v4708_v0 = vpop.permute.xlu1 %4707 }
 0x322   : > { %v4849_v37 = vmul.f32 %v18863_v29, %v4708_v0  ;;  %v4703_v22 = vpop.permute.xlu0 %4702  ;;  %1917 = vperm.xlu1 %16851, %v13848_v60  }
 0x323   : > { %v4848_v62 = vmul.f32 %v18863_v29, %v4703_v22  ;;  %1912 = vperm.xlu0 %16850, %v13847_v19   ;;  %v14032_v22 = vld [vmem:[%s17141_s8 + $0x114] ss:$2 sm:$0xff] }
 0x324   : > { %v4927_v40 = vadd.f32 %v4849_v37, %v4217_v44 }
 0x325   : > { %v4926_v31 = vadd.f32 %v4848_v62, %v4216_v9  ;;  %v18950_v53 = vpop.permute.xlu1 %995  ;;  %v18968_v9 = vld [vmem:[%s21798_s28] ss:$0 sm:$0xff] }
 0x326   : > { %v5012_v17 = vadd.f32 %v18876_v18, %v4927_v40  ;;  %v18953_v25 = vpop.permute.xlu0 %990  ;;  %2357 = vperm.xlu1 %16851, %v13874_v46   ;;  %v14031_v46 = vld [vmem:[%s17141_s8 + $0x104] ss:$2 sm:$0xff] }
 0x327   : > { %v5011_v7 = vadd.f32 %v18876_v18, %v4926_v31  ;;  %2352 = vperm.xlu0 %16850, %v13873_v41  }
 0x328   : > { %v5090_v60 = vmax.f32 %v5012_v17, 0.0  ;;  %v14164_v17 = vld [vmem:[%s17141_s8 + $0x455] ss:$2 sm:$0xff] }
 0x329   : > { %v5089_v19 = vmax.f32 %v5011_v7, 0.0  ;;  %v18958_v48 = vpop.permute.xlu1 %1627  ;;  %v1957_v7 = vmul.f32 %v18906_v36, %v18652_v42  ;;  %v1324_v42 = vmul.f32 %v18752_v20, %v18647_v33 }
 0x32a   : > { %v5175_v0 = vmul.f32 %v18889_v38, %v5090_v60  ;;  %v18961_v44 = vpop.permute.xlu0 %1622  ;;  %3327 = vperm.xlu1 %16851, %v14006_v55   ;;  %v14163_v55 = vld [vmem:[%s17141_s8 + $0x445] ss:$2 sm:$0xff]  ;;  %v1956_v60 = vmul.f32 %v18906_v36, %v18657_v12 }
 0x32b   : > { %v5174_v37 = vmul.f32 %v18889_v38, %v5089_v19  ;;  %3322 = vperm.xlu0 %16850, %v14005_v16   ;;  %v1325_v19 = vmul.f32 %v18752_v20, %v18644_v43  ;;  %v3377_v43 = vmul.f32 %v18770_v13, %v18828_v54  ;;  %v4086_v54 = vmul.f32 %v18785_v4, %v18937_v1 }
 0x32c   : > { %v5260_v62 = vadd.f32 %v18968_v9, %v5175_v0  ;;  %v2667_v0 = vmul.f32 %v18759_v3, %v18729_v50  ;;  %v13716_v50 = vld [vmem:[%s17141_s8 + $0x140] ss:$2 sm:$0xff]  ;;  %v2034_v14 = vadd.f32 %v1956_v60, %v1324_v42 }
 0x32d   : > { %v5259_v40 = vadd.f32 %v18968_v9, %v5174_v37  ;;  %v18973_v41 = vpop.permute.xlu1 %2597 }
 0x32e   : > { %5339 = vst.msk [vmem:[#allocation2 + $0x1f8] sm:$0xff] %vm5275_vm2, %v5260_v62  ;;  %v18976_v31 = vpop.permute.xlu0 %2592  ;;  %3767 = vperm.xlu1 %16851, %v14032_v22   ;;  %v2666_v62 = vmul.f32 %v18759_v3, %v18732_v51  ;;  %v4087_v51 = vmul.f32 %v18785_v4, %v18933_v59 }
 0x32f   : > { %5338 = vst.msk [vmem:[#allocation2 + $0x1f0] sm:$0xff] %vm5275_vm2, %v5259_v40  ;;  %3762 = vperm.xlu0 %16850, %v14031_v46   ;;  %v13717_v46 = vld [vmem:[%s17141_s8 + $0x150] ss:$2 sm:$0xff]  ;;  %v2035_v40 = vadd.f32 %v1957_v7, %v1325_v19  ;;  %v13795_v19 = vld [vmem:[%s17141_s8 + $0x141] ss:$2 sm:$0xff] }
 0x330   : > { %v2744_v7 = vadd.f32 %v2666_v62, %v2034_v14 }
 0x331   : > { %v18985_v16 = vpop.permute.xlu1 %3037  ;;  %v2745_v33 = vadd.f32 %v2667_v0, %v2035_v40  ;;  %v13928_v40 = vld [vmem:[%s17141_s8 + $0x492] ss:$2 sm:$0xff] }
 0x332   : > { %v18991_v37 = vpop.f32.mrb[0].mxu0  ;;  %v18993_v22 = vpop.permute.xlu0 %3032  ;;  %4737 = vperm.xlu1 %16851, %v14164_v17   ;;  %v3376_v17 = vmul.f32 %v18770_v13, %v18834_v24  ;;  %v13796_v24 = vld [vmem:[%s17141_s8 + $0x151] ss:$2 sm:$0xff] }
 0x333   : > { %v15270_v12 = vpop.f32.mrb[1].mxu0  ;;  %4732 = vperm.xlu0 %16850, %v14163_v55   ;;  %v3455_v60 = vadd.f32 %v3377_v43, %v2745_v33  ;;  %v13927_v43 = vld [vmem:[%s17141_s8 + $0x482] ss:$2 sm:$0xff] }
 0x334   : > { %v3454_v59 = vadd.f32 %v3376_v17, %v2744_v7 }
 0x335   : > { %v19005_v5 = vpop.permute.xlu1 %4007  ;;  %v4165_v42 = vadd.f32 %v4087_v51, %v3455_v60  ;;  %v13953_v60 = vld [vmem:[%s17141_s8 + $0x123] ss:$2 sm:$0xff] }
 0x336   : > { %v19009_v12 = vpop.permute.xlu0 %4002  ;;  %1025 = vperm.xlu1 %16851, %v13717_v46   ;;  %v5496_v55 = vld [vmem:[#allocation2 + $0x1f1] ss:$2 sm:$0xff]  ;;  %v4164_v1 = vadd.f32 %v4086_v54, %v3454_v59 }
 0x337   : > { %1020 = vperm.xlu0 %16850, %v13716_v50   ;;  %15362 = vmatmul.mubr.msk.f32.gmra.mrb[36].mxu1 %vm5275_vm2, %v5496_v55  ;;  %v13954_v54 = vld [vmem:[%s17141_s8 + $0x133] ss:$2 sm:$0xff] }
 0x338   : > { %15364 = vmatprep.mubr.msk.f32.mxu1 %vm16954_vm1, %v21804_v28 }
 0x339   : > { %v4448_v0 = vpop.permute.xlu1 %4447 }
 0x33a   : > { %v4797_v46 = vmul.f32 %v18863_v29, %v4448_v0  ;;  %v4443_v14 = vpop.permute.xlu0 %4442  ;;  %1657 = vperm.xlu1 %16851, %v13796_v24  }
 0x33b   : > { %v4796_v62 = vmul.f32 %v18863_v29, %v4443_v14  ;;  %1652 = vperm.xlu0 %16850, %v13795_v19   ;;  %v14086_v14 = vld [vmem:[%s17141_s8 + $0x474] ss:$2 sm:$0xff] }
 0x33c   : > { %v4875_v50 = vadd.f32 %v4797_v46, %v4165_v42 }
 0x33d   : > { %v4874_v33 = vadd.f32 %v4796_v62, %v4164_v1  ;;  %v19022_v55 = vpop.permute.xlu1 %1265  ;;  %v14085_v62 = vld [vmem:[%s17141_s8 + $0x464] ss:$2 sm:$0xff] }
 0x33e   : > { %v4960_v17 = vadd.f32 %v18876_v18, %v4875_v50  ;;  %v19025_v51 = vpop.permute.xlu0 %1260  ;;  %2627 = vperm.xlu1 %16851, %v13928_v40  }
 0x33f   : > { %v4959_v7 = vadd.f32 %v18876_v18, %v4874_v33  ;;  %2622 = vperm.xlu0 %16850, %v13927_v43   ;;  %v14112_v33 = vld [vmem:[%s17141_s8 + $0x115] ss:$2 sm:$0xff] }
 0x340   : > { %v5038_v24 = vmax.f32 %v4960_v17, 0.0  ;;  %v2011_v17 = vmul.f32 %v18906_v36, %v18719_v61  ;;  %v1378_v61 = vmul.f32 %v18752_v20, %v18714_v58 }
 0x341   : > { %v5037_v19 = vmax.f32 %v4959_v7, 0.0  ;;  %v19030_v59 = vpop.permute.xlu1 %1897  ;;  %v14111_v7 = vld [vmem:[%s17141_s8 + $0x105] ss:$2 sm:$0xff] }
 0x342   : > { %v5123_v0 = vmul.f32 %v18889_v38, %v5038_v24  ;;  %v19033_v42 = vpop.permute.xlu0 %1892  ;;  %3067 = vperm.xlu1 %16851, %v13954_v54   ;;  %v2010_v54 = vmul.f32 %v18906_v36, %v18722_v47 }
 0x343   : > { %v5122_v46 = vmul.f32 %v18889_v38, %v5037_v19  ;;  %3062 = vperm.xlu0 %16850, %v13953_v60   ;;  %v1379_v60 = vmul.f32 %v18752_v20, %v18711_v21  ;;  %v2721_v19 = vmul.f32 %v18759_v3, %v18816_v30  ;;  %v3431_v21 = vmul.f32 %v18770_v13, %v18913_v56  ;;  %v13770_v30 = vld [vmem:[%s17141_s8 + $0x4a0] ss:$2 sm:$0xff] }
 0x344   : > { %v5208_v1 = vadd.f32 %v18968_v9, %v5123_v0  ;;  %v4140_v56 = vmul.f32 %v18785_v4, %v19009_v12 }
 0x345   : > { %v5207_v40 = vadd.f32 %v18968_v9, %v5122_v46  ;;  %v19040_v50 = vpop.permute.xlu1 %2337 }
 0x346   : > { %5287 = vst.msk [vmem:[#allocation2 + $0x58] sm:$0xff] %vm5275_vm2, %v5208_v1  ;;  %v19043_v43 = vpop.permute.xlu0 %2332  ;;  %4037 = vperm.xlu1 %16851, %v14086_v14   ;;  %v2720_v14 = vmul.f32 %v18759_v3, %v18819_v27  ;;  %v13771_v1 = vld [vmem:[%s17141_s8 + $0x4b0] ss:$2 sm:$0xff]  ;;  %v4141_v27 = vmul.f32 %v18785_v4, %v19005_v5 }
 0x347   : > { %5286 = vst.msk [vmem:[#allocation2 + $0x50] sm:$0xff] %vm5275_vm2, %v5207_v40  ;;  %4032 = vperm.xlu0 %16850, %v14085_v62   ;;  %v2089_v62 = vadd.f32 %v2011_v17, %v1379_v60  ;;  %v2088_v40 = vadd.f32 %v2010_v54, %v1378_v61  ;;  %v13849_v60 = vld [vmem:[%s17141_s8 + $0x4a1] ss:$2 sm:$0xff] }
 0x349   : > { %v19052_v24 = vpop.permute.xlu1 %3307  ;;  %v2799_v58 = vadd.f32 %v2721_v19, %v2089_v62  ;;  %v2798_v17 = vadd.f32 %v2720_v14, %v2088_v40 }
 0x34a   : > { %v19058_v0 = vpop.f32.mrb[28].mxu1  ;;  %v19060_v46 = vpop.permute.xlu0 %3302  ;;  %4477 = vperm.xlu1 %16851, %v14112_v33   ;;  %v3430_v33 = vmul.f32 %v18770_v13, %v18921_v57  ;;  %v13850_v57 = vld [vmem:[%s17141_s8 + $0x4b1] ss:$2 sm:$0xff] }
 0x34b   : > { %21811 = vst [vmem:[#allocation24_spill] sm:$0xff] %v19058_v0  ;;  %v15351_v47 = vpop.f32.mrb[29].mxu1  ;;  %4472 = vperm.xlu0 %16850, %v14111_v7   ;;  %v3509_v54 = vadd.f32 %v3431_v21, %v2799_v58  ;;  %v13875_v21 = vld [vmem:[%s17141_s8 + $0x142] ss:$2 sm:$0xff] }
 0x34c   : > { %v3508_v5 = vadd.f32 %v3430_v33, %v2798_v17 }
 0x34d   : > { %v19072_v0 = vpop.permute.xlu1 %3747  ;;  %v4219_v61 = vadd.f32 %v4141_v27, %v3509_v54  ;;  %v14007_v54 = vld [vmem:[%s17141_s8 + $0x483] ss:$2 sm:$0xff] }
 0x34e   : > { %v19076_v47 = vpop.permute.xlu0 %3742  ;;  %1295 = vperm.xlu1 %16851, %v13771_v1   ;;  %v5444_v7 = vld [vmem:[#allocation2 + $0x51] ss:$2 sm:$0xff]  ;;  %v4218_v12 = vadd.f32 %v4140_v56, %v3508_v5 }
 0x34f   : > { %1290 = vperm.xlu0 %16850, %v13770_v30   ;;  %15284 = vmatmul.mubr.msk.f32.gmra.mrb[10].mxu0 %vm5275_vm2, %v5444_v7  ;;  %v13876_v30 = vld [vmem:[%s17141_s8 + $0x152] ss:$2 sm:$0xff]  ;;  %v14008_v56 = vld [vmem:[%s17141_s8 + $0x493] ss:$2 sm:$0xff] }
 0x350   : > { %15286 = vmatprep.mubr.msk.f32.mxu0 %vm16954_vm1, %v21804_v28 }
 0x351   : > { %v4718_v19 = vpop.permute.xlu1 %4717 }
 0x352   : > { %v4851_v1 = vmul.f32 %v18863_v29, %v4718_v19  ;;  %v4713_v14 = vpop.permute.xlu0 %4712  ;;  %1927 = vperm.xlu1 %16851, %v13850_v57  }
 0x353   : > { %v4850_v62 = vmul.f32 %v18863_v29, %v4713_v14  ;;  %1922 = vperm.xlu0 %16850, %v13849_v60   ;;  %v14034_v14 = vld [vmem:[%s17141_s8 + $0x134] ss:$2 sm:$0xff] }
 0x354   : > { %v4929_v40 = vadd.f32 %v4851_v1, %v4219_v61 }
 0x355   : > { %v4928_v58 = vadd.f32 %v4850_v62, %v4218_v12  ;;  %v19089_v7 = vpop.permute.xlu1 %1005  ;;  %v14033_v62 = vld [vmem:[%s17141_s8 + $0x124] ss:$2 sm:$0xff] }
 0x356   : > { %v5014_v33 = vadd.f32 %v18876_v18, %v4929_v40  ;;  %v19092_v27 = vpop.permute.xlu0 %1000  ;;  %2367 = vperm.xlu1 %16851, %v13876_v30  }
 0x357   : > { %v5013_v17 = vadd.f32 %v18876_v18, %v4928_v58  ;;  %2362 = vperm.xlu0 %16850, %v13875_v21   ;;  %v14166_v58 = vld [vmem:[%s17141_s8 + $0x475] ss:$2 sm:$0xff] }
 0x358   : > { %v5092_v57 = vmax.f32 %v5014_v33, 0.0  ;;  %v1959_v33 = vmul.f32 %v18906_v36, %v18806_v2  ;;  %v1326_v2 = vmul.f32 %v18752_v20, %v18801_v49 }
 0x359   : > { %v5091_v60 = vmax.f32 %v5013_v17, 0.0  ;;  %v19097_v5 = vpop.permute.xlu1 %1637  ;;  %v14165_v17 = vld [vmem:[%s17141_s8 + $0x465] ss:$2 sm:$0xff] }
 0x35a   : > { %v5177_v19 = vmul.f32 %v18889_v38, %v5092_v57  ;;  %v19100_v61 = vpop.permute.xlu0 %1632  ;;  %3337 = vperm.xlu1 %16851, %v14008_v56   ;;  %v1958_v56 = vmul.f32 %v18906_v36, %v18809_v52 }
 0x35b   : > { %v5176_v1 = vmul.f32 %v18889_v38, %v5091_v60  ;;  %3332 = vperm.xlu0 %16850, %v14007_v54   ;;  %v1327_v54 = vmul.f32 %v18752_v20, %v18798_v32  ;;  %v2669_v60 = vmul.f32 %v18759_v3, %v18896_v15  ;;  %v3379_v32 = vmul.f32 %v18770_v13, %v18985_v16  ;;  %v13718_v15 = vld [vmem:[%s17141_s8 + $0x160] ss:$2 sm:$0xff] }
 0x35c   : > { %v5262_v12 = vadd.f32 %v18968_v9, %v5177_v19  ;;  %v4088_v16 = vmul.f32 %v18785_v4, %v19076_v47 }
 0x35d   : > { %v5261_v30 = vadd.f32 %v18968_v9, %v5176_v1  ;;  %v19107_v40 = vpop.permute.xlu1 %2607 }
 0x35e   : > { %5341 = vst.msk [vmem:[#allocation2 + $0x208] sm:$0xff] %vm5275_vm2, %v5262_v12  ;;  %v19110_v21 = vpop.permute.xlu0 %2602  ;;  %3777 = vperm.xlu1 %16851, %v14034_v14   ;;  %v2668_v14 = vmul.f32 %v18759_v3, %v18899_v63  ;;  %v13719_v12 = vld [vmem:[%s17141_s8 + $0x170] ss:$2 sm:$0xff]  ;;  %v4089_v63 = vmul.f32 %v18785_v4, %v19072_v0 }
 0x35f   : > { %5340 = vst.msk [vmem:[#allocation2 + $0x200] sm:$0xff] %vm5275_vm2, %v5261_v30  ;;  %3772 = vperm.xlu0 %16850, %v14033_v62   ;;  %v2037_v62 = vadd.f32 %v1959_v33, %v1327_v54  ;;  %v2036_v30 = vadd.f32 %v1958_v56, %v1326_v2  ;;  %v13797_v54 = vld [vmem:[%s17141_s8 + $0x161] ss:$2 sm:$0xff] }
 0x361   : > { %v19119_v57 = vpop.permute.xlu1 %3047  ;;  %v2747_v49 = vadd.f32 %v2669_v60, %v2037_v62  ;;  %v2746_v33 = vadd.f32 %v2668_v14, %v2036_v30 }
 0x362   : > { %v19125_v19 = vpop.f32.mrb[2].mxu0  ;;  %v19127_v1 = vpop.permute.xlu0 %3042  ;;  %4747 = vperm.xlu1 %16851, %v14166_v58   ;;  %v3378_v58 = vmul.f32 %v18770_v13, %v18993_v22  ;;  %v13798_v22 = vld [vmem:[%s17141_s8 + $0x171] ss:$2 sm:$0xff] }
 0x363   : > { %v15273_v52 = vpop.f32.mrb[3].mxu0  ;;  %4742 = vperm.xlu0 %16850, %v14165_v17   ;;  %v3457_v56 = vadd.f32 %v3379_v32, %v2747_v49  ;;  %v13929_v32 = vld [vmem:[%s17141_s8 + $0x4a2] ss:$2 sm:$0xff] }
 0x364   : > { %v3456_v0 = vadd.f32 %v3378_v58, %v2746_v33 }
 0x365   : > { %v19139_v6 = vpop.permute.xlu1 %4017  ;;  %v4167_v2 = vadd.f32 %v4089_v63, %v3457_v56  ;;  %v13955_v56 = vld [vmem:[%s17141_s8 + $0x143] ss:$2 sm:$0xff] }
 0x366   : > { %v19143_v52 = vpop.permute.xlu0 %4012  ;;  %1035 = vperm.xlu1 %16851, %v13719_v12   ;;  %v5498_v17 = vld [vmem:[#allocation2 + $0x201] ss:$2 sm:$0xff]  ;;  %v4166_v47 = vadd.f32 %v4088_v16, %v3456_v0 }
 0x367   : > { %1030 = vperm.xlu0 %16850, %v13718_v15   ;;  %15365 = vmatmul.mubr.msk.f32.gmra.mrb[38].mxu1 %vm5275_vm2, %v5498_v17  ;;  %v13930_v15 = vld [vmem:[%s17141_s8 + $0x4b2] ss:$2 sm:$0xff]  ;;  %v13956_v16 = vld [vmem:[%s17141_s8 + $0x153] ss:$2 sm:$0xff] }
 0x368   : > { %15367 = vmatprep.mubr.msk.f32.mxu1 %vm16954_vm1, %v21804_v28 }
 0x369   : > { %v4458_v60 = vpop.permute.xlu1 %4457 }
 0x36a   : > { %v4799_v12 = vmul.f32 %v18863_v29, %v4458_v60  ;;  %v4453_v14 = vpop.permute.xlu0 %4452  ;;  %1667 = vperm.xlu1 %16851, %v13798_v22  }
 0x36b   : > { %v4798_v62 = vmul.f32 %v18863_v29, %v4453_v14  ;;  %1662 = vperm.xlu0 %16850, %v13797_v54   ;;  %v14088_v14 = vld [vmem:[%s17141_s8 + $0x494] ss:$2 sm:$0xff] }
 0x36c   : > { %v4877_v30 = vadd.f32 %v4799_v12, %v4167_v2 }
 0x36d   : > { %v4876_v49 = vadd.f32 %v4798_v62, %v4166_v47  ;;  %v19156_v17 = vpop.permute.xlu1 %1275  ;;  %v14087_v62 = vld [vmem:[%s17141_s8 + $0x484] ss:$2 sm:$0xff] }
 0x36e   : > { %v4962_v58 = vadd.f32 %v18876_v18, %v4877_v30  ;;  %v19159_v63 = vpop.permute.xlu0 %1270  ;;  %2637 = vperm.xlu1 %16851, %v13930_v15  }
 0x36f   : > { %v4961_v33 = vadd.f32 %v18876_v18, %v4876_v49  ;;  %2632 = vperm.xlu0 %16850, %v13929_v32   ;;  %v14114_v49 = vld [vmem:[%s17141_s8 + $0x135] ss:$2 sm:$0xff] }
 0x370   : > { %v5040_v22 = vmax.f32 %v4962_v58, 0.0  ;;  %v2013_v58 = vmul.f32 %v18906_v36, %v18881_v8  ;;  %v1380_v8 = vmul.f32 %v18752_v20, %v18871_v34 }
 0x371   : > { %v5039_v54 = vmax.f32 %v4961_v33, 0.0  ;;  %v19164_v0 = vpop.permute.xlu1 %1907  ;;  %v14113_v33 = vld [vmem:[%s17141_s8 + $0x125] ss:$2 sm:$0xff] }
 0x372   : > { %v5125_v60 = vmul.f32 %v18889_v38, %v5040_v22  ;;  %v19167_v2 = vpop.permute.xlu0 %1902  ;;  %3077 = vperm.xlu1 %16851, %v13956_v16   ;;  %v2012_v16 = vmul.f32 %v18906_v36, %v18884_v35 }
 0x373   : > { %v5124_v12 = vmul.f32 %v18889_v38, %v5039_v54  ;;  %3072 = vperm.xlu0 %16850, %v13955_v56   ;;  %v1381_v56 = vmul.f32 %v18752_v20, %v18868_v26  ;;  %v2723_v54 = vmul.f32 %v18759_v3, %v18973_v41  ;;  %v3433_v26 = vmul.f32 %v18770_v13, %v19052_v24  ;;  %v13772_v41 = vld [vmem:[%s17141_s8 + $0x4c0] ss:$2 sm:$0xff] }
 0x374   : > { %v5210_v47 = vadd.f32 %v18968_v9, %v5125_v60  ;;  %v4142_v24 = vmul.f32 %v18785_v4, %v19143_v52 }
 0x375   : > { %v5209_v15 = vadd.f32 %v18968_v9, %v5124_v12  ;;  %v19174_v30 = vpop.permute.xlu1 %2347 }
 0x376   : > { %5289 = vst.msk [vmem:[#allocation2 + $0x68] sm:$0xff] %vm5275_vm2, %v5210_v47  ;;  %v19177_v32 = vpop.permute.xlu0 %2342  ;;  %4047 = vperm.xlu1 %16851, %v14088_v14   ;;  %v2722_v14 = vmul.f32 %v18759_v3, %v18976_v31  ;;  %v13773_v47 = vld [vmem:[%s17141_s8 + $0x4d0] ss:$2 sm:$0x7f]  ;;  %v4143_v31 = vmul.f32 %v18785_v4, %v19139_v6 }
 0x377   : > { %5288 = vst.msk [vmem:[#allocation2 + $0x60] sm:$0xff] %vm5275_vm2, %v5209_v15  ;;  %4042 = vperm.xlu0 %16850, %v14087_v62   ;;  %v2091_v62 = vadd.f32 %v2013_v58, %v1381_v56  ;;  %v2090_v15 = vadd.f32 %v2012_v16, %v1380_v8  ;;  %v13851_v56 = vld [vmem:[%s17141_s8 + $0x4c1] ss:$2 sm:$0xff] }
 0x379   : > { %v19186_v22 = vpop.permute.xlu1 %3317  ;;  %v2801_v34 = vadd.f32 %v2723_v54, %v2091_v62  ;;  %v2800_v58 = vadd.f32 %v2722_v14, %v2090_v15 }
 0x37a   : > { %v19192_v60 = vpop.f32.mrb[30].mxu1  ;;  %v19194_v12 = vpop.permute.xlu0 %3312  ;;  %4487 = vperm.xlu1 %16851, %v14114_v49   ;;  %v3432_v49 = vmul.f32 %v18770_v13, %v19060_v46  ;;  %v13852_v46 = vld [vmem:[%s17141_s8 + $0x4d1] ss:$2 sm:$0x7f] }
 0x37b   : > { %21812 = vst [vmem:[#allocation25_spill] sm:$0xff] %v19192_v60  ;;  %v15354_v35 = vpop.f32.mrb[31].mxu1  ;;  %4482 = vperm.xlu0 %16850, %v14113_v33   ;;  %v3511_v16 = vadd.f32 %v3433_v26, %v2801_v34  ;;  %v13877_v26 = vld [vmem:[%s17141_s8 + $0x162] ss:$2 sm:$0xff] }
 0x37c   : > { %v3510_v6 = vadd.f32 %v3432_v49, %v2800_v58 }
 0x37d   : > { %v19206_v60 = vpop.permute.xlu1 %3757  ;;  %v4221_v8 = vadd.f32 %v4143_v31, %v3511_v16 }
 0x37e   : > { %v19210_v35 = vpop.permute.xlu0 %3752  ;;  %1305 = vperm.xlu1 %16851, %v13773_v47   ;;  %v5446_v33 = vld [vmem:[#allocation2 + $0x61] ss:$2 sm:$0xff]  ;;  %v4220_v52 = vadd.f32 %v4142_v24, %v3510_v6 }
 0x37f   : > { %1300 = vperm.xlu0 %16850, %v13772_v41   ;;  %15287 = vmatmul.mubr.msk.f32.gmra.mrb[12].mxu0 %vm5275_vm2, %v5446_v33  ;;  %v13878_v41 = vld [vmem:[%s17141_s8 + $0x172] ss:$2 sm:$0xff]  ;;  %v14010_v24 = vld [vmem:[%s17141_s8 + $0x4b3] ss:$2 sm:$0xff] }
 0x380   : > { %15289 = vmatprep.mubr.msk.f32.mxu0 %vm16954_vm1, %v21804_v28 }
 0x381   : > { %v4728_v54 = vpop.permute.xlu1 %4727 }
 0x382   : > { %v4853_v47 = vmul.f32 %v18863_v29, %v4728_v54  ;;  %v4723_v14 = vpop.permute.xlu0 %4722  ;;  %1937 = vperm.xlu1 %16851, %v13852_v46   ;;  %v5432_v46 = vld [vmem:[%s21793_s0] sm:$0x7] }
 0x383   : > { %v4852_v62 = vmul.f32 %v18863_v29, %v4723_v14  ;;  %1932 = vperm.xlu0 %16850, %v13851_v56   ;;  %v14009_v56 = vld [vmem:[%s17141_s8 + $0x4a3] ss:$2 sm:$0xff]  ;;  %15386 = vmatpush3.msk.msra.mxu1 %vm5630_vm0, %v5432_v46  ;;  %v1960_v46 = vmul.f32 %v18906_v36, %v18961_v44 }
 0x384   : > { %v4931_v15 = vadd.f32 %v4853_v47, %v4221_v8  ;;  %15623 = vmatprep.subr.mxu1 %v21804_v28 }
 0x385   : > { %v4930_v34 = vadd.f32 %v4852_v62, %v4220_v52  ;;  %v19223_v33 = vpop.permute.xlu1 %1015  ;;  %v14036_v52 = vld [vmem:[%s17141_s8 + $0x154] ss:$2 sm:$0xff] }
 0x386   : > { %v5016_v49 = vadd.f32 %v18876_v18, %v4931_v15  ;;  %v19226_v58 = vpop.permute.xlu0 %1010  ;;  %2377 = vperm.xlu1 %16851, %v13878_v41   ;;  %v14035_v41 = vld [vmem:[%s17141_s8 + $0x144] ss:$2 sm:$0xff] }
 0x387   : > { %v5015_v31 = vadd.f32 %v18876_v18, %v4930_v34  ;;  %2372 = vperm.xlu0 %16850, %v13877_v26  }
 0x388   : > { %v5094_v16 = vmax.f32 %v5016_v49, 0.0  ;;  %v14168_v49 = vld [vmem:[%s17141_s8 + $0x495] ss:$2 sm:$0xff] }
 0x389   : > { %v5093_v6 = vmax.f32 %v5015_v31, 0.0  ;;  %v19235_v54 = vpop.permute.xlu1 %1647  ;;  %v1961_v31 = vmul.f32 %v18906_v36, %v18958_v48  ;;  %v19271_v48 = vld [vmem:[%s21794_s9] ss:$0 sm:$0xff] }
 0x38a   : > { %v5179_v8 = vmul.f32 %v18889_v38, %v5094_v16  ;;  %v19239_v47 = vpop.permute.xlu0 %1642  ;;  %3347 = vperm.xlu1 %16851, %v14010_v24   ;;  %v14167_v24 = vld [vmem:[%s17141_s8 + $0x485] ss:$2 sm:$0xff]  ;;  %v1328_v44 = vmul.f32 %v19271_v48, %v18953_v25  ;;  %v19289_v25 = vld [vmem:[%s21794_s9 + $0x3] ss:$0 sm:$0xff] }
 0x38b   : > { %v5178_v14 = vmul.f32 %v18889_v38, %v5093_v6  ;;  %3342 = vperm.xlu0 %16850, %v14009_v56   ;;  %v1329_v56 = vmul.f32 %v18752_v20, %v18950_v53  ;;  %v2671_v6 = vmul.f32 %v18759_v3, %v19040_v50  ;;  %v19278_v20 = vld [vmem:[%s21794_s9 + $0x2] ss:$0 sm:$0xff]  ;;  %v13721_v50 = vld [vmem:[%s17141_s8 + $0x190] ss:$2 sm:$0xff] }
 0x38c   : > { %v5264_v62 = vadd.f32 %v18968_v9, %v5179_v8  ;;  %v2670_v3 = vmul.f32 %v19278_v20, %v19043_v43 }
 0x38d   : > { %v5263_v15 = vadd.f32 %v18968_v9, %v5178_v14  ;;  %v19246_v26 = vpop.permute.xlu1 %2617 }
 0x38e   : > { %5343 = vst.msk [vmem:[#allocation2 + $0x218] sm:$0xff] %vm5275_vm2, %v5264_v62  ;;  %v19249_v34 = vpop.permute.xlu0 %2612  ;;  %3787 = vperm.xlu1 %16851, %v14036_v52   ;;  %v2039_v52 = vadd.f32 %v1961_v31, %v1329_v56  ;;  %v3381_v62 = vmul.f32 %v18770_v13, %v19119_v57  ;;  %v4091_v31 = vmul.f32 %v18785_v4, %v19206_v60  ;;  %v13799_v60 = vld [vmem:[%s17141_s8 + $0x181] ss:$2 sm:$0xff] }
 0x38f   : > { %5342 = vst.msk [vmem:[#allocation2 + $0x210] sm:$0xff] %vm5275_vm2, %v5263_v15  ;;  %3782 = vperm.xlu0 %16850, %v14035_v41   ;;  %v13720_v41 = vld [vmem:[%s17141_s8 + $0x180] ss:$2 sm:$0xff]  ;;  %v2038_v15 = vadd.f32 %v1960_v46, %v1328_v44 }
 0x390   : > { %v19302_v46 = vld [vmem:[%s21794_s9 + $0x4] ss:$0 sm:$0xff] }
 0x391   : > { %v19258_v16 = vpop.permute.xlu1 %3057  ;;  %v2748_v57 = vadd.f32 %v2670_v3, %v2038_v15  ;;  %v4090_v44 = vmul.f32 %v19302_v46, %v19210_v35  ;;  %v13932_v15 = vld [vmem:[%s17141_s8 + $0x4d2] ss:$2 sm:$0x7f] }
 0x392   : > { %v19264_v8 = vpop.f32.mrb[4].mxu0  ;;  %v19266_v14 = vpop.permute.xlu0 %3052  ;;  %4757 = vperm.xlu1 %16851, %v14168_v49   ;;  %v3380_v49 = vmul.f32 %v19289_v25, %v19127_v1  ;;  %v13800_v1 = vld [vmem:[%s17141_s8 + $0x191] ss:$2 sm:$0xff] }
 0x393   : > { %v15276_v53 = vpop.f32.mrb[5].mxu0  ;;  %4752 = vperm.xlu0 %16850, %v14167_v24   ;;  %v2749_v24 = vadd.f32 %v2671_v6, %v2039_v52 }
 0x394   : > { %v3458_v6 = vadd.f32 %v3380_v49, %v2748_v57  ;;  %v13958_v57 = vld [vmem:[%s17141_s8 + $0x173] ss:$2 sm:$0xff] }
 0x395   : > { %v19293_v43 = vpop.permute.xlu1 %4027  ;;  %v3459_v4 = vadd.f32 %v3381_v62, %v2749_v24  ;;  %v13931_v62 = vld [vmem:[%s17141_s8 + $0x4c2] ss:$2 sm:$0xff] }
 0x396   : > { %v19297_v56 = vpop.permute.xlu0 %4022  ;;  %1045 = vperm.xlu1 %16851, %v13721_v50   ;;  %v5500_v13 = vld [vmem:[#allocation2 + $0x211] ss:$2 sm:$0xff]  ;;  %v4168_v35 = vadd.f32 %v4090_v44, %v3458_v6 }
 0x397   : > { %1040 = vperm.xlu0 %16850, %v13720_v41   ;;  %15368 = vmatmul.mubr.msk.f32.gmra.mrb[40].mxu1 %vm5275_vm2, %v5500_v13  ;;  %v4169_v53 = vadd.f32 %v4091_v31, %v3459_v4  ;;  %v13957_v44 = vld [vmem:[%s17141_s8 + $0x163] ss:$2 sm:$0xff] }
 0x398   : > { %15370 = vmatprep.mubr.msk.f32.mxu1 %vm16954_vm1, %v21804_v28 }
 0x399   : > { %v4468_v3 = vpop.permute.xlu1 %4467 }
 0x39a   : > { %v4801_v50 = vmul.f32 %v18863_v29, %v4468_v3  ;;  %v4463_v52 = vpop.permute.xlu0 %4462  ;;  %1677 = vperm.xlu1 %16851, %v13800_v1  }
 0x39b   : > { %v4800_v41 = vmul.f32 %v18863_v29, %v4463_v52  ;;  %1672 = vperm.xlu0 %16850, %v13799_v60  }
 0x39c   : > { %v4879_v13 = vadd.f32 %v4801_v50, %v4169_v53 }
 0x39d   : > { %v4878_v24 = vadd.f32 %v4800_v41, %v4168_v35  ;;  %v1286_v10 = vpop.permute.xlu1 %1285 }
 0x39e   : > { %v4964_v11 = vadd.f32 %v18876_v18, %v4879_v13  ;;  %v1281_v49 = vpop.permute.xlu0 %1280  ;;  %2647 = vperm.xlu1 %16851, %v13932_v15   ;;  %v1387_v6 = vmul.f32 %v19271_v48, %v1286_v10  ;;  %v14089_v15 = vld [vmem:[%s17141_s8 + $0x4a4] ss:$2 sm:$0xff] }
 0x39f   : > { %v4963_v31 = vadd.f32 %v18876_v18, %v4878_v24  ;;  %2642 = vperm.xlu0 %16850, %v13931_v62   ;;  %v1386_v18 = vmul.f32 %v19271_v48, %v1281_v49  ;;  %v14116_v24 = vld [vmem:[%s17141_s8 + $0x155] ss:$2 sm:$0xff]  ;;  %v2015_v49 = vmul.f32 %v18906_v36, %v19030_v59  ;;  %v1382_v59 = vmul.f32 %v19271_v48, %v19025_v51 }
 0x3a0   : > { %v5042_v1 = vmax.f32 %v4964_v11, 0.0  ;;  %v14090_v11 = vld [vmem:[%s17141_s8 + $0x4b4] ss:$2 sm:$0xff] }
 0x3a1   : > { %v5041_v4 = vmax.f32 %v4963_v31, 0.0  ;;  %v1918_v29 = vpop.permute.xlu1 %1917  ;;  %v14115_v31 = vld [vmem:[%s17141_s8 + $0x145] ss:$2 sm:$0xff] }
 0x3a2   : > { %v5127_v60 = vmul.f32 %v18889_v38, %v5042_v1  ;;  %v2019_v3 = vmul.f32 %v18906_v36, %v1918_v29  ;;  %v1913_v53 = vpop.permute.xlu0 %1912  ;;  %3087 = vperm.xlu1 %16851, %v13958_v57   ;;  %v2014_v57 = vmul.f32 %v18906_v36, %v19033_v42 }
 0x3a3   : > { %v5126_v50 = vmul.f32 %v18889_v38, %v5041_v4  ;;  %v2018_v52 = vmul.f32 %v18906_v36, %v1913_v53  ;;  %3082 = vperm.xlu0 %16850, %v13957_v44   ;;  %v1383_v44 = vmul.f32 %v19271_v48, %v19022_v55  ;;  %v2725_v4 = vmul.f32 %v19278_v20, %v19107_v40  ;;  %v13879_v40 = vld [vmem:[%s17141_s8 + $0x182] ss:$2 sm:$0xff] }
 0x3a4   : > { %v5212_v35 = vadd.f32 %v18968_v9, %v5127_v60  ;;  %v19327_v41 = vadd.f32 %v2019_v3, %v1387_v6  ;;  %v2724_v6 = vmul.f32 %v19278_v20, %v19110_v21  ;;  %v13880_v3 = vld [vmem:[%s17141_s8 + $0x192] ss:$2 sm:$0xff]  ;;  %v3435_v55 = vmul.f32 %v19289_v25, %v19186_v22 }
 0x3a5   : > { %v5211_v10 = vadd.f32 %v18968_v9, %v5126_v50  ;;  %v19331_v13 = vadd.f32 %v2018_v52, %v1386_v18  ;;  %v19333_v62 = vpop.permute.xlu1 %2357  ;;  %v2093_v53 = vadd.f32 %v2015_v49, %v1383_v44  ;;  %v2092_v50 = vadd.f32 %v2014_v57, %v1382_v59  ;;  %v19381_v57 = vld [vmem:[%s21794_s9 + $0x5] ss:$0 sm:$0xff] }
 0x3a6   : > { %5291 = vst.msk [vmem:[#allocation2 + $0x78] sm:$0xff] %vm5275_vm2, %v5212_v35  ;;  %v19336_v38 = vpop.permute.xlu0 %2352  ;;  %4057 = vperm.xlu1 %16851, %v14090_v11   ;;  %v3434_v18 = vmul.f32 %v19289_v25, %v19194_v12  ;;  %v4145_v21 = vmul.f32 %v19302_v46, %v19293_v43  ;;  %v4144_v22 = vmul.f32 %v19302_v46, %v19297_v56 }
 0x3a7   : > { %5290 = vst.msk [vmem:[#allocation2 + $0x70] sm:$0xff] %vm5275_vm2, %v5211_v10  ;;  %4052 = vperm.xlu0 %16850, %v14089_v15   ;;  %v2803_v51 = vadd.f32 %v2725_v4, %v2093_v53  ;;  %v2802_v15 = vadd.f32 %v2724_v6, %v2092_v50  ;;  %v14012_v10 = vld [vmem:[%s17141_s8 + $0x4d3] ss:$2 sm:$0x7f]  ;;  %v14038_v6 = vld [vmem:[%s17141_s8 + $0x174] ss:$2 sm:$0xff] }
 0x3a9   : > { %v19345_v1 = vpop.permute.xlu1 %3327  ;;  %v3513_v12 = vadd.f32 %v3435_v55, %v2803_v51  ;;  %v3512_v43 = vadd.f32 %v3434_v18, %v2802_v15  ;;  %v14169_v15 = vld [vmem:[%s17141_s8 + $0x4a5] ss:$2 sm:$0xff] }
 0x3aa   : > { %v19351_v29 = vpop.f32.mrb[32].mxu1  ;;  %v19353_v60 = vpop.permute.xlu0 %3322  ;;  %4497 = vperm.xlu1 %16851, %v14116_v24   ;;  %v14011_v24 = vld [vmem:[%s17141_s8 + $0x4c3] ss:$2 sm:$0xff] }
 0x3ab   : > { %v15357_v42 = vpop.f32.mrb[33].mxu1  ;;  %4492 = vperm.xlu0 %16850, %v14115_v31   ;;  %v4223_v31 = vadd.f32 %v4145_v21, %v3513_v12  ;;  %v4222_v4 = vadd.f32 %v4144_v22, %v3512_v43  ;;  %v14170_v21 = vld [vmem:[%s17141_s8 + $0x4b5] ss:$2 sm:$0xff]  ;;  %v14259_v12 = vld [vmem:[%s21793_s0 + $0x8] sm:$0x7] }
 0x3ac   : > { %15505 = vmatpush3.msk.msra.mxu0 %vm5630_vm0, %v14259_v12 }
 0x3ad   : > { %v19365_v52 = vpop.permute.xlu1 %3767  ;;  %15742 = vmatprep.subr.mxu0 %v21804_v28 }
 0x3ae   : > { %v19369_v11 = vpop.permute.xlu0 %3762  ;;  %2387 = vperm.xlu1 %16851, %v13880_v3   ;;  %v5448_v35 = vld [vmem:[#allocation2 + $0x71] ss:$2 sm:$0xff]  ;;  %v14037_v3 = vld [vmem:[%s17141_s8 + $0x164] ss:$2 sm:$0xff] }
 0x3af   : > { %2382 = vperm.xlu0 %16850, %v13879_v40   ;;  %15290 = vmatmul.mubr.msk.f32.gmra.mrb[14].mxu0 %vm5275_vm2, %v5448_v35  ;;  %v19390_v40 = vld [vmem:[%s21796_s26] ss:$0 sm:$0xff] }
 0x3b0   : > { %15292 = vmatprep.mubr.msk.f32.mxu0 %vm16954_vm1, %v21804_v28 }
 0x3b1   : > { %v4738_v49 = vpop.permute.xlu1 %4737 }
 0x3b2   : > { %v4855_v56 = vmul.f32 %v19381_v57, %v4738_v49  ;;  %v4733_v44 = vpop.permute.xlu0 %4732  ;;  %3357 = vperm.xlu1 %16851, %v14012_v10  }
 0x3b3   : > { %v4854_v59 = vmul.f32 %v19381_v57, %v4733_v44  ;;  %3352 = vperm.xlu0 %16850, %v14011_v24   ;;  %v19402_v24 = vld [vmem:[%s21797_s27] ss:$0 sm:$0xff] }
 0x3b4   : > { %v4933_v42 = vadd.f32 %v4855_v56, %v4223_v31 }
 0x3b5   : > { %v4932_v53 = vadd.f32 %v4854_v59, %v4222_v4  ;;  %v1026_v55 = vpop.permute.xlu1 %1025  ;;  %v19413_v59 = vld [vmem:[%s21794_s9 + $0x1] ss:$0 sm:$0xff]  ;;  %s21828_s9 = sld [smem:[#allocation33_spill]] }
 0x3b6   : > { %v5018_v50 = vadd.f32 %v19390_v40, %v4933_v42  ;;  %v1021_v18 = vpop.permute.xlu0 %1020  ;;  %3797 = vperm.xlu1 %16851, %v14038_v6   ;;  %v1335_v49 = vmul.f32 %v19271_v48, %v1026_v55  ;;  %v13960_v42 = vld [vmem:[%s17141_s8 + $0x193] ss:$2 sm:$0xff]  ;;  %v1962_v12 = vmul.f32 %v19413_v59, %v19100_v61  ;;  %v2672_v61 = vmul.f32 %v19278_v20, %v19177_v32 }
 0x3b7   : > { %v5017_v51 = vadd.f32 %v19390_v40, %v4932_v53  ;;  %3792 = vperm.xlu0 %16850, %v14037_v3   ;;  %v1334_v4 = vmul.f32 %v19271_v48, %v1021_v18  ;;  %v13959_v53 = vld [vmem:[%s17141_s8 + $0x183] ss:$2 sm:$0xff]  ;;  %v4093_v32 = vmul.f32 %v19302_v46, %v19365_v52 }
 0x3b8   : > { %v5096_v35 = vmax.f32 %v5018_v50, 0.0 }
 0x3b9   : > { %v5095_v22 = vmax.f32 %v5017_v51, 0.0  ;;  %v1658_v10 = vpop.permute.xlu1 %1657 }
 0x3ba   : > { %v5181_v43 = vmul.f32 %v19402_v24, %v5096_v35  ;;  %v1967_v31 = vmul.f32 %v18906_v36, %v1658_v10  ;;  %v1653_v56 = vpop.permute.xlu0 %1652  ;;  %4767 = vperm.xlu1 %16851, %v14170_v21   ;;  %v14091_v10 = vld [vmem:[%s17141_s8 + $0x4c4] ss:$2 sm:$0xff] }
 0x3bb   : > { %v5180_v44 = vmul.f32 %v19402_v24, %v5095_v22  ;;  %v1966_v6 = vmul.f32 %v19413_v59, %v1653_v56  ;;  %4762 = vperm.xlu0 %16850, %v14169_v15   ;;  %v14092_v15 = vld [vmem:[%s17141_s8 + $0x4d4] ss:$2 sm:$0x7f]  ;;  %v1963_v22 = vmul.f32 %v19413_v59, %v19097_v5  ;;  %v2673_v56 = vmul.f32 %v19278_v20, %v19174_v30  ;;  %v14117_v30 = vld [vmem:[%s17141_s8 + $0x165] ss:$2 sm:$0xff] }
 0x3bc   : > { %v5266_v36 = vadd.f32 %v18968_v9, %v5181_v43  ;;  %v19419_v3 = vadd.f32 %v1967_v31, %v1335_v49  ;;  %v1331_v31 = vmul.f32 %v19271_v48, %v19089_v7  ;;  %v3383_v7 = vmul.f32 %v19289_v25, %v19258_v16 }
 0x3bd   : > { %v5265_v55 = vadd.f32 %v18968_v9, %v5180_v44  ;;  %v19423_v50 = vadd.f32 %v1966_v6, %v1334_v4  ;;  %v2628_v18 = vpop.permute.xlu1 %2627  ;;  %v1330_v44 = vmul.f32 %v19271_v48, %v19092_v27  ;;  %v14118_v4 = vld [vmem:[%s17141_s8 + $0x175] ss:$2 sm:$0xff]  ;;  %v4092_v16 = vmul.f32 %v19302_v46, %v19369_v11 }
 0x3be   : > { %5345 = vst.msk [vmem:[#allocation2 + $0x228] sm:$0xff] %vm5275_vm2, %v5266_v36  ;;  %v2729_v51 = vmul.f32 %v19278_v20, %v2628_v18  ;;  %v2623_v21 = vpop.permute.xlu0 %2622  ;;  %3097 = vperm.xlu1 %16851, %v13960_v42   ;;  %v2041_v6 = vadd.f32 %v1963_v22, %v1331_v31  ;;  %v3382_v36 = vmul.f32 %v19289_v25, %v19266_v14  ;;  %v14040_v14 = vld [vmem:[%s17141_s8 + $0x194] ss:$2 sm:$0xff] }
 0x3bf   : > { %5344 = vst.msk [vmem:[#allocation2 + $0x220] sm:$0xff] %vm5275_vm2, %v5265_v55  ;;  %v2728_v35 = vmul.f32 %v19278_v20, %v2623_v21  ;;  %3092 = vperm.xlu0 %16850, %v13959_v53   ;;  %v2040_v42 = vadd.f32 %v1962_v12, %v1330_v44 }
 0x3c0   : > { %v19433_v9 = vadd.f32 %v2729_v51, %v19327_v41  ;;  %v2751_v27 = vadd.f32 %v2673_v56, %v2041_v6  ;;  %v14172_v56 = vld [vmem:[%s17141_s8 + $0x4d5] ss:$2 sm:$0x7f] }
 0x3c1   : > { %v19439_v43 = vadd.f32 %v2728_v35, %v19331_v13  ;;  %v19441_v49 = vpop.permute.xlu1 %3067  ;;  %v2750_v51 = vadd.f32 %v2672_v61, %v2040_v42  ;;  %v14039_v35 = vld [vmem:[%s17141_s8 + $0x184] ss:$2 sm:$0xff]  ;;  %v14171_v61 = vld [vmem:[%s17141_s8 + $0x4c5] ss:$2 sm:$0xff]  ;;  %v14120_v42 = vld [vmem:[%s17141_s8 + $0x195] ss:$2 sm:$0xff] }
 0x3c2   : > { %v19447_v5 = vpop.f32.mrb[6].mxu0  ;;  %v19449_v41 = vpop.permute.xlu0 %3062  ;;  %4067 = vperm.xlu1 %16851, %v14092_v15   ;;  %v3461_v21 = vadd.f32 %v3383_v7, %v2751_v27  ;;  %v14119_v27 = vld [vmem:[%s17141_s8 + $0x185] ss:$2 sm:$0xff] }
 0x3c3   : > { %v15279_v13 = vpop.f32.mrb[7].mxu0  ;;  %4062 = vperm.xlu0 %16850, %v14091_v10   ;;  %v3460_v52 = vadd.f32 %v3382_v36, %v2750_v51 }
 0x3c4   : > { %v4171_v22 = vadd.f32 %v4093_v32, %v3461_v21 }
 0x3c5   : > { %v19461_v53 = vpop.permute.xlu1 %4037  ;;  %v4170_v11 = vadd.f32 %v4092_v16, %v3460_v52 }
 0x3c6   : > { %v19465_v55 = vpop.permute.xlu0 %4032  ;;  %4507 = vperm.xlu1 %16851, %v14118_v4   ;;  %v5502_v18 = vld [vmem:[#allocation2 + $0x221] ss:$2 sm:$0xff] }
 0x3c7   : > { %4502 = vperm.xlu0 %16850, %v14117_v30   ;;  %15371 = vmatmul.mubr.msk.f32.gmra.mrb[42].mxu1 %vm5275_vm2, %v5502_v18 }
 0x3c8   : > { %15373 = vmatprep.mubr.msk.f32.mxu1 %vm16954_vm1, %v21804_v28 }
 0x3c9   : > { %v4478_v15 = vpop.permute.xlu1 %4477 }
 0x3ca   : > { %v4803_v10 = vmul.f32 %v19381_v57, %v4478_v15  ;;  %v4473_v12 = vpop.permute.xlu0 %4472  ;;  %3807 = vperm.xlu1 %16851, %v14040_v14  }
 0x3cb   : > { %v4802_v31 = vmul.f32 %v19381_v57, %v4473_v12  ;;  %3802 = vperm.xlu0 %16850, %v14039_v35  }
 0x3cc   : > { %v4881_v44 = vadd.f32 %v4803_v10, %v4171_v22  ;;  %v19491_v22 = vld [vmem:[%s21798_s28] ss:$0 sm:$0xff] }
 0x3cd   : > { %v4880_v13 = vadd.f32 %v4802_v31, %v4170_v11  ;;  %v1296_v4 = vpop.permute.xlu1 %1295 }
 0x3ce   : > { %v4966_v6 = vadd.f32 %v19390_v40, %v4881_v44  ;;  %v1291_v7 = vpop.permute.xlu0 %1290  ;;  %4777 = vperm.xlu1 %16851, %v14172_v56   ;;  %v1389_v16 = vmul.f32 %v19271_v48, %v1296_v4  ;;  %v2017_v4 = vmul.f32 %v19413_v59, %v19164_v0 }
 0x3cf   : > { %v4965_v30 = vadd.f32 %v19390_v40, %v4880_v13  ;;  %4772 = vperm.xlu0 %16850, %v14171_v61   ;;  %v1388_v52 = vmul.f32 %v19271_v48, %v1291_v7  ;;  %v2016_v7 = vmul.f32 %v19413_v59, %v19167_v2  ;;  %v2726_v2 = vmul.f32 %v19278_v20, %v19249_v34 }
 0x3d0   : > { %v5044_v36 = vmax.f32 %v4966_v6, 0.0  ;;  %v4146_v34 = vmul.f32 %v19302_v46, %v19465_v55 }
 0x3d1   : > { %v5043_v32 = vmax.f32 %v4965_v30, 0.0  ;;  %v1928_v18 = vpop.permute.xlu1 %1927 }
 0x3d2   : > { %v5129_v51 = vmul.f32 %v19402_v24, %v5044_v36  ;;  %v2021_v14 = vmul.f32 %v19413_v59, %v1928_v18  ;;  %v1923_v21 = vpop.permute.xlu0 %1922  ;;  %4517 = vperm.xlu1 %16851, %v14120_v42   ;;  %v1385_v36 = vmul.f32 %v19271_v48, %v19156_v17  ;;  %v3436_v17 = vmul.f32 %v19289_v25, %v19353_v60 }
 0x3d3   : > { %v5128_v35 = vmul.f32 %v19402_v24, %v5043_v32  ;;  %v2020_v15 = vmul.f32 %v19413_v59, %v1923_v21  ;;  %4512 = vperm.xlu0 %16850, %v14119_v27   ;;  %v2727_v27 = vmul.f32 %v19278_v20, %v19246_v26  ;;  %v4147_v21 = vmul.f32 %v19302_v46, %v19461_v53 }
 0x3d4   : > { %v5214_v10 = vadd.f32 %v19491_v22, %v5129_v51  ;;  %v19494_v12 = vadd.f32 %v2021_v14, %v1389_v16  ;;  %v2095_v18 = vadd.f32 %v2017_v4, %v1385_v36  ;;  %v3437_v51 = vmul.f32 %v19289_v25, %v19345_v1 }
 0x3d5   : > { %v5213_v11 = vadd.f32 %v19491_v22, %v5128_v35  ;;  %v19497_v31 = vadd.f32 %v2020_v15, %v1388_v52  ;;  %v2368_v56 = vpop.permute.xlu1 %2367 }
 0x3d6   : > { %5293 = vst.msk [vmem:[#allocation2 + $0x88] sm:$0xff] %vm5275_vm2, %v5214_v10  ;;  %v2677_v44 = vmul.f32 %v19278_v20, %v2368_v56  ;;  %v2363_v61 = vpop.permute.xlu0 %2362  ;;  %v2805_v14 = vadd.f32 %v2727_v27, %v2095_v18 }
 0x3d7   : > { %5292 = vst.msk [vmem:[#allocation2 + $0x80] sm:$0xff] %vm5275_vm2, %v5213_v11  ;;  %v2676_v13 = vmul.f32 %v19278_v20, %v2363_v61 }
 0x3d8   : > { %v19506_v6 = vadd.f32 %v2677_v44, %v19419_v3  ;;  %v1384_v3 = vmul.f32 %v19271_v48, %v19159_v63  ;;  %v3515_v15 = vadd.f32 %v3437_v51, %v2805_v14 }
 0x3d9   : > { %v19511_v30 = vadd.f32 %v2676_v13, %v19423_v50  ;;  %v19513_v42 = vpop.permute.xlu1 %3337 }
 0x3da   : > { %v19519_v32 = vpop.f32.mrb[34].mxu1  ;;  %v19521_v0 = vpop.permute.xlu0 %3332  ;;  %v2094_v16 = vadd.f32 %v2016_v7, %v1384_v3  ;;  %v4225_v60 = vadd.f32 %v4147_v21, %v3515_v15 }
 0x3db   : > { %v15360_v50 = vpop.f32.mrb[35].mxu1 }
 0x3dc   : > { %v2804_v63 = vadd.f32 %v2726_v2, %v2094_v16 }
 0x3dd   : > { %v3778_v26 = vpop.permute.xlu1 %3777 }
 0x3de   : > { %v3773_v35 = vpop.permute.xlu0 %3772  ;;  %v5450_v52 = vld [vmem:[#allocation2 + $0x81] ss:$2 sm:$0xff]  ;;  %v3514_v1 = vadd.f32 %v3436_v17, %v2804_v63 }
 0x3df   : > { %15293 = vmatmul.mubr.msk.f32.gmra.mrb[16].mxu0 %vm5275_vm2, %v5450_v52 }
 0x3e0   : > { %15295 = vmatprep.mubr.msk.f32.mxu0 %vm16954_vm1, %v21804_v28  ;;  %v4224_v44 = vadd.f32 %v4146_v34, %v3514_v1 }
 0x3e1   : > { %v4748_v10 = vpop.permute.xlu1 %4747 }
 0x3e2   : > { %v4857_v11 = vmul.f32 %v19381_v57, %v4748_v10  ;;  %v4743_v56 = vpop.permute.xlu0 %4742 }
 0x3e3   : > { %v4856_v53 = vmul.f32 %v19381_v57, %v4743_v56  ;;  %v1965_v56 = vmul.f32 %v19413_v59, %v19235_v54 }
 0x3e4   : > { %v4935_v61 = vadd.f32 %v4857_v11, %v4225_v60 }
 0x3e5   : > { %v4934_v13 = vadd.f32 %v4856_v53, %v4224_v44  ;;  %v1036_v4 = vpop.permute.xlu1 %1035  ;;  %v1964_v53 = vmul.f32 %v19413_v59, %v19239_v47  ;;  %v2674_v47 = vmul.f32 %v19278_v20, %v19336_v38 }
 0x3e6   : > { %v5020_v55 = vadd.f32 %v19390_v40, %v4935_v61  ;;  %v1031_v7 = vpop.permute.xlu0 %1030  ;;  %v1337_v18 = vmul.f32 %v19271_v48, %v1036_v4  ;;  %v1333_v4 = vmul.f32 %v19271_v48, %v19223_v33  ;;  %v3384_v33 = vmul.f32 %v19289_v25, %v19449_v41 }
 0x3e7   : > { %v5019_v36 = vadd.f32 %v19390_v40, %v4934_v13  ;;  %v1336_v14 = vmul.f32 %v19271_v48, %v1031_v7 }
 0x3e8   : > { %v5098_v27 = vmax.f32 %v5020_v55, 0.0  ;;  %v2675_v55 = vmul.f32 %v19278_v20, %v19333_v62 }
 0x3e9   : > { %v5097_v3 = vmax.f32 %v5019_v36, 0.0  ;;  %v1668_v2 = vpop.permute.xlu1 %1667  ;;  %v2043_v36 = vadd.f32 %v1965_v56, %v1333_v4 }
 0x3ea   : > { %v5183_v50 = vmul.f32 %v19402_v24, %v5098_v27  ;;  %v1969_v51 = vmul.f32 %v19413_v59, %v1668_v2  ;;  %v1663_v16 = vpop.permute.xlu0 %1662  ;;  %v3385_v27 = vmul.f32 %v19289_v25, %v19441_v49 }
 0x3eb   : > { %v5182_v17 = vmul.f32 %v19402_v24, %v5097_v3  ;;  %v1968_v21 = vmul.f32 %v19413_v59, %v1663_v16  ;;  %v2753_v2 = vadd.f32 %v2675_v55, %v2043_v36 }
 0x3ec   : > { %v5268_v52 = vadd.f32 %v19491_v22, %v5183_v50  ;;  %v19549_v63 = vadd.f32 %v1969_v51, %v1337_v18  ;;  %v4095_v50 = vmul.f32 %v19302_v46, %v3778_v26 }
 0x3ed   : > { %v5267_v34 = vadd.f32 %v19491_v22, %v5182_v17  ;;  %v19552_v15 = vadd.f32 %v1968_v21, %v1336_v14  ;;  %v2638_v1 = vpop.permute.xlu1 %2637  ;;  %v3463_v38 = vadd.f32 %v3385_v27, %v2753_v2 }
 0x3ee   : > { %5347 = vst.msk [vmem:[#allocation2 + $0x238] sm:$0xff] %vm5275_vm2, %v5268_v52  ;;  %v2731_v10 = vmul.f32 %v19278_v20, %v2638_v1  ;;  %v2633_v60 = vpop.permute.xlu0 %2632 }
 0x3ef   : > { %5346 = vst.msk [vmem:[#allocation2 + $0x230] sm:$0xff] %vm5275_vm2, %v5267_v34  ;;  %v2730_v11 = vmul.f32 %v19278_v20, %v2633_v60  ;;  %v4173_v14 = vadd.f32 %v4095_v50, %v3463_v38 }
 0x3f0   : > { %v19561_v44 = vadd.f32 %v2731_v10, %v19494_v12  ;;  %v1332_v12 = vmul.f32 %v19271_v48, %v19226_v58  ;;  %v4094_v58 = vmul.f32 %v19302_v46, %v3773_v35 }
 0x3f1   : > { %v19566_v61 = vadd.f32 %v2730_v11, %v19497_v31  ;;  %v19568_v13 = vpop.permute.xlu1 %3077 }
 0x3f2   : > { %v19574_v7 = vpop.f32.mrb[8].mxu0  ;;  %v19576_v54 = vpop.permute.xlu0 %3072  ;;  %v2042_v3 = vadd.f32 %v1964_v53, %v1332_v12 }
 0x3f3   : > { %v15282_v31 = vpop.f32.mrb[9].mxu0 }
 0x3f4   : > { %v2752_v16 = vadd.f32 %v2674_v47, %v2042_v3 }
 0x3f5   : > { %v4048_v62 = vpop.permute.xlu1 %4047 }
 0x3f6   : > { %v4043_v18 = vpop.permute.xlu0 %4042  ;;  %v5504_v51 = vld [vmem:[#allocation2 + $0x231] ss:$2 sm:$0xff]  ;;  %v3462_v49 = vadd.f32 %v3384_v33, %v2752_v16 }
 0x3f7   : > { %15374 = vmatmul.mubr.msk.f32.gmra.mrb[44].mxu1 %vm5275_vm2, %v5504_v51 }
 0x3f8   : > { %15376 = vmatprep.mubr.msk.f32.mxu1 %vm16954_vm1, %v21804_v28  ;;  %v4172_v52 = vadd.f32 %v4094_v58, %v3462_v49 }
 0x3f9   : > { %v4488_v17 = vpop.permute.xlu1 %4487 }
 0x3fa   : > { %v4805_v41 = vmul.f32 %v19381_v57, %v4488_v17  ;;  %v4483_v21 = vpop.permute.xlu0 %4482 }
 0x3fb   : > { %v4804_v26 = vmul.f32 %v19381_v57, %v4483_v21  ;;  %v3438_v21 = vmul.f32 %v19289_v25, %v19521_v0 }
 0x3fc   : > { %v4883_v34 = vadd.f32 %v4805_v41, %v4173_v14  ;;  %v3439_v41 = vmul.f32 %v19289_v25, %v19513_v42 }
 0x3fd   : > { %v4882_v1 = vadd.f32 %v4804_v26, %v4172_v52  ;;  %v1306_v10 = vpop.permute.xlu1 %1305  ;;  %v4149_v26 = vmul.f32 %v19302_v46, %v4048_v62 }
 0x3fe   : > { %v4968_v35 = vadd.f32 %v19390_v40, %v4883_v34  ;;  %v1301_v60 = vpop.permute.xlu0 %1300  ;;  %v1391_v12 = vmul.f32 %v19271_v48, %v1306_v10  ;;  %v4148_v10 = vmul.f32 %v19302_v46, %v4043_v18 }
 0x3ff   : > { %v4967_v11 = vadd.f32 %v19390_v40, %v4882_v1  ;;  %v1390_v27 = vmul.f32 %v19271_v48, %v1301_v60  ;;  %v3516_v60 = vadd.f32 %v3438_v21, %v19439_v43 }
 0x400   : > { %v5046_v56 = vmax.f32 %v4968_v35, 0.0  ;;  %v3517_v35 = vadd.f32 %v3439_v41, %v19433_v9 }
 0x401   : > { %v5045_v53 = vmax.f32 %v4967_v11, 0.0  ;;  %v1938_v4 = vpop.permute.xlu1 %1937 }
 0x402   : > { %v5131_v55 = vmul.f32 %v19402_v24, %v5046_v56  ;;  %v2023_v47 = vmul.f32 %v19413_v59, %v1938_v4  ;;  %v1933_v31 = vpop.permute.xlu0 %1932  ;;  %v4227_v11 = vadd.f32 %v4149_v26, %v3517_v35 }
 0x403   : > { %v5130_v36 = vmul.f32 %v19402_v24, %v5045_v53  ;;  %v2022_v3 = vmul.f32 %v19413_v59, %v1933_v31  ;;  %v4226_v53 = vadd.f32 %v4148_v10, %v3516_v60  ;;  %v3387_v60 = vmul.f32 %v19289_v25, %v19568_v13 }
 0x404   : > { %v5216_v33 = vadd.f32 %v19491_v22, %v5131_v55  ;;  %v19602_v2 = vadd.f32 %v2023_v47, %v1391_v12 }
 0x405   : > { %v5215_v50 = vadd.f32 %v19491_v22, %v5130_v36  ;;  %v19605_v51 = vadd.f32 %v2022_v3, %v1390_v27  ;;  %v19607_v16 = vpop.permute.xlu1 %2377 }
 0x406   : > { %5295 = vst.msk [vmem:[#allocation2 + $0x98] sm:$0xff] %vm5275_vm2, %v5216_v33  ;;  %v19610_v58 = vpop.permute.xlu0 %2372 }
 0x407   : > { %5294 = vst.msk [vmem:[#allocation2 + $0x90] sm:$0xff] %vm5275_vm2, %v5215_v50 }
 0x409   : > { %v19613_v38 = vpop.permute.xlu1 %3347 }
 0x40a   : > { %v19615_v49 = vpop.f32.mrb[36].mxu1  ;;  %v19617_v17 = vpop.permute.xlu0 %3342 }
 0x40b   : > { %v15363_v14 = vpop.f32.mrb[37].mxu1 }
 0x40d   : > { %v3788_v52 = vpop.permute.xlu1 %3787 }
 0x40e   : > { %v3783_v34 = vpop.permute.xlu0 %3782  ;;  %v5452_v1 = vld [vmem:[#allocation2 + $0x91] ss:$2 sm:$0xff] }
 0x40f   : > { %15296 = vmatmul.mubr.msk.f32.gmra.mrb[18].mxu0 %vm5275_vm2, %v5452_v1 }
 0x410   : > { %15298 = vmatprep.mubr.msk.f32.mxu0 %vm16954_vm1, %v21804_v28 }
 0x411   : > { %v4758_v42 = vpop.permute.xlu1 %4757 }
 0x412   : > { %v4859_v0 = vmul.f32 %v19381_v57, %v4758_v42  ;;  %v4753_v56 = vpop.permute.xlu0 %4752  ;;  %v3386_v42 = vmul.f32 %v19289_v25, %v19576_v54 }
 0x413   : > { %v4858_v62 = vmul.f32 %v19381_v57, %v4753_v56 }
 0x414   : > { %v4937_v4 = vadd.f32 %v4859_v0, %v4227_v11  ;;  %v4097_v0 = vmul.f32 %v19302_v46, %v3788_v52 }
 0x415   : > { %v4936_v55 = vadd.f32 %v4858_v62, %v4226_v53  ;;  %v19632_v18 = vpop.permute.xlu1 %1045  ;;  %v4096_v62 = vmul.f32 %v19302_v46, %v3783_v34 }
 0x416   : > { %v5022_v12 = vadd.f32 %v19390_v40, %v4937_v4  ;;  %v19635_v9 = vpop.permute.xlu0 %1040  ;;  %v3465_v4 = vadd.f32 %v3387_v60, %v19506_v6 }
 0x417   : > { %v5021_v47 = vadd.f32 %v19390_v40, %v4936_v55  ;;  %v3464_v55 = vadd.f32 %v3386_v42, %v19511_v30 }
 0x418   : > { %v5100_v31 = vmax.f32 %v5022_v12, 0.0  ;;  %v4175_v12 = vadd.f32 %v4097_v0, %v3465_v4  ;;  %v3440_v4 = vmul.f32 %v19289_v25, %v19617_v17 }
 0x419   : > { %v5099_v43 = vmax.f32 %v5021_v47, 0.0  ;;  %v19638_v36 = vpop.permute.xlu1 %1677 }
 0x41a   : > { %v5185_v27 = vmul.f32 %v19402_v24, %v5100_v31  ;;  %v19641_v3 = vpop.permute.xlu0 %1672  ;;  %v4174_v31 = vadd.f32 %v4096_v62, %v3464_v55 }
 0x41b   : > { %v5184_v33 = vmul.f32 %v19402_v24, %v5099_v43 }
 0x41c   : > { %v5270_v50 = vadd.f32 %v19491_v22, %v5185_v27 }
 0x41d   : > { %v5269_v14 = vadd.f32 %v19491_v22, %v5184_v33  ;;  %v19646_v41 = vpop.permute.xlu1 %2647 }
 0x41e   : > { %5349 = vst.msk [vmem:[#allocation2 + $0x248] sm:$0xff] %vm5275_vm2, %v5270_v50  ;;  %v19649_v21 = vpop.permute.xlu0 %2642 }
 0x41f   : > { %5348 = vst.msk [vmem:[#allocation2 + $0x240] sm:$0xff] %vm5275_vm2, %v5269_v14 }
 0x421   : > { %v19652_v26 = vpop.permute.xlu1 %3087 }
 0x422   : > { %v19654_v1 = vpop.f32.mrb[10].mxu0  ;;  %v19656_v10 = vpop.permute.xlu0 %3082 }
 0x423   : > { %v15285_v35 = vpop.f32.mrb[11].mxu0 }
 0x425   : > { %v4058_v11 = vpop.permute.xlu1 %4057 }
 0x426   : > { %v4053_v56 = vpop.permute.xlu0 %4052  ;;  %v5506_v53 = vld [vmem:[#allocation2 + $0x241] ss:$2 sm:$0xff] }
 0x427   : > { %15377 = vmatmul.mubr.msk.f32.gmra.mrb[46].mxu1 %vm5275_vm2, %v5506_v53  ;;  %v3441_v53 = vmul.f32 %v19289_v25, %v19613_v38  ;;  %v3518_v38 = vadd.f32 %v3440_v4, %v19566_v61 }
 0x428   : > { %15379 = vmatprep.mubr.msk.f32.mxu1 %vm16954_vm1, %v21804_v28 }
 0x429   : > { %v4498_v13 = vpop.permute.xlu1 %4497 }
 0x42a   : > { %v4807_v54 = vmul.f32 %v19381_v57, %v4498_v13  ;;  %v4493_v47 = vpop.permute.xlu0 %4492 }
 0x42b   : > { %v4806_v52 = vmul.f32 %v19381_v57, %v4493_v47  ;;  %v4150_v47 = vmul.f32 %v19302_v46, %v4053_v56 }
 0x42c   : > { %v4885_v43 = vadd.f32 %v4807_v54, %v4175_v12  ;;  %v4151_v12 = vmul.f32 %v19302_v46, %v4058_v11 }
 0x42d   : > { %v4884_v27 = vadd.f32 %v4806_v52, %v4174_v31  ;;  %v19671_v34 = vpop.permute.xlu1 %2387  ;;  %v3519_v31 = vadd.f32 %v3441_v53, %v19561_v44 }
 0x42e   : > { %v4970_v33 = vadd.f32 %v19390_v40, %v4885_v43  ;;  %v19674_v6 = vpop.permute.xlu0 %2382 }
 0x42f   : > { %v4969_v50 = vadd.f32 %v19390_v40, %v4884_v27  ;;  %v4229_v43 = vadd.f32 %v4151_v12, %v3519_v31 }
 0x430   : > { %v5048_v14 = vmax.f32 %v4970_v33, 0.0 }
 0x431   : > { %v5047_v30 = vmax.f32 %v4969_v50, 0.0  ;;  %v19677_v35 = vpop.permute.xlu1 %3357  ;;  %v4228_v50 = vadd.f32 %v4150_v47, %v3518_v38 }
 0x432   : > { %v5133_v60 = vmul.f32 %v19402_v24, %v5048_v14  ;;  %v19680_v42 = vpop.permute.xlu0 %3352 }
 0x433   : > { %v5132_v0 = vmul.f32 %v19402_v24, %v5047_v30 }
 0x434   : > { %v5218_v62 = vadd.f32 %v19491_v22, %v5133_v60 }
 0x435   : > { %v5217_v55 = vadd.f32 %v19491_v22, %v5132_v0  ;;  %v3798_v13 = vpop.permute.xlu1 %3797  ;;  %v2679_v0 = vmul.f32 %v19278_v20, %v19607_v16  ;;  %v3388_v16 = vmul.f32 %v19289_v25, %v19656_v10 }
 0x436   : > { %5297 = vst.msk [vmem:[#allocation2 + $0xa8] sm:$0xff] %vm5275_vm2, %v5218_v62  ;;  %v3793_v54 = vpop.permute.xlu0 %3792  ;;  %v2678_v62 = vmul.f32 %v19278_v20, %v19610_v58  ;;  %v4099_v58 = vmul.f32 %v19302_v46, %v3798_v13  ;;  %v2733_v13 = vmul.f32 %v19278_v20, %v19646_v41  ;;  %v1339_v41 = vmul.f32 %v19271_v48, %v19632_v18 }
 0x437   : > { %5296 = vst.msk [vmem:[#allocation2 + $0xa0] sm:$0xff] %vm5275_vm2, %v5217_v55  ;;  %v3389_v55 = vmul.f32 %v19289_v25, %v19652_v26  ;;  %v2757_v38 = vadd.f32 %v2679_v0, %v19549_v63  ;;  %v4098_v26 = vmul.f32 %v19302_v46, %v3793_v54  ;;  %v1971_v63 = vmul.f32 %v19413_v59, %v19638_v36 }
 0x438   : > { %v1970_v0 = vmul.f32 %v19413_v59, %v19641_v3  ;;  %v1338_v59 = vmul.f32 %v19271_v48, %v19635_v9  ;;  %v2680_v3 = vmul.f32 %v19278_v20, %v19674_v6  ;;  %v2811_v18 = vadd.f32 %v2733_v13, %v19602_v2 }
 0x439   : > { %v4768_v52 = vpop.permute.xlu1 %4767 }
 0x43a   : > { %v4861_v17 = vmul.f32 %v19381_v57, %v4768_v52  ;;  %v19696_v27 = vpop.f32.mrb[38].mxu1  ;;  %v4763_v33 = vpop.permute.xlu0 %4762 }
 0x43b   : > { %v4860_v11 = vmul.f32 %v19381_v57, %v4763_v33  ;;  %v15366_v14 = vpop.f32.mrb[39].mxu1 }
 0x43c   : > { %v4939_v30 = vadd.f32 %v4861_v17, %v4229_v43  ;;  %v2756_v17 = vadd.f32 %v2678_v62, %v19552_v15  ;;  %v2681_v62 = vmul.f32 %v19278_v20, %v19671_v34 }
 0x43d   : > { %v4938_v60 = vadd.f32 %v4860_v11, %v4228_v50  ;;  %v3098_v56 = vpop.permute.xlu1 %3097  ;;  %v3467_v50 = vadd.f32 %v3389_v55, %v2757_v38 }
 0x43e   : > { %v5024_v44 = vadd.f32 %v19390_v40, %v4939_v30  ;;  %v3093_v61 = vpop.permute.xlu0 %3092  ;;  %v5454_v53 = vld [vmem:[#allocation2 + $0xa1] ss:$2 sm:$0xff]  ;;  %v3466_v14 = vadd.f32 %v3388_v16, %v2756_v17 }
 0x43f   : > { %v5023_v4 = vadd.f32 %v19390_v40, %v4938_v60  ;;  %15299 = vmatmul.mubr.msk.f32.gmra.mrb[20].mxu0 %vm5275_vm2, %v5454_v53  ;;  %v4177_v60 = vadd.f32 %v4099_v58, %v3467_v50  ;;  %v2048_v58 = vadd.f32 %v1970_v0, %v1338_v59  ;;  %v3390_v2 = vmul.f32 %v19289_v25, %v3093_v61 }
 0x440   : > { %v5102_v12 = vmax.f32 %v5024_v44, 0.0  ;;  %15301 = vmatprep.mubr.msk.f32.mxu0 %vm16954_vm1, %v21804_v28  ;;  %v2732_v44 = vmul.f32 %v19278_v20, %v19649_v21  ;;  %v4176_v53 = vadd.f32 %v4098_v26, %v3466_v14  ;;  %v3442_v21 = vmul.f32 %v19289_v25, %v19680_v42 }
 0x441   : > { %v5101_v47 = vmax.f32 %v5023_v4, 0.0  ;;  %v4068_v31 = vpop.permute.xlu1 %4067  ;;  %v3443_v4 = vmul.f32 %v19289_v25, %v19677_v35  ;;  %v3391_v42 = vmul.f32 %v19289_v25, %v3098_v56  ;;  %v2758_v26 = vadd.f32 %v2680_v3, %v2048_v58 }
 0x442   : > { %v5187_v52 = vmul.f32 %v19402_v24, %v5102_v12  ;;  %v4063_v43 = vpop.permute.xlu0 %4062  ;;  %v4153_v34 = vmul.f32 %v19302_v46, %v4068_v31 }
 0x443   : > { %v5186_v33 = vmul.f32 %v19402_v24, %v5101_v47  ;;  %v2049_v47 = vadd.f32 %v1971_v63, %v1339_v41  ;;  %v4152_v48 = vmul.f32 %v19302_v46, %v4063_v43  ;;  %v3521_v6 = vadd.f32 %v3443_v4, %v2811_v18 }
 0x444   : > { %v5272_v11 = vadd.f32 %v19491_v22, %v5187_v52  ;;  %v2810_v52 = vadd.f32 %v2732_v44, %v19605_v51 }
 0x445   : > { %v5271_v10 = vadd.f32 %v19491_v22, %v5186_v33  ;;  %v4508_v30 = vpop.permute.xlu1 %4507  ;;  %v2759_v9 = vadd.f32 %v2681_v62, %v2049_v47 }
 0x446   : > { %5351 = vst.msk [vmem:[#allocation2 + $0x258] sm:$0xff] %vm5275_vm2, %v5272_v11  ;;  %v4809_v15 = vmul.f32 %v19381_v57, %v4508_v30  ;;  %v4503_v54 = vpop.permute.xlu0 %4502  ;;  %v3520_v33 = vadd.f32 %v3442_v21, %v2810_v52  ;;  %v4231_v11 = vadd.f32 %v4153_v34, %v3521_v6 }
 0x447   : > { %5350 = vst.msk [vmem:[#allocation2 + $0x250] sm:$0xff] %vm5275_vm2, %v5271_v10  ;;  %v4808_v36 = vmul.f32 %v19381_v57, %v4503_v54  ;;  %v3469_v25 = vadd.f32 %v3391_v42, %v2759_v9  ;;  %v3468_v54 = vadd.f32 %v3390_v2, %v2758_v26  ;;  %v5355_v2 = vld [vmem:[#allocation2] ss:$2 sm:$0xff] }
 0x448   : > { %v4887_v55 = vadd.f32 %v4809_v15, %v4177_v60  ;;  %v4230_v63 = vadd.f32 %v4152_v48, %v3520_v33 }
 0x449   : > { %v4886_v12 = vadd.f32 %v4808_v36, %v4176_v53  ;;  %v3808_v16 = vpop.permute.xlu1 %3807 }
 0x44a   : > { %v4972_v38 = vadd.f32 %v19390_v40, %v4887_v55  ;;  %v3803_v35 = vpop.permute.xlu0 %3802  ;;  %v4101_v51 = vmul.f32 %v19302_v46, %v3808_v16 }
 0x44b   : > { %v4971_v20 = vadd.f32 %v19390_v40, %v4886_v12  ;;  %v4100_v56 = vmul.f32 %v19302_v46, %v3803_v35 }
 0x44c   : > { %v5050_v17 = vmax.f32 %v4972_v38, 0.0  ;;  %v4179_v36 = vadd.f32 %v4101_v51, %v3469_v25  ;;  %v5359_v51 = vld [vmem:[#allocation2 + $0x20] ss:$2 sm:$0xff] }
 0x44d   : > { %v5049_v31 = vmax.f32 %v4971_v20, 0.0  ;;  %v4778_v50 = vpop.permute.xlu1 %4777  ;;  %v4178_v55 = vadd.f32 %v4100_v56, %v3468_v54  ;;  %v5365_v56 = vld [vmem:[#allocation2 + $0x50] ss:$2 sm:$0xff]  ;;  %v5367_v25 = vld [vmem:[#allocation2 + $0x60] ss:$2 sm:$0xff] }
 0x44e   : > { %v5135_v14 = vmul.f32 %v19402_v24, %v5050_v17  ;;  %v4863_v43 = vmul.f32 %v19381_v57, %v4778_v50  ;;  %v4773_v10 = vpop.permute.xlu0 %4772  ;;  %v5508_v30 = vld [vmem:[#allocation2 + $0x251] ss:$2 sm:$0xff]  ;;  %v5357_v50 = vld [vmem:[#allocation2 + $0x10] ss:$2 sm:$0xff] }
 0x44f   : > { %v5134_v13 = vmul.f32 %v19402_v24, %v5049_v31  ;;  %v4862_v60 = vmul.f32 %v19381_v57, %v4773_v10  ;;  %15380 = vmatmul.mubr.msk.f32.gmra.mrb[48].mxu1 %vm5275_vm2, %v5508_v30  ;;  %v5361_v10 = vld [vmem:[#allocation2 + $0x30] ss:$2 sm:$0xff] }
 0x450   : > { %v5220_v61 = vadd.f32 %v19491_v22, %v5135_v14  ;;  %v4941_v15 = vadd.f32 %v4863_v43, %v4231_v11  ;;  %15382 = vmatprep.mubr.msk.f32.mxu1 %vm16954_vm1, %v21804_v28  ;;  %v6275_v11 = vld [vmem:[#allocation2 + $0x2] ss:$2 sm:$0xff]  ;;  %v6277_v43 = vld [vmem:[#allocation2 + $0x12] ss:$2 sm:$0xff] }
 0x451   : > { %v5219_v0 = vadd.f32 %v19491_v22, %v5134_v13  ;;  %v4940_v44 = vadd.f32 %v4862_v60, %v4230_v63  ;;  %v4518_v53 = vpop.permute.xlu1 %4517  ;;  %v6279_v30 = vld [vmem:[#allocation2 + $0x22] ss:$2 sm:$0xff]  ;;  %v6281_v13 = vld [vmem:[#allocation2 + $0x32] ss:$2 sm:$0xff] }
 0x452   : > { %5299 = vst.msk [vmem:[#allocation2 + $0xb8] sm:$0xff] %vm5275_vm2, %v5220_v61  ;;  %v5026_v46 = vadd.f32 %v19390_v40, %v4941_v15  ;;  %v4811_v41 = vmul.f32 %v19381_v57, %v4518_v53  ;;  %v19766_v62 = vpop.f32.mrb[12].mxu0  ;;  %v4513_v4 = vpop.permute.xlu0 %4512  ;;  %v5363_v63 = vld [vmem:[#allocation2 + $0x40] ss:$2 sm:$0xff]  ;;  %v5369_v54 = vld [vmem:[#allocation2 + $0x70] ss:$2 sm:$0xff] }
 0x453   : > { %5298 = vst.msk [vmem:[#allocation2 + $0xb0] sm:$0xff] %vm5275_vm2, %v5219_v0  ;;  %v5025_v59 = vadd.f32 %v19390_v40, %v4940_v44  ;;  %v4810_v3 = vmul.f32 %v19381_v57, %v4513_v4  ;;  %v15288_v21 = vpop.f32.mrb[13].mxu0  ;;  %v6283_v60 = vld [vmem:[#allocation2 + $0x42] ss:$2 sm:$0xff]  ;;  %v6285_v61 = vld [vmem:[#allocation2 + $0x52] ss:$2 sm:$0xff] }
 0x454   : > { %v5104_v12 = vmax.f32 %v5026_v46, 0.0  ;;  %v4889_v16 = vadd.f32 %v4811_v41, %v4179_v36  ;;  %v6287_v0 = vld [vmem:[#allocation2 + $0x62] ss:$2 sm:$0xff]  ;;  %v6289_v36 = vld [vmem:[#allocation2 + $0x72] ss:$2 sm:$0xff] }
 0x455   : > { %v5103_v47 = vmax.f32 %v5025_v59, 0.0  ;;  %v4888_v18 = vadd.f32 %v4810_v3, %v4178_v55  ;;  %v5371_v53 = vld [vmem:[#allocation2 + $0x80] ss:$2 sm:$0xff]  ;;  %v5373_v46 = vld [vmem:[#allocation2 + $0x90] ss:$2 sm:$0xff] }
 0x456   : > { %v5189_v34 = vmul.f32 %v19402_v24, %v5104_v12  ;;  %v4974_v38 = vadd.f32 %v19390_v40, %v4889_v16  ;;  %v6291_v41 = vld [vmem:[#allocation2 + $0x82] ss:$2 sm:$0xff]  ;;  %v6293_v55 = vld [vmem:[#allocation2 + $0x92] ss:$2 sm:$0xff] }
 0x457   : > { %v5188_v35 = vmul.f32 %v19402_v24, %v5103_v47  ;;  %v4973_v58 = vadd.f32 %v19390_v40, %v4888_v18  ;;  %v5375_v4 = vld [vmem:[#allocation2 + $0xa0] ss:$2 sm:$0xff]  ;;  %v5381_v47 = vld [vmem:[#allocation2 + $0xd0] ss:$2 sm:$0xff] }
 0x458   : > { %v5274_v52 = vadd.f32 %v19491_v22, %v5189_v34  ;;  %v5052_v48 = vmax.f32 %v4974_v38, 0.0  ;;  %v5383_v38 = vld [vmem:[#allocation2 + $0xe0] ss:$2 sm:$0xff] }
 0x459   : > { %v5273_v20 = vadd.f32 %v19491_v22, %v5188_v35  ;;  %v5051_v57 = vmax.f32 %v4973_v58, 0.0  ;;  %v6301_v35 = vld [vmem:[#allocation2 + $0xd2] ss:$2 sm:$0xff] }
 0x45a   : > { %5354 = vst.msk [vmem:[#allocation2 + $0x268] sm:$0x7f] %vm5353_vm3, %v5274_v52  ;;  %v5137_v9 = vmul.f32 %v19402_v24, %v5052_v48  ;;  %v5456_v6 = vld [vmem:[#allocation2 + $0xb1] ss:$2 sm:$0xff]  ;;  %v5377_v59 = vld [vmem:[#allocation2 + $0xb0] ss:$2 sm:$0xff] }
 0x45b   : > { %5352 = vst.msk [vmem:[#allocation2 + $0x260] sm:$0xff] %vm5275_vm2, %v5273_v20  ;;  %v5136_v42 = vmul.f32 %v19402_v24, %v5051_v57  ;;  %15302 = vmatmul.mubr.msk.f32.gmra.mrb[22].mxu0 %vm5275_vm2, %v5456_v6  ;;  %v14300_v24 = vld [vmem:[%s21793_s0 + $0xc] sm:$0x7]  ;;  %v5385_v58 = vld [vmem:[#allocation2 + $0xf0] ss:$2 sm:$0xff] }
 0x45c   : > { %v5222_v17 = vadd.f32 %v19491_v22, %v5137_v9  ;;  %15304 = vmatprep.mubr.msk.f32.mxu0 %vm16954_vm1, %v21804_v28  ;;  %v6295_v3 = vld [vmem:[#allocation2 + $0xa2] ss:$2 sm:$0xff]  ;;  %v6305_v20 = vld [vmem:[#allocation2 + $0xf2] ss:$2 sm:$0xff] }
 0x45d   : > { %v5221_v40 = vadd.f32 %v19491_v22, %v5136_v42  ;;  %v14341_v22 = vld [vmem:[%s21793_s0 + $0x10] sm:$0x7]  ;;  %v5387_v48 = vld [vmem:[#allocation2 + $0x100] ss:$2 sm:$0xff]  ;;  %s755_s0 = sand.u32 1, %s16942_s2  }
 0x45e   : > { %5301 = vst.msk [vmem:[#allocation2 + $0xc8] sm:$0xff] %vm5275_vm2, %v5222_v17  ;;  %v6303_v52 = vld [vmem:[#allocation2 + $0xe2] ss:$2 sm:$0xff]  ;;  %v6309_v42 = vld [vmem:[#allocation2 + $0x112] ss:$2 sm:$0xff]  ;;  %s756_s8 = scalar_lea.vmem [#allocation6], %s755_s0 }
 0x45f   : > { %5300 = vst.msk [vmem:[#allocation2 + $0xc0] sm:$0xff] %vm5275_vm2, %v5221_v40  ;;  %v5389_v57 = vld [vmem:[#allocation2 + $0x110] ss:$2 sm:$0xff]  ;;  %v5391_v6 = vld [vmem:[#allocation2 + $0x120] ss:$2 sm:$0xff]  ;;  %s13637_s5 = sshll.u32 %s756_s8, 4  ;;  %s21691_s5 = int_to_ptr.vmem [resolvable:$true] %s13637_s5 }
 0x460   : > { %v6307_v9 = vld [vmem:[#allocation2 + $0x102] ss:$2 sm:$0xff]  ;;  %s16888_s26 = scalar_lea.vmem %s21691_s5, 16 }
 0x461   : > { %v5393_v40 = vld [vmem:[#allocation2 + $0x130] ss:$2 sm:$0xff]  ;;  %p16889_p11 = scmp.ne.s32.totalorder %s21691_s5, %s16888_s26 }
 0x462   : > { %v5510_v26 = vld [vmem:[#allocation2 + $0x261] ss:$2 sm:$0x3f] }
 0x463   : > { %15383 = vmatmul.mubr.msk.f32.gmra.mrb[50].mxu1 %vm5275_vm2, %v5510_v26  ;;  %v6311_v26 = vld [vmem:[#allocation2 + $0x122] ss:$2 sm:$0xff]  ;;  %p16890_p12 = pnand %p16889_p11, %p17126_p5 }
 0x464   : > { %15387 = vmatprep.mubr.msk.f32.mxu1 %vm16954_vm1, %v21804_v28 }
 0x465   : > { %p16891_p13 = pneg %p16890_p12 }
 0x466   : > { %v5458_v33 = vld [vmem:[#allocation2 + $0xc1] ss:$2 sm:$0xff]  ;;  %v5379_v21 = vld [vmem:[#allocation2 + $0xc0] ss:$2 sm:$0xff] }
 0x467   : > { %15305 = vmatmul.mubr.msk.f32.gmra.mrb[24].mxu0 %vm5275_vm2, %v5458_v33  ;;  %15388 = vmatmul.mubr.msk.f32.vlgmr.msra.gmra.mrb[52].mxu1 %vm5275_vm2, %v5355_v2  ;;  %v6297_v12 = vld [vmem:[#allocation2 + $0xb2] ss:$2 sm:$0xff]  ;;  %v6299_v18 = vld [vmem:[#allocation2 + $0xc2] ss:$2 sm:$0xff] }
 0x468   : > { %15624 = vmatpush3.msk.msra.mxu1 %vm5630_vm0, %v14300_v24  ;;  %15390 = vmatprep.mubr.msk.f32.mxu1 %vm16954_vm1, %v21804_v28  ;;  %v5395_v33 = vld [vmem:[#allocation2 + $0x140] ss:$2 sm:$0xff] }
 0x469   : > { %15506 = vmatprep.mubr.msk.f32.mxu0 %vm16954_vm1, %v21804_v28  ;;  %v6313_v2 = vld [vmem:[#allocation2 + $0x132] ss:$2 sm:$0xff] }
 0x46a   : > { %v19803_v31 = vpop.f32.mrb[40].mxu1 }
 0x46b   : > { %v15369_v14 = vpop.f32.mrb[41].mxu1  ;;  %15391 = vmatmul.mubr.msk.f32.gmra.mrb[54].mxu1 %vm5275_vm2, %v5357_v50  ;;  %15507 = vmatmul.mubr.msk.f32.vlgmr.msra.gmra.mrb[26].mxu0 %vm5275_vm2, %v6275_v11  ;;  %v6315_v50 = vld [vmem:[#allocation2 + $0x142] ss:$2 sm:$0xff] }
 0x46c   : > { %15743 = vmatpush3.msk.msra.mxu0 %vm5630_vm0, %v14341_v22  ;;  %15393 = vmatprep.mubr.msk.f32.mxu1 %vm16954_vm1, %v21804_v28  ;;  %v5397_v22 = vld [vmem:[#allocation2 + $0x150] ss:$2 sm:$0xff]  ;;  %v5399_v11 = vld [vmem:[#allocation2 + $0x160] ss:$2 sm:$0xff] }
 0x46d   : > { %15509 = vmatprep.mubr.msk.f32.mxu0 %vm16954_vm1, %v21804_v28  ;;  %v6317_v14 = vld [vmem:[#allocation2 + $0x152] ss:$2 sm:$0xff] }
 0x46f   : > { %15394 = vmatmul.mubr.msk.f32.gmra.mrb[56].mxu1 %vm5275_vm2, %v5359_v51  ;;  %15510 = vmatmul.mubr.msk.f32.gmra.mrb[28].mxu0 %vm5275_vm2, %v6277_v43  ;;  %v5401_v51 = vld [vmem:[#allocation2 + $0x170] ss:$2 sm:$0xff] }
 0x470   : > { %15396 = vmatprep.mubr.msk.f32.mxu1 %vm16954_vm1, %v21804_v28  ;;  %15512 = vmatprep.mubr.msk.f32.mxu0 %vm16954_vm1, %v21804_v28  ;;  %v6319_v43 = vld [vmem:[#allocation2 + $0x162] ss:$2 sm:$0xff] }
 0x473   : > { %15397 = vmatmul.mubr.msk.f32.gmra.mrb[58].mxu1 %vm5275_vm2, %v5361_v10  ;;  %15513 = vmatmul.mubr.msk.f32.gmra.mrb[30].mxu0 %vm5275_vm2, %v6279_v30  ;;  %v5403_v10 = vld [vmem:[#allocation2 + $0x180] ss:$2 sm:$0xff] }
 0x474   : > { %15399 = vmatprep.mubr.msk.f32.mxu1 %vm16954_vm1, %v21804_v28  ;;  %15515 = vmatprep.mubr.msk.f32.mxu0 %vm16954_vm1, %v21804_v28  ;;  %v6321_v30 = vld [vmem:[#allocation2 + $0x172] ss:$2 sm:$0xff] }
 0x477   : > { %15400 = vmatmul.mubr.msk.f32.gmra.mrb[60].mxu1 %vm5275_vm2, %v5363_v63  ;;  %15516 = vmatmul.mubr.msk.f32.gmra.mrb[32].mxu0 %vm5275_vm2, %v6281_v13  ;;  %v5405_v13 = vld [vmem:[#allocation2 + $0x190] ss:$2 sm:$0xff] }
 0x478   : > { %15402 = vmatprep.mubr.msk.f32.mxu1 %vm16954_vm1, %v21804_v28  ;;  %15518 = vmatprep.mubr.msk.f32.mxu0 %vm16954_vm1, %v21804_v28 }
 0x47b   : > { %15403 = vmatmul.mubr.msk.f32.gmra.mrb[62].mxu1 %vm5275_vm2, %v5365_v56  ;;  %15519 = vmatmul.mubr.msk.f32.gmra.mrb[34].mxu0 %vm5275_vm2, %v6283_v60  ;;  %v6323_v56 = vld [vmem:[#allocation2 + $0x182] ss:$2 sm:$0xff] }
 0x47c   : > { %15405 = vmatprep.mubr.msk.f32.mxu1 %vm16954_vm1, %v21804_v28  ;;  %15521 = vmatprep.mubr.msk.f32.mxu0 %vm16954_vm1, %v21804_v28 }
 0x47f   : > { %15406 = vmatmul.mubr.msk.f32.gmra.mrb[64].mxu1 %vm5275_vm2, %v5367_v25  ;;  %15522 = vmatmul.mubr.msk.f32.gmra.mrb[36].mxu0 %vm5275_vm2, %v6285_v61  ;;  %v5407_v25 = vld [vmem:[#allocation2 + $0x1a0] ss:$2 sm:$0xff] }
 0x480   : > { %15408 = vmatprep.mubr.msk.f32.mxu1 %vm16954_vm1, %v21804_v28  ;;  %15524 = vmatprep.mubr.msk.f32.mxu0 %vm16954_vm1, %v21804_v28  ;;  %v6325_v61 = vld [vmem:[#allocation2 + $0x192] ss:$2 sm:$0xff] }
 0x482   : > { %v19842_v15 = vpop.f32.mrb[14].mxu0 }
 0x483   : > { %v15291_v44 = vpop.f32.mrb[15].mxu0  ;;  %15409 = vmatmul.mubr.msk.f32.gmra.mrb[66].mxu1 %vm5275_vm2, %v5369_v54  ;;  %15525 = vmatmul.mubr.msk.f32.gmra.mrb[38].mxu0 %vm5275_vm2, %v6287_v0  ;;  %v5409_v54 = vld [vmem:[#allocation2 + $0x1b0] ss:$2 sm:$0xff] }
 0x484   : > { %15411 = vmatprep.mubr.msk.f32.mxu1 %vm16954_vm1, %v21804_v28  ;;  %15527 = vmatprep.mubr.msk.f32.mxu0 %vm16954_vm1, %v21804_v28  ;;  %v6327_v0 = vld [vmem:[#allocation2 + $0x1a2] ss:$2 sm:$0xff] }
 0x485   : > { %v5411_v44 = vld [vmem:[#allocation2 + $0x1c0] ss:$2 sm:$0xff] }
 0x487   : > { %15412 = vmatmul.mubr.msk.f32.gmra.mrb[68].mxu1 %vm5275_vm2, %v5371_v53  ;;  %15528 = vmatmul.mubr.msk.f32.gmra.mrb[40].mxu0 %vm5275_vm2, %v6289_v36  ;;  %v6329_v53 = vld [vmem:[#allocation2 + $0x1b2] ss:$2 sm:$0xff] }
 0x488   : > { %15414 = vmatprep.mubr.msk.f32.mxu1 %vm16954_vm1, %v21804_v28  ;;  %15530 = vmatprep.mubr.msk.f32.mxu0 %vm16954_vm1, %v21804_v28  ;;  %v5413_v36 = vld [vmem:[#allocation2 + $0x1d0] ss:$2 sm:$0xff] }
 0x48b   : > { %15415 = vmatmul.mubr.msk.f32.gmra.mrb[70].mxu1 %vm5275_vm2, %v5373_v46  ;;  %15531 = vmatmul.mubr.msk.f32.gmra.mrb[42].mxu0 %vm5275_vm2, %v6291_v41  ;;  %v6331_v46 = vld [vmem:[#allocation2 + $0x1c2] ss:$2 sm:$0xff] }
 0x48c   : > { %15417 = vmatprep.mubr.msk.f32.mxu1 %vm16954_vm1, %v21804_v28  ;;  %15533 = vmatprep.mubr.msk.f32.mxu0 %vm16954_vm1, %v21804_v28  ;;  %v5415_v41 = vld [vmem:[#allocation2 + $0x1e0] ss:$2 sm:$0xff] }
 0x48f   : > { %15418 = vmatmul.mubr.msk.f32.gmra.mrb[72].mxu1 %vm5275_vm2, %v5375_v4  ;;  %15534 = vmatmul.mubr.msk.f32.gmra.mrb[44].mxu0 %vm5275_vm2, %v6293_v55  ;;  %v6333_v4 = vld [vmem:[#allocation2 + $0x1d2] ss:$2 sm:$0xff] }
 0x490   : > { %15420 = vmatprep.mubr.msk.f32.mxu1 %vm16954_vm1, %v21804_v28  ;;  %15536 = vmatprep.mubr.msk.f32.mxu0 %vm16954_vm1, %v21804_v28 }
 0x493   : > { %15421 = vmatmul.mubr.msk.f32.gmra.mrb[74].mxu1 %vm5275_vm2, %v5377_v59  ;;  %15537 = vmatmul.mubr.msk.f32.gmra.mrb[46].mxu0 %vm5275_vm2, %v6295_v3  ;;  %v5417_v59 = vld [vmem:[#allocation2 + $0x1f0] ss:$2 sm:$0xff] }
 0x494   : > { %15423 = vmatprep.mubr.msk.f32.mxu1 %vm16954_vm1, %v21804_v28  ;;  %15539 = vmatprep.mubr.msk.f32.mxu0 %vm16954_vm1, %v21804_v28  ;;  %v6335_v3 = vld [vmem:[#allocation2 + $0x1e2] ss:$2 sm:$0xff] }
 0x497   : > { %15424 = vmatmul.mubr.msk.f32.gmra.mrb[76].mxu1 %vm5275_vm2, %v5379_v21  ;;  %15540 = vmatmul.mubr.msk.f32.gmra.mrb[48].mxu0 %vm5275_vm2, %v6297_v12  ;;  %v5419_v12 = vld [vmem:[#allocation2 + $0x200] ss:$2 sm:$0xff] }
 0x498   : > { %15426 = vmatprep.mubr.msk.f32.mxu1 %vm16954_vm1, %v21804_v28  ;;  %15542 = vmatprep.mubr.msk.f32.mxu0 %vm16954_vm1, %v21804_v28 }
 0x49a   : > { %v19880_v16 = vpop.f32.mrb[42].mxu1 }
 0x49b   : > { %v15372_v34 = vpop.f32.mrb[43].mxu1  ;;  %15427 = vmatmul.mubr.msk.f32.gmra.mrb[78].mxu1 %vm5275_vm2, %v5381_v47  ;;  %15543 = vmatmul.mubr.msk.f32.gmra.mrb[50].mxu0 %vm5275_vm2, %v6299_v18  ;;  %v6337_v47 = vld [vmem:[#allocation2 + $0x1f2] ss:$2 sm:$0xff] }
 0x49c   : > { %15429 = vmatprep.mubr.msk.f32.mxu1 %vm16954_vm1, %v21804_v28  ;;  %15545 = vmatprep.mubr.msk.f32.mxu0 %vm16954_vm1, %v21804_v28  ;;  %v5421_v18 = vld [vmem:[#allocation2 + $0x210] ss:$2 sm:$0xff] }
 0x49d   : > { %v6339_v34 = vld [vmem:[#allocation2 + $0x202] ss:$2 sm:$0xff] }
 0x49f   : > { %15430 = vmatmul.mubr.msk.f32.gmra.mrb[80].mxu1 %vm5275_vm2, %v5383_v38  ;;  %15546 = vmatmul.mubr.msk.f32.gmra.mrb[52].mxu0 %vm5275_vm2, %v6301_v35  ;;  %v5423_v38 = vld [vmem:[#allocation2 + $0x220] ss:$2 sm:$0xff] }
 0x4a0   : > { %15432 = vmatprep.mubr.msk.f32.mxu1 %vm16954_vm1, %v21804_v28  ;;  %15548 = vmatprep.mubr.msk.f32.mxu0 %vm16954_vm1, %v21804_v28  ;;  %v6341_v35 = vld [vmem:[#allocation2 + $0x212] ss:$2 sm:$0xff] }
 0x4a3   : > { %15433 = vmatmul.mubr.msk.f32.gmra.mrb[82].mxu1 %vm5275_vm2, %v5385_v58  ;;  %15549 = vmatmul.mubr.msk.f32.gmra.mrb[54].mxu0 %vm5275_vm2, %v6303_v52  ;;  %v5425_v58 = vld [vmem:[#allocation2 + $0x230] ss:$2 sm:$0xff] }
 0x4a4   : > { %15435 = vmatprep.mubr.msk.f32.mxu1 %vm16954_vm1, %v21804_v28  ;;  %15551 = vmatprep.mubr.msk.f32.mxu0 %vm16954_vm1, %v21804_v28  ;;  %v6343_v52 = vld [vmem:[#allocation2 + $0x222] ss:$2 sm:$0xff] }
 0x4a7   : > { %15436 = vmatmul.mubr.msk.f32.gmra.mrb[84].mxu1 %vm5275_vm2, %v5387_v48  ;;  %15552 = vmatmul.mubr.msk.f32.gmra.mrb[56].mxu0 %vm5275_vm2, %v6305_v20  ;;  %v5427_v48 = vld [vmem:[#allocation2 + $0x240] ss:$2 sm:$0xff] }
 0x4a8   : > { %15438 = vmatprep.mubr.msk.f32.mxu1 %vm16954_vm1, %v21804_v28  ;;  %15554 = vmatprep.mubr.msk.f32.mxu0 %vm16954_vm1, %v21804_v28  ;;  %v6345_v20 = vld [vmem:[#allocation2 + $0x232] ss:$2 sm:$0xff] }
 0x4ab   : > { %15439 = vmatmul.mubr.msk.f32.gmra.mrb[86].mxu1 %vm5275_vm2, %v5389_v57  ;;  %15555 = vmatmul.mubr.msk.f32.gmra.mrb[58].mxu0 %vm5275_vm2, %v6307_v9  ;;  %v5429_v9 = vld [vmem:[#allocation2 + $0x250] ss:$2 sm:$0xff] }
 0x4ac   : > { %15441 = vmatprep.mubr.msk.f32.mxu1 %vm16954_vm1, %v21804_v28  ;;  %15557 = vmatprep.mubr.msk.f32.mxu0 %vm16954_vm1, %v21804_v28 }
 0x4af   : > { %15442 = vmatmul.mubr.msk.f32.gmra.mrb[88].mxu1 %vm5275_vm2, %v5391_v6  ;;  %15558 = vmatmul.mubr.msk.f32.gmra.mrb[60].mxu0 %vm5275_vm2, %v6309_v42  ;;  %v6347_v6 = vld [vmem:[#allocation2 + $0x242] ss:$2 sm:$0xff] }
 0x4b0   : > { %15444 = vmatprep.mubr.msk.f32.mxu1 %vm16954_vm1, %v21804_v28  ;;  %15560 = vmatprep.mubr.msk.f32.mxu0 %vm16954_vm1, %v21804_v28 }
 0x4b2   : > { %v19918_v17 = vpop.f32.mrb[16].mxu0 }
 0x4b3   : > { %v15294_v24 = vpop.f32.mrb[17].mxu0  ;;  %15445 = vmatmul.mubr.msk.f32.gmra.mrb[90].mxu1 %vm5275_vm2, %v5393_v40  ;;  %15561 = vmatmul.mubr.msk.f32.gmra.mrb[62].mxu0 %vm5275_vm2, %v6311_v26  ;;  %v5431_v40 = vld [vmem:[#allocation2 + $0x260] ss:$2 sm:$0x3f] }
 0x4b4   : > { %15447 = vmatprep.mubr.msk.f32.mxu1 %vm16954_vm1, %v21804_v28  ;;  %15563 = vmatprep.mubr.msk.f32.mxu0 %vm16954_vm1, %v21804_v28  ;;  %v6349_v26 = vld [vmem:[#allocation2 + $0x252] ss:$2 sm:$0xff]  ;;  %v6351_v24 = vld [vmem:[#allocation2 + $0x262] ss:$2 sm:$0x3f] }
 0x4b7   : > { %15448 = vmatmul.mubr.msk.f32.gmra.mrb[92].mxu1 %vm5275_vm2, %v5395_v33  ;;  %15564 = vmatmul.mubr.msk.f32.gmra.mrb[64].mxu0 %vm5275_vm2, %v6313_v2  ;;  %v6774_v33 = vld [vmem:[#allocation2 + $0x3] ss:$2 sm:$0xff]  ;;  %v6776_v2 = vld [vmem:[#allocation2 + $0x13] ss:$2 sm:$0xff] }
 0x4b8   : > { %15450 = vmatprep.mubr.msk.f32.mxu1 %vm16954_vm1, %v21804_v28  ;;  %15566 = vmatprep.mubr.msk.f32.mxu0 %vm16954_vm1, %v21804_v28 }
 0x4bb   : > { %15451 = vmatmul.mubr.msk.f32.gmra.mrb[94].mxu1 %vm5275_vm2, %v5397_v22  ;;  %15567 = vmatmul.mubr.msk.f32.gmra.mrb[66].mxu0 %vm5275_vm2, %v6315_v50  ;;  %v7273_v22 = vld [vmem:[#allocation2 + $0x4] ss:$2 sm:$0xff]  ;;  %v6778_v50 = vld [vmem:[#allocation2 + $0x23] ss:$2 sm:$0xff] }
 0x4bc   : > { %15453 = vmatprep.mubr.msk.f32.mxu1 %vm16954_vm1, %v21804_v28  ;;  %15569 = vmatprep.mubr.msk.f32.mxu0 %vm16954_vm1, %v21804_v28 }
 0x4bf   : > { %15454 = vmatmul.mubr.msk.f32.gmra.mrb[96].mxu1 %vm5275_vm2, %v5399_v11  ;;  %15570 = vmatmul.mubr.msk.f32.gmra.mrb[68].mxu0 %vm5275_vm2, %v6317_v14  ;;  %v7275_v11 = vld [vmem:[#allocation2 + $0x14] ss:$2 sm:$0xff]  ;;  %v6780_v14 = vld [vmem:[#allocation2 + $0x33] ss:$2 sm:$0xff] }
 0x4c0   : > { %15456 = vmatprep.mubr.msk.f32.mxu1 %vm16954_vm1, %v21804_v28  ;;  %15572 = vmatprep.mubr.msk.f32.mxu0 %vm16954_vm1, %v21804_v28 }
 0x4c3   : > { %15457 = vmatmul.mubr.msk.f32.gmra.mrb[98].mxu1 %vm5275_vm2, %v5401_v51  ;;  %15573 = vmatmul.mubr.msk.f32.gmra.mrb[70].mxu0 %vm5275_vm2, %v6319_v43  ;;  %v7277_v51 = vld [vmem:[#allocation2 + $0x24] ss:$2 sm:$0xff] }
 0x4c4   : > { %15459 = vmatprep.mubr.msk.f32.mxu1 %vm16954_vm1, %v21804_v28  ;;  %15575 = vmatprep.mubr.msk.f32.mxu0 %vm16954_vm1, %v21804_v28 }
 0x4c7   : > { %15460 = vmatmul.mubr.msk.f32.gmra.mrb[100].mxu1 %vm5275_vm2, %v5403_v10  ;;  %15576 = vmatmul.mubr.msk.f32.gmra.mrb[72].mxu0 %vm5275_vm2, %v6321_v30  ;;  %v6782_v10 = vld [vmem:[#allocation2 + $0x43] ss:$2 sm:$0xff]  ;;  %v7279_v30 = vld [vmem:[#allocation2 + $0x34] ss:$2 sm:$0xff] }
 0x4c8   : > { %15462 = vmatprep.mubr.msk.f32.mxu1 %vm16954_vm1, %v21804_v28  ;;  %15578 = vmatprep.mubr.msk.f32.mxu0 %vm16954_vm1, %v21804_v28 }
 0x4ca   : > { %v19956_v63 = vpop.f32.mrb[44].mxu1 }
 0x4cb   : > { %v15375_v60 = vpop.f32.mrb[45].mxu1  ;;  %15463 = vmatmul.mubr.msk.f32.gmra.mrb[102].mxu1 %vm5275_vm2, %v5405_v13  ;;  %15579 = vmatmul.mubr.msk.f32.gmra.mrb[74].mxu0 %vm5275_vm2, %v6323_v56  ;;  %v6784_v56 = vld [vmem:[#allocation2 + $0x53] ss:$2 sm:$0xff] }
 0x4cc   : > { %15465 = vmatprep.mubr.msk.f32.mxu1 %vm16954_vm1, %v21804_v28  ;;  %15581 = vmatprep.mubr.msk.f32.mxu0 %vm16954_vm1, %v21804_v28  ;;  %v7281_v60 = vld [vmem:[#allocation2 + $0x44] ss:$2 sm:$0xff] }
 0x4cf   : > { %15466 = vmatmul.mubr.msk.f32.gmra.mrb[104].mxu1 %vm5275_vm2, %v5407_v25  ;;  %15582 = vmatmul.mubr.msk.f32.gmra.mrb[76].mxu0 %vm5275_vm2, %v6325_v61  ;;  %v6786_v25 = vld [vmem:[#allocation2 + $0x63] ss:$2 sm:$0xff]  ;;  %v7283_v61 = vld [vmem:[#allocation2 + $0x54] ss:$2 sm:$0xff] }
 0x4d0   : > { %15468 = vmatprep.mubr.msk.f32.mxu1 %vm16954_vm1, %v21804_v28  ;;  %15584 = vmatprep.mubr.msk.f32.mxu0 %vm16954_vm1, %v21804_v28 }
 0x4d3   : > { %15469 = vmatmul.mubr.msk.f32.gmra.mrb[106].mxu1 %vm5275_vm2, %v5409_v54  ;;  %15585 = vmatmul.mubr.msk.f32.gmra.mrb[78].mxu0 %vm5275_vm2, %v6327_v0  ;;  %v6788_v54 = vld [vmem:[#allocation2 + $0x73] ss:$2 sm:$0xff]  ;;  %v7285_v0 = vld [vmem:[#allocation2 + $0x64] ss:$2 sm:$0xff] }
 0x4d4   : > { %15471 = vmatprep.mubr.msk.f32.mxu1 %vm16954_vm1, %v21804_v28  ;;  %15587 = vmatprep.mubr.msk.f32.mxu0 %vm16954_vm1, %v21804_v28 }
 0x4d7   : > { %15472 = vmatmul.mubr.msk.f32.gmra.mrb[108].mxu1 %vm5275_vm2, %v5411_v44  ;;  %15588 = vmatmul.mubr.msk.f32.gmra.mrb[80].mxu0 %vm5275_vm2, %v6329_v53  ;;  %v6790_v53 = vld [vmem:[#allocation2 + $0x83] ss:$2 sm:$0xff] }
 0x4d8   : > { %15474 = vmatprep.mubr.msk.f32.mxu1 %vm16954_vm1, %v21804_v28  ;;  %15590 = vmatprep.mubr.msk.f32.mxu0 %vm16954_vm1, %v21804_v28 }
 0x4db   : > { %15475 = vmatmul.mubr.msk.f32.gmra.mrb[110].mxu1 %vm5275_vm2, %v5413_v36  ;;  %15591 = vmatmul.mubr.msk.f32.gmra.mrb[82].mxu0 %vm5275_vm2, %v6331_v46  ;;  %v7287_v36 = vld [vmem:[#allocation2 + $0x74] ss:$2 sm:$0xff] }
 0x4dc   : > { %15477 = vmatprep.mubr.msk.f32.mxu1 %vm16954_vm1, %v21804_v28  ;;  %15593 = vmatprep.mubr.msk.f32.mxu0 %vm16954_vm1, %v21804_v28 }
 0x4df   : > { %15478 = vmatmul.mubr.msk.f32.gmra.mrb[112].mxu1 %vm5275_vm2, %v5415_v41  ;;  %15594 = vmatmul.mubr.msk.f32.gmra.mrb[84].mxu0 %vm5275_vm2, %v6333_v4  ;;  %v6792_v41 = vld [vmem:[#allocation2 + $0x93] ss:$2 sm:$0xff]  ;;  %v7289_v4 = vld [vmem:[#allocation2 + $0x84] ss:$2 sm:$0xff] }
 0x4e0   : > { %15480 = vmatprep.mubr.msk.f32.mxu1 %vm16954_vm1, %v21804_v28  ;;  %15596 = vmatprep.mubr.msk.f32.mxu0 %vm16954_vm1, %v21804_v28 }
 0x4e2   : > { %v19994_v55 = vpop.f32.mrb[18].mxu0 }
 0x4e3   : > { %v15297_v21 = vpop.f32.mrb[19].mxu0  ;;  %15481 = vmatmul.mubr.msk.f32.gmra.mrb[114].mxu1 %vm5275_vm2, %v5417_v59  ;;  %15597 = vmatmul.mubr.msk.f32.gmra.mrb[86].mxu0 %vm5275_vm2, %v6335_v3  ;;  %v6794_v59 = vld [vmem:[#allocation2 + $0xa3] ss:$2 sm:$0xff]  ;;  %v7291_v3 = vld [vmem:[#allocation2 + $0x94] ss:$2 sm:$0xff] }
 0x4e4   : > { %15483 = vmatprep.mubr.msk.f32.mxu1 %vm16954_vm1, %v21804_v28  ;;  %15599 = vmatprep.mubr.msk.f32.mxu0 %vm16954_vm1, %v21804_v28 }
 0x4e7   : > { %15484 = vmatmul.mubr.msk.f32.gmra.mrb[116].mxu1 %vm5275_vm2, %v5419_v12  ;;  %15600 = vmatmul.mubr.msk.f32.gmra.mrb[88].mxu0 %vm5275_vm2, %v6337_v47  ;;  %v6796_v12 = vld [vmem:[#allocation2 + $0xb3] ss:$2 sm:$0xff]  ;;  %v7293_v47 = vld [vmem:[#allocation2 + $0xa4] ss:$2 sm:$0xff] }
 0x4e8   : > { %15486 = vmatprep.mubr.msk.f32.mxu1 %vm16954_vm1, %v21804_v28  ;;  %15602 = vmatprep.mubr.msk.f32.mxu0 %vm16954_vm1, %v21804_v28 }
 0x4eb   : > { %15487 = vmatmul.mubr.msk.f32.gmra.mrb[118].mxu1 %vm5275_vm2, %v5421_v18  ;;  %15603 = vmatmul.mubr.msk.f32.gmra.mrb[90].mxu0 %vm5275_vm2, %v6339_v34  ;;  %v6798_v34 = vld [vmem:[#allocation2 + $0xc3] ss:$2 sm:$0xff] }
 0x4ec   : > { %15489 = vmatprep.mubr.msk.f32.mxu1 %vm16954_vm1, %v21804_v28  ;;  %15605 = vmatprep.mubr.msk.f32.mxu0 %vm16954_vm1, %v21804_v28 }
 0x4ef   : > { %15490 = vmatmul.mubr.msk.f32.gmra.mrb[120].mxu1 %vm5275_vm2, %v5423_v38  ;;  %15606 = vmatmul.mubr.msk.f32.gmra.mrb[92].mxu0 %vm5275_vm2, %v6341_v35  ;;  %v7295_v38 = vld [vmem:[#allocation2 + $0xb4] ss:$2 sm:$0xff] }
 0x4f0   : > { %15492 = vmatprep.mubr.msk.f32.mxu1 %vm16954_vm1, %v21804_v28  ;;  %15608 = vmatprep.mubr.msk.f32.mxu0 %vm16954_vm1, %v21804_v28 }
 0x4f3   : > { %15493 = vmatmul.mubr.msk.f32.gmra.mrb[122].mxu1 %vm5275_vm2, %v5425_v58  ;;  %15609 = vmatmul.mubr.msk.f32.gmra.mrb[94].mxu0 %vm5275_vm2, %v6343_v52  ;;  %v6800_v58 = vld [vmem:[#allocation2 + $0xd3] ss:$2 sm:$0xff]  ;;  %v7297_v52 = vld [vmem:[#allocation2 + $0xc4] ss:$2 sm:$0xff] }
 0x4f4   : > { %15495 = vmatprep.mubr.msk.f32.mxu1 %vm16954_vm1, %v21804_v28  ;;  %15611 = vmatprep.mubr.msk.f32.mxu0 %vm16954_vm1, %v21804_v28 }
 0x4f7   : > { %15496 = vmatmul.mubr.msk.f32.gmra.mrb[124].mxu1 %vm5275_vm2, %v5427_v48  ;;  %15612 = vmatmul.mubr.msk.f32.gmra.mrb[96].mxu0 %vm5275_vm2, %v6345_v20 }
 0x4f8   : > { %15498 = vmatprep.mubr.msk.f32.mxu1 %vm16954_vm1, %v21804_v28  ;;  %15614 = vmatprep.mubr.msk.f32.mxu0 %vm16954_vm1, %v21804_v28 }
 0x4fa   : > { %v20032_v57 = vpop.f32.mrb[46].mxu1 }
 0x4fb   : > { %v15378_v42 = vpop.f32.mrb[47].mxu1  ;;  %15499 = vmatmul.mubr.msk.f32.gmra.mrb[126].mxu1 %vm5275_vm2, %v5429_v9  ;;  %15615 = vmatmul.mubr.msk.f32.gmra.mrb[98].mxu0 %vm5275_vm2, %v6347_v6  ;;  %v6802_v6 = vld [vmem:[#allocation2 + $0xe3] ss:$2 sm:$0xff] }
 0x4fc   : > { %15501 = vmatprep.mubr.msk.f32.mxu1 %vm16954_vm1, %v21804_v28  ;;  %15617 = vmatprep.mubr.msk.f32.mxu0 %vm16954_vm1, %v21804_v28  ;;  %v7299_v42 = vld [vmem:[#allocation2 + $0xd4] ss:$2 sm:$0xff] }
 0x4ff   : > { %15502 = vmatmul.mubr.msk.f32.gmra.mrb[128].mxu1 %vm5275_vm2, %v5431_v40  ;;  %15618 = vmatmul.mubr.msk.f32.gmra.mrb[100].mxu0 %vm5275_vm2, %v6349_v26 }
 0x500   : > { %15620 = vmatprep.mubr.msk.f32.mxu0 %vm16954_vm1, %v21804_v28  ;;  %15625 = vmatprep.mubr.msk.f32.mxu1 %vm16954_vm1, %v21804_v28 }
 0x503   : > { %15621 = vmatmul.mubr.msk.f32.gmra.mrb[102].mxu0 %vm5275_vm2, %v6351_v24  ;;  %15626 = vmatmul.mubr.msk.f32.vlgmr.msra.gmra.mrb[130].mxu1 %vm5275_vm2, %v6774_v33 }
 0x504   : > { %15628 = vmatprep.mubr.msk.f32.mxu1 %vm16954_vm1, %v21804_v28  ;;  %15744 = vmatprep.mubr.msk.f32.mxu0 %vm16954_vm1, %v21804_v28 }
 0x507   : > { %15629 = vmatmul.mubr.msk.f32.gmra.mrb[132].mxu1 %vm5275_vm2, %v6776_v2  ;;  %15745 = vmatmul.mubr.msk.f32.vlgmr.msra.gmra.mrb[104].mxu0 %vm5275_vm2, %v7273_v22  ;;  %v6804_v22 = vld [vmem:[#allocation2 + $0xf3] ss:$2 sm:$0xff] }
 0x508   : > { %15631 = vmatprep.mubr.msk.f32.mxu1 %vm16954_vm1, %v21804_v28  ;;  %15747 = vmatprep.mubr.msk.f32.mxu0 %vm16954_vm1, %v21804_v28 }
 0x50b   : > { %15632 = vmatmul.mubr.msk.f32.gmra.mrb[134].mxu1 %vm5275_vm2, %v6778_v50  ;;  %15748 = vmatmul.mubr.msk.f32.gmra.mrb[106].mxu0 %vm5275_vm2, %v7275_v11  ;;  %v7301_v50 = vld [vmem:[#allocation2 + $0xe4] ss:$2 sm:$0xff] }
 0x50c   : > { %15634 = vmatprep.mubr.msk.f32.mxu1 %vm16954_vm1, %v21804_v28  ;;  %15750 = vmatprep.mubr.msk.f32.mxu0 %vm16954_vm1, %v21804_v28 }
 0x50f   : > { %15635 = vmatmul.mubr.msk.f32.gmra.mrb[136].mxu1 %vm5275_vm2, %v6780_v14  ;;  %15751 = vmatmul.mubr.msk.f32.gmra.mrb[108].mxu0 %vm5275_vm2, %v7277_v51 }
 0x510   : > { %15637 = vmatprep.mubr.msk.f32.mxu1 %vm16954_vm1, %v21804_v28  ;;  %15753 = vmatprep.mubr.msk.f32.mxu0 %vm16954_vm1, %v21804_v28 }
 0x512   : > { %v20070_v43 = vpop.f32.mrb[20].mxu0 }
 0x513   : > { %v15300_v13 = vpop.f32.mrb[21].mxu0  ;;  %15638 = vmatmul.mubr.msk.f32.gmra.mrb[138].mxu1 %vm5275_vm2, %v6782_v10  ;;  %15754 = vmatmul.mubr.msk.f32.gmra.mrb[110].mxu0 %vm5275_vm2, %v7279_v30 }
 0x514   : > { %15640 = vmatprep.mubr.msk.f32.mxu1 %vm16954_vm1, %v21804_v28  ;;  %15756 = vmatprep.mubr.msk.f32.mxu0 %vm16954_vm1, %v21804_v28  ;;  %v6806_v13 = vld [vmem:[#allocation2 + $0x103] ss:$2 sm:$0xff] }
 0x517   : > { %15641 = vmatmul.mubr.msk.f32.gmra.mrb[140].mxu1 %vm5275_vm2, %v6784_v56  ;;  %15757 = vmatmul.mubr.msk.f32.gmra.mrb[112].mxu0 %vm5275_vm2, %v7281_v60  ;;  %v7303_v56 = vld [vmem:[#allocation2 + $0xf4] ss:$2 sm:$0xff] }
 0x518   : > { %15643 = vmatprep.mubr.msk.f32.mxu1 %vm16954_vm1, %v21804_v28  ;;  %15759 = vmatprep.mubr.msk.f32.mxu0 %vm16954_vm1, %v21804_v28 }
 0x51b   : > { %15644 = vmatmul.mubr.msk.f32.gmra.mrb[142].mxu1 %vm5275_vm2, %v6786_v25  ;;  %15760 = vmatmul.mubr.msk.f32.gmra.mrb[114].mxu0 %vm5275_vm2, %v7283_v61 }
 0x51c   : > { %15646 = vmatprep.mubr.msk.f32.mxu1 %vm16954_vm1, %v21804_v28  ;;  %15762 = vmatprep.mubr.msk.f32.mxu0 %vm16954_vm1, %v21804_v28 }
 0x51f   : > { %15647 = vmatmul.mubr.msk.f32.gmra.mrb[144].mxu1 %vm5275_vm2, %v6788_v54  ;;  %15763 = vmatmul.mubr.msk.f32.gmra.mrb[116].mxu0 %vm5275_vm2, %v7285_v0  ;;  %v14385_v54 = vld [vmem:[%s21813_s1 + $0x8] sm:$0x1f] }
 0x520   : > { %15649 = vmatprep.mubr.msk.f32.mxu1 %vm16954_vm1, %v21804_v28  ;;  %15765 = vmatprep.mubr.msk.f32.mxu0 %vm16954_vm1, %v21804_v28 }
 0x521   : > { %15861 = vmatprep.subr.msk.mxu1 %vm8131_vm4, %v14385_v54 }
 0x522   : > { %v20096_v44 = vpop.f32.mrb[48].mxu1  ;;  %15862 = vmatpush3.msk.msra.mxu1 %vm8131_vm4, %v14385_v54 }
 0x523   : > { %v15381_v46 = vpop.f32.mrb[49].mxu1  ;;  %15650 = vmatmul.mubr.msk.f32.gmra.mrb[146].mxu1 %vm5275_vm2, %v6790_v53  ;;  %15766 = vmatmul.mubr.msk.f32.gmra.mrb[118].mxu0 %vm5275_vm2, %v7287_v36  ;;  %v6808_v53 = vld [vmem:[#allocation2 + $0x113] ss:$2 sm:$0xff]  ;;  %v7305_v36 = vld [vmem:[#allocation2 + $0x104] ss:$2 sm:$0xff] }
 0x524   : > { %15652 = vmatprep.mubr.msk.f32.mxu1 %vm16954_vm1, %v21804_v28  ;;  %15768 = vmatprep.mubr.msk.f32.mxu0 %vm16954_vm1, %v21804_v28 }
 0x527   : > { %15653 = vmatmul.mubr.msk.f32.gmra.mrb[148].mxu1 %vm5275_vm2, %v6792_v41  ;;  %15769 = vmatmul.mubr.msk.f32.gmra.mrb[120].mxu0 %vm5275_vm2, %v7289_v4 }
 0x528   : > { %15655 = vmatprep.mubr.msk.f32.mxu1 %vm16954_vm1, %v21804_v28  ;;  %15771 = vmatprep.mubr.msk.f32.mxu0 %vm16954_vm1, %v21804_v28 }
 0x52b   : > { %15656 = vmatmul.mubr.msk.f32.gmra.mrb[150].mxu1 %vm5275_vm2, %v6794_v59  ;;  %15772 = vmatmul.mubr.msk.f32.gmra.mrb[122].mxu0 %vm5275_vm2, %v7291_v3 }
 0x52c   : > { %15658 = vmatprep.mubr.msk.f32.mxu1 %vm16954_vm1, %v21804_v28  ;;  %15774 = vmatprep.mubr.msk.f32.mxu0 %vm16954_vm1, %v21804_v28 }
 0x52e   : > { %v20116_v21 = vpop.f32.mrb[22].mxu0 }
 0x52f   : > { %v15303_v18 = vpop.f32.mrb[23].mxu0  ;;  %15659 = vmatmul.mubr.msk.f32.gmra.mrb[152].mxu1 %vm5275_vm2, %v6796_v12  ;;  %15775 = vmatmul.mubr.msk.f32.gmra.mrb[124].mxu0 %vm5275_vm2, %v7293_v47  ;;  %v6810_v47 = vld [vmem:[#allocation2 + $0x123] ss:$2 sm:$0xff] }
 0x530   : > { %15661 = vmatprep.mubr.msk.f32.mxu1 %vm16954_vm1, %v21804_v28  ;;  %15777 = vmatprep.mubr.msk.f32.mxu0 %vm16954_vm1, %v21804_v28  ;;  %v7307_v18 = vld [vmem:[#allocation2 + $0x114] ss:$2 sm:$0xff] }
 0x533   : > { %15662 = vmatmul.mubr.msk.f32.gmra.mrb[154].mxu1 %vm5275_vm2, %v6798_v34  ;;  %15778 = vmatmul.mubr.msk.f32.gmra.mrb[126].mxu0 %vm5275_vm2, %v7295_v38 }
 0x534   : > { %15664 = vmatprep.mubr.msk.f32.mxu1 %vm16954_vm1, %v21804_v28  ;;  %15780 = vmatprep.mubr.msk.f32.mxu0 %vm16954_vm1, %v21804_v28 }
 0x536   : > { %v20130_v35 = vpop.f32.mrb[50].mxu1 }
 0x537   : > { %v15384_v48 = vpop.f32.mrb[51].mxu1  ;;  %15665 = vmatmul.mubr.msk.f32.gmra.mrb[156].mxu1 %vm5275_vm2, %v6800_v58  ;;  %15781 = vmatmul.mubr.msk.f32.gmra.mrb[128].mxu0 %vm5275_vm2, %v7297_v52 }
 0x538   : > { %15667 = vmatprep.mubr.msk.f32.mxu1 %vm16954_vm1, %v21804_v28  ;;  %15783 = vmatprep.mubr.msk.f32.mxu0 %vm16954_vm1, %v21804_v28 }
 0x53a   : > { %v20138_v20 = vpop.f32.mrb[24].mxu0  ;;  %v6080_v9 = vpop.f32.mrb[52].mxu1 }
 0x53b   : > { %v6081_v40 = vadd.f32 %v6080_v9, %v18991_v37  ;;  %v15306_v26 = vpop.f32.mrb[25].mxu0  ;;  %v15389_v24 = vpop.f32.mrb[53].mxu1  ;;  %15668 = vmatmul.mubr.msk.f32.gmra.mrb[158].mxu1 %vm5275_vm2, %v6802_v6  ;;  %15784 = vmatmul.mubr.msk.f32.gmra.mrb[130].mxu0 %vm5275_vm2, %v7299_v42  ;;  %v6812_v9 = vld [vmem:[#allocation2 + $0x133] ss:$2 sm:$0xff]  ;;  %v7309_v6 = vld [vmem:[#allocation2 + $0x124] ss:$2 sm:$0xff] }
 0x53c   : > { %15670 = vmatprep.mubr.msk.f32.mxu1 %vm16954_vm1, %v21804_v28  ;;  %15786 = vmatprep.mubr.msk.f32.mxu0 %vm16954_vm1, %v21804_v28 }
 0x53e   : > { %v6085_v33 = vpop.f32.mrb[54].mxu1  ;;  %v6540_v2 = vpop.f32.mrb[26].mxu0 }
 0x53f   : > { %v6086_v11 = vadd.f32 %v6085_v33, %v19125_v19  ;;  %v20148_v14 = vadd.f32 %v6540_v2, %v6081_v40  ;;  %v15392_v37 = vpop.f32.mrb[55].mxu1  ;;  %v15508_v51 = vpop.f32.mrb[27].mxu0  ;;  %15671 = vmatmul.mubr.msk.f32.gmra.mrb[160].mxu1 %vm5275_vm2, %v6804_v22  ;;  %15787 = vmatmul.mubr.msk.f32.gmra.mrb[132].mxu0 %vm5275_vm2, %v7301_v50  ;;  %v6814_v2 = vld [vmem:[#allocation2 + $0x143] ss:$2 sm:$0xff]  ;;  %v7311_v22 = vld [vmem:[#allocation2 + $0x134] ss:$2 sm:$0xff] }
 0x540   : > { %15673 = vmatprep.mubr.msk.f32.mxu1 %vm16954_vm1, %v21804_v28  ;;  %15789 = vmatprep.mubr.msk.f32.mxu0 %vm16954_vm1, %v21804_v28 }
 0x542   : > { %v6090_v10 = vpop.f32.mrb[56].mxu1  ;;  %v6545_v30 = vpop.f32.mrb[28].mxu0 }
 0x543   : > { %v6091_v19 = vadd.f32 %v6090_v10, %v19264_v8  ;;  %v20157_v60 = vadd.f32 %v6545_v30, %v6086_v11  ;;  %v15395_v25 = vpop.f32.mrb[57].mxu1  ;;  %v15511_v61 = vpop.f32.mrb[29].mxu0  ;;  %15674 = vmatmul.mubr.msk.f32.gmra.mrb[162].mxu1 %vm5275_vm2, %v6806_v13  ;;  %15790 = vmatmul.mubr.msk.f32.gmra.mrb[134].mxu0 %vm5275_vm2, %v7303_v56  ;;  %v6816_v30 = vld [vmem:[#allocation2 + $0x153] ss:$2 sm:$0xff]  ;;  %v7313_v13 = vld [vmem:[#allocation2 + $0x144] ss:$2 sm:$0xff] }
 0x544   : > { %15676 = vmatprep.mubr.msk.f32.mxu1 %vm16954_vm1, %v21804_v28  ;;  %15792 = vmatprep.mubr.msk.f32.mxu0 %vm16954_vm1, %v21804_v28 }
 0x546   : > { %v6095_v8 = vpop.f32.mrb[58].mxu1  ;;  %v6550_v0 = vpop.f32.mrb[30].mxu0 }
 0x547   : > { %v6096_v46 = vadd.f32 %v6095_v8, %v19447_v5  ;;  %v20171_v41 = vadd.f32 %v6550_v0, %v6091_v19  ;;  %v15398_v4 = vpop.f32.mrb[59].mxu1  ;;  %v15514_v59 = vpop.f32.mrb[31].mxu0  ;;  %15677 = vmatmul.mubr.msk.f32.gmra.mrb[164].mxu1 %vm5275_vm2, %v6808_v53  ;;  %15793 = vmatmul.mubr.msk.f32.gmra.mrb[136].mxu0 %vm5275_vm2, %v7305_v36  ;;  %v6818_v8 = vld [vmem:[#allocation2 + $0x163] ss:$2 sm:$0xff]  ;;  %v7315_v0 = vld [vmem:[#allocation2 + $0x154] ss:$2 sm:$0xff] }
 0x548   : > { %15679 = vmatprep.mubr.msk.f32.mxu1 %vm16954_vm1, %v21804_v28  ;;  %15795 = vmatprep.mubr.msk.f32.mxu0 %vm16954_vm1, %v21804_v28 }
 0x54a   : > { %v6100_v3 = vpop.f32.mrb[60].mxu1  ;;  %v6555_v12 = vpop.f32.mrb[32].mxu0 }
 0x54b   : > { %v6101_v5 = vadd.f32 %v6100_v3, %v19574_v7  ;;  %v20180_v34 = vadd.f32 %v6555_v12, %v6096_v46  ;;  %v15401_v38 = vpop.f32.mrb[61].mxu1  ;;  %v15517_v58 = vpop.f32.mrb[33].mxu0  ;;  %15680 = vmatmul.mubr.msk.f32.gmra.mrb[166].mxu1 %vm5275_vm2, %v6810_v47  ;;  %15796 = vmatmul.mubr.msk.f32.gmra.mrb[138].mxu0 %vm5275_vm2, %v7307_v18  ;;  %v6820_v3 = vld [vmem:[#allocation2 + $0x173] ss:$2 sm:$0xff]  ;;  %v7317_v12 = vld [vmem:[#allocation2 + $0x164] ss:$2 sm:$0xff] }
 0x54c   : > { %15682 = vmatprep.mubr.msk.f32.mxu1 %vm16954_vm1, %v21804_v28  ;;  %15798 = vmatprep.mubr.msk.f32.mxu0 %vm16954_vm1, %v21804_v28 }
 0x54e   : > { %v6105_v52 = vpop.f32.mrb[62].mxu1  ;;  %v6560_v48 = vpop.f32.mrb[34].mxu0 }
 0x54f   : > { %v6106_v7 = vadd.f32 %v6105_v52, %v19654_v1  ;;  %v20189_v42 = vadd.f32 %v6560_v48, %v6101_v5  ;;  %v15404_v40 = vpop.f32.mrb[63].mxu1  ;;  %v15520_v26 = vpop.f32.mrb[35].mxu0  ;;  %15683 = vmatmul.mubr.msk.f32.gmra.mrb[168].mxu1 %vm5275_vm2, %v6812_v9  ;;  %15799 = vmatmul.mubr.msk.f32.gmra.mrb[140].mxu0 %vm5275_vm2, %v7309_v6  ;;  %v6822_v52 = vld [vmem:[#allocation2 + $0x183] ss:$2 sm:$0xff]  ;;  %v7319_v48 = vld [vmem:[#allocation2 + $0x174] ss:$2 sm:$0xff] }
 0x550   : > { %15685 = vmatprep.mubr.msk.f32.mxu1 %vm16954_vm1, %v21804_v28  ;;  %15801 = vmatprep.mubr.msk.f32.mxu0 %vm16954_vm1, %v21804_v28 }
 0x552   : > { %v6110_v24 = vpop.f32.mrb[64].mxu1  ;;  %v6565_v33 = vpop.f32.mrb[36].mxu0 }
 0x553   : > { %v6111_v1 = vadd.f32 %v6110_v24, %v19766_v62  ;;  %v20198_v50 = vadd.f32 %v6565_v33, %v6106_v7  ;;  %v15407_v11 = vpop.f32.mrb[65].mxu1  ;;  %v15523_v37 = vpop.f32.mrb[37].mxu0  ;;  %15686 = vmatmul.mubr.msk.f32.gmra.mrb[170].mxu1 %vm5275_vm2, %v6814_v2  ;;  %15802 = vmatmul.mubr.msk.f32.gmra.mrb[142].mxu0 %vm5275_vm2, %v7311_v22  ;;  %v6824_v24 = vld [vmem:[#allocation2 + $0x193] ss:$2 sm:$0xff]  ;;  %v7321_v33 = vld [vmem:[#allocation2 + $0x184] ss:$2 sm:$0xff] }
 0x554   : > { %15688 = vmatprep.mubr.msk.f32.mxu1 %vm16954_vm1, %v21804_v28  ;;  %15804 = vmatprep.mubr.msk.f32.mxu0 %vm16954_vm1, %v21804_v28 }
 0x556   : > { %v6115_v51 = vpop.f32.mrb[66].mxu1  ;;  %v6570_v10 = vpop.f32.mrb[38].mxu0 }
 0x557   : > { %v6116_v62 = vadd.f32 %v6115_v51, %v19842_v15  ;;  %v20207_v56 = vadd.f32 %v6570_v10, %v6111_v1  ;;  %v15410_v19 = vpop.f32.mrb[67].mxu1  ;;  %v15526_v25 = vpop.f32.mrb[39].mxu0  ;;  %15689 = vmatmul.mubr.msk.f32.gmra.mrb[172].mxu1 %vm5275_vm2, %v6816_v30  ;;  %15805 = vmatmul.mubr.msk.f32.gmra.mrb[144].mxu0 %vm5275_vm2, %v7313_v13  ;;  %v6826_v51 = vld [vmem:[#allocation2 + $0x1a3] ss:$2 sm:$0xff]  ;;  %v7323_v10 = vld [vmem:[#allocation2 + $0x194] ss:$2 sm:$0xff] }
 0x558   : > { %15691 = vmatprep.mubr.msk.f32.mxu1 %vm16954_vm1, %v21804_v28  ;;  %15807 = vmatprep.mubr.msk.f32.mxu0 %vm16954_vm1, %v21804_v28 }
 0x55a   : > { %v6120_v61 = vpop.f32.mrb[68].mxu1  ;;  %v6575_v54 = vpop.f32.mrb[40].mxu0 }
 0x55b   : > { %v6121_v15 = vadd.f32 %v6120_v61, %v19918_v17  ;;  %v20216_v53 = vadd.f32 %v6575_v54, %v6116_v62  ;;  %v15413_v36 = vpop.f32.mrb[69].mxu1  ;;  %v15529_v46 = vpop.f32.mrb[41].mxu0  ;;  %15692 = vmatmul.mubr.msk.f32.gmra.mrb[174].mxu1 %vm5275_vm2, %v6818_v8  ;;  %15808 = vmatmul.mubr.msk.f32.gmra.mrb[146].mxu0 %vm5275_vm2, %v7315_v0  ;;  %v6828_v61 = vld [vmem:[#allocation2 + $0x1b3] ss:$2 sm:$0xff]  ;;  %v7325_v54 = vld [vmem:[#allocation2 + $0x1a4] ss:$2 sm:$0xff] }
 0x55c   : > { %15694 = vmatprep.mubr.msk.f32.mxu1 %vm16954_vm1, %v21804_v28  ;;  %15810 = vmatprep.mubr.msk.f32.mxu0 %vm16954_vm1, %v21804_v28 }
 0x55e   : > { %v6125_v4 = vpop.f32.mrb[70].mxu1  ;;  %v6580_v59 = vpop.f32.mrb[42].mxu0 }
 0x55f   : > { %v6126_v17 = vadd.f32 %v6125_v4, %v19994_v55  ;;  %v20225_v47 = vadd.f32 %v6580_v59, %v6121_v15  ;;  %v15416_v18 = vpop.f32.mrb[71].mxu1  ;;  %v15532_v5 = vpop.f32.mrb[43].mxu0  ;;  %15695 = vmatmul.mubr.msk.f32.gmra.mrb[176].mxu1 %vm5275_vm2, %v6820_v3  ;;  %15811 = vmatmul.mubr.msk.f32.gmra.mrb[148].mxu0 %vm5275_vm2, %v7317_v12  ;;  %v6830_v4 = vld [vmem:[#allocation2 + $0x1c3] ss:$2 sm:$0xff]  ;;  %v7327_v59 = vld [vmem:[#allocation2 + $0x1b4] ss:$2 sm:$0xff] }
 0x560   : > { %15697 = vmatprep.mubr.msk.f32.mxu1 %vm16954_vm1, %v21804_v28  ;;  %15813 = vmatprep.mubr.msk.f32.mxu0 %vm16954_vm1, %v21804_v28 }
 0x562   : > { %v6130_v38 = vpop.f32.mrb[72].mxu1  ;;  %v6585_v58 = vpop.f32.mrb[44].mxu0 }
 0x563   : > { %v6131_v55 = vadd.f32 %v6130_v38, %v20070_v43  ;;  %v20234_v9 = vadd.f32 %v6585_v58, %v6126_v17  ;;  %v15419_v6 = vpop.f32.mrb[73].mxu1  ;;  %v15535_v7 = vpop.f32.mrb[45].mxu0  ;;  %15698 = vmatmul.mubr.msk.f32.gmra.mrb[178].mxu1 %vm5275_vm2, %v6822_v52  ;;  %15814 = vmatmul.mubr.msk.f32.gmra.mrb[150].mxu0 %vm5275_vm2, %v7319_v48  ;;  %v6832_v38 = vld [vmem:[#allocation2 + $0x1d3] ss:$2 sm:$0xff]  ;;  %v7329_v58 = vld [vmem:[#allocation2 + $0x1c4] ss:$2 sm:$0xff] }
 0x564   : > { %15700 = vmatprep.mubr.msk.f32.mxu1 %vm16954_vm1, %v21804_v28  ;;  %15816 = vmatprep.mubr.msk.f32.mxu0 %vm16954_vm1, %v21804_v28 }
 0x566   : > { %v6135_v40 = vpop.f32.mrb[74].mxu1  ;;  %v6590_v26 = vpop.f32.mrb[46].mxu0 }
 0x567   : > { %v6136_v43 = vadd.f32 %v6135_v40, %v20116_v21  ;;  %v20243_v2 = vadd.f32 %v6590_v26, %v6131_v55  ;;  %v15422_v22 = vpop.f32.mrb[75].mxu1  ;;  %v15538_v1 = vpop.f32.mrb[47].mxu0  ;;  %15701 = vmatmul.mubr.msk.f32.gmra.mrb[180].mxu1 %vm5275_vm2, %v6824_v24  ;;  %15817 = vmatmul.mubr.msk.f32.gmra.mrb[152].mxu0 %vm5275_vm2, %v7321_v33  ;;  %v6834_v40 = vld [vmem:[#allocation2 + $0x1e3] ss:$2 sm:$0xff]  ;;  %v7331_v26 = vld [vmem:[#allocation2 + $0x1d4] ss:$2 sm:$0xff] }
 0x568   : > { %15703 = vmatprep.mubr.msk.f32.mxu1 %vm16954_vm1, %v21804_v28  ;;  %15819 = vmatprep.mubr.msk.f32.mxu0 %vm16954_vm1, %v21804_v28  ;;  %v21814_v24 = vld [vmem:[#allocation13_spill] sm:$0xff] }
 0x56a   : > { %v6140_v11 = vpop.f32.mrb[76].mxu1  ;;  %v6595_v37 = vpop.f32.mrb[48].mxu0 }
 0x56b   : > { %v6141_v21 = vadd.f32 %v6140_v11, %v20138_v20  ;;  %v20252_v30 = vadd.f32 %v6595_v37, %v6136_v43  ;;  %v15425_v13 = vpop.f32.mrb[77].mxu1  ;;  %v15541_v62 = vpop.f32.mrb[49].mxu0  ;;  %15704 = vmatmul.mubr.msk.f32.gmra.mrb[182].mxu1 %vm5275_vm2, %v6826_v51  ;;  %15820 = vmatmul.mubr.msk.f32.gmra.mrb[154].mxu0 %vm5275_vm2, %v7323_v10  ;;  %v6836_v37 = vld [vmem:[#allocation2 + $0x1f3] ss:$2 sm:$0xff]  ;;  %v7333_v51 = vld [vmem:[#allocation2 + $0x1e4] ss:$2 sm:$0xff] }
 0x56c   : > { %15706 = vmatprep.mubr.msk.f32.mxu1 %vm16954_vm1, %v21804_v28  ;;  %15822 = vmatprep.mubr.msk.f32.mxu0 %vm16954_vm1, %v21804_v28  ;;  %v21815_v10 = vld [vmem:[#allocation14_spill] sm:$0xff] }
 0x56e   : > { %v6145_v19 = vpop.f32.mrb[78].mxu1  ;;  %v6600_v25 = vpop.f32.mrb[50].mxu0 }
 0x56f   : > { %v6146_v20 = vadd.f32 %v6145_v19, %v17931_v23  ;;  %v20261_v8 = vadd.f32 %v6600_v25, %v6141_v21  ;;  %v15428_v0 = vpop.f32.mrb[79].mxu1  ;;  %v15544_v15 = vpop.f32.mrb[51].mxu0  ;;  %15707 = vmatmul.mubr.msk.f32.gmra.mrb[184].mxu1 %vm5275_vm2, %v6828_v61  ;;  %15823 = vmatmul.mubr.msk.f32.gmra.mrb[156].mxu0 %vm5275_vm2, %v7325_v54  ;;  %v6838_v54 = vld [vmem:[#allocation2 + $0x203] ss:$2 sm:$0xff] }
 0x570   : > { %15709 = vmatprep.mubr.msk.f32.mxu1 %vm16954_vm1, %v21804_v28  ;;  %15825 = vmatprep.mubr.msk.f32.mxu0 %vm16954_vm1, %v21804_v28  ;;  %v21816_v0 = vld [vmem:[#allocation15_spill] sm:$0xff] }
 0x572   : > { %v6150_v36 = vpop.f32.mrb[80].mxu1  ;;  %v6605_v46 = vpop.f32.mrb[52].mxu0 }
 0x573   : > { %v6151_v23 = vadd.f32 %v6150_v36, %v17992_v39  ;;  %v20270_v3 = vadd.f32 %v6605_v46, %v6146_v20  ;;  %v15431_v12 = vpop.f32.mrb[81].mxu1  ;;  %v15547_v17 = vpop.f32.mrb[53].mxu0  ;;  %15710 = vmatmul.mubr.msk.f32.gmra.mrb[186].mxu1 %vm5275_vm2, %v6830_v4  ;;  %15826 = vmatmul.mubr.msk.f32.gmra.mrb[158].mxu0 %vm5275_vm2, %v7327_v59  ;;  %v7335_v20 = vld [vmem:[#allocation2 + $0x1f4] ss:$2 sm:$0xff] }
 0x574   : > { %15712 = vmatprep.mubr.msk.f32.mxu1 %vm16954_vm1, %v21804_v28  ;;  %15828 = vmatprep.mubr.msk.f32.mxu0 %vm16954_vm1, %v21804_v28  ;;  %v6840_v12 = vld [vmem:[#allocation2 + $0x213] ss:$2 sm:$0xff]  ;;  %v7337_v17 = vld [vmem:[#allocation2 + $0x204] ss:$2 sm:$0xff] }
 0x576   : > { %v6155_v18 = vpop.f32.mrb[82].mxu1  ;;  %v6610_v5 = vpop.f32.mrb[54].mxu0 }
 0x577   : > { %v6156_v39 = vadd.f32 %v6155_v18, %v18051_v45  ;;  %v20279_v52 = vadd.f32 %v6610_v5, %v6151_v23  ;;  %v15434_v48 = vpop.f32.mrb[83].mxu1  ;;  %v15550_v55 = vpop.f32.mrb[55].mxu0  ;;  %15713 = vmatmul.mubr.msk.f32.gmra.mrb[188].mxu1 %vm5275_vm2, %v6832_v38  ;;  %15829 = vmatmul.mubr.msk.f32.gmra.mrb[160].mxu0 %vm5275_vm2, %v7329_v58  ;;  %v21817_v18 = vld [vmem:[#allocation16_spill] sm:$0xff] }
 0x578   : > { %15715 = vmatprep.mubr.msk.f32.mxu1 %vm16954_vm1, %v21804_v28  ;;  %15831 = vmatprep.mubr.msk.f32.mxu0 %vm16954_vm1, %v21804_v28 }
 0x57a   : > { %v6160_v6 = vpop.f32.mrb[84].mxu1  ;;  %v6615_v7 = vpop.f32.mrb[56].mxu0 }
 0x57b   : > { %v6161_v45 = vadd.f32 %v6160_v6, %v21814_v24  ;;  %v20288_v33 = vadd.f32 %v6615_v7, %v6156_v39  ;;  %v15437_v43 = vpop.f32.mrb[85].mxu1  ;;  %v15553_v22 = vpop.f32.mrb[57].mxu0  ;;  %15716 = vmatmul.mubr.msk.f32.gmra.mrb[190].mxu1 %vm5275_vm2, %v6834_v40  ;;  %15832 = vmatmul.mubr.msk.f32.gmra.mrb[162].mxu0 %vm5275_vm2, %v7331_v26  ;;  %v6842_v6 = vld [vmem:[#allocation2 + $0x223] ss:$2 sm:$0xff]  ;;  %v7339_v7 = vld [vmem:[#allocation2 + $0x214] ss:$2 sm:$0xff] }
 0x57c   : > { %15718 = vmatprep.mubr.msk.f32.mxu1 %vm16954_vm1, %v21804_v28  ;;  %15834 = vmatprep.mubr.msk.f32.mxu0 %vm16954_vm1, %v21804_v28  ;;  %v21818_v40 = vld [vmem:[#allocation17_spill] sm:$0xff] }
 0x57e   : > { %v6165_v1 = vpop.f32.mrb[86].mxu1  ;;  %v6620_v11 = vpop.f32.mrb[58].mxu0 }
 0x57f   : > { %v6166_v21 = vadd.f32 %v6165_v1, %v21815_v10  ;;  %v20297_v13 = vadd.f32 %v6620_v11, %v6161_v45  ;;  %v15440_v62 = vpop.f32.mrb[87].mxu1  ;;  %v15556_v19 = vpop.f32.mrb[59].mxu0  ;;  %15719 = vmatmul.mubr.msk.f32.gmra.mrb[192].mxu1 %vm5275_vm2, %v6836_v37  ;;  %15835 = vmatmul.mubr.msk.f32.gmra.mrb[164].mxu0 %vm5275_vm2, %v7333_v51  ;;  %v6844_v11 = vld [vmem:[#allocation2 + $0x233] ss:$2 sm:$0xff]  ;;  %v7341_v37 = vld [vmem:[#allocation2 + $0x224] ss:$2 sm:$0xff] }
 0x580   : > { %15721 = vmatprep.mubr.msk.f32.mxu1 %vm16954_vm1, %v21804_v28  ;;  %15837 = vmatprep.mubr.msk.f32.mxu0 %vm16954_vm1, %v21804_v28  ;;  %v21819_v51 = vld [vmem:[#allocation18_spill] sm:$0xff] }
 0x582   : > { %v6170_v25 = vpop.f32.mrb[88].mxu1  ;;  %v6625_v61 = vpop.f32.mrb[60].mxu0 }
 0x583   : > { %v6171_v15 = vadd.f32 %v6170_v25, %v21816_v0  ;;  %v20306_v36 = vadd.f32 %v6625_v61, %v6166_v21  ;;  %v15443_v46 = vpop.f32.mrb[89].mxu1  ;;  %v15559_v4 = vpop.f32.mrb[61].mxu0  ;;  %15722 = vmatmul.mubr.msk.f32.gmra.mrb[194].mxu1 %vm5275_vm2, %v6838_v54  ;;  %15838 = vmatmul.mubr.msk.f32.gmra.mrb[166].mxu0 %vm5275_vm2, %v7335_v20  ;;  %v6846_v54 = vld [vmem:[#allocation2 + $0x243] ss:$2 sm:$0xff]  ;;  %v7343_v20 = vld [vmem:[#allocation2 + $0x234] ss:$2 sm:$0xff] }
 0x584   : > { %15724 = vmatprep.mubr.msk.f32.mxu1 %vm16954_vm1, %v21804_v28  ;;  %15840 = vmatprep.mubr.msk.f32.mxu0 %vm16954_vm1, %v21804_v28  ;;  %v21820_v0 = vld [vmem:[#allocation19_spill] sm:$0xff] }
 0x586   : > { %v6175_v59 = vpop.f32.mrb[90].mxu1  ;;  %v6630_v23 = vpop.f32.mrb[62].mxu0 }
 0x587   : > { %v6176_v5 = vadd.f32 %v6175_v59, %v21817_v18  ;;  %v20315_v38 = vadd.f32 %v6630_v23, %v6171_v15  ;;  %v15446_v58 = vpop.f32.mrb[91].mxu1  ;;  %v15562_v39 = vpop.f32.mrb[63].mxu0  ;;  %15725 = vmatmul.mubr.msk.f32.gmra.mrb[196].mxu1 %vm5275_vm2, %v6840_v12  ;;  %15841 = vmatmul.mubr.msk.f32.gmra.mrb[168].mxu0 %vm5275_vm2, %v7337_v17  ;;  %v6848_v17 = vld [vmem:[#allocation2 + $0x253] ss:$2 sm:$0xff]  ;;  %v7345_v18 = vld [vmem:[#allocation2 + $0x244] ss:$2 sm:$0xff] }
 0x588   : > { %15727 = vmatprep.mubr.msk.f32.mxu1 %vm16954_vm1, %v21804_v28  ;;  %15843 = vmatprep.mubr.msk.f32.mxu0 %vm16954_vm1, %v21804_v28 }
 0x58a   : > { %v6180_v48 = vpop.f32.mrb[92].mxu1  ;;  %v6635_v55 = vpop.f32.mrb[64].mxu0 }
 0x58b   : > { %v6181_v26 = vadd.f32 %v6180_v48, %v21818_v40  ;;  %v20324_v24 = vadd.f32 %v6635_v55, %v6176_v5  ;;  %v15449_v45 = vpop.f32.mrb[93].mxu1  ;;  %v15565_v43 = vpop.f32.mrb[65].mxu0  ;;  %15728 = vmatmul.mubr.msk.f32.gmra.mrb[198].mxu1 %vm5275_vm2, %v6842_v6  ;;  %15844 = vmatmul.mubr.msk.f32.gmra.mrb[170].mxu0 %vm5275_vm2, %v7339_v7  ;;  %v21821_v5 = vld [vmem:[#allocation20_spill] sm:$0xff]  ;;  %v6850_v6 = vld [vmem:[#allocation2 + $0x263] ss:$2 sm:$0x3f] }
 0x58c   : > { %15730 = vmatprep.mubr.msk.f32.mxu1 %vm16954_vm1, %v21804_v28  ;;  %15846 = vmatprep.mubr.msk.f32.mxu0 %vm16954_vm1, %v21804_v28  ;;  %v21822_v45 = vld [vmem:[#allocation21_spill] sm:$0xff] }
 0x58e   : > { %v6185_v22 = vpop.f32.mrb[94].mxu1  ;;  %v6640_v1 = vpop.f32.mrb[66].mxu0 }
 0x58f   : > { %v6186_v10 = vadd.f32 %v6185_v22, %v21819_v51  ;;  %v20333_v21 = vadd.f32 %v6640_v1, %v6181_v26  ;;  %v15452_v62 = vpop.f32.mrb[95].mxu1  ;;  %v15568_v19 = vpop.f32.mrb[67].mxu0  ;;  %15731 = vmatmul.mubr.msk.f32.gmra.mrb[200].mxu1 %vm5275_vm2, %v6844_v11  ;;  %15847 = vmatmul.mubr.msk.f32.gmra.mrb[172].mxu0 %vm5275_vm2, %v7341_v37  ;;  %v7347_v26 = vld [vmem:[#allocation2 + $0x254] ss:$2 sm:$0xff] }
 0x590   : > { %15733 = vmatprep.mubr.msk.f32.mxu1 %vm16954_vm1, %v21804_v28  ;;  %15849 = vmatprep.mubr.msk.f32.mxu0 %vm16954_vm1, %v21804_v28  ;;  %v21823_v62 = vld [vmem:[#allocation22_spill] sm:$0xff] }
 0x592   : > { %v6190_v25 = vpop.f32.mrb[96].mxu1  ;;  %v6645_v61 = vpop.f32.mrb[68].mxu0 }
 0x593   : > { %v6191_v15 = vadd.f32 %v6190_v25, %v21820_v0  ;;  %v20342_v46 = vadd.f32 %v6645_v61, %v6186_v10  ;;  %v15455_v4 = vpop.f32.mrb[97].mxu1  ;;  %v15571_v59 = vpop.f32.mrb[69].mxu0  ;;  %15734 = vmatmul.mubr.msk.f32.gmra.mrb[202].mxu1 %vm5275_vm2, %v6846_v54  ;;  %15850 = vmatmul.mubr.msk.f32.gmra.mrb[174].mxu0 %vm5275_vm2, %v7343_v20  ;;  %v7349_v10 = vld [vmem:[#allocation2 + $0x264] ss:$2 sm:$0x3f] }
 0x594   : > { %15736 = vmatprep.mubr.msk.f32.mxu1 %vm16954_vm1, %v21804_v28  ;;  %15852 = vmatprep.mubr.msk.f32.mxu0 %vm16954_vm1, %v21804_v28 }
 0x596   : > { %v6195_v23 = vpop.f32.mrb[98].mxu1  ;;  %v6650_v12 = vpop.f32.mrb[70].mxu0 }
 0x597   : > { %v6196_v58 = vadd.f32 %v6195_v23, %v21821_v5  ;;  %v20351_v39 = vadd.f32 %v6650_v12, %v6191_v15  ;;  %v15458_v48 = vpop.f32.mrb[99].mxu1  ;;  %v15574_v55 = vpop.f32.mrb[71].mxu0  ;;  %15737 = vmatmul.mubr.msk.f32.gmra.mrb[204].mxu1 %vm5275_vm2, %v6848_v17  ;;  %15853 = vmatmul.mubr.msk.f32.gmra.mrb[176].mxu0 %vm5275_vm2, %v7345_v18  ;;  %v21824_v15 = vld [vmem:[#allocation23_spill] sm:$0xff]  ;;  %v21825_v5 = vld [vmem:[#allocation24_spill] sm:$0xff] }
 0x598   : > { %15739 = vmatprep.mubr.msk.f32.mxu1 %vm16954_vm1, %v21804_v28  ;;  %15855 = vmatprep.mubr.msk.f32.mxu0 %vm16954_vm1, %v21804_v28 }
 0x59a   : > { %v6200_v7 = vpop.f32.mrb[100].mxu1  ;;  %v6655_v40 = vpop.f32.mrb[72].mxu0 }
 0x59b   : > { %v6201_v43 = vadd.f32 %v6200_v7, %v21822_v45  ;;  %v20360_v22 = vadd.f32 %v6655_v40, %v6196_v58  ;;  %v15461_v1 = vpop.f32.mrb[101].mxu1  ;;  %v15577_v11 = vpop.f32.mrb[73].mxu0  ;;  %15740 = vmatmul.mubr.msk.f32.gmra.mrb[206].mxu1 %vm5275_vm2, %v6850_v6  ;;  %15856 = vmatmul.mubr.msk.f32.gmra.mrb[178].mxu0 %vm5275_vm2, %v7347_v26  ;;  %v21826_v26 = vld [vmem:[#allocation25_spill] sm:$0xff] }
 0x59c   : > { %15858 = vmatprep.mubr.msk.f32.mxu0 %vm16954_vm1, %v21804_v28 }
 0x59e   : > { %v6205_v37 = vpop.f32.mrb[102].mxu1  ;;  %v6660_v51 = vpop.f32.mrb[74].mxu0 }
 0x59f   : > { %v6206_v19 = vadd.f32 %v6205_v37, %v21823_v62  ;;  %v20367_v25 = vadd.f32 %v6660_v51, %v6201_v43  ;;  %v15464_v61 = vpop.f32.mrb[103].mxu1  ;;  %v15580_v54 = vpop.f32.mrb[75].mxu0  ;;  %15859 = vmatmul.mubr.msk.f32.gmra.mrb[180].mxu0 %vm5275_vm2, %v7349_v10 }
 0x5a2   : > { %v6210_v20 = vpop.f32.mrb[104].mxu1  ;;  %v6665_v0 = vpop.f32.mrb[76].mxu0 }
 0x5a3   : > { %v6211_v4 = vadd.f32 %v6210_v20, %v21824_v15  ;;  %v20371_v59 = vadd.f32 %v6665_v0, %v6206_v19  ;;  %v15467_v23 = vpop.f32.mrb[105].mxu1  ;;  %v15583_v12 = vpop.f32.mrb[77].mxu0 }
 0x5a6   : > { %v6215_v17 = vpop.f32.mrb[106].mxu1  ;;  %v6670_v18 = vpop.f32.mrb[78].mxu0 }
 0x5a7   : > { %v6216_v58 = vadd.f32 %v6215_v17, %v21825_v5  ;;  %v20374_v48 = vadd.f32 %v6670_v18, %v6211_v4  ;;  %v15470_v55 = vpop.f32.mrb[107].mxu1  ;;  %v15586_v6 = vpop.f32.mrb[79].mxu0 }
 0x5aa   : > { %v6220_v7 = vpop.f32.mrb[108].mxu1  ;;  %v6675_v40 = vpop.f32.mrb[80].mxu0 }
 0x5ab   : > { %v6221_v45 = vadd.f32 %v6220_v7, %v21826_v26  ;;  %v20377_v43 = vadd.f32 %v6675_v40, %v6216_v58  ;;  %v15473_v1 = vpop.f32.mrb[109].mxu1  ;;  %v15589_v11 = vpop.f32.mrb[81].mxu0 }
 0x5ae   : > { %v6225_v37 = vpop.f32.mrb[110].mxu1  ;;  %v6680_v51 = vpop.f32.mrb[82].mxu0 }
 0x5af   : > { %v6226_v10 = vadd.f32 %v6225_v37, %v19351_v29  ;;  %v20380_v62 = vadd.f32 %v6680_v51, %v6221_v45  ;;  %v15476_v19 = vpop.f32.mrb[111].mxu1  ;;  %v15592_v61 = vpop.f32.mrb[83].mxu0 }
 0x5b2   : > { %v6230_v54 = vpop.f32.mrb[112].mxu1  ;;  %v6685_v20 = vpop.f32.mrb[84].mxu0 }
 0x5b3   : > { %v6231_v0 = vadd.f32 %v6230_v54, %v19519_v32  ;;  %v20383_v15 = vadd.f32 %v6685_v20, %v6226_v10  ;;  %v15479_v4 = vpop.f32.mrb[113].mxu1  ;;  %v15595_v23 = vpop.f32.mrb[85].mxu0 }
 0x5b6   : > { %v6235_v12 = vpop.f32.mrb[114].mxu1  ;;  %v6690_v17 = vpop.f32.mrb[86].mxu0 }
 0x5b7   : > { %v6236_v18 = vadd.f32 %v6235_v12, %v19615_v49  ;;  %v20386_v5 = vadd.f32 %v6690_v17, %v6231_v0  ;;  %v15482_v58 = vpop.f32.mrb[115].mxu1  ;;  %v15598_v29 = vpop.f32.mrb[87].mxu0 }
 0x5ba   : > { %v6240_v55 = vpop.f32.mrb[116].mxu1  ;;  %v6695_v6 = vpop.f32.mrb[88].mxu0 }
 0x5bb   : > { %v6241_v7 = vadd.f32 %v6240_v55, %v19696_v27  ;;  %v20389_v40 = vadd.f32 %v6695_v6, %v6236_v18  ;;  %v15485_v26 = vpop.f32.mrb[117].mxu1  ;;  %v15601_v32 = vpop.f32.mrb[89].mxu0 }
 0x5be   : > { %v6245_v45 = vpop.f32.mrb[118].mxu1  ;;  %v6700_v1 = vpop.f32.mrb[90].mxu0 }
 0x5bf   : > { %v6246_v11 = vadd.f32 %v6245_v45, %v19803_v31  ;;  %v20392_v37 = vadd.f32 %v6700_v1, %v6241_v7  ;;  %v15488_v51 = vpop.f32.mrb[119].mxu1  ;;  %v15604_v49 = vpop.f32.mrb[91].mxu0 }
 0x5c2   : > { %v6250_v10 = vpop.f32.mrb[120].mxu1  ;;  %v6705_v19 = vpop.f32.mrb[92].mxu0 }
 0x5c3   : > { %v6251_v61 = vadd.f32 %v6250_v10, %v19880_v16  ;;  %v20395_v54 = vadd.f32 %v6705_v19, %v6246_v11  ;;  %v15491_v20 = vpop.f32.mrb[121].mxu1  ;;  %v15607_v27 = vpop.f32.mrb[93].mxu0 }
 0x5c6   : > { %v6255_v0 = vpop.f32.mrb[122].mxu1  ;;  %v6710_v4 = vpop.f32.mrb[94].mxu0 }
 0x5c7   : > { %v6256_v23 = vadd.f32 %v6255_v0, %v19956_v63  ;;  %v20398_v12 = vadd.f32 %v6710_v4, %v6251_v61  ;;  %v15494_v17 = vpop.f32.mrb[123].mxu1  ;;  %v15610_v31 = vpop.f32.mrb[95].mxu0 }
 0x5c8   : > { %v20415_v31 = vld [vmem:[%s21827_s6] ss:$0 sm:$0xff]  ;;  %s21829_s6 = sld [smem:[#allocation34_spill]] }
 0x5ca   : > { %v6260_v18 = vpop.f32.mrb[124].mxu1  ;;  %v6715_v58 = vpop.f32.mrb[96].mxu0 }
 0x5cb   : > { %v6261_v29 = vadd.f32 %v6260_v18, %v20032_v57  ;;  %v20401_v55 = vadd.f32 %v6715_v58, %v6256_v23  ;;  %v15497_v6 = vpop.f32.mrb[125].mxu1  ;;  %v15613_v16 = vpop.f32.mrb[97].mxu0 }
 0x5ce   : > { %v6265_v7 = vpop.f32.mrb[126].mxu1  ;;  %v6720_v26 = vpop.f32.mrb[98].mxu0 }
 0x5cf   : > { %v6266_v32 = vadd.f32 %v6265_v7, %v20096_v44  ;;  %v20404_v45 = vadd.f32 %v6720_v26, %v6261_v29  ;;  %v15500_v1 = vpop.f32.mrb[127].mxu1  ;;  %v15616_v63 = vpop.f32.mrb[99].mxu0 }
 0x5d2   : > { %v6270_v11 = vpop.f32.mrb[128].mxu1  ;;  %v6725_v51 = vpop.f32.mrb[100].mxu0 }
 0x5d3   : > { %v6271_v49 = vadd.f32 %v6270_v11, %v20130_v35  ;;  %v20407_v10 = vadd.f32 %v6725_v51, %v6266_v32  ;;  %v15503_v19 = vpop.f32.mrb[129].mxu1  ;;  %v15619_v57 = vpop.f32.mrb[101].mxu0 }
 0x5d6   : > { %v6730_v61 = vpop.f32.mrb[102].mxu0  ;;  %v7039_v20 = vpop.f32.mrb[130].mxu1 }
 0x5d7   : > { %v20409_v27 = vadd.f32 %v6730_v61, %v6271_v49  ;;  %v7233_v0 = vadd.f32 %v7039_v20, %v20148_v14  ;;  %v15622_v4 = vpop.f32.mrb[103].mxu0  ;;  %v15627_v44 = vpop.f32.mrb[131].mxu1  ;;  %v20422_v14 = vld [vmem:[%s21828_s9] ss:$0 sm:$0xff]  ;;  %s13625_s9 = scalar_lea.sflag [#allocation7], %s755_s0 }
 0x5da   : > { %v7044_v23 = vpop.f32.mrb[132].mxu1  ;;  %v7538_v17 = vpop.f32.mrb[104].mxu0 }
 0x5db   : > { %v7234_v35 = vadd.f32 %v7044_v23, %v20157_v60  ;;  %v7732_v18 = vadd.f32 %v7538_v17, %v7233_v0  ;;  %v15630_v58 = vpop.f32.mrb[133].mxu1  ;;  %v15746_v29 = vpop.f32.mrb[105].mxu0  ;;  %v20428_v60 = vld [vmem:[%s21829_s6] ss:$0 sm:$0xff] }
 0x5dd   : > { %v7778_v6 = vadd.f32 %v20415_v31, %v7732_v18 }
 0x5de   : > { %v7049_v16 = vpop.f32.mrb[134].mxu1  ;;  %v7543_v7 = vpop.f32.mrb[106].mxu0 }
 0x5df   : > { %v7817_v26 = vmax.f32 %v7778_v6, 0.0  ;;  %v7235_v32 = vadd.f32 %v7049_v16, %v20171_v41  ;;  %v7733_v1 = vadd.f32 %v7543_v7, %v7234_v35  ;;  %v15633_v63 = vpop.f32.mrb[135].mxu1  ;;  %v15749_v11 = vpop.f32.mrb[107].mxu0 }
 0x5e1   : > { %v7863_v51 = vmul.f32 %v20422_v14, %v7817_v26  ;;  %v7779_v49 = vadd.f32 %v20415_v31, %v7733_v1  ;;  %v8028_v1 = vld [vmem:[%s21813_s1] sm:$0x1f] }
 0x5e2   : > { %v7054_v19 = vpop.f32.mrb[136].mxu1  ;;  %v7548_v57 = vpop.f32.mrb[108].mxu0  ;;  %15893 = vmatprep.subr.msk.mxu1 %vm8131_vm4, %v8028_v1 }
 0x5e3   : > { %v7909_v61 = vadd.f32 %v20428_v60, %v7863_v51  ;;  %v7818_v20 = vmax.f32 %v7779_v49, 0.0  ;;  %v7236_v41 = vadd.f32 %v7054_v19, %v20180_v34  ;;  %v7734_v0 = vadd.f32 %v7548_v57, %v7235_v32  ;;  %v15636_v4 = vpop.f32.mrb[137].mxu1  ;;  %v15752_v44 = vpop.f32.mrb[109].mxu0 }
 0x5e5   : > { %7949 = vst.msk [vmem:[#allocation3] sm:$0xff] %vm7948_vm5, %v7909_v61  ;;  %v7864_v23 = vmul.f32 %v20422_v14, %v7818_v20  ;;  %v7780_v17 = vadd.f32 %v20415_v31, %v7734_v0 }
 0x5e6   : > { %v7059_v35 = vpop.f32.mrb[138].mxu1  ;;  %v7553_v18 = vpop.f32.mrb[110].mxu0 }
 0x5e7   : > { %v7910_v58 = vadd.f32 %v20428_v60, %v7864_v23  ;;  %v7819_v29 = vmax.f32 %v7780_v17, 0.0  ;;  %v7237_v6 = vadd.f32 %v7059_v35, %v20189_v42  ;;  %v7735_v16 = vadd.f32 %v7553_v18, %v7236_v41  ;;  %v15639_v7 = vpop.f32.mrb[139].mxu1  ;;  %v15755_v26 = vpop.f32.mrb[111].mxu0 }
 0x5e9   : > { %7950 = vst.msk [vmem:[#allocation3 + $0x8] sm:$0xff] %vm7948_vm5, %v7910_v58  ;;  %v7865_v34 = vmul.f32 %v20422_v14, %v7819_v29  ;;  %v7781_v32 = vadd.f32 %v20415_v31, %v7735_v16 }
 0x5ea   : > { %v7064_v63 = vpop.f32.mrb[140].mxu1  ;;  %v7558_v11 = vpop.f32.mrb[112].mxu0 }
 0x5eb   : > { %v7911_v51 = vadd.f32 %v20428_v60, %v7865_v34  ;;  %v7820_v42 = vmax.f32 %v7781_v32, 0.0  ;;  %v7238_v49 = vadd.f32 %v7064_v63, %v20198_v50  ;;  %v7736_v19 = vadd.f32 %v7558_v11, %v7237_v6  ;;  %v15642_v57 = vpop.f32.mrb[141].mxu1  ;;  %v15758_v61 = vpop.f32.mrb[113].mxu0 }
 0x5ed   : > { %7951 = vst.msk [vmem:[#allocation3 + $0x10] sm:$0xff] %vm7948_vm5, %v7911_v51  ;;  %v7866_v20 = vmul.f32 %v20422_v14, %v7820_v42  ;;  %v7782_v41 = vadd.f32 %v20415_v31, %v7736_v19 }
 0x5ee   : > { %v7069_v0 = vpop.f32.mrb[142].mxu1  ;;  %v7563_v4 = vpop.f32.mrb[114].mxu0 }
 0x5ef   : > { %v7912_v44 = vadd.f32 %v20428_v60, %v7866_v20  ;;  %v7821_v23 = vmax.f32 %v7782_v41, 0.0  ;;  %v7239_v17 = vadd.f32 %v7069_v0, %v20207_v56  ;;  %v7737_v35 = vadd.f32 %v7563_v4, %v7238_v49  ;;  %v15645_v18 = vpop.f32.mrb[143].mxu1  ;;  %v15761_v58 = vpop.f32.mrb[115].mxu0 }
 0x5f0   : > { %v8030_v50 = vld [vmem:[#allocation3 + $0x1] ss:$2 sm:$0xff] }
 0x5f1   : > { %7952 = vst.msk [vmem:[#allocation3 + $0x18] sm:$0xff] %vm7948_vm5, %v7912_v44  ;;  %v7867_v29 = vmul.f32 %v20422_v14, %v7821_v23  ;;  %v7783_v6 = vadd.f32 %v20415_v31, %v7737_v35  ;;  %15863 = vmatprep.mubr.msk.f32.mxu1 %vm7948_vm5, %v8030_v50 }
 0x5f2   : > { %v7074_v16 = vpop.f32.mrb[144].mxu1  ;;  %v7568_v7 = vpop.f32.mrb[116].mxu0 }
 0x5f3   : > { %v7913_v26 = vadd.f32 %v20428_v60, %v7867_v29  ;;  %v7822_v34 = vmax.f32 %v7783_v6, 0.0  ;;  %v7240_v32 = vadd.f32 %v7074_v16, %v20216_v53  ;;  %v7738_v56 = vadd.f32 %v7568_v7, %v7239_v17  ;;  %v15648_v63 = vpop.f32.mrb[145].mxu1  ;;  %v15764_v11 = vpop.f32.mrb[117].mxu0 }
 0x5f5   : > { %7953 = vst.msk [vmem:[#allocation3 + $0x20] sm:$0xff] %vm7948_vm5, %v7913_v26  ;;  %v7868_v51 = vmul.f32 %v20422_v14, %v7822_v34  ;;  %v7784_v42 = vadd.f32 %v20415_v31, %v7738_v56 }
 0x5f6   : > { %v7079_v49 = vpop.f32.mrb[146].mxu1  ;;  %v7573_v19 = vpop.f32.mrb[118].mxu0 }
 0x5f7   : > { %v7914_v57 = vadd.f32 %v20428_v60, %v7868_v51  ;;  %v7823_v61 = vmax.f32 %v7784_v42, 0.0  ;;  %v7241_v20 = vadd.f32 %v7079_v49, %v20225_v47  ;;  %v7739_v41 = vadd.f32 %v7573_v19, %v7240_v32  ;;  %v15651_v0 = vpop.f32.mrb[147].mxu1  ;;  %v15767_v4 = vpop.f32.mrb[119].mxu0 }
 0x5f8   : > { %v8032_v53 = vld [vmem:[#allocation3 + $0x11] ss:$2 sm:$0xff] }
 0x5f9   : > { %7954 = vst.msk [vmem:[#allocation3 + $0x28] sm:$0xff] %vm7948_vm5, %v7914_v57  ;;  %v7869_v44 = vmul.f32 %v20422_v14, %v7823_v61  ;;  %v7785_v23 = vadd.f32 %v20415_v31, %v7739_v41  ;;  %15864 = vmatmul.mubr.msk.f32.vlgmr.msra.gmra.mrb[208].mxu1 %vm7948_vm5, %v8032_v53 }
 0x5fa   : > { %v7084_v17 = vpop.f32.mrb[148].mxu1  ;;  %v7578_v35 = vpop.f32.mrb[120].mxu0  ;;  %15894 = vmatpush3.msk.msra.mxu1 %vm8131_vm4, %v8028_v1 }
 0x5fb   : > { %v7915_v18 = vadd.f32 %v20428_v60, %v7869_v44  ;;  %v7824_v58 = vmax.f32 %v7785_v23, 0.0  ;;  %v7242_v47 = vadd.f32 %v7084_v17, %v20234_v9  ;;  %v7740_v50 = vadd.f32 %v7578_v35, %v7241_v20  ;;  %v15654_v29 = vpop.f32.mrb[149].mxu1  ;;  %v15770_v6 = vpop.f32.mrb[121].mxu0  ;;  %v20488_v35 = vld [vmem:[%s21813_s1 + $0x10] sm:$0x1f] }
 0x5fc   : > { %15925 = vmatprep.subr.msk.mxu1 %vm8131_vm4, %v20488_v35 }
 0x5fd   : > { %7955 = vst.msk [vmem:[#allocation3 + $0x30] sm:$0xff] %vm7948_vm5, %v7915_v18  ;;  %v7870_v16 = vmul.f32 %v20422_v14, %v7824_v58  ;;  %v7786_v7 = vadd.f32 %v20415_v31, %v7740_v50 }
 0x5fe   : > { %v7089_v26 = vpop.f32.mrb[150].mxu1  ;;  %v7583_v34 = vpop.f32.mrb[122].mxu0 }
 0x5ff   : > { %v7916_v32 = vadd.f32 %v20428_v60, %v7870_v16  ;;  %v7825_v56 = vmax.f32 %v7786_v7, 0.0  ;;  %v7243_v1 = vadd.f32 %v7089_v26, %v20243_v2  ;;  %v7741_v63 = vadd.f32 %v7583_v34, %v7242_v47  ;;  %v15657_v11 = vpop.f32.mrb[151].mxu1  ;;  %v15773_v51 = vpop.f32.mrb[123].mxu0 }
 0x600   : > { %v8034_v9 = vld [vmem:[#allocation3 + $0x21] ss:$2 sm:$0xff] }
 0x601   : > { %7956 = vst.msk [vmem:[#allocation3 + $0x38] sm:$0xff] %vm7948_vm5, %v7916_v32  ;;  %v7871_v42 = vmul.f32 %v20422_v14, %v7825_v56  ;;  %v7787_v49 = vadd.f32 %v20415_v31, %v7741_v63  ;;  %15866 = vmatprep.mubr.msk.f32.mxu1 %vm7948_vm5, %v8034_v9 }
 0x602   : > { %v7094_v19 = vpop.f32.mrb[152].mxu1  ;;  %v7588_v57 = vpop.f32.mrb[124].mxu0 }
 0x603   : > { %v7917_v61 = vadd.f32 %v20428_v60, %v7871_v42  ;;  %v7826_v20 = vmax.f32 %v7787_v49, 0.0  ;;  %v7244_v41 = vadd.f32 %v7094_v19, %v20252_v30  ;;  %v7742_v2 = vadd.f32 %v7588_v57, %v7243_v1  ;;  %v15660_v0 = vpop.f32.mrb[153].mxu1  ;;  %v15776_v4 = vpop.f32.mrb[125].mxu0 }
 0x605   : > { %7957 = vst.msk [vmem:[#allocation3 + $0x40] sm:$0xff] %vm7948_vm5, %v7917_v61  ;;  %v7872_v53 = vmul.f32 %v20422_v14, %v7826_v20  ;;  %v7788_v44 = vadd.f32 %v20415_v31, %v7742_v2 }
 0x606   : > { %v7099_v23 = vpop.f32.mrb[154].mxu1  ;;  %v7593_v17 = vpop.f32.mrb[126].mxu0 }
 0x607   : > { %v7918_v18 = vadd.f32 %v20428_v60, %v7872_v53  ;;  %v7827_v58 = vmax.f32 %v7788_v44, 0.0  ;;  %v7245_v30 = vadd.f32 %v7099_v23, %v20261_v8  ;;  %v7743_v47 = vadd.f32 %v7593_v17, %v7244_v41  ;;  %v15663_v50 = vpop.f32.mrb[155].mxu1  ;;  %v15779_v29 = vpop.f32.mrb[127].mxu0 }
 0x608   : > { %v8036_v6 = vld [vmem:[#allocation3 + $0x31] ss:$2 sm:$0xff] }
 0x609   : > { %7958 = vst.msk [vmem:[#allocation3 + $0x48] sm:$0xff] %vm7948_vm5, %v7918_v18  ;;  %v7873_v16 = vmul.f32 %v20422_v14, %v7827_v58  ;;  %v7789_v7 = vadd.f32 %v20415_v31, %v7743_v47  ;;  %15867 = vmatmul.mubr.msk.f32.gmra.mrb[210].mxu1 %vm7948_vm5, %v8036_v6 }
 0x60a   : > { %v7104_v26 = vpop.f32.mrb[156].mxu1  ;;  %v7598_v34 = vpop.f32.mrb[128].mxu0 }
 0x60b   : > { %v7919_v32 = vadd.f32 %v20428_v60, %v7873_v16  ;;  %v7828_v8 = vmax.f32 %v7789_v7, 0.0  ;;  %v7246_v56 = vadd.f32 %v7104_v26, %v20270_v3  ;;  %v7744_v1 = vadd.f32 %v7598_v34, %v7245_v30  ;;  %v15666_v63 = vpop.f32.mrb[157].mxu1  ;;  %v15782_v11 = vpop.f32.mrb[129].mxu0 }
 0x60d   : > { %7959 = vst.msk [vmem:[#allocation3 + $0x50] sm:$0xff] %vm7948_vm5, %v7919_v32  ;;  %v7874_v51 = vmul.f32 %v20422_v14, %v7828_v8  ;;  %v7790_v9 = vadd.f32 %v20415_v31, %v7744_v1 }
 0x60e   : > { %v7109_v42 = vpop.f32.mrb[158].mxu1  ;;  %v7603_v49 = vpop.f32.mrb[130].mxu0 }
 0x60f   : > { %v7920_v19 = vadd.f32 %v20428_v60, %v7874_v51  ;;  %v7829_v57 = vmax.f32 %v7790_v9, 0.0  ;;  %v7247_v61 = vadd.f32 %v7109_v42, %v20279_v52  ;;  %v7745_v20 = vadd.f32 %v7603_v49, %v7246_v56  ;;  %v15669_v41 = vpop.f32.mrb[159].mxu1  ;;  %v15785_v2 = vpop.f32.mrb[131].mxu0 }
 0x610   : > { %v8038_v3 = vld [vmem:[#allocation3 + $0x41] ss:$2 sm:$0xff] }
 0x611   : > { %7960 = vst.msk [vmem:[#allocation3 + $0x58] sm:$0xff] %vm7948_vm5, %v7920_v19  ;;  %v7875_v0 = vmul.f32 %v20422_v14, %v7829_v57  ;;  %v7791_v4 = vadd.f32 %v20415_v31, %v7745_v20  ;;  %15869 = vmatprep.mubr.msk.f32.mxu1 %vm7948_vm5, %v8038_v3 }
 0x612   : > { %v7114_v53 = vpop.f32.mrb[160].mxu1  ;;  %v7608_v44 = vpop.f32.mrb[132].mxu0 }
 0x613   : > { %v7921_v23 = vadd.f32 %v20428_v60, %v7875_v0  ;;  %v7830_v17 = vmax.f32 %v7791_v4, 0.0  ;;  %v7248_v18 = vadd.f32 %v7114_v53, %v20288_v33  ;;  %v7746_v52 = vadd.f32 %v7608_v44, %v7247_v61  ;;  %v15672_v58 = vpop.f32.mrb[161].mxu1  ;;  %v15788_v30 = vpop.f32.mrb[133].mxu0 }
 0x615   : > { %7961 = vst.msk [vmem:[#allocation3 + $0x60] sm:$0xff] %vm7948_vm5, %v7921_v23  ;;  %v7876_v47 = vmul.f32 %v20422_v14, %v7830_v17  ;;  %v7792_v50 = vadd.f32 %v20415_v31, %v7746_v52 }
 0x616   : > { %v7119_v29 = vpop.f32.mrb[162].mxu1  ;;  %v7613_v6 = vpop.f32.mrb[134].mxu0 }
 0x617   : > { %v7922_v16 = vadd.f32 %v20428_v60, %v7876_v47  ;;  %v7831_v7 = vmax.f32 %v7792_v50, 0.0  ;;  %v7249_v26 = vadd.f32 %v7119_v29, %v20297_v13  ;;  %v7747_v34 = vadd.f32 %v7613_v6, %v7248_v18  ;;  %v15675_v32 = vpop.f32.mrb[163].mxu1  ;;  %v15791_v8 = vpop.f32.mrb[135].mxu0 }
 0x618   : > { %v8040_v33 = vld [vmem:[#allocation3 + $0x51] ss:$2 sm:$0xff] }
 0x619   : > { %7962 = vst.msk [vmem:[#allocation3 + $0x68] sm:$0xff] %vm7948_vm5, %v7922_v16  ;;  %v7877_v56 = vmul.f32 %v20422_v14, %v7831_v7  ;;  %v7793_v1 = vadd.f32 %v20415_v31, %v7747_v34  ;;  %15870 = vmatmul.mubr.msk.f32.gmra.mrb[212].mxu1 %vm7948_vm5, %v8040_v33 }
 0x61a   : > { %v7124_v63 = vpop.f32.mrb[164].mxu1  ;;  %v7618_v11 = vpop.f32.mrb[136].mxu0 }
 0x61b   : > { %v7923_v51 = vadd.f32 %v20428_v60, %v7877_v56  ;;  %v7832_v9 = vmax.f32 %v7793_v1, 0.0  ;;  %v7250_v42 = vadd.f32 %v7124_v63, %v20306_v36  ;;  %v7748_v13 = vadd.f32 %v7618_v11, %v7249_v26  ;;  %v15678_v49 = vpop.f32.mrb[165].mxu1  ;;  %v15794_v19 = vpop.f32.mrb[137].mxu0 }
 0x61d   : > { %7963 = vst.msk [vmem:[#allocation3 + $0x70] sm:$0xff] %vm7948_vm5, %v7923_v51  ;;  %v7878_v57 = vmul.f32 %v20422_v14, %v7832_v9  ;;  %v7794_v61 = vadd.f32 %v20415_v31, %v7748_v13 }
 0x61e   : > { %v7129_v20 = vpop.f32.mrb[166].mxu1  ;;  %v7623_v41 = vpop.f32.mrb[138].mxu0 }
 0x61f   : > { %v7924_v2 = vadd.f32 %v20428_v60, %v7878_v57  ;;  %v7833_v3 = vmax.f32 %v7794_v61, 0.0  ;;  %v7251_v0 = vadd.f32 %v7129_v20, %v20315_v38  ;;  %v7749_v4 = vadd.f32 %v7623_v41, %v7250_v42  ;;  %v15681_v53 = vpop.f32.mrb[167].mxu1  ;;  %v15797_v44 = vpop.f32.mrb[139].mxu0 }
 0x620   : > { %v8042_v36 = vld [vmem:[#allocation3 + $0x61] ss:$2 sm:$0xff] }
 0x621   : > { %7964 = vst.msk [vmem:[#allocation3 + $0x78] sm:$0xff] %vm7948_vm5, %v7924_v2  ;;  %v7879_v23 = vmul.f32 %v20422_v14, %v7833_v3  ;;  %v7795_v17 = vadd.f32 %v20415_v31, %v7749_v4  ;;  %15872 = vmatprep.mubr.msk.f32.mxu1 %vm7948_vm5, %v8042_v36 }
 0x622   : > { %v7134_v18 = vpop.f32.mrb[168].mxu1  ;;  %v7628_v52 = vpop.f32.mrb[140].mxu0 }
 0x623   : > { %v7925_v58 = vadd.f32 %v20428_v60, %v7879_v23  ;;  %v7834_v30 = vmax.f32 %v7795_v17, 0.0  ;;  %v7252_v47 = vadd.f32 %v7134_v18, %v20324_v24  ;;  %v7750_v38 = vadd.f32 %v7628_v52, %v7251_v0  ;;  %v15684_v50 = vpop.f32.mrb[169].mxu1  ;;  %v15800_v29 = vpop.f32.mrb[141].mxu0 }
 0x625   : > { %7965 = vst.msk [vmem:[#allocation3 + $0x80] sm:$0xff] %vm7948_vm5, %v7925_v58  ;;  %v7880_v6 = vmul.f32 %v20422_v14, %v7834_v30  ;;  %v7796_v16 = vadd.f32 %v20415_v31, %v7750_v38 }
 0x626   : > { %v7139_v7 = vpop.f32.mrb[170].mxu1  ;;  %v7633_v26 = vpop.f32.mrb[142].mxu0 }
 0x627   : > { %v7926_v34 = vadd.f32 %v20428_v60, %v7880_v6  ;;  %v7835_v32 = vmax.f32 %v7796_v16, 0.0  ;;  %v7253_v8 = vadd.f32 %v7139_v7, %v20333_v21  ;;  %v7751_v33 = vadd.f32 %v7633_v26, %v7252_v47  ;;  %v15687_v56 = vpop.f32.mrb[171].mxu1  ;;  %v15803_v1 = vpop.f32.mrb[143].mxu0 }
 0x628   : > { %v8044_v24 = vld [vmem:[#allocation3 + $0x71] ss:$2 sm:$0xff] }
 0x629   : > { %7966 = vst.msk [vmem:[#allocation3 + $0x88] sm:$0xff] %vm7948_vm5, %v7926_v34  ;;  %v7881_v63 = vmul.f32 %v20422_v14, %v7835_v32  ;;  %v7797_v11 = vadd.f32 %v20415_v31, %v7751_v33  ;;  %15873 = vmatmul.mubr.msk.f32.gmra.mrb[214].mxu1 %vm7948_vm5, %v8044_v24 }
 0x62a   : > { %v7144_v51 = vpop.f32.mrb[172].mxu1  ;;  %v7638_v9 = vpop.f32.mrb[144].mxu0 }
 0x62b   : > { %v7927_v42 = vadd.f32 %v20428_v60, %v7881_v63  ;;  %v7836_v13 = vmax.f32 %v7797_v11, 0.0  ;;  %v7254_v49 = vadd.f32 %v7144_v51, %v20342_v46  ;;  %v7752_v21 = vadd.f32 %v7638_v9, %v7253_v8  ;;  %v15690_v19 = vpop.f32.mrb[173].mxu1  ;;  %v15806_v57 = vpop.f32.mrb[145].mxu0 }
 0x62d   : > { %7967 = vst.msk [vmem:[#allocation3 + $0x90] sm:$0xff] %vm7948_vm5, %v7927_v42  ;;  %v7882_v61 = vmul.f32 %v20422_v14, %v7836_v13  ;;  %v7798_v20 = vadd.f32 %v20415_v31, %v7752_v21 }
 0x62e   : > { %v7149_v41 = vpop.f32.mrb[174].mxu1  ;;  %v7643_v2 = vpop.f32.mrb[146].mxu0 }
 0x62f   : > { %v7928_v3 = vadd.f32 %v20428_v60, %v7882_v61  ;;  %v7837_v0 = vmax.f32 %v7798_v20, 0.0  ;;  %v7255_v4 = vadd.f32 %v7149_v41, %v20351_v39  ;;  %v7753_v53 = vadd.f32 %v7643_v2, %v7254_v49  ;;  %v15693_v44 = vpop.f32.mrb[175].mxu1  ;;  %v15809_v36 = vpop.f32.mrb[147].mxu0 }
 0x630   : > { %v8046_v46 = vld [vmem:[#allocation3 + $0x81] ss:$2 sm:$0xff] }
 0x631   : > { %7968 = vst.msk [vmem:[#allocation3 + $0x98] sm:$0xff] %vm7948_vm5, %v7928_v3  ;;  %v7883_v23 = vmul.f32 %v20422_v14, %v7837_v0  ;;  %v7799_v17 = vadd.f32 %v20415_v31, %v7753_v53  ;;  %15875 = vmatprep.mubr.msk.f32.mxu1 %vm7948_vm5, %v8046_v46 }
 0x632   : > { %v7154_v18 = vpop.f32.mrb[176].mxu1  ;;  %v7648_v52 = vpop.f32.mrb[148].mxu0 }
 0x633   : > { %v7929_v58 = vadd.f32 %v20428_v60, %v7883_v23  ;;  %v7838_v30 = vmax.f32 %v7799_v17, 0.0  ;;  %v7256_v47 = vadd.f32 %v7154_v18, %v20360_v22  ;;  %v7754_v39 = vadd.f32 %v7648_v52, %v7255_v4  ;;  %v15696_v38 = vpop.f32.mrb[177].mxu1  ;;  %v15812_v50 = vpop.f32.mrb[149].mxu0 }
 0x635   : > { %7969 = vst.msk [vmem:[#allocation3 + $0xa0] sm:$0xff] %vm7948_vm5, %v7929_v58  ;;  %v7884_v29 = vmul.f32 %v20422_v14, %v7838_v30  ;;  %v7800_v6 = vadd.f32 %v20415_v31, %v7754_v39 }
 0x636   : > { %v7159_v16 = vpop.f32.mrb[178].mxu1  ;;  %v7653_v7 = vpop.f32.mrb[150].mxu0 }
 0x637   : > { %v7930_v26 = vadd.f32 %v20428_v60, %v7884_v29  ;;  %v7839_v34 = vmax.f32 %v7800_v6, 0.0  ;;  %v7257_v32 = vadd.f32 %v7159_v16, %v20367_v25  ;;  %v7755_v8 = vadd.f32 %v7653_v7, %v7256_v47  ;;  %v15699_v33 = vpop.f32.mrb[179].mxu1  ;;  %v15815_v56 = vpop.f32.mrb[151].mxu0 }
 0x638   : > { %v8048_v22 = vld [vmem:[#allocation3 + $0x91] ss:$2 sm:$0xff] }
 0x639   : > { %7970 = vst.msk [vmem:[#allocation3 + $0xa8] sm:$0xff] %vm7948_vm5, %v7930_v26  ;;  %v7885_v1 = vmul.f32 %v20422_v14, %v7839_v34  ;;  %v7801_v24 = vadd.f32 %v20415_v31, %v7755_v8  ;;  %15876 = vmatmul.mubr.msk.f32.gmra.mrb[216].mxu1 %vm7948_vm5, %v8048_v22 }
 0x63a   : > { %v7164_v63 = vpop.f32.mrb[180].mxu1  ;;  %v7658_v11 = vpop.f32.mrb[152].mxu0 }
 0x63b   : > { %v7931_v51 = vadd.f32 %v20428_v60, %v7885_v1  ;;  %v7840_v9 = vmax.f32 %v7801_v24, 0.0  ;;  %v7258_v42 = vadd.f32 %v7164_v63, %v20371_v59  ;;  %v7756_v25 = vadd.f32 %v7658_v11, %v7257_v32  ;;  %v15702_v13 = vpop.f32.mrb[181].mxu1  ;;  %v15818_v49 = vpop.f32.mrb[153].mxu0 }
 0x63d   : > { %7971 = vst.msk [vmem:[#allocation3 + $0xb0] sm:$0xff] %vm7948_vm5, %v7931_v51  ;;  %v7886_v21 = vmul.f32 %v20422_v14, %v7840_v9  ;;  %v7802_v19 = vadd.f32 %v20415_v31, %v7756_v25 }
 0x63e   : > { %v7169_v57 = vpop.f32.mrb[182].mxu1  ;;  %v7663_v61 = vpop.f32.mrb[154].mxu0 }
 0x63f   : > { %v7932_v20 = vadd.f32 %v20428_v60, %v7886_v21  ;;  %v7841_v41 = vmax.f32 %v7802_v19, 0.0  ;;  %v7259_v2 = vadd.f32 %v7169_v57, %v20374_v48  ;;  %v7757_v3 = vadd.f32 %v7663_v61, %v7258_v42  ;;  %v15705_v0 = vpop.f32.mrb[183].mxu1  ;;  %v15821_v4 = vpop.f32.mrb[155].mxu0 }
 0x640   : > { %v8050_v59 = vld [vmem:[#allocation3 + $0xa1] ss:$2 sm:$0xff] }
 0x641   : > { %7972 = vst.msk [vmem:[#allocation3 + $0xb8] sm:$0xff] %vm7948_vm5, %v7932_v20  ;;  %v7887_v53 = vmul.f32 %v20422_v14, %v7841_v41  ;;  %v7803_v44 = vadd.f32 %v20415_v31, %v7757_v3  ;;  %15878 = vmatprep.mubr.msk.f32.mxu1 %vm7948_vm5, %v8050_v59 }
 0x642   : > { %v7174_v36 = vpop.f32.mrb[184].mxu1  ;;  %v7668_v46 = vpop.f32.mrb[156].mxu0 }
 0x643   : > { %v7933_v23 = vadd.f32 %v20428_v60, %v7887_v53  ;;  %v7842_v17 = vmax.f32 %v7803_v44, 0.0  ;;  %v7260_v18 = vadd.f32 %v7174_v36, %v20377_v43  ;;  %v7758_v48 = vadd.f32 %v7668_v46, %v7259_v2  ;;  %v15708_v52 = vpop.f32.mrb[185].mxu1  ;;  %v15824_v58 = vpop.f32.mrb[157].mxu0 }
 0x645   : > { %7973 = vst.msk [vmem:[#allocation3 + $0xc0] sm:$0xff] %vm7948_vm5, %v7933_v23  ;;  %v7888_v30 = vmul.f32 %v20422_v14, %v7842_v17  ;;  %v7804_v47 = vadd.f32 %v20415_v31, %v7758_v48 }
 0x646   : > { %v7179_v39 = vpop.f32.mrb[186].mxu1  ;;  %v7673_v38 = vpop.f32.mrb[158].mxu0 }
 0x647   : > { %v7934_v50 = vadd.f32 %v20428_v60, %v7888_v30  ;;  %v7843_v29 = vmax.f32 %v7804_v47, 0.0  ;;  %v7261_v6 = vadd.f32 %v7179_v39, %v20380_v62  ;;  %v7759_v16 = vadd.f32 %v7673_v38, %v7260_v18  ;;  %v15711_v7 = vpop.f32.mrb[187].mxu1  ;;  %v15827_v26 = vpop.f32.mrb[159].mxu0 }
 0x648   : > { %v8052_v43 = vld [vmem:[#allocation3 + $0xb1] ss:$2 sm:$0xff] }
 0x649   : > { %7974 = vst.msk [vmem:[#allocation3 + $0xc8] sm:$0xff] %vm7948_vm5, %v7934_v50  ;;  %v7889_v34 = vmul.f32 %v20422_v14, %v7843_v29  ;;  %v7805_v32 = vadd.f32 %v20415_v31, %v7759_v16  ;;  %15879 = vmatmul.mubr.msk.f32.gmra.mrb[218].mxu1 %vm7948_vm5, %v8052_v43 }
 0x64a   : > { %v7184_v8 = vpop.f32.mrb[188].mxu1  ;;  %v7678_v33 = vpop.f32.mrb[160].mxu0 }
 0x64b   : > { %v7935_v56 = vadd.f32 %v20428_v60, %v7889_v34  ;;  %v7844_v22 = vmax.f32 %v7805_v32, 0.0  ;;  %v7262_v1 = vadd.f32 %v7184_v8, %v20383_v15  ;;  %v7760_v62 = vadd.f32 %v7678_v33, %v7261_v6  ;;  %v15714_v24 = vpop.f32.mrb[189].mxu1  ;;  %v15830_v63 = vpop.f32.mrb[161].mxu0 }
 0x64d   : > { %7975 = vst.msk [vmem:[#allocation3 + $0xd0] sm:$0xff] %vm7948_vm5, %v7935_v56  ;;  %v7890_v11 = vmul.f32 %v20422_v14, %v7844_v22  ;;  %v7806_v51 = vadd.f32 %v20415_v31, %v7760_v62 }
 0x64e   : > { %v7189_v9 = vpop.f32.mrb[190].mxu1  ;;  %v7683_v42 = vpop.f32.mrb[162].mxu0 }
 0x64f   : > { %v7936_v25 = vadd.f32 %v20428_v60, %v7890_v11  ;;  %v7845_v13 = vmax.f32 %v7806_v51, 0.0  ;;  %v7263_v49 = vadd.f32 %v7189_v9, %v20386_v5  ;;  %v7761_v21 = vadd.f32 %v7683_v42, %v7262_v1  ;;  %v15717_v19 = vpop.f32.mrb[191].mxu1  ;;  %v15833_v57 = vpop.f32.mrb[163].mxu0 }
 0x650   : > { %v8054_v15 = vld [vmem:[#allocation3 + $0xc1] ss:$2 sm:$0xff] }
 0x651   : > { %7976 = vst.msk [vmem:[#allocation3 + $0xd8] sm:$0xff] %vm7948_vm5, %v7936_v25  ;;  %v7891_v61 = vmul.f32 %v20422_v14, %v7845_v13  ;;  %v7807_v20 = vadd.f32 %v20415_v31, %v7761_v21  ;;  %15881 = vmatprep.mubr.msk.f32.mxu1 %vm7948_vm5, %v8054_v15 }
 0x652   : > { %v7194_v41 = vpop.f32.mrb[192].mxu1  ;;  %v7688_v2 = vpop.f32.mrb[164].mxu0 }
 0x653   : > { %v7937_v3 = vadd.f32 %v20428_v60, %v7891_v61  ;;  %v7846_v0 = vmax.f32 %v7807_v20, 0.0  ;;  %v7264_v4 = vadd.f32 %v7194_v41, %v20389_v40  ;;  %v7762_v5 = vadd.f32 %v7688_v2, %v7263_v49  ;;  %v15720_v59 = vpop.f32.mrb[193].mxu1  ;;  %v15836_v53 = vpop.f32.mrb[165].mxu0 }
 0x655   : > { %7977 = vst.msk [vmem:[#allocation3 + $0xe0] sm:$0xff] %vm7948_vm5, %v7937_v3  ;;  %v7892_v44 = vmul.f32 %v20422_v14, %v7846_v0  ;;  %v7808_v36 = vadd.f32 %v20415_v31, %v7762_v5 }
 0x656   : > { %v7199_v46 = vpop.f32.mrb[194].mxu1  ;;  %v7693_v23 = vpop.f32.mrb[166].mxu0 }
 0x657   : > { %v7938_v17 = vadd.f32 %v20428_v60, %v7892_v44  ;;  %v7847_v18 = vmax.f32 %v7808_v36, 0.0  ;;  %v7265_v48 = vadd.f32 %v7199_v46, %v20392_v37  ;;  %v7763_v52 = vadd.f32 %v7693_v23, %v7264_v4  ;;  %v15723_v58 = vpop.f32.mrb[195].mxu1  ;;  %v15839_v30 = vpop.f32.mrb[167].mxu0 }
 0x658   : > { %v8056_v40 = vld [vmem:[#allocation3 + $0xd1] ss:$2 sm:$0xff] }
 0x659   : > { %7978 = vst.msk [vmem:[#allocation3 + $0xe8] sm:$0xff] %vm7948_vm5, %v7938_v17  ;;  %v7893_v47 = vmul.f32 %v20422_v14, %v7847_v18  ;;  %v7809_v39 = vadd.f32 %v20415_v31, %v7763_v52  ;;  %15882 = vmatmul.mubr.msk.f32.gmra.mrb[220].mxu1 %vm7948_vm5, %v8056_v40 }
 0x65a   : > { %v7204_v38 = vpop.f32.mrb[196].mxu1  ;;  %v7698_v50 = vpop.f32.mrb[168].mxu0 }
 0x65b   : > { %v7939_v29 = vadd.f32 %v20428_v60, %v7893_v47  ;;  %v7848_v6 = vmax.f32 %v7809_v39, 0.0  ;;  %v7266_v16 = vadd.f32 %v7204_v38, %v20395_v54  ;;  %v7764_v37 = vadd.f32 %v7698_v50, %v7265_v48  ;;  %v15726_v7 = vpop.f32.mrb[197].mxu1  ;;  %v15842_v26 = vpop.f32.mrb[169].mxu0 }
 0x65d   : > { %7979 = vst.msk [vmem:[#allocation3 + $0xf0] sm:$0xff] %vm7948_vm5, %v7939_v29  ;;  %v7894_v43 = vmul.f32 %v20422_v14, %v7848_v6  ;;  %v7810_v34 = vadd.f32 %v20415_v31, %v7764_v37 }
 0x65e   : > { %v7209_v32 = vpop.f32.mrb[198].mxu1  ;;  %v7703_v8 = vpop.f32.mrb[170].mxu0 }
 0x65f   : > { %v7940_v33 = vadd.f32 %v20428_v60, %v7894_v43  ;;  %v7849_v56 = vmax.f32 %v7810_v34, 0.0  ;;  %v7267_v22 = vadd.f32 %v7209_v32, %v20398_v12  ;;  %v7765_v1 = vadd.f32 %v7703_v8, %v7266_v16  ;;  %v15729_v62 = vpop.f32.mrb[199].mxu1  ;;  %v15845_v24 = vpop.f32.mrb[171].mxu0 }
 0x660   : > { %v8058_v54 = vld [vmem:[#allocation3 + $0xe1] ss:$2 sm:$0xff] }
 0x661   : > { %7980 = vst.msk [vmem:[#allocation3 + $0xf8] sm:$0xff] %vm7948_vm5, %v7940_v33  ;;  %v7895_v63 = vmul.f32 %v20422_v14, %v7849_v56  ;;  %v7811_v11 = vadd.f32 %v20415_v31, %v7765_v1  ;;  %15884 = vmatprep.mubr.msk.f32.mxu1 %vm7948_vm5, %v8058_v54  ;;  %v14475_v62 = vld [vmem:[%s21744_s13 + $0x10] sm:$0xff]  ;;  %v14673_v54 = vld [vmem:[%s21752_s21 + $0x220] sm:$0xf] }
 0x662   : > { %v7214_v51 = vpop.f32.mrb[200].mxu1  ;;  %v7708_v9 = vpop.f32.mrb[172].mxu0 }
 0x663   : > { %v7941_v42 = vadd.f32 %v20428_v60, %v7895_v63  ;;  %v7850_v25 = vmax.f32 %v7811_v11, 0.0  ;;  %v7268_v13 = vadd.f32 %v7214_v51, %v20401_v55  ;;  %v7766_v12 = vadd.f32 %v7708_v9, %v7267_v22  ;;  %v15732_v49 = vpop.f32.mrb[201].mxu1  ;;  %v15848_v21 = vpop.f32.mrb[173].mxu0  ;;  %v7989_v63 = vld [vmem:[#allocation3] ss:$2 sm:$0xff] }
 0x664   : > { %v7991_v11 = vld [vmem:[#allocation3 + $0x10] ss:$2 sm:$0xff]  ;;  %v14450_v51 = vld [vmem:[%s21813_s1 + $0x18] sm:$0x1f]  ;;  %s14748_s1 = sshll.u32 %s17109_s7, 4  ;;  %s16957_s7 = smov [#allocation6]  }
 0x665   : > { %7981 = vst.msk [vmem:[#allocation3 + $0x100] sm:$0xff] %vm7948_vm5, %v7941_v42  ;;  %v7896_v19 = vmul.f32 %v20422_v14, %v7850_v25  ;;  %v7812_v57 = vadd.f32 %v20415_v31, %v7766_v12  ;;  %v7993_v9 = vld [vmem:[#allocation3 + $0x20] ss:$2 sm:$0xff]  ;;  %v7995_v42 = vld [vmem:[#allocation3 + $0x30] ss:$2 sm:$0xff] }
 0x666   : > { %v7219_v15 = vpop.f32.mrb[202].mxu1  ;;  %v7713_v61 = vpop.f32.mrb[174].mxu0  ;;  %v7997_v25 = vld [vmem:[#allocation3 + $0x40] ss:$2 sm:$0xff]  ;;  %v8003_v49 = vld [vmem:[#allocation3 + $0x70] ss:$2 sm:$0xff] }
 0x667   : > { %v7942_v20 = vadd.f32 %v20428_v60, %v7896_v19  ;;  %v7851_v41 = vmax.f32 %v7812_v57, 0.0  ;;  %v7269_v2 = vadd.f32 %v7219_v15, %v20404_v45  ;;  %v7767_v3 = vadd.f32 %v7713_v61, %v7268_v13  ;;  %v15735_v0 = vpop.f32.mrb[203].mxu1  ;;  %v15851_v4 = vpop.f32.mrb[175].mxu0  ;;  %v7999_v13 = vld [vmem:[#allocation3 + $0x50] ss:$2 sm:$0xff] }
 0x668   : > { %v8060_v55 = vld [vmem:[#allocation3 + $0xf1] ss:$2 sm:$0xff]  ;;  %v8001_v12 = vld [vmem:[#allocation3 + $0x60] ss:$2 sm:$0xff]  ;;  %v8007_v21 = vld [vmem:[#allocation3 + $0x90] ss:$2 sm:$0xff] }
 0x669   : > { %7982 = vst.msk [vmem:[#allocation3 + $0x108] sm:$0xff] %vm7948_vm5, %v7942_v20  ;;  %v7897_v5 = vmul.f32 %v20422_v14, %v7851_v41  ;;  %v7813_v59 = vadd.f32 %v20415_v31, %v7767_v3  ;;  %15885 = vmatmul.mubr.msk.f32.gmra.mrb[222].mxu1 %vm7948_vm5, %v8060_v55  ;;  %v8009_v19 = vld [vmem:[#allocation3 + $0xa0] ss:$2 sm:$0xff]  ;;  %v8011_v57 = vld [vmem:[#allocation3 + $0xb0] ss:$2 sm:$0xff] }
 0x66a   : > { %v7224_v53 = vpop.f32.mrb[204].mxu1  ;;  %v7718_v44 = vpop.f32.mrb[176].mxu0  ;;  %v8013_v15 = vld [vmem:[#allocation3 + $0xc0] ss:$2 sm:$0xff]  ;;  %v8015_v61 = vld [vmem:[#allocation3 + $0xd0] ss:$2 sm:$0xff] }
 0x66b   : > { %v7943_v36 = vadd.f32 %v20428_v60, %v7897_v5  ;;  %v7852_v46 = vmax.f32 %v7813_v59, 0.0  ;;  %v7270_v23 = vadd.f32 %v7224_v53, %v20407_v10  ;;  %v7768_v45 = vadd.f32 %v7718_v44, %v7269_v2  ;;  %v15738_v17 = vpop.f32.mrb[205].mxu1  ;;  %v15854_v18 = vpop.f32.mrb[177].mxu0  ;;  %v8017_v20 = vld [vmem:[#allocation3 + $0xe0] ss:$2 sm:$0xff] }
 0x66c   : > { %v8019_v41 = vld [vmem:[#allocation3 + $0xf0] ss:$2 sm:$0xff] }
 0x66d   : > { %7983 = vst.msk [vmem:[#allocation3 + $0x110] sm:$0xff] %vm7948_vm5, %v7943_v36  ;;  %v7898_v48 = vmul.f32 %v20422_v14, %v7852_v46  ;;  %v7814_v52 = vadd.f32 %v20415_v31, %v7768_v45  ;;  %v8529_v55 = vld [vmem:[#allocation3 + $0x2] ss:$2 sm:$0xff]  ;;  %v8531_v5 = vld [vmem:[#allocation3 + $0x12] ss:$2 sm:$0xff] }
 0x66e   : > { %v7229_v58 = vpop.f32.mrb[206].mxu1  ;;  %v7723_v30 = vpop.f32.mrb[178].mxu0  ;;  %v8533_v59 = vld [vmem:[#allocation3 + $0x22] ss:$2 sm:$0xff]  ;;  %v8535_v53 = vld [vmem:[#allocation3 + $0x32] ss:$2 sm:$0xff] }
 0x66f   : > { %v7944_v40 = vadd.f32 %v20428_v60, %v7898_v48  ;;  %v7853_v47 = vmax.f32 %v7814_v52, 0.0  ;;  %v7271_v39 = vadd.f32 %v7229_v58, %v20409_v27  ;;  %v7769_v38 = vadd.f32 %v7723_v30, %v7270_v23  ;;  %v15741_v50 = vpop.f32.mrb[207].mxu1  ;;  %v15857_v29 = vpop.f32.mrb[179].mxu0  ;;  %v8537_v44 = vld [vmem:[#allocation3 + $0x42] ss:$2 sm:$0xff] }
 0x670   : > { %v8062_v10 = vld [vmem:[#allocation3 + $0x101] ss:$2 sm:$0xff]  ;;  %v8021_v2 = vld [vmem:[#allocation3 + $0x100] ss:$2 sm:$0xff] }
 0x671   : > { %7984 = vst.msk [vmem:[#allocation3 + $0x118] sm:$0xff] %vm7948_vm5, %v7944_v40  ;;  %v7899_v6 = vmul.f32 %v20422_v14, %v7853_v47  ;;  %v7815_v16 = vadd.f32 %v20415_v31, %v7769_v38  ;;  %15887 = vmatprep.mubr.msk.f32.mxu1 %vm7948_vm5, %v8062_v10  ;;  %v8539_v36 = vld [vmem:[#allocation3 + $0x52] ss:$2 sm:$0xff]  ;;  %v8541_v46 = vld [vmem:[#allocation3 + $0x62] ss:$2 sm:$0xff] }
 0x672   : > { %v7728_v37 = vpop.f32.mrb[180].mxu0  ;;  %v8543_v23 = vld [vmem:[#allocation3 + $0x72] ss:$2 sm:$0xff]  ;;  %v8545_v45 = vld [vmem:[#allocation3 + $0x82] ss:$2 sm:$0xff] }
 0x673   : > { %v7945_v7 = vadd.f32 %v20428_v60, %v7899_v6  ;;  %v7854_v26 = vmax.f32 %v7815_v16, 0.0  ;;  %v7770_v43 = vadd.f32 %v7728_v37, %v7271_v39  ;;  %v15860_v34 = vpop.f32.mrb[181].mxu0  ;;  %v8547_v17 = vld [vmem:[#allocation3 + $0x92] ss:$2 sm:$0xff]  ;;  %v8549_v18 = vld [vmem:[#allocation3 + $0xa2] ss:$2 sm:$0xff] }
 0x674   : > { %v8551_v48 = vld [vmem:[#allocation3 + $0xb2] ss:$2 sm:$0xff]  ;;  %v8553_v52 = vld [vmem:[#allocation3 + $0xc2] ss:$2 sm:$0xff]  ;;  %v8819_v29 = vld [vmem:[#allocation3 + $0x3] ss:$2 sm:$0xff] }
 0x675   : > { %7985 = vst.msk [vmem:[#allocation3 + $0x120] sm:$0xff] %vm7948_vm5, %v7945_v7  ;;  %v7900_v27 = vmul.f32 %v20422_v14, %v7854_v26  ;;  %v7816_v32 = vadd.f32 %v20415_v31, %v7770_v43  ;;  %v14476_v31 = vld [vmem:[%s21744_s13 + $0x18] sm:$0x3]  ;;  %v8555_v58 = vld [vmem:[#allocation3 + $0xd2] ss:$2 sm:$0xff] }
 0x676   : > { %v16489_v24 = vpack.c.bf16 %v14476_v31, %v14475_v62  ;;  %v8557_v30 = vld [vmem:[#allocation3 + $0xe2] ss:$2 sm:$0xff]  ;;  %v8559_v40 = vld [vmem:[#allocation3 + $0xf2] ss:$2 sm:$0xff]  ;;  %v8821_v10 = vld [vmem:[#allocation3 + $0x13] ss:$2 sm:$0xff] }
 0x677   : > { %v7946_v8 = vadd.f32 %v20428_v60, %v7900_v27  ;;  %v7855_v33 = vmax.f32 %v7816_v32, 0.0  ;;  %v8561_v47 = vld [vmem:[#allocation3 + $0x102] ss:$2 sm:$0xff]  ;;  %v8823_v6 = vld [vmem:[#allocation3 + $0x23] ss:$2 sm:$0xff] }
 0x678   : > { %v8064_v56 = vld [vmem:[#allocation3 + $0x111] ss:$2 sm:$0xff]  ;;  %16491 = vmatprep.subr.msk.bf16.mxu0 %vm20656_vm9, %v16489_v24  ;;  %v8023_v3 = vld [vmem:[#allocation3 + $0x110] ss:$2 sm:$0xff] }
 0x679   : > { %7986 = vst.msk [vmem:[#allocation3 + $0x128] sm:$0xff] %vm7948_vm5, %v7946_v8  ;;  %v7901_v22 = vmul.f32 %v20422_v14, %v7855_v33  ;;  %15888 = vmatmul.mubr.msk.f32.gmra.mrb[224].mxu1 %vm7948_vm5, %v8064_v56  ;;  %16494 = vmatpush3.bf16.msk.msra.mxu0 %vm20656_vm9, %v16489_v24  ;;  %v8825_v16 = vld [vmem:[#allocation3 + $0x33] ss:$2 sm:$0xff]  ;;  %v8827_v37 = vld [vmem:[#allocation3 + $0x43] ss:$2 sm:$0xff] }
 0x67a   : > { %v8829_v7 = vld [vmem:[#allocation3 + $0x53] ss:$2 sm:$0xff]  ;;  %v8831_v26 = vld [vmem:[#allocation3 + $0x63] ss:$2 sm:$0xff] }
 0x67b   : > { %v7947_v1 = vadd.f32 %v20428_v60, %v7901_v22  ;;  %v8833_v43 = vld [vmem:[#allocation3 + $0x73] ss:$2 sm:$0xff]  ;;  %v8835_v34 = vld [vmem:[#allocation3 + $0x83] ss:$2 sm:$0xff] }
 0x67c   : > { %v8563_v39 = vld [vmem:[#allocation3 + $0x112] ss:$2 sm:$0xff]  ;;  %v8837_v27 = vld [vmem:[#allocation3 + $0x93] ss:$2 sm:$0xff]  ;;  %v8839_v32 = vld [vmem:[#allocation3 + $0xa3] ss:$2 sm:$0xff] }
 0x67d   : > { %7988 = vst.msk [vmem:[#allocation3 + $0x130] sm:$0x3f] %vm7987_vm6, %v7947_v1  ;;  %v8841_v8 = vld [vmem:[#allocation3 + $0xb3] ss:$2 sm:$0xff]  ;;  %v8843_v33 = vld [vmem:[#allocation3 + $0xc3] ss:$2 sm:$0xff] }
 0x67e   : > { %v8845_v56 = vld [vmem:[#allocation3 + $0xd3] ss:$2 sm:$0xff]  ;;  %v8847_v22 = vld [vmem:[#allocation3 + $0xe3] ss:$2 sm:$0xff] }
 0x67f   : > { %v8849_v1 = vld [vmem:[#allocation3 + $0xf3] ss:$2 sm:$0xff]  ;;  %v8851_v62 = vld [vmem:[#allocation3 + $0x103] ss:$2 sm:$0xff] }
 0x680   : > { %v8066_v14 = vld [vmem:[#allocation3 + $0x121] ss:$2 sm:$0xff]  ;;  %v8025_v0 = vld [vmem:[#allocation3 + $0x120] ss:$2 sm:$0xff] }
 0x681   : > { %15890 = vmatprep.mubr.msk.f32.mxu1 %vm7948_vm5, %v8066_v14  ;;  %v8853_v31 = vld [vmem:[#allocation3 + $0x113] ss:$2 sm:$0xff] }
 0x684   : > { %v8068_v60 = vld [vmem:[#allocation3 + $0x131] ss:$2 sm:$0x3]  ;;  %v8027_v4 = vld [vmem:[#allocation3 + $0x130] ss:$2 sm:$0x3] }
 0x685   : > { %15891 = vmatmul.mubr.msk.f32.gmra.mrb[226].mxu1 %vm7948_vm5, %v8068_v60  ;;  %v8565_v38 = vld [vmem:[#allocation3 + $0x122] ss:$2 sm:$0xff]  ;;  %v8567_v50 = vld [vmem:[#allocation3 + $0x132] ss:$2 sm:$0x3] }
 0x686   : > { %15895 = vmatprep.mubr.msk.f32.mxu1 %vm7948_vm5, %v7989_v63  ;;  %v8855_v24 = vld [vmem:[#allocation3 + $0x123] ss:$2 sm:$0xff]  ;;  %v8857_v14 = vld [vmem:[#allocation3 + $0x133] ss:$2 sm:$0x3] }
 0x687   : > { %v9250_v60 = vld [vmem:[%s21744_s13] sm:$0xff]  ;;  %v9251_v63 = vld [vmem:[%s21744_s13 + $0x8] sm:$0x3] }
 0x689   : > { %15896 = vmatmul.mubr.msk.f32.vlgmr.msra.gmra.mrb[208].mxu1 %vm7948_vm5, %v7991_v11  ;;  %v20741_v11 = vpack.c.bf16 %v9251_v63, %v9250_v60 }
 0x68a   : > { %15926 = vmatpush3.msk.msra.mxu1 %vm8131_vm4, %v20488_v35  ;;  %15898 = vmatprep.mubr.msk.f32.mxu1 %vm7948_vm5, %v7993_v9  ;;  %v8005_v35 = vld [vmem:[#allocation3 + $0x80] ss:$2 sm:$0xff]  ;;  %v14529_v9 = vld [vmem:[%s21748_s17 + $0x20] sm:$0xff] }
 0x68b   : > { %15957 = vmatprep.subr.msk.mxu1 %vm8131_vm4, %v14450_v51  ;;  %16497 = vmatprep.subr.msk.bf16.mxu0 %vm20656_vm9, %v20741_v11 }
 0x68d   : > { %15899 = vmatmul.mubr.msk.f32.gmra.mrb[210].mxu1 %vm7948_vm5, %v7995_v42  ;;  %v16956_v42 = vmov 0.0|0.0  }
 0x68e   : > { %15901 = vmatprep.mubr.msk.f32.mxu1 %vm7948_vm5, %v7997_v25 }
 0x691   : > { %15902 = vmatmul.mubr.msk.f32.gmra.mrb[212].mxu1 %vm7948_vm5, %v7999_v13  ;;  %v14530_v13 = vld [vmem:[%s21748_s17 + $0x28] sm:$0xf] }
 0x692   : > { %15904 = vmatprep.mubr.msk.f32.mxu1 %vm7948_vm5, %v8001_v12  ;;  %v20762_v12 = vld [vmem:[%s21832_s10] ss:$0 sm:$0xff]  ;;  %s21689_s10 = scalar_lea.hbm %s21756_s25, %s14748_s1 }
 0x695   : > { %15905 = vmatmul.mubr.msk.f32.gmra.mrb[214].mxu1 %vm7948_vm5, %v8003_v49 }
 0x696   : > { %15907 = vmatprep.mubr.msk.f32.mxu1 %vm7948_vm5, %v8005_v35 }
 0x699   : > { %15908 = vmatmul.mubr.msk.f32.gmra.mrb[216].mxu1 %vm7948_vm5, %v8007_v21 }
 0x69a   : > { %15910 = vmatprep.mubr.msk.f32.mxu1 %vm7948_vm5, %v8009_v19  ;;  %v20768_v19 = vld [vmem:[%s21833_s11] ss:$0 sm:$0xff]  ;;  %s16892_s11 = sshll.u32 %s16957_s7, 4  ;;  %s16893_s11 = int_to_ptr.vmem [resolvable:$false] %s16892_s11 }
 0x69b   : > { %p16895_p0 = scmp.lt.s32.totalorder %s21691_s5, %s16893_s11 }
 0x69d   : > { %15911 = vmatmul.mubr.msk.f32.gmra.mrb[218].mxu1 %vm7948_vm5, %v8011_v57 }
 0x69e   : > { %15913 = vmatprep.mubr.msk.f32.mxu1 %vm7948_vm5, %v8013_v15 }
 0x6a1   : > { %15914 = vmatmul.mubr.msk.f32.gmra.mrb[220].mxu1 %vm7948_vm5, %v8015_v61  ;;  %v20774_v61 = vld [vmem:[%s21834_s12] ss:$0 sm:$0xff]  ;;  %s16894_s12 = scalar_lea.vmem %s16893_s11, 32 }
 0x6a2   : > { %15916 = vmatprep.mubr.msk.f32.mxu1 %vm7948_vm5, %v8017_v20  ;;  %p16896_p1 = scmp.lt.s32.totalorder %s16894_s12, %s16888_s26 }
 0x6a4   : > { %p16897_p2 = por %p16896_p1, %p16895_p0 }
 0x6a5   : > { %15917 = vmatmul.mubr.msk.f32.gmra.mrb[222].mxu1 %vm7948_vm5, %v8019_v41 }
 0x6a6   : > { %15919 = vmatprep.mubr.msk.f32.mxu1 %vm7948_vm5, %v8021_v2  ;;  %p16898_p3 = pnand %p16897_p2, %p16891_p13 }
 0x6a9   : > { %15920 = vmatmul.mubr.msk.f32.gmra.mrb[224].mxu1 %vm7948_vm5, %v8023_v3 }
 0x6aa   : > { %15922 = vmatprep.mubr.msk.f32.mxu1 %vm7948_vm5, %v8025_v0 }
 0x6ad   : > { %15923 = vmatmul.mubr.msk.f32.gmra.mrb[226].mxu1 %vm7948_vm5, %v8027_v4 }
 0x6ae   : > { %15927 = vmatprep.mubr.msk.f32.mxu1 %vm7948_vm5, %v8529_v55 }
 0x6b1   : > { %15928 = vmatmul.mubr.msk.f32.vlgmr.msra.gmra.mrb[208].mxu1 %vm7948_vm5, %v8531_v5 }
 0x6b2   : > { %15958 = vmatpush3.msk.msra.mxu1 %vm8131_vm4, %v14450_v51  ;;  %15930 = vmatprep.mubr.msk.f32.mxu1 %vm7948_vm5, %v8533_v59  ;;  %v14528_v51 = vld [vmem:[%s21748_s17 + $0x18] sm:$0xff] }
 0x6b3   : > { %16513 = vmatprep.subr.bf16.mxu1 %v16956_v42  ;;  %v16514_v25 = vpack.c.bf16 %v14529_v9, %v14528_v51 }
 0x6b5   : > { %15931 = vmatmul.mubr.msk.f32.gmra.mrb[210].mxu1 %vm7948_vm5, %v8535_v53 }
 0x6b6   : > { %15933 = vmatprep.mubr.msk.f32.mxu1 %vm7948_vm5, %v8537_v44 }
 0x6b9   : > { %15934 = vmatmul.mubr.msk.f32.gmra.mrb[212].mxu1 %vm7948_vm5, %v8539_v36 }
 0x6ba   : > { %15936 = vmatprep.mubr.msk.f32.mxu1 %vm7948_vm5, %v8541_v46 }
 0x6bd   : > { %15937 = vmatmul.mubr.msk.f32.gmra.mrb[214].mxu1 %vm7948_vm5, %v8543_v23 }
 0x6be   : > { %15939 = vmatprep.mubr.msk.f32.mxu1 %vm7948_vm5, %v8545_v45 }
 0x6c1   : > { %15940 = vmatmul.mubr.msk.f32.gmra.mrb[216].mxu1 %vm7948_vm5, %v8547_v17 }
 0x6c2   : > { %15942 = vmatprep.mubr.msk.f32.mxu1 %vm7948_vm5, %v8549_v18 }
 0x6c5   : > { %15943 = vmatmul.mubr.msk.f32.gmra.mrb[218].mxu1 %vm7948_vm5, %v8551_v48 }
 0x6c6   : > { %15945 = vmatprep.mubr.msk.f32.mxu1 %vm7948_vm5, %v8553_v52 }
 0x6c9   : > { %15946 = vmatmul.mubr.msk.f32.gmra.mrb[220].mxu1 %vm7948_vm5, %v8555_v58 }
 0x6ca   : > { %15948 = vmatprep.mubr.msk.f32.mxu1 %vm7948_vm5, %v8557_v30 }
 0x6cd   : > { %15949 = vmatmul.mubr.msk.f32.gmra.mrb[222].mxu1 %vm7948_vm5, %v8559_v40 }
 0x6ce   : > { %15951 = vmatprep.mubr.msk.f32.mxu1 %vm7948_vm5, %v8561_v47 }
 0x6d1   : > { %15952 = vmatmul.mubr.msk.f32.gmra.mrb[224].mxu1 %vm7948_vm5, %v8563_v39 }
 0x6d2   : > { %15954 = vmatprep.mubr.msk.f32.mxu1 %vm7948_vm5, %v8565_v38 }
 0x6d5   : > { %15955 = vmatmul.mubr.msk.f32.gmra.mrb[226].mxu1 %vm7948_vm5, %v8567_v50 }
 0x6d6   : > { %15959 = vmatprep.mubr.msk.f32.mxu1 %vm7948_vm5, %v8819_v29 }
 0x6d9   : > { %15960 = vmatmul.mubr.msk.f32.vlgmr.msra.gmra.mrb[208].mxu1 %vm7948_vm5, %v8821_v10 }
 0x6da   : > { %15962 = vmatprep.mubr.msk.f32.mxu1 %vm7948_vm5, %v8823_v6  ;;  %16515 = vmatpush3.bf16.msra.mxu1 %v16514_v25 }
 0x6db   : > { %16069 = vmatprep.subr.mxu1 %v21804_v28 }
 0x6dd   : > { %15963 = vmatmul.mubr.msk.f32.gmra.mrb[210].mxu1 %vm7948_vm5, %v8825_v16 }
 0x6de   : > { %15965 = vmatprep.mubr.msk.f32.mxu1 %vm7948_vm5, %v8827_v37  ;;  %16070 = vmatpush3.msk.msra.mxu1 %vm10048_vm10, %v14530_v13 }
 0x6df   : > { %16516 = vmatprep.subr.bf16.mxu1 %v16956_v42 }
 0x6e1   : > { %15966 = vmatmul.mubr.msk.f32.gmra.mrb[212].mxu1 %vm7948_vm5, %v8829_v7 }
 0x6e2   : > { %15968 = vmatprep.mubr.msk.f32.mxu1 %vm7948_vm5, %v8831_v26 }
 0x6e5   : > { %15969 = vmatmul.mubr.msk.f32.gmra.mrb[214].mxu1 %vm7948_vm5, %v8833_v43 }
 0x6e6   : > { %15971 = vmatprep.mubr.msk.f32.mxu1 %vm7948_vm5, %v8835_v34 }
 0x6e9   : > { %15972 = vmatmul.mubr.msk.f32.gmra.mrb[216].mxu1 %vm7948_vm5, %v8837_v27 }
 0x6ea   : > { %15974 = vmatprep.mubr.msk.f32.mxu1 %vm7948_vm5, %v8839_v32  ;;  %v14499_v32 = vld [vmem:[%s21744_s13 + $0x20] sm:$0xff] }
 0x6ed   : > { %15975 = vmatmul.mubr.msk.f32.gmra.mrb[218].mxu1 %vm7948_vm5, %v8841_v8  ;;  %v14500_v8 = vld [vmem:[%s21744_s13 + $0x28] sm:$0x3] }
 0x6ee   : > { %15977 = vmatprep.mubr.msk.f32.mxu1 %vm7948_vm5, %v8843_v33 }
 0x6f1   : > { %15978 = vmatmul.mubr.msk.f32.gmra.mrb[220].mxu1 %vm7948_vm5, %v8845_v56 }
 0x6f2   : > { %15980 = vmatprep.mubr.msk.f32.mxu1 %vm7948_vm5, %v8847_v22 }
 0x6f5   : > { %15981 = vmatmul.mubr.msk.f32.gmra.mrb[222].mxu1 %vm7948_vm5, %v8849_v1 }
 0x6f6   : > { %15983 = vmatprep.mubr.msk.f32.mxu1 %vm7948_vm5, %v8851_v62 }
 0x6f9   : > { %15984 = vmatmul.mubr.msk.f32.gmra.mrb[224].mxu1 %vm7948_vm5, %v8853_v31 }
 0x6fa   : > { %15986 = vmatprep.mubr.msk.f32.mxu1 %vm7948_vm5, %v8855_v24 }
 0x6fd   : > { %15987 = vmatmul.mubr.msk.f32.gmra.mrb[226].mxu1 %vm7948_vm5, %v8857_v14  ;;  %v20813_v14 = vpack.c.bf16 %v14500_v8, %v14499_v32 }
 0x6fe   : > { %16071 = vmatprep.mubr.msk.f32.mxu1 %vm16954_vm1, %v21804_v28 }
 0x7ac   : > { %v15961_v49 = vpop.f32.mrb[208].mxu1 }
 0x7ad   : > { %v9116_v35 = vadd.f32 %v15961_v49, %v20762_v12  ;;  %v8989_v21 = vpop.f32.mrb[209].mxu1 }
 0x7ae   : > { %v9115_v57 = vadd.f32 %v20762_v12, %v8989_v21 }
 0x7af   : > { %v9136_v15 = vmax.f32 %v9116_v35, 0.0 }
 0x7b0   : > { %v9135_v20 = vmax.f32 %v9115_v57, 0.0  ;;  %v15964_v41 = vpop.f32.mrb[210].mxu1 }
 0x7b1   : > { %v9163_v2 = vmul.f32 %v20768_v19, %v9136_v15  ;;  %v9118_v3 = vadd.f32 %v15964_v41, %v20762_v12  ;;  %v8999_v0 = vpop.f32.mrb[211].mxu1 }
 0x7b2   : > { %v9162_v4 = vmul.f32 %v20768_v19, %v9135_v20  ;;  %v9117_v55 = vadd.f32 %v20762_v12, %v8999_v0 }
 0x7b3   : > { %v9190_v5 = vadd.f32 %v20774_v61, %v9163_v2  ;;  %v9138_v59 = vmax.f32 %v9118_v3, 0.0 }
 0x7b4   : > { %v9189_v53 = vadd.f32 %v20774_v61, %v9162_v4  ;;  %v9137_v44 = vmax.f32 %v9117_v55, 0.0  ;;  %v15967_v36 = vpop.f32.mrb[212].mxu1 }
 0x7b5   : > { %9211 = vst.msk [vmem:[#allocation4 + $0x8] sm:$0xff] %vm9209_vm11, %v9190_v5  ;;  %v9165_v46 = vmul.f32 %v20768_v19, %v9138_v59  ;;  %v9120_v23 = vadd.f32 %v15967_v36, %v20762_v12  ;;  %v9009_v45 = vpop.f32.mrb[213].mxu1 }
 0x7b6   : > { %9210 = vst.msk [vmem:[#allocation4] sm:$0xff] %vm9209_vm11, %v9189_v53  ;;  %v9164_v17 = vmul.f32 %v20768_v19, %v9137_v44  ;;  %v9119_v18 = vadd.f32 %v20762_v12, %v9009_v45 }
 0x7b7   : > { %v9192_v48 = vadd.f32 %v20774_v61, %v9165_v46  ;;  %v9140_v52 = vmax.f32 %v9120_v23, 0.0 }
 0x7b8   : > { %v9191_v58 = vadd.f32 %v20774_v61, %v9164_v17  ;;  %v9139_v30 = vmax.f32 %v9119_v18, 0.0  ;;  %v15970_v40 = vpop.f32.mrb[214].mxu1 }
 0x7b9   : > { %9213 = vst.msk [vmem:[#allocation4 + $0x18] sm:$0xff] %vm9209_vm11, %v9192_v48  ;;  %v9167_v47 = vmul.f32 %v20768_v19, %v9140_v52  ;;  %v9122_v39 = vadd.f32 %v15970_v40, %v20762_v12  ;;  %v9019_v38 = vpop.f32.mrb[215].mxu1 }
 0x7ba   : > { %9212 = vst.msk [vmem:[#allocation4 + $0x10] sm:$0xff] %vm9209_vm11, %v9191_v58  ;;  %v9166_v50 = vmul.f32 %v20768_v19, %v9139_v30  ;;  %v9121_v29 = vadd.f32 %v20762_v12, %v9019_v38 }
 0x7bb   : > { %v9194_v10 = vadd.f32 %v20774_v61, %v9167_v47  ;;  %v9142_v6 = vmax.f32 %v9122_v39, 0.0 }
 0x7bc   : > { %v9193_v16 = vadd.f32 %v20774_v61, %v9166_v50  ;;  %v9141_v37 = vmax.f32 %v9121_v29, 0.0  ;;  %v15973_v7 = vpop.f32.mrb[216].mxu1 }
 0x7bd   : > { %9215 = vst.msk [vmem:[#allocation4 + $0x28] sm:$0xff] %vm9209_vm11, %v9194_v10  ;;  %v9169_v26 = vmul.f32 %v20768_v19, %v9142_v6  ;;  %v9124_v43 = vadd.f32 %v15973_v7, %v20762_v12  ;;  %v9029_v34 = vpop.f32.mrb[217].mxu1  ;;  %v9253_v27 = vld [vmem:[#allocation4 + $0x1] ss:$2 sm:$0xff] }
 0x7be   : > { %9214 = vst.msk [vmem:[#allocation4 + $0x20] sm:$0xff] %vm9209_vm11, %v9193_v16  ;;  %v9168_v33 = vmul.f32 %v20768_v19, %v9141_v37  ;;  %v9123_v56 = vadd.f32 %v20762_v12, %v9029_v34  ;;  %15993 = vmatprep.mubr.msk.f32.mxu0 %vm9209_vm11, %v9253_v27 }
 0x7bf   : > { %v9196_v22 = vadd.f32 %v20774_v61, %v9169_v26  ;;  %v9144_v1 = vmax.f32 %v9124_v43, 0.0 }
 0x7c0   : > { %v9195_v62 = vadd.f32 %v20774_v61, %v9168_v33  ;;  %v9143_v31 = vmax.f32 %v9123_v56, 0.0  ;;  %v15976_v24 = vpop.f32.mrb[218].mxu1 }
 0x7c1   : > { %9217 = vst.msk [vmem:[#allocation4 + $0x38] sm:$0xff] %vm9209_vm11, %v9196_v22  ;;  %v9171_v60 = vmul.f32 %v20768_v19, %v9144_v1  ;;  %v9126_v63 = vadd.f32 %v15976_v24, %v20762_v12  ;;  %v9039_v51 = vpop.f32.mrb[219].mxu1  ;;  %v9255_v9 = vld [vmem:[#allocation4 + $0x11] ss:$2 sm:$0xff] }
 0x7c2   : > { %9216 = vst.msk [vmem:[#allocation4 + $0x30] sm:$0xff] %vm9209_vm11, %v9195_v62  ;;  %v9170_v25 = vmul.f32 %v20768_v19, %v9143_v31  ;;  %v9125_v13 = vadd.f32 %v20762_v12, %v9039_v51  ;;  %15994 = vmatmul.mubr.msk.f32.vlgmr.msra.gmra.mrb[182].mxu0 %vm9209_vm11, %v9255_v9 }
 0x7c3   : > { %v9198_v49 = vadd.f32 %v20774_v61, %v9171_v60  ;;  %v9146_v35 = vmax.f32 %v9126_v63, 0.0  ;;  %16500 = vmatpush3.bf16.msk.msra.mxu0 %vm20656_vm9, %v20741_v11 }
 0x7c4   : > { %v9197_v21 = vadd.f32 %v20774_v61, %v9170_v25  ;;  %v9145_v57 = vmax.f32 %v9125_v13, 0.0  ;;  %v15979_v15 = vpop.f32.mrb[220].mxu1  ;;  %16503 = vmatprep.subr.msk.bf16.mxu0 %vm20656_vm9, %v20813_v14  ;;  %v14513_v25 = vld [vmem:[%s21744_s13 + $0x38] sm:$0x3] }
 0x7c5   : > { %9219 = vst.msk [vmem:[#allocation4 + $0x48] sm:$0xff] %vm9209_vm11, %v9198_v49  ;;  %v9173_v20 = vmul.f32 %v20768_v19, %v9146_v35  ;;  %v9128_v41 = vadd.f32 %v15979_v15, %v20762_v12  ;;  %v9049_v2 = vpop.f32.mrb[221].mxu1  ;;  %v9257_v3 = vld [vmem:[#allocation4 + $0x21] ss:$2 sm:$0xff]  ;;  %v9233_v49 = vld [vmem:[#allocation4 + $0x10] ss:$2 sm:$0xff] }
 0x7c6   : > { %9218 = vst.msk [vmem:[#allocation4 + $0x40] sm:$0xff] %vm9209_vm11, %v9197_v21  ;;  %v9172_v11 = vmul.f32 %v20768_v19, %v9145_v57  ;;  %v9127_v0 = vadd.f32 %v20762_v12, %v9049_v2  ;;  %15996 = vmatprep.mubr.msk.f32.mxu0 %vm9209_vm11, %v9257_v3  ;;  %v9235_v35 = vld [vmem:[#allocation4 + $0x20] ss:$2 sm:$0xff] }
 0x7c7   : > { %v9200_v4 = vadd.f32 %v20774_v61, %v9173_v20  ;;  %v9148_v55 = vmax.f32 %v9128_v41, 0.0  ;;  %v9573_v3 = vld [vmem:[#allocation4 + $0x2] ss:$2 sm:$0xff] }
 0x7c8   : > { %v9199_v5 = vadd.f32 %v20774_v61, %v9172_v11  ;;  %v9147_v59 = vmax.f32 %v9127_v0, 0.0  ;;  %v15982_v53 = vpop.f32.mrb[222].mxu1  ;;  %v9575_v11 = vld [vmem:[#allocation4 + $0x12] ss:$2 sm:$0xff] }
 0x7c9   : > { %9221 = vst.msk [vmem:[#allocation4 + $0x58] sm:$0xff] %vm9209_vm11, %v9200_v4  ;;  %v9175_v44 = vmul.f32 %v20768_v19, %v9148_v55  ;;  %v9130_v36 = vadd.f32 %v15982_v53, %v20762_v12  ;;  %v9059_v46 = vpop.f32.mrb[223].mxu1  ;;  %v9259_v23 = vld [vmem:[#allocation4 + $0x31] ss:$2 sm:$0xff]  ;;  %v9237_v21 = vld [vmem:[#allocation4 + $0x30] ss:$2 sm:$0xff] }
 0x7ca   : > { %9220 = vst.msk [vmem:[#allocation4 + $0x50] sm:$0xff] %vm9209_vm11, %v9199_v5  ;;  %v9174_v45 = vmul.f32 %v20768_v19, %v9147_v59  ;;  %v9129_v17 = vadd.f32 %v20762_v12, %v9059_v46  ;;  %15997 = vmatmul.mubr.msk.f32.gmra.mrb[184].mxu0 %vm9209_vm11, %v9259_v23  ;;  %v9577_v0 = vld [vmem:[#allocation4 + $0x22] ss:$2 sm:$0xff]  ;;  %v9754_v46 = vld [vmem:[#allocation4 + $0x3] ss:$2 sm:$0xff] }
 0x7cb   : > { %v9202_v18 = vadd.f32 %v20774_v61, %v9175_v44  ;;  %v9150_v48 = vmax.f32 %v9130_v36, 0.0  ;;  %v9756_v23 = vld [vmem:[#allocation4 + $0x13] ss:$2 sm:$0xff] }
 0x7cc   : > { %v9201_v52 = vadd.f32 %v20774_v61, %v9174_v45  ;;  %v9149_v58 = vmax.f32 %v9129_v17, 0.0  ;;  %v15985_v30 = vpop.f32.mrb[224].mxu1  ;;  %v9758_v45 = vld [vmem:[#allocation4 + $0x23] ss:$2 sm:$0xff] }
 0x7cd   : > { %9223 = vst.msk [vmem:[#allocation4 + $0x68] sm:$0xff] %vm9209_vm11, %v9202_v18  ;;  %v9177_v40 = vmul.f32 %v20768_v19, %v9150_v48  ;;  %v9132_v47 = vadd.f32 %v15985_v30, %v20762_v12  ;;  %v9069_v39 = vpop.f32.mrb[225].mxu1  ;;  %v9261_v38 = vld [vmem:[#allocation4 + $0x41] ss:$2 sm:$0xff]  ;;  %v9239_v57 = vld [vmem:[#allocation4 + $0x40] ss:$2 sm:$0xff] }
 0x7ce   : > { %9222 = vst.msk [vmem:[#allocation4 + $0x60] sm:$0xff] %vm9209_vm11, %v9201_v52  ;;  %v9176_v50 = vmul.f32 %v20768_v19, %v9149_v58  ;;  %v9131_v29 = vadd.f32 %v20762_v12, %v9069_v39  ;;  %15999 = vmatprep.mubr.msk.f32.mxu0 %vm9209_vm11, %v9261_v38  ;;  %v9579_v4 = vld [vmem:[#allocation4 + $0x32] ss:$2 sm:$0xff]  ;;  %v9760_v17 = vld [vmem:[#allocation4 + $0x33] ss:$2 sm:$0xff] }
 0x7cf   : > { %v9204_v10 = vadd.f32 %v20774_v61, %v9177_v40  ;;  %v9152_v6 = vmax.f32 %v9132_v47, 0.0  ;;  %v14525_v47 = vld [vmem:[%s21745_s14] ss:$0 sm:$0xff] }
 0x7d0   : > { %v9203_v16 = vadd.f32 %v20774_v61, %v9176_v50  ;;  %v9151_v37 = vmax.f32 %v9131_v29, 0.0  ;;  %v15988_v7 = vpop.f32.mrb[226].mxu1  ;;  %v20929_v29 = vld [vmem:[%s21746_s15] ss:$0 sm:$0xff] }
 0x7d1   : > { %9225 = vst.msk [vmem:[#allocation4 + $0x78] sm:$0xff] %vm9209_vm11, %v9204_v10  ;;  %v9179_v26 = vmul.f32 %v20768_v19, %v9152_v6  ;;  %v9134_v43 = vadd.f32 %v15988_v7, %v20762_v12  ;;  %v9079_v34 = vpop.f32.mrb[227].mxu1  ;;  %v9263_v27 = vld [vmem:[#allocation4 + $0x51] ss:$2 sm:$0xff]  ;;  %v9241_v15 = vld [vmem:[#allocation4 + $0x50] ss:$2 sm:$0xff] }
 0x7d2   : > { %9224 = vst.msk [vmem:[#allocation4 + $0x70] sm:$0xff] %vm9209_vm11, %v9203_v16  ;;  %v9178_v32 = vmul.f32 %v20768_v19, %v9151_v37  ;;  %v9133_v8 = vadd.f32 %v20762_v12, %v9079_v34  ;;  %16000 = vmatmul.mubr.msk.f32.gmra.mrb[186].mxu0 %vm9209_vm11, %v9263_v27  ;;  %v9581_v55 = vld [vmem:[#allocation4 + $0x42] ss:$2 sm:$0xff]  ;;  %v9762_v18 = vld [vmem:[#allocation4 + $0x43] ss:$2 sm:$0xff] }
 0x7d3   : > { %v9206_v33 = vadd.f32 %v20774_v61, %v9179_v26  ;;  %v9154_v56 = vmax.f32 %v9134_v43, 0.0  ;;  %v20934_v16 = vld [vmem:[%s21747_s16] ss:$0 sm:$0xff] }
 0x7d4   : > { %v9205_v22 = vadd.f32 %v20774_v61, %v9178_v32  ;;  %v9153_v1 = vmax.f32 %v9133_v8, 0.0 }
 0x7d5   : > { %9227 = vst.msk [vmem:[#allocation4 + $0x88] sm:$0xff] %vm9209_vm11, %v9206_v33  ;;  %v9181_v62 = vmul.f32 %v20768_v19, %v9154_v56  ;;  %v9265_v31 = vld [vmem:[#allocation4 + $0x61] ss:$2 sm:$0xff]  ;;  %v9243_v20 = vld [vmem:[#allocation4 + $0x60] ss:$2 sm:$0xff] }
 0x7d6   : > { %9226 = vst.msk [vmem:[#allocation4 + $0x80] sm:$0xff] %vm9209_vm11, %v9205_v22  ;;  %v9180_v24 = vmul.f32 %v20768_v19, %v9153_v1  ;;  %16002 = vmatprep.mubr.msk.f32.mxu0 %vm9209_vm11, %v9265_v31  ;;  %v14512_v19 = vld [vmem:[%s21744_s13 + $0x30] sm:$0xff]  ;;  %v9583_v5 = vld [vmem:[#allocation4 + $0x52] ss:$2 sm:$0xff]  ;;  %v9764_v48 = vld [vmem:[#allocation4 + $0x53] ss:$2 sm:$0xff] }
 0x7d7   : > { %v9208_v12 = vadd.f32 %v20774_v61, %v9181_v62  ;;  %v16507_v13 = vpack.c.bf16 %v14513_v25, %v14512_v19 }
 0x7d8   : > { %v9207_v60 = vadd.f32 %v20774_v61, %v9180_v24  ;;  %v9231_v61 = vld [vmem:[#allocation4] ss:$2 sm:$0xff] }
 0x7d9   : > { %9230 = vst.msk [vmem:[#allocation4 + $0x98] sm:$0x3] %vm9229_vm12, %v9208_v12  ;;  %v9267_v63 = vld [vmem:[#allocation4 + $0x71] ss:$2 sm:$0xff]  ;;  %v9245_v41 = vld [vmem:[#allocation4 + $0x70] ss:$2 sm:$0xff] }
 0x7da   : > { %9228 = vst.msk [vmem:[#allocation4 + $0x90] sm:$0xff] %vm9209_vm11, %v9207_v60  ;;  %16003 = vmatmul.mubr.msk.f32.gmra.mrb[188].mxu0 %vm9209_vm11, %v9267_v63  ;;  %v9585_v59 = vld [vmem:[#allocation4 + $0x62] ss:$2 sm:$0xff]  ;;  %v9766_v52 = vld [vmem:[#allocation4 + $0x63] ss:$2 sm:$0xff] }
 0x7dd   : > { %v9269_v51 = vld [vmem:[#allocation4 + $0x81] ss:$2 sm:$0xff]  ;;  %v9587_v53 = vld [vmem:[#allocation4 + $0x72] ss:$2 sm:$0xff] }
 0x7de   : > { %16005 = vmatprep.mubr.msk.f32.mxu0 %vm9209_vm11, %v9269_v51  ;;  %v9768_v58 = vld [vmem:[#allocation4 + $0x73] ss:$2 sm:$0xff] }
 0x7e1   : > { %v9271_v9 = vld [vmem:[#allocation4 + $0x91] ss:$2 sm:$0xf]  ;;  %v9249_v2 = vld [vmem:[#allocation4 + $0x90] ss:$2 sm:$0xf] }
 0x7e2   : > { %16006 = vmatmul.mubr.msk.f32.gmra.mrb[190].mxu0 %vm9209_vm11, %v9271_v9  ;;  %v9589_v44 = vld [vmem:[#allocation4 + $0x82] ss:$2 sm:$0xff]  ;;  %v9591_v36 = vld [vmem:[#allocation4 + $0x92] ss:$2 sm:$0xf] }
 0x7e3   : > { %16012 = vmatprep.mubr.msk.f32.mxu0 %vm9209_vm11, %v9231_v61  ;;  %v9770_v30 = vld [vmem:[#allocation4 + $0x83] ss:$2 sm:$0xff]  ;;  %v9772_v40 = vld [vmem:[#allocation4 + $0x93] ss:$2 sm:$0xf] }
 0x7e4   : > { %v10016_v61 = vld [vmem:[%s21748_s17] sm:$0xff] }
 0x7e6   : > { %16013 = vmatmul.mubr.msk.f32.vlgmr.msra.gmra.mrb[182].mxu0 %vm9209_vm11, %v9233_v49 }
 0x7e7   : > { %16506 = vmatpush3.bf16.msk.msra.mxu0 %vm20656_vm9, %v20813_v14  ;;  %16015 = vmatprep.mubr.msk.f32.mxu0 %vm9209_vm11, %v9235_v35  ;;  %v9247_v14 = vld [vmem:[#allocation4 + $0x80] ss:$2 sm:$0xff] }
 0x7e8   : > { %16509 = vmatprep.subr.msk.bf16.mxu0 %vm20656_vm9, %v16507_v13 }
 0x7ea   : > { %16016 = vmatmul.mubr.msk.f32.gmra.mrb[184].mxu0 %vm9209_vm11, %v9237_v21 }
 0x7eb   : > { %16018 = vmatprep.mubr.msk.f32.mxu0 %vm9209_vm11, %v9239_v57 }
 0x7ee   : > { %16019 = vmatmul.mubr.msk.f32.gmra.mrb[186].mxu0 %vm9209_vm11, %v9241_v15 }
 0x7ef   : > { %16021 = vmatprep.mubr.msk.f32.mxu0 %vm9209_vm11, %v9243_v20 }
 0x7f2   : > { %16022 = vmatmul.mubr.msk.f32.gmra.mrb[188].mxu0 %vm9209_vm11, %v9245_v41 }
 0x7f3   : > { %16024 = vmatprep.mubr.msk.f32.mxu0 %vm9209_vm11, %v9247_v14 }
 0x7f6   : > { %16025 = vmatmul.mubr.msk.f32.gmra.mrb[190].mxu0 %vm9209_vm11, %v9249_v2 }
 0x7f7   : > { %16031 = vmatprep.mubr.msk.f32.mxu0 %vm9209_vm11, %v9573_v3 }
 0x7fa   : > { %16032 = vmatmul.mubr.msk.f32.vlgmr.msra.gmra.mrb[182].mxu0 %vm9209_vm11, %v9575_v11 }
 0x7fb   : > { %16512 = vmatpush3.bf16.msk.msra.mxu0 %vm20656_vm9, %v16507_v13  ;;  %16034 = vmatprep.mubr.msk.f32.mxu0 %vm9209_vm11, %v9577_v0  ;;  %v10017_v13 = vld [vmem:[%s21748_s17 + $0x8] sm:$0xff] }
 0x7fc   : > { %16525 = vmatprep.subr.bf16.mxu0 %v16956_v42  ;;  %v16517_v14 = vpack.c.bf16 %v10017_v13, %v10016_v61 }
 0x7fe   : > { %16035 = vmatmul.mubr.msk.f32.gmra.mrb[184].mxu0 %vm9209_vm11, %v9579_v4 }
 0x7ff   : > { %16037 = vmatprep.mubr.msk.f32.mxu0 %vm9209_vm11, %v9581_v55 }
 0x802   : > { %16038 = vmatmul.mubr.msk.f32.gmra.mrb[186].mxu0 %vm9209_vm11, %v9583_v5 }
 0x803   : > { %16040 = vmatprep.mubr.msk.f32.mxu0 %vm9209_vm11, %v9585_v59 }
 0x806   : > { %16041 = vmatmul.mubr.msk.f32.gmra.mrb[188].mxu0 %vm9209_vm11, %v9587_v53 }
 0x807   : > { %16043 = vmatprep.mubr.msk.f32.mxu0 %vm9209_vm11, %v9589_v44 }
 0x80a   : > { %16044 = vmatmul.mubr.msk.f32.gmra.mrb[190].mxu0 %vm9209_vm11, %v9591_v36 }
 0x80b   : > { %16050 = vmatprep.mubr.msk.f32.mxu0 %vm9209_vm11, %v9754_v46 }
 0x80e   : > { %16051 = vmatmul.mubr.msk.f32.vlgmr.msra.gmra.mrb[182].mxu0 %vm9209_vm11, %v9756_v23 }
 0x80f   : > { %16053 = vmatprep.mubr.msk.f32.mxu0 %vm9209_vm11, %v9758_v45  ;;  %v10018_v45 = vld [vmem:[%s21748_s17 + $0x10] sm:$0xf] }
 0x812   : > { %16054 = vmatmul.mubr.msk.f32.gmra.mrb[184].mxu0 %vm9209_vm11, %v9760_v17 }
 0x813   : > { %16056 = vmatprep.mubr.msk.f32.mxu0 %vm9209_vm11, %v9762_v18 }
 0x816   : > { %16057 = vmatmul.mubr.msk.f32.gmra.mrb[186].mxu0 %vm9209_vm11, %v9764_v48 }
 0x817   : > { %16059 = vmatprep.mubr.msk.f32.mxu0 %vm9209_vm11, %v9766_v52 }
 0x81a   : > { %16060 = vmatmul.mubr.msk.f32.gmra.mrb[188].mxu0 %vm9209_vm11, %v9768_v58 }
 0x81b   : > { %16062 = vmatprep.mubr.msk.f32.mxu0 %vm9209_vm11, %v9770_v30 }
 0x81e   : > { %16063 = vmatmul.mubr.msk.f32.gmra.mrb[190].mxu0 %vm9209_vm11, %v9772_v40 }
 0x81f   : > { %16155 = vmatprep.mubr.msk.f32.mxu0 %vm16954_vm1, %v21804_v28 }
 0x8e1   : > { %v16052_v39 = vpop.f32.mrb[182].mxu0 }
 0x8e2   : > { %v9942_v38 = vadd.f32 %v16052_v39, %v14525_v47  ;;  %v9875_v50 = vpop.f32.mrb[183].mxu0  ;;  %v14544_v39 = vld [vmem:[%s21748_s17 + $0x38] sm:$0xff] }
 0x8e3   : > { %v9941_v10 = vadd.f32 %v14525_v47, %v9875_v50 }
 0x8e4   : > { %v9952_v6 = vmax.f32 %v9942_v38, 0.0 }
 0x8e5   : > { %v9951_v37 = vmax.f32 %v9941_v10, 0.0  ;;  %v16055_v7 = vpop.f32.mrb[184].mxu0  ;;  %v14545_v10 = vld [vmem:[%s21748_s17 + $0x40] sm:$0xf] }
 0x8e6   : > { %v9969_v26 = vmul.f32 %v20929_v29, %v9952_v6  ;;  %v9944_v43 = vadd.f32 %v16055_v7, %v14525_v47  ;;  %v9885_v34 = vpop.f32.mrb[185].mxu0  ;;  %v14552_v7 = vld [vmem:[%s21748_s17 + $0x48] sm:$0xff] }
 0x8e7   : > { %v9968_v27 = vmul.f32 %v20929_v29, %v9951_v37  ;;  %v9943_v32 = vadd.f32 %v14525_v47, %v9885_v34 }
 0x8e8   : > { %v9986_v8 = vadd.f32 %v20934_v16, %v9969_v26  ;;  %v9954_v33 = vmax.f32 %v9944_v43, 0.0  ;;  %v14553_v26 = vld [vmem:[%s21748_s17 + $0x50] sm:$0xff] }
 0x8e9   : > { %v9985_v56 = vadd.f32 %v20934_v16, %v9968_v27  ;;  %v9953_v22 = vmax.f32 %v9943_v32, 0.0  ;;  %v16058_v1 = vpop.f32.mrb[186].mxu0  ;;  %v16523_v34 = vpack.c.bf16 %v14553_v26, %v14552_v7  ;;  %v14554_v32 = vld [vmem:[%s21748_s17 + $0x58] sm:$0xf] }
 0x8ea   : > { %9997 = vst.msk [vmem:[#allocation5 + $0x8] sm:$0xff] %vm9995_vm13, %v9986_v8  ;;  %v9971_v62 = vmul.f32 %v20929_v29, %v9954_v33  ;;  %v9946_v31 = vadd.f32 %v16058_v1, %v14525_v47  ;;  %v9895_v24 = vpop.f32.mrb[187].mxu0 }
 0x8eb   : > { %9996 = vst.msk [vmem:[#allocation5] sm:$0xff] %vm9995_vm13, %v9985_v56  ;;  %v9970_v12 = vmul.f32 %v20929_v29, %v9953_v22  ;;  %v9945_v60 = vadd.f32 %v14525_v47, %v9895_v24 }
 0x8ec   : > { %v9988_v63 = vadd.f32 %v20934_v16, %v9971_v62  ;;  %v9956_v51 = vmax.f32 %v9946_v31, 0.0 }
 0x8ed   : > { %v9987_v9 = vadd.f32 %v20934_v16, %v9970_v12  ;;  %v9955_v19 = vmax.f32 %v9945_v60, 0.0  ;;  %v16061_v25 = vpop.f32.mrb[188].mxu0  ;;  %v10546_v60 = vld [vmem:[%s21752_s21] sm:$0xff] }
 0x8ee   : > { %9999 = vst.msk [vmem:[#allocation5 + $0x18] sm:$0xff] %vm9995_vm13, %v9988_v63  ;;  %v9973_v49 = vmul.f32 %v20929_v29, %v9956_v51  ;;  %v9948_v35 = vadd.f32 %v16061_v25, %v14525_v47  ;;  %v9905_v21 = vpop.f32.mrb[189].mxu0  ;;  %v10547_v63 = vld [vmem:[%s21752_s21 + $0x8] sm:$0xff] }
 0x8ef   : > { %9998 = vst.msk [vmem:[#allocation5 + $0x10] sm:$0xff] %vm9995_vm13, %v9987_v9  ;;  %v9972_v57 = vmul.f32 %v20929_v29, %v9955_v19  ;;  %v9947_v15 = vadd.f32 %v14525_v47, %v9905_v21  ;;  %v16526_v51 = vpack.c.bf16 %v10547_v63, %v10546_v60  ;;  %v10548_v9 = vld [vmem:[%s21752_s21 + $0x10] sm:$0xf] }
 0x8f0   : > { %v9990_v20 = vadd.f32 %v20934_v16, %v9973_v49  ;;  %v9958_v41 = vmax.f32 %v9948_v35, 0.0 }
 0x8f1   : > { %v9989_v2 = vadd.f32 %v20934_v16, %v9972_v57  ;;  %v9957_v3 = vmax.f32 %v9947_v15, 0.0  ;;  %v16064_v11 = vpop.f32.mrb[190].mxu0  ;;  %16527 = vmatpush3.bf16.msra.mxu0 %v16526_v51 }
 0x8f2   : > { %10001 = vst.msk [vmem:[#allocation5 + $0x28] sm:$0xff] %vm9995_vm13, %v9990_v20  ;;  %v9975_v0 = vmul.f32 %v20929_v29, %v9958_v41  ;;  %v9950_v4 = vadd.f32 %v16064_v11, %v14525_v47  ;;  %v9915_v55 = vpop.f32.mrb[191].mxu0  ;;  %v10020_v5 = vld [vmem:[#allocation5 + $0x1] ss:$2 sm:$0xff]  ;;  %16153 = vmatprep.subr.mxu0 %v21804_v28 }
 0x8f3   : > { %10000 = vst.msk [vmem:[#allocation5 + $0x20] sm:$0xff] %vm9995_vm13, %v9989_v2  ;;  %v9974_v59 = vmul.f32 %v20929_v29, %v9957_v3  ;;  %v9949_v53 = vadd.f32 %v14525_v47, %v9915_v55  ;;  %16072 = vmatmul.mubr.msk.f32.vlgmr.msra.gmra.mrb[228].mxu1 %vm9995_vm13, %v10020_v5  ;;  %v14543_v47 = vld [vmem:[%s21748_s17 + $0x30] sm:$0xff] }
 0x8f4   : > { %v9992_v44 = vadd.f32 %v20934_v16, %v9975_v0  ;;  %v9960_v36 = vmax.f32 %v9950_v4, 0.0  ;;  %16518 = vmatpush3.bf16.msra.mxu1 %v16517_v14  ;;  %16074 = vmatprep.mubr.msk.f32.mxu1 %vm16954_vm1, %v21804_v28  ;;  %v16520_v50 = vpack.c.bf16 %v14544_v39, %v14543_v47 }
 0x8f5   : > { %v9991_v46 = vadd.f32 %v20934_v16, %v9974_v59  ;;  %v9959_v23 = vmax.f32 %v9949_v53, 0.0  ;;  %16090 = vmatprep.subr.mxu1 %v21804_v28  ;;  %16154 = vmatpush3.msk.msra.mxu0 %vm10048_vm10, %v10548_v9 }
 0x8f6   : > { %10003 = vst.msk [vmem:[#allocation5 + $0x38] sm:$0xff] %vm9995_vm13, %v9992_v44  ;;  %v9977_v17 = vmul.f32 %v20929_v29, %v9960_v36  ;;  %v10022_v18 = vld [vmem:[#allocation5 + $0x11] ss:$2 sm:$0xff]  ;;  %v10009_v6 = vld [vmem:[#allocation5 + $0x10] ss:$2 sm:$0xff]  ;;  %16528 = vmatprep.subr.bf16.mxu0 %v16956_v42 }
 0x8f7   : > { %10002 = vst.msk [vmem:[#allocation5 + $0x30] sm:$0xff] %vm9995_vm13, %v9991_v46  ;;  %v9976_v48 = vmul.f32 %v20929_v29, %v9959_v23  ;;  %16075 = vmatmul.mubr.msk.f32.gmra.mrb[230].mxu1 %vm9995_vm13, %v10022_v18  ;;  %v10007_v29 = vld [vmem:[#allocation5] ss:$2 sm:$0xff]  ;;  %v10378_v1 = vld [vmem:[#allocation5 + $0x3] ss:$2 sm:$0xff] }
 0x8f8   : > { %v9994_v52 = vadd.f32 %v20934_v16, %v9977_v17  ;;  %16077 = vmatprep.mubr.msk.f32.mxu1 %vm16954_vm1, %v21804_v28  ;;  %16091 = vmatpush3.msk.msra.mxu1 %vm10048_vm10, %v10018_v45  ;;  %v10251_v27 = vld [vmem:[#allocation5 + $0x2] ss:$2 sm:$0xff] }
 0x8f9   : > { %v9993_v58 = vadd.f32 %v20934_v16, %v9976_v48  ;;  %16519 = vmatprep.subr.bf16.mxu1 %v16956_v42 }
 0x8fa   : > { %10006 = vst.msk [vmem:[#allocation5 + $0x48] sm:$0xf] %vm10005_vm14, %v9994_v52  ;;  %v10024_v30 = vld [vmem:[#allocation5 + $0x21] ss:$2 sm:$0xff]  ;;  %v10011_v16 = vld [vmem:[#allocation5 + $0x20] ss:$2 sm:$0xff] }
 0x8fb   : > { %10004 = vst.msk [vmem:[#allocation5 + $0x40] sm:$0xff] %vm9995_vm13, %v9993_v58  ;;  %16078 = vmatmul.mubr.msk.f32.gmra.mrb[232].mxu1 %vm9995_vm13, %v10024_v30  ;;  %v10253_v8 = vld [vmem:[#allocation5 + $0x12] ss:$2 sm:$0xff]  ;;  %v10380_v62 = vld [vmem:[#allocation5 + $0x13] ss:$2 sm:$0xff] }
 0x8fc   : > { %16080 = vmatprep.mubr.msk.f32.mxu1 %vm16954_vm1, %v21804_v28 }
 0x8fe   : > { %v10026_v40 = vld [vmem:[#allocation5 + $0x31] ss:$2 sm:$0xff]  ;;  %v10013_v37 = vld [vmem:[#allocation5 + $0x30] ss:$2 sm:$0xff] }
 0x8ff   : > { %16081 = vmatmul.mubr.msk.f32.gmra.mrb[234].mxu1 %vm9995_vm13, %v10026_v40  ;;  %v10255_v33 = vld [vmem:[#allocation5 + $0x22] ss:$2 sm:$0xff]  ;;  %v10382_v31 = vld [vmem:[#allocation5 + $0x23] ss:$2 sm:$0xff] }
 0x900   : > { %16083 = vmatprep.mubr.msk.f32.mxu1 %vm16954_vm1, %v21804_v28 }
 0x902   : > { %v10028_v38 = vld [vmem:[#allocation5 + $0x41] ss:$2 sm:$0x1f]  ;;  %v10015_v43 = vld [vmem:[#allocation5 + $0x40] ss:$2 sm:$0x1f] }
 0x903   : > { %16084 = vmatmul.mubr.msk.f32.gmra.mrb[236].mxu1 %vm9995_vm13, %v10028_v38  ;;  %v10257_v56 = vld [vmem:[#allocation5 + $0x32] ss:$2 sm:$0xff]  ;;  %v10259_v22 = vld [vmem:[#allocation5 + $0x42] ss:$2 sm:$0x1f] }
 0x904   : > { %16092 = vmatprep.mubr.msk.f32.mxu1 %vm16954_vm1, %v21804_v28  ;;  %v10384_v24 = vld [vmem:[#allocation5 + $0x33] ss:$2 sm:$0xff]  ;;  %v10386_v12 = vld [vmem:[#allocation5 + $0x43] ss:$2 sm:$0x1f] }
 0x907   : > { %16093 = vmatmul.mubr.msk.f32.vlgmr.msra.gmra.mrb[238].mxu1 %vm9995_vm13, %v10007_v29 }
 0x908   : > { %16521 = vmatpush3.bf16.msra.mxu1 %v16520_v50  ;;  %16095 = vmatprep.mubr.msk.f32.mxu1 %vm16954_vm1, %v21804_v28 }
 0x909   : > { %16111 = vmatprep.subr.mxu1 %v21804_v28 }
 0x90b   : > { %16096 = vmatmul.mubr.msk.f32.gmra.mrb[240].mxu1 %vm9995_vm13, %v10009_v6 }
 0x90c   : > { %16098 = vmatprep.mubr.msk.f32.mxu1 %vm16954_vm1, %v21804_v28  ;;  %16112 = vmatpush3.msk.msra.mxu1 %vm10048_vm10, %v14545_v10 }
 0x90d   : > { %16522 = vmatprep.subr.bf16.mxu1 %v16956_v42 }
 0x90f   : > { %16099 = vmatmul.mubr.msk.f32.gmra.mrb[242].mxu1 %vm9995_vm13, %v10011_v16 }
 0x910   : > { %16101 = vmatprep.mubr.msk.f32.mxu1 %vm16954_vm1, %v21804_v28 }
 0x913   : > { %16102 = vmatmul.mubr.msk.f32.gmra.mrb[244].mxu1 %vm9995_vm13, %v10013_v37  ;;  %v14561_v37 = vld [vmem:[%s21749_s18] ss:$0 sm:$0xff] }
 0x914   : > { %16104 = vmatprep.mubr.msk.f32.mxu1 %vm16954_vm1, %v21804_v28 }
 0x917   : > { %16105 = vmatmul.mubr.msk.f32.gmra.mrb[246].mxu1 %vm9995_vm13, %v10015_v43 }
 0x918   : > { %16113 = vmatprep.mubr.msk.f32.mxu1 %vm16954_vm1, %v21804_v28 }
 0x91b   : > { %16114 = vmatmul.mubr.msk.f32.vlgmr.msra.gmra.mrb[248].mxu1 %vm9995_vm13, %v10251_v27 }
 0x91c   : > { %16524 = vmatpush3.bf16.msra.mxu1 %v16523_v34  ;;  %16116 = vmatprep.mubr.msk.f32.mxu1 %vm16954_vm1, %v21804_v28  ;;  %v14562_v34 = vld [vmem:[%s21750_s19] ss:$0 sm:$0xff] }
 0x91d   : > { %16132 = vmatprep.subr.mxu1 %v21804_v28 }
 0x91f   : > { %16117 = vmatmul.mubr.msk.f32.gmra.mrb[250].mxu1 %vm9995_vm13, %v10253_v8 }
 0x920   : > { %16119 = vmatprep.mubr.msk.f32.mxu1 %vm16954_vm1, %v21804_v28  ;;  %16133 = vmatpush3.msk.msra.mxu1 %vm10048_vm10, %v14554_v32 }
 0x921   : > { %16636 = vmatprep.subr.bf16.mxu1 %v16956_v42 }
 0x923   : > { %16120 = vmatmul.mubr.msk.f32.gmra.mrb[252].mxu1 %vm9995_vm13, %v10255_v33 }
 0x924   : > { %16122 = vmatprep.mubr.msk.f32.mxu1 %vm16954_vm1, %v21804_v28 }
 0x927   : > { %16123 = vmatmul.mubr.msk.f32.gmra.mrb[254].mxu1 %vm9995_vm13, %v10257_v56  ;;  %v14566_v56 = vld [vmem:[%s21752_s21 + $0x18] sm:$0xff] }
 0x928   : > { %16125 = vmatprep.mubr.msk.f32.mxu1 %vm16954_vm1, %v21804_v28 }
 0x92b   : > { %16126 = vmatmul.mubr.msk.f32.gmra.mrb[0].mxu1 %vm9995_vm13, %v10259_v22  ;;  %v14567_v22 = vld [vmem:[%s21752_s21 + $0x20] sm:$0xff] }
 0x92c   : > { %16134 = vmatprep.mubr.msk.f32.mxu1 %vm16954_vm1, %v21804_v28 }
 0x92f   : > { %16135 = vmatmul.mubr.msk.f32.vlgmr.msra.gmra.mrb[2].mxu1 %vm9995_vm13, %v10378_v1  ;;  %v14563_v1 = vld [vmem:[%s21751_s20] ss:$0 sm:$0xff] }
 0x930   : > { %16137 = vmatprep.mubr.msk.f32.mxu1 %vm16954_vm1, %v21804_v28 }
 0x933   : > { %16138 = vmatmul.mubr.msk.f32.gmra.mrb[4].mxu1 %vm9995_vm13, %v10380_v62 }
 0x934   : > { %16140 = vmatprep.mubr.msk.f32.mxu1 %vm16954_vm1, %v21804_v28 }
 0x937   : > { %16141 = vmatmul.mubr.msk.f32.gmra.mrb[6].mxu1 %vm9995_vm13, %v10382_v31 }
 0x938   : > { %16143 = vmatprep.mubr.msk.f32.mxu1 %vm16954_vm1, %v21804_v28 }
 0x93b   : > { %16144 = vmatmul.mubr.msk.f32.gmra.mrb[8].mxu1 %vm9995_vm13, %v10384_v24 }
 0x93c   : > { %16146 = vmatprep.mubr.msk.f32.mxu1 %vm16954_vm1, %v21804_v28 }
 0x93f   : > { %16147 = vmatmul.mubr.msk.f32.gmra.mrb[10].mxu1 %vm9995_vm13, %v10386_v12  ;;  %v16529_v12 = vpack.c.bf16 %v14567_v22, %v14566_v56  ;;  %v14598_v56 = vld [vmem:[%s21752_s21 + $0xb8] sm:$0xf]  ;;  %v14601_v22 = vld [vmem:[%s21752_s21 + $0xc0] sm:$0xff] }
 0x940   : > { %16486 = vmatprep.mubr.msk.f32.mxu1 %vm16954_vm1, %v21804_v28 }
 0x9c6   : > { %v10118_v19 = vpop.f32.mrb[228].mxu1 }
 0x9c7   : > { %v16073_v25 = vpop.f32.mrb[229].mxu1 }
 0x9ca   : > { %v10123_v61 = vpop.f32.mrb[230].mxu1 }
 0x9cb   : > { %v16076_v13 = vpop.f32.mrb[231].mxu1 }
 0x9ce   : > { %v10128_v49 = vpop.f32.mrb[232].mxu1 }
 0x9cf   : > { %v16079_v35 = vpop.f32.mrb[233].mxu1 }
 0x9d2   : > { %v10133_v21 = vpop.f32.mrb[234].mxu1 }
 0x9d3   : > { %v16082_v57 = vpop.f32.mrb[235].mxu1 }
 0x9d4   : > { %v14568_v57 = vld [vmem:[%s21752_s21 + $0x28] sm:$0xf] }
 0x9d6   : > { %v10138_v15 = vpop.f32.mrb[236].mxu1 }
 0x9d7   : > { %v16085_v20 = vpop.f32.mrb[237].mxu1 }
 0x9d8   : > { %v14572_v20 = vld [vmem:[%s21752_s21 + $0x38] sm:$0xff] }
 0x9da   : > { %v10226_v41 = vpop.f32.mrb[238].mxu1 }
 0x9db   : > { %v10227_v14 = vadd.f32 %v10226_v41, %v10118_v19  ;;  %v16094_v2 = vpop.f32.mrb[239].mxu1 }
 0x9de   : > { %v10231_v3 = vpop.f32.mrb[240].mxu1 }
 0x9df   : > { %v10232_v11 = vadd.f32 %v10231_v3, %v10123_v61  ;;  %v16097_v0 = vpop.f32.mrb[241].mxu1 }
 0x9e2   : > { %v10236_v4 = vpop.f32.mrb[242].mxu1 }
 0x9e3   : > { %v10237_v55 = vadd.f32 %v10236_v4, %v10128_v49  ;;  %v16100_v5 = vpop.f32.mrb[243].mxu1 }
 0x9e6   : > { %v10241_v59 = vpop.f32.mrb[244].mxu1 }
 0x9e7   : > { %v10242_v53 = vadd.f32 %v10241_v59, %v10133_v21  ;;  %v16103_v44 = vpop.f32.mrb[245].mxu1 }
 0x9ea   : > { %v10246_v36 = vpop.f32.mrb[246].mxu1 }
 0x9eb   : > { %v10247_v46 = vadd.f32 %v10246_v36, %v10138_v15  ;;  %v16106_v23 = vpop.f32.mrb[247].mxu1  ;;  %v14571_v15 = vld [vmem:[%s21752_s21 + $0x30] sm:$0xff] }
 0x9ec   : > { %v16532_v3 = vpack.c.bf16 %v14572_v20, %v14571_v15  ;;  %v14576_v23 = vld [vmem:[%s21752_s21 + $0x48] sm:$0xff]  ;;  %v14618_v20 = vld [vmem:[%s21752_s21 + $0x118] sm:$0xf] }
 0x9ee   : > { %v10348_v45 = vpop.f32.mrb[248].mxu1 }
 0x9ef   : > { %v10372_v17 = vadd.f32 %v10348_v45, %v10227_v14  ;;  %v16115_v18 = vpop.f32.mrb[249].mxu1  ;;  %v14577_v45 = vld [vmem:[%s21752_s21 + $0x50] sm:$0xff] }
 0x9f0   : > { %v16535_v18 = vpack.c.bf16 %v14577_v45, %v14576_v23 }
 0x9f2   : > { %v10353_v48 = vpop.f32.mrb[250].mxu1 }
 0x9f3   : > { %v10373_v52 = vadd.f32 %v10353_v48, %v10232_v11  ;;  %v16118_v58 = vpop.f32.mrb[251].mxu1 }
 0x9f4   : > { %v14578_v58 = vld [vmem:[%s21752_s21 + $0x58] sm:$0xf] }
 0x9f6   : > { %v10358_v30 = vpop.f32.mrb[252].mxu1 }
 0x9f7   : > { %v10374_v40 = vadd.f32 %v10358_v30, %v10237_v55  ;;  %v16121_v47 = vpop.f32.mrb[253].mxu1  ;;  %v14581_v30 = vld [vmem:[%s21752_s21 + $0x60] sm:$0xff] }
 0x9fa   : > { %v10363_v39 = vpop.f32.mrb[254].mxu1 }
 0x9fb   : > { %v10375_v38 = vadd.f32 %v10363_v39, %v10242_v53  ;;  %v16124_v50 = vpop.f32.mrb[255].mxu1 }
 0x9fc   : > { %v14586_v50 = vld [vmem:[%s21752_s21 + $0x78] sm:$0xff] }
 0x9fe   : > { %v10368_v29 = vpop.f32.mrb[0].mxu1 }
 0x9ff   : > { %v10376_v10 = vadd.f32 %v10368_v29, %v10247_v46  ;;  %v16127_v6 = vpop.f32.mrb[1].mxu1  ;;  %v14573_v46 = vld [vmem:[%s21752_s21 + $0x40] sm:$0xf] }
 0xa00   : > { %v14587_v29 = vld [vmem:[%s21752_s21 + $0x80] sm:$0xff] }
 0xa02   : > { %v10475_v16 = vpop.f32.mrb[2].mxu1 }
 0xa03   : > { %v10499_v7 = vadd.f32 %v10475_v16, %v10372_v17  ;;  %v16136_v26 = vpop.f32.mrb[3].mxu1  ;;  %v14588_v16 = vld [vmem:[%s21752_s21 + $0x88] sm:$0xf] }
 0xa05   : > { %v10511_v43 = vadd.f32 %v14561_v37, %v10499_v7  ;;  %v14592_v7 = vld [vmem:[%s21752_s21 + $0x98] sm:$0xff] }
 0xa06   : > { %v10480_v27 = vpop.f32.mrb[4].mxu1 }
 0xa07   : > { %v10516_v32 = vmax.f32 %v10511_v43, 0.0  ;;  %v10500_v8 = vadd.f32 %v10480_v27, %v10373_v52  ;;  %v16139_v33 = vpop.f32.mrb[5].mxu1  ;;  %v14596_v27 = vld [vmem:[%s21752_s21 + $0xa8] sm:$0xff] }
 0xa09   : > { %v10528_v62 = vmul.f32 %v14562_v34, %v10516_v32  ;;  %v10512_v31 = vadd.f32 %v14561_v37, %v10500_v8  ;;  %v14597_v32 = vld [vmem:[%s21752_s21 + $0xb0] sm:$0xff] }
 0xa0a   : > { %v10485_v24 = vpop.f32.mrb[6].mxu1  ;;  %v16547_v8 = vpack.c.bf16 %v14597_v32, %v14596_v27  ;;  %v14656_v27 = vld [vmem:[%s21752_s21 + $0x1c8] sm:$0xff]  ;;  %v14657_v32 = vld [vmem:[%s21752_s21 + $0x1d0] sm:$0xff] }
 0xa0b   : > { %v21088_v60 = vadd.f32 %v14563_v1, %v10528_v62  ;;  %v10517_v63 = vmax.f32 %v10512_v31, 0.0  ;;  %v10501_v51 = vadd.f32 %v10485_v24, %v10374_v40  ;;  %v16142_v9 = vpop.f32.mrb[7].mxu1  ;;  %v14582_v40 = vld [vmem:[%s21752_s21 + $0x68] sm:$0xff]  ;;  %v14603_v24 = vld [vmem:[%s21752_s21 + $0xd0] sm:$0xf] }
 0xa0c   : > { %v16538_v47 = vpack.c.bf16 %v14582_v40, %v14581_v30  ;;  %v14611_v9 = vld [vmem:[%s21752_s21 + $0xf0] sm:$0xff]  ;;  %v14638_v40 = vld [vmem:[%s21752_s21 + $0x178] sm:$0xf] }
 0xa0d   : > { %v10529_v19 = vmul.f32 %v14562_v34, %v10517_v63  ;;  %v10513_v25 = vadd.f32 %v14561_v37, %v10501_v51  ;;  %16156 = vmatmul.mubr.msk.f32.vlgmr.msra.gmra.mrb[192].mxu0 %vm9995_vm13, %v21088_v60  ;;  %v10630_v5 = vrot.slane %v21088_v60, 1  ;;  %v10711_v52 = vrot.slane %v21088_v60, 2  ;;  %v14608_v51 = vld [vmem:[%s21752_s21 + $0xe8] sm:$0xf] }
 0xa0e   : > { %16530 = vmatpush3.bf16.msra.mxu0 %v16529_v12  ;;  %v10490_v61 = vpop.f32.mrb[8].mxu1  ;;  %16164 = vmatprep.mubr.msk.f32.mxu0 %vm16954_vm1, %v21804_v28  ;;  %v10792_v39 = vrot.slane %v21088_v60, 3  ;;  %v10873_v6 = vrot.slane %v21088_v60, 4  ;;  %v10954_v43 = vrot.slane %v21088_v60, 5  ;;  %v11035_v33 = vrot.slane %v21088_v60, 6  ;;  %v14606_v12 = vld [vmem:[%s21752_s21 + $0xd8] sm:$0xff] }
 0xa0f   : > { %v21094_v13 = vadd.f32 %v14563_v1, %v10529_v19  ;;  %v10518_v49 = vmax.f32 %v10513_v25, 0.0  ;;  %v10502_v35 = vadd.f32 %v10490_v61, %v10375_v38  ;;  %v16145_v21 = vpop.f32.mrb[9].mxu1  ;;  %16162 = vmatprep.subr.mxu0 %v21804_v28  ;;  %v14583_v38 = vld [vmem:[%s21752_s21 + $0x70] sm:$0xf]  ;;  %v11116_v31 = vrot.slane %v21088_v60, 7  ;;  %v14607_v60 = vld [vmem:[%s21752_s21 + $0xe0] sm:$0xff] }
 0xa10   : > { %v16553_v63 = vpack.c.bf16 %v14607_v60, %v14606_v12  ;;  %v14612_v19 = vld [vmem:[%s21752_s21 + $0xf8] sm:$0xff]  ;;  %v14617_v21 = vld [vmem:[%s21752_s21 + $0x110] sm:$0xff]  ;;  %v14667_v60 = vld [vmem:[%s21752_s21 + $0x200] sm:$0xff] }
 0xa11   : > { %v10530_v41 = vmul.f32 %v14562_v34, %v10518_v49  ;;  %v10514_v14 = vadd.f32 %v14561_v37, %v10502_v35  ;;  %v16556_v25 = vpack.c.bf16 %v14612_v19, %v14611_v9  ;;  %v11278_v61 = vrot.slane %v21094_v13, 1  ;;  %v14613_v49 = vld [vmem:[%s21752_s21 + $0x100] sm:$0xf]  ;;  %v14616_v35 = vld [vmem:[%s21752_s21 + $0x108] sm:$0xff]  ;;  %v14666_v12 = vld [vmem:[%s21752_s21 + $0x1f8] sm:$0xff] }
 0xa12   : > { %16163 = vmatpush3.msk.msra.mxu0 %vm10048_vm10, %v14568_v57  ;;  %v10495_v2 = vpop.f32.mrb[10].mxu1  ;;  %v16559_v57 = vpack.c.bf16 %v14617_v21, %v14616_v35  ;;  %v11359_v15 = vrot.slane %v21094_v13, 2  ;;  %v11602_v45 = vrot.slane %v21094_v13, 5  ;;  %v11683_v30 = vrot.slane %v21094_v13, 6  ;;  %v13543_v9 = vld [vmem:[%s21754_s23] sm:$0xff]  ;;  %v14672_v35 = vld [vmem:[%s21752_s21 + $0x218] sm:$0xff] }
 0xa13   : > { %v21107_v11 = vadd.f32 %v14563_v1, %v10530_v41  ;;  %v10519_v0 = vmax.f32 %v10514_v14, 0.0  ;;  %v10503_v4 = vadd.f32 %v10495_v2, %v10376_v10  ;;  %v16148_v55 = vpop.f32.mrb[11].mxu1  ;;  %16531 = vmatprep.subr.bf16.mxu0 %v16956_v42  ;;  %v16541_v10 = vpack.c.bf16 %v14587_v29, %v14586_v50  ;;  %v14621_v41 = vld [vmem:[%s21752_s21 + $0x120] sm:$0xff]  ;;  %v14622_v14 = vld [vmem:[%s21752_s21 + $0x128] sm:$0xff]  ;;  %v14643_v29 = vld [vmem:[%s21752_s21 + $0x190] sm:$0xf] }
 0xa14   : > { %v16562_v2 = vpack.c.bf16 %v14622_v14, %v14621_v41  ;;  %v14627_v55 = vld [vmem:[%s21752_s21 + $0x140] sm:$0xff]  ;;  %v11764_v50 = vrot.slane %v21094_v13, 7  ;;  %v13544_v19 = vld [vmem:[%s21754_s23 + $0x8] sm:$0x3] }
 0xa15   : > { %v10531_v59 = vmul.f32 %v14562_v34, %v10519_v0  ;;  %v10515_v53 = vadd.f32 %v14561_v37, %v10503_v4  ;;  %16165 = vmatmul.mubr.msk.f32.vlgmr.msra.gmra.mrb[192].mxu0 %vm9995_vm13, %v10630_v5  ;;  %v14591_v37 = vld [vmem:[%s21752_s21 + $0x90] sm:$0xff]  ;;  %v14626_v4 = vld [vmem:[%s21752_s21 + $0x138] sm:$0xff]  ;;  %v12331_v14 = vrot.slane %v21107_v11, 6 }
 0xa16   : > { %16533 = vmatpush3.bf16.msra.mxu0 %v16532_v3  ;;  %16173 = vmatprep.mubr.msk.f32.mxu0 %vm16954_vm1, %v21804_v28  ;;  %v16544_v26 = vpack.c.bf16 %v14592_v7, %v14591_v37  ;;  %v11440_v3 = vrot.slane %v21094_v13, 3  ;;  %v14623_v0 = vld [vmem:[%s21752_s21 + $0x130] sm:$0xf]  ;;  %v16565_v5 = vpack.c.bf16 %v14627_v55, %v14626_v4  ;;  %v14652_v7 = vld [vmem:[%s21752_s21 + $0x1b8] sm:$0xff]  ;;  %v12412_v55 = vrot.slane %v21107_v11, 7 }
 0xa17   : > { %v21114_v44 = vadd.f32 %v14563_v1, %v10531_v59  ;;  %v10520_v36 = vmax.f32 %v10515_v53, 0.0  ;;  %16171 = vmatprep.subr.mxu0 %v21804_v28  ;;  %v11521_v59 = vrot.slane %v21094_v13, 4  ;;  %v14628_v53 = vld [vmem:[%s21752_s21 + $0x148] sm:$0xf]  ;;  %v14651_v37 = vld [vmem:[%s21752_s21 + $0x1b0] sm:$0xff] }
 0xa19   : > { %v10532_v17 = vmul.f32 %v14562_v34, %v10520_v36  ;;  %v14593_v34 = vld [vmem:[%s21752_s21 + $0xa0] sm:$0xf]  ;;  %v14631_v36 = vld [vmem:[%s21752_s21 + $0x150] sm:$0xff] }
 0xa1a   : > { %16172 = vmatpush3.msk.msra.mxu0 %vm10048_vm10, %v14573_v46  ;;  %v14632_v46 = vld [vmem:[%s21752_s21 + $0x158] sm:$0xff] }
 0xa1b   : > { %v21127_v48 = vadd.f32 %v14563_v1, %v10532_v17  ;;  %16534 = vmatprep.subr.bf16.mxu0 %v16956_v42  ;;  %v14602_v1 = vld [vmem:[%s21752_s21 + $0xc8] sm:$0xff]  ;;  %v16568_v23 = vpack.c.bf16 %v14632_v46, %v14631_v36  ;;  %v14633_v17 = vld [vmem:[%s21752_s21 + $0x160] sm:$0xf]  ;;  %v14691_v46 = vld [vmem:[%s21752_s21 + $0x270] sm:$0xff] }
 0xa1c   : > { %v16550_v62 = vpack.c.bf16 %v14602_v1, %v14601_v22  ;;  %v14661_v22 = vld [vmem:[%s21752_s21 + $0x1e0] sm:$0xff]  ;;  %v14662_v1 = vld [vmem:[%s21752_s21 + $0x1e8] sm:$0xff] }
 0xa1d   : > { %16174 = vmatmul.mubr.msk.f32.vlgmr.msra.gmra.mrb[192].mxu0 %vm9995_vm13, %v10711_v52  ;;  %v14637_v52 = vld [vmem:[%s21752_s21 + $0x170] sm:$0xff]  ;;  %v14688_v36 = vld [vmem:[%s21752_s21 + $0x268] sm:$0xf] }
 0xa1e   : > { %16536 = vmatpush3.bf16.msra.mxu0 %v16535_v18  ;;  %16182 = vmatprep.mubr.msk.f32.mxu0 %vm16954_vm1, %v21804_v28  ;;  %v14636_v18 = vld [vmem:[%s21752_s21 + $0x168] sm:$0xff] }
 0xa1f   : > { %16180 = vmatprep.subr.mxu0 %v21804_v28 }
 0xa22   : > { %16181 = vmatpush3.msk.msra.mxu0 %vm10048_vm10, %v14578_v58  ;;  %v16571_v58 = vpack.c.bf16 %v14637_v52, %v14636_v18  ;;  %v14693_v18 = vld [vmem:[%s21752_s21 + $0x280] sm:$0xf]  ;;  %v14696_v52 = vld [vmem:[%s21752_s21 + $0x288] sm:$0xff] }
 0xa23   : > { %16537 = vmatprep.subr.bf16.mxu0 %v16956_v42 }
 0xa25   : > { %16183 = vmatmul.mubr.msk.f32.vlgmr.msra.gmra.mrb[192].mxu0 %vm9995_vm13, %v10792_v39  ;;  %v14642_v39 = vld [vmem:[%s21752_s21 + $0x188] sm:$0xff] }
 0xa26   : > { %16539 = vmatpush3.bf16.msra.mxu0 %v16538_v47  ;;  %16191 = vmatprep.mubr.msk.f32.mxu0 %vm16954_vm1, %v21804_v28  ;;  %v14641_v47 = vld [vmem:[%s21752_s21 + $0x180] sm:$0xff] }
 0xa27   : > { %16189 = vmatprep.subr.mxu0 %v21804_v28 }
 0xa2a   : > { %16190 = vmatpush3.msk.msra.mxu0 %vm10048_vm10, %v14583_v38  ;;  %v16574_v38 = vpack.c.bf16 %v14642_v39, %v14641_v47  ;;  %v14698_v47 = vld [vmem:[%s21752_s21 + $0x298] sm:$0xf]  ;;  %v14701_v39 = vld [vmem:[%s21752_s21 + $0x2a0] sm:$0xff] }
 0xa2b   : > { %16540 = vmatprep.subr.bf16.mxu0 %v16956_v42 }
 0xa2d   : > { %16192 = vmatmul.mubr.msk.f32.vlgmr.msra.gmra.mrb[192].mxu0 %vm9995_vm13, %v10873_v6 }
 0xa2e   : > { %16542 = vmatpush3.bf16.msra.mxu0 %v16541_v10  ;;  %16200 = vmatprep.mubr.msk.f32.mxu0 %vm16954_vm1, %v21804_v28  ;;  %v14646_v10 = vld [vmem:[%s21752_s21 + $0x198] sm:$0xff] }
 0xa2f   : > { %16198 = vmatprep.subr.mxu0 %v21804_v28 }
 0xa32   : > { %16199 = vmatpush3.msk.msra.mxu0 %vm10048_vm10, %v14588_v16  ;;  %v14648_v16 = vld [vmem:[%s21752_s21 + $0x1a8] sm:$0xf] }
 0xa33   : > { %16543 = vmatprep.subr.bf16.mxu0 %v16956_v42 }
 0xa35   : > { %16201 = vmatmul.mubr.msk.f32.vlgmr.msra.gmra.mrb[192].mxu0 %vm9995_vm13, %v10954_v43  ;;  %v11926_v43 = vrot.slane %v21107_v11, 1 }
 0xa36   : > { %16545 = vmatpush3.bf16.msra.mxu0 %v16544_v26  ;;  %16209 = vmatprep.mubr.msk.f32.mxu0 %vm16954_vm1, %v21804_v28  ;;  %v16580_v26 = vpack.c.bf16 %v14652_v7, %v14651_v37  ;;  %v12817_v37 = vrot.slane %v21114_v44, 4  ;;  %v14708_v7 = vld [vmem:[%s21752_s21 + $0x2c8] sm:$0xf] }
 0xa37   : > { %16207 = vmatprep.subr.mxu0 %v21804_v28 }
 0xa3a   : > { %16208 = vmatpush3.msk.msra.mxu0 %vm10048_vm10, %v14593_v34  ;;  %v14653_v34 = vld [vmem:[%s21752_s21 + $0x1c0] sm:$0xf] }
 0xa3b   : > { %16546 = vmatprep.subr.bf16.mxu0 %v16956_v42 }
 0xa3d   : > { %16210 = vmatmul.mubr.msk.f32.vlgmr.msra.gmra.mrb[192].mxu0 %vm9995_vm13, %v11035_v33  ;;  %v12007_v33 = vrot.slane %v21107_v11, 2 }
 0xa3e   : > { %16548 = vmatpush3.bf16.msra.mxu0 %v16547_v8  ;;  %16218 = vmatprep.mubr.msk.f32.mxu0 %vm16954_vm1, %v21804_v28  ;;  %v16583_v8 = vpack.c.bf16 %v14657_v32, %v14656_v27  ;;  %v12898_v27 = vrot.slane %v21114_v44, 5  ;;  %v14713_v32 = vld [vmem:[%s21752_s21 + $0x2e0] sm:$0xf] }
 0xa3f   : > { %16216 = vmatprep.subr.mxu0 %v21804_v28 }
 0xa42   : > { %16217 = vmatpush3.msk.msra.mxu0 %vm10048_vm10, %v14598_v56  ;;  %v14658_v56 = vld [vmem:[%s21752_s21 + $0x1d8] sm:$0xf] }
 0xa43   : > { %16549 = vmatprep.subr.bf16.mxu0 %v16956_v42 }
 0xa45   : > { %16219 = vmatmul.mubr.msk.f32.vlgmr.msra.gmra.mrb[192].mxu0 %vm9995_vm13, %v11116_v31  ;;  %v12088_v31 = vrot.slane %v21107_v11, 3 }
 0xa46   : > { %16551 = vmatpush3.bf16.msra.mxu0 %v16550_v62  ;;  %16227 = vmatprep.mubr.msk.f32.mxu0 %vm16954_vm1, %v21804_v28  ;;  %v16586_v62 = vpack.c.bf16 %v14662_v1, %v14661_v22  ;;  %v12979_v22 = vrot.slane %v21114_v44, 6  ;;  %v14718_v1 = vld [vmem:[%s21752_s21 + $0x2f8] sm:$0xf] }
 0xa47   : > { %16225 = vmatprep.subr.mxu0 %v21804_v28 }
 0xa4a   : > { %16226 = vmatpush3.msk.msra.mxu0 %vm10048_vm10, %v14603_v24  ;;  %v14663_v24 = vld [vmem:[%s21752_s21 + $0x1f0] sm:$0xf] }
 0xa4b   : > { %16552 = vmatprep.subr.bf16.mxu0 %v16956_v42 }
 0xa4d   : > { %16228 = vmatmul.mubr.msk.f32.vlgmr.msra.gmra.mrb[192].mxu0 %vm9995_vm13, %v21094_v13  ;;  %v14647_v13 = vld [vmem:[%s21752_s21 + $0x1a0] sm:$0xff] }
 0xa4e   : > { %16554 = vmatpush3.bf16.msra.mxu0 %v16553_v63  ;;  %16236 = vmatprep.mubr.msk.f32.mxu0 %vm16954_vm1, %v21804_v28  ;;  %v16577_v6 = vpack.c.bf16 %v14647_v13, %v14646_v10  ;;  %v16589_v63 = vpack.c.bf16 %v14667_v60, %v14666_v12  ;;  %v14703_v10 = vld [vmem:[%s21752_s21 + $0x2b0] sm:$0xf]  ;;  %v14706_v13 = vld [vmem:[%s21752_s21 + $0x2b8] sm:$0xff]  ;;  %v13060_v12 = vrot.slane %v21114_v44, 7 }
 0xa4f   : > { %16234 = vmatprep.subr.mxu0 %v21804_v28  ;;  %v14723_v60 = vld [vmem:[%s21752_s21 + $0x310] sm:$0xf] }
 0xa52   : > { %16235 = vmatpush3.msk.msra.mxu0 %vm10048_vm10, %v14608_v51  ;;  %v12169_v51 = vrot.slane %v21107_v11, 4 }
 0xa53   : > { %16555 = vmatprep.subr.bf16.mxu0 %v16956_v42 }
 0xa55   : > { %16237 = vmatmul.mubr.msk.f32.vlgmr.msra.gmra.mrb[192].mxu0 %vm9995_vm13, %v11278_v61  ;;  %v14668_v61 = vld [vmem:[%s21752_s21 + $0x208] sm:$0xf] }
 0xa56   : > { %16557 = vmatpush3.bf16.msra.mxu0 %v16556_v25  ;;  %16245 = vmatprep.mubr.msk.f32.mxu0 %vm16954_vm1, %v21804_v28  ;;  %v16637_v25 = vpack.c.bf16 %v13544_v19, %v13543_v9  ;;  %v14728_v9 = vld [vmem:[%s21752_s21 + $0x328] sm:$0xf]  ;;  %v14731_v19 = vld [vmem:[%s21752_s21 + $0x330] sm:$0xff] }
 0xa57   : > { %16243 = vmatprep.subr.mxu0 %v21804_v28 }
 0xa58   : > { %16639 = vmatpush3.bf16.msk.msra.mxu1 %vm20656_vm9, %v16637_v25  ;;  %v14732_v25 = vld [vmem:[%s21752_s21 + $0x338] sm:$0xff] }
 0xa5a   : > { %16244 = vmatpush3.msk.msra.mxu0 %vm10048_vm10, %v14613_v49  ;;  %v14671_v49 = vld [vmem:[%s21752_s21 + $0x210] sm:$0xff] }
 0xa5b   : > { %16558 = vmatprep.subr.bf16.mxu0 %v16956_v42  ;;  %v16592_v21 = vpack.c.bf16 %v14672_v35, %v14671_v49  ;;  %v13222_v49 = vrot.slane %v21127_v48, 1  ;;  %v14733_v35 = vld [vmem:[%s21752_s21 + $0x340] sm:$0xf] }
 0xa5d   : > { %16246 = vmatmul.mubr.msk.f32.vlgmr.msra.gmra.mrb[192].mxu0 %vm9995_vm13, %v11359_v15  ;;  %v14676_v15 = vld [vmem:[%s21752_s21 + $0x228] sm:$0xff] }
 0xa5e   : > { %16560 = vmatpush3.bf16.msra.mxu0 %v16559_v57  ;;  %16254 = vmatprep.mubr.msk.f32.mxu0 %vm16954_vm1, %v21804_v28  ;;  %v12250_v57 = vrot.slane %v21107_v11, 5 }
 0xa5f   : > { %16252 = vmatprep.subr.mxu0 %v21804_v28 }
 0xa62   : > { %16253 = vmatpush3.msk.msra.mxu0 %vm10048_vm10, %v14618_v20  ;;  %v14677_v20 = vld [vmem:[%s21752_s21 + $0x230] sm:$0xff] }
 0xa63   : > { %16561 = vmatprep.subr.bf16.mxu0 %v16956_v42  ;;  %v16595_v41 = vpack.c.bf16 %v14677_v20, %v14676_v15  ;;  %v13303_v15 = vrot.slane %v21127_v48, 2  ;;  %v14738_v20 = vld [vmem:[%s21752_s21 + $0x358] sm:$0xf] }
 0xa65   : > { %16255 = vmatmul.mubr.msk.f32.vlgmr.msra.gmra.mrb[192].mxu0 %vm9995_vm13, %v11440_v3  ;;  %v14681_v3 = vld [vmem:[%s21752_s21 + $0x240] sm:$0xff] }
 0xa66   : > { %16563 = vmatpush3.bf16.msra.mxu0 %v16562_v2  ;;  %16263 = vmatprep.mubr.msk.f32.mxu0 %vm16954_vm1, %v21804_v28  ;;  %v14678_v2 = vld [vmem:[%s21752_s21 + $0x238] sm:$0xf] }
 0xa67   : > { %16261 = vmatprep.subr.mxu0 %v21804_v28 }
 0xa6a   : > { %16262 = vmatpush3.msk.msra.mxu0 %vm10048_vm10, %v14623_v0  ;;  %v14682_v0 = vld [vmem:[%s21752_s21 + $0x248] sm:$0xff] }
 0xa6b   : > { %16564 = vmatprep.subr.bf16.mxu0 %v16956_v42  ;;  %v16598_v4 = vpack.c.bf16 %v14682_v0, %v14681_v3  ;;  %v13384_v3 = vrot.slane %v21127_v48, 3  ;;  %v14743_v0 = vld [vmem:[%s21752_s21 + $0x370] sm:$0xf] }
 0xa6d   : > { %16264 = vmatmul.mubr.msk.f32.vlgmr.msra.gmra.mrb[192].mxu0 %vm9995_vm13, %v11521_v59  ;;  %v14686_v59 = vld [vmem:[%s21752_s21 + $0x258] sm:$0xff] }
 0xa6e   : > { %16566 = vmatpush3.bf16.msra.mxu0 %v16565_v5  ;;  %16272 = vmatprep.mubr.msk.f32.mxu0 %vm16954_vm1, %v21804_v28  ;;  %v14683_v5 = vld [vmem:[%s21752_s21 + $0x250] sm:$0xf] }
 0xa6f   : > { %16270 = vmatprep.subr.mxu0 %v21804_v28 }
 0xa72   : > { %16271 = vmatpush3.msk.msra.mxu0 %vm10048_vm10, %v14628_v53 }
 0xa73   : > { %16567 = vmatprep.subr.bf16.mxu0 %v16956_v42 }
 0xa75   : > { %16273 = vmatmul.mubr.msk.f32.vlgmr.msra.gmra.mrb[192].mxu0 %vm9995_vm13, %v11602_v45 }
 0xa76   : > { %16569 = vmatpush3.bf16.msra.mxu0 %v16568_v23  ;;  %16281 = vmatprep.mubr.msk.f32.mxu0 %vm16954_vm1, %v21804_v28  ;;  %v14692_v23 = vld [vmem:[%s21752_s21 + $0x278] sm:$0xff] }
 0xa77   : > { %16279 = vmatprep.subr.mxu0 %v21804_v28  ;;  %v16604_v45 = vpack.c.bf16 %v14692_v23, %v14691_v46 }
 0xa7a   : > { %16280 = vmatpush3.msk.msra.mxu0 %vm10048_vm10, %v14633_v17  ;;  %v12574_v17 = vrot.slane %v21114_v44, 1 }
 0xa7b   : > { %16570 = vmatprep.subr.bf16.mxu0 %v16956_v42 }
 0xa7d   : > { %16282 = vmatmul.mubr.msk.f32.vlgmr.msra.gmra.mrb[192].mxu0 %vm9995_vm13, %v11683_v30 }
 0xa7e   : > { %16572 = vmatpush3.bf16.msra.mxu0 %v16571_v58  ;;  %16290 = vmatprep.mubr.msk.f32.mxu0 %vm16954_vm1, %v21804_v28  ;;  %v14697_v58 = vld [vmem:[%s21752_s21 + $0x290] sm:$0xff] }
 0xa7f   : > { %16288 = vmatprep.subr.mxu0 %v21804_v28  ;;  %v16607_v30 = vpack.c.bf16 %v14697_v58, %v14696_v52 }
 0xa82   : > { %16289 = vmatpush3.msk.msra.mxu0 %vm10048_vm10, %v14638_v40  ;;  %v12655_v40 = vrot.slane %v21114_v44, 2 }
 0xa83   : > { %16573 = vmatprep.subr.bf16.mxu0 %v16956_v42 }
 0xa85   : > { %16291 = vmatmul.mubr.msk.f32.vlgmr.msra.gmra.mrb[192].mxu0 %vm9995_vm13, %v11764_v50 }
 0xa86   : > { %16575 = vmatpush3.bf16.msra.mxu0 %v16574_v38  ;;  %16299 = vmatprep.mubr.msk.f32.mxu0 %vm16954_vm1, %v21804_v28  ;;  %v14702_v38 = vld [vmem:[%s21752_s21 + $0x2a8] sm:$0xff] }
 0xa87   : > { %16297 = vmatprep.subr.mxu0 %v21804_v28  ;;  %v16610_v50 = vpack.c.bf16 %v14702_v38, %v14701_v39 }
 0xa8a   : > { %16298 = vmatpush3.msk.msra.mxu0 %vm10048_vm10, %v14643_v29  ;;  %v12736_v29 = vrot.slane %v21114_v44, 3 }
 0xa8b   : > { %16576 = vmatprep.subr.bf16.mxu0 %v16956_v42 }
 0xa8d   : > { %16300 = vmatmul.mubr.msk.f32.vlgmr.msra.gmra.mrb[192].mxu0 %vm9995_vm13, %v21107_v11  ;;  %v14687_v11 = vld [vmem:[%s21752_s21 + $0x260] sm:$0xff] }
 0xa8e   : > { %16578 = vmatpush3.bf16.msra.mxu0 %v16577_v6  ;;  %16308 = vmatprep.mubr.msk.f32.mxu0 %vm16954_vm1, %v21804_v28  ;;  %v16601_v53 = vpack.c.bf16 %v14687_v11, %v14686_v59  ;;  %v14707_v6 = vld [vmem:[%s21752_s21 + $0x2c0] sm:$0xff] }
 0xa8f   : > { %16306 = vmatprep.subr.mxu0 %v21804_v28 }
 0xa92   : > { %16307 = vmatpush3.msk.msra.mxu0 %vm10048_vm10, %v14648_v16  ;;  %v16613_v16 = vpack.c.bf16 %v14707_v6, %v14706_v13 }
 0xa93   : > { %16579 = vmatprep.subr.bf16.mxu0 %v16956_v42 }
 0xa95   : > { %16309 = vmatmul.mubr.msk.f32.vlgmr.msra.gmra.mrb[192].mxu0 %vm9995_vm13, %v11926_v43  ;;  %v14712_v43 = vld [vmem:[%s21752_s21 + $0x2d8] sm:$0xff] }
 0xa96   : > { %16581 = vmatpush3.bf16.msra.mxu0 %v16580_v26  ;;  %16317 = vmatprep.mubr.msk.f32.mxu0 %vm16954_vm1, %v21804_v28  ;;  %v14711_v26 = vld [vmem:[%s21752_s21 + $0x2d0] sm:$0xff] }
 0xa97   : > { %16315 = vmatprep.subr.mxu0 %v21804_v28 }
 0xa9a   : > { %16316 = vmatpush3.msk.msra.mxu0 %vm10048_vm10, %v14653_v34  ;;  %v16616_v34 = vpack.c.bf16 %v14712_v43, %v14711_v26 }
 0xa9b   : > { %16582 = vmatprep.subr.bf16.mxu0 %v16956_v42 }
 0xa9d   : > { %16318 = vmatmul.mubr.msk.f32.vlgmr.msra.gmra.mrb[192].mxu0 %vm9995_vm13, %v12007_v33  ;;  %v14717_v33 = vld [vmem:[%s21752_s21 + $0x2f0] sm:$0xff] }
 0xa9e   : > { %16584 = vmatpush3.bf16.msra.mxu0 %v16583_v8  ;;  %16326 = vmatprep.mubr.msk.f32.mxu0 %vm16954_vm1, %v21804_v28  ;;  %v14716_v8 = vld [vmem:[%s21752_s21 + $0x2e8] sm:$0xff] }
 0xa9f   : > { %16324 = vmatprep.subr.mxu0 %v21804_v28 }
 0xaa2   : > { %16325 = vmatpush3.msk.msra.mxu0 %vm10048_vm10, %v14658_v56  ;;  %v16619_v56 = vpack.c.bf16 %v14717_v33, %v14716_v8 }
 0xaa3   : > { %16585 = vmatprep.subr.bf16.mxu0 %v16956_v42 }
 0xaa5   : > { %16327 = vmatmul.mubr.msk.f32.vlgmr.msra.gmra.mrb[192].mxu0 %vm9995_vm13, %v12088_v31  ;;  %v14722_v31 = vld [vmem:[%s21752_s21 + $0x308] sm:$0xff] }
 0xaa6   : > { %16587 = vmatpush3.bf16.msra.mxu0 %v16586_v62  ;;  %16335 = vmatprep.mubr.msk.f32.mxu0 %vm16954_vm1, %v21804_v28  ;;  %v14721_v62 = vld [vmem:[%s21752_s21 + $0x300] sm:$0xff] }
 0xaa7   : > { %16333 = vmatprep.subr.mxu0 %v21804_v28 }
 0xaaa   : > { %16334 = vmatpush3.msk.msra.mxu0 %vm10048_vm10, %v14663_v24  ;;  %v16622_v24 = vpack.c.bf16 %v14722_v31, %v14721_v62 }
 0xaab   : > { %16588 = vmatprep.subr.bf16.mxu0 %v16956_v42 }
 0xaad   : > { %16336 = vmatmul.mubr.msk.f32.vlgmr.msra.gmra.mrb[192].mxu0 %vm9995_vm13, %v12169_v51 }
 0xaae   : > { %16590 = vmatpush3.bf16.msra.mxu0 %v16589_v63  ;;  %16344 = vmatprep.mubr.msk.f32.mxu0 %vm16954_vm1, %v21804_v28  ;;  %v14726_v63 = vld [vmem:[%s21752_s21 + $0x318] sm:$0xff] }
 0xaaf   : > { %16342 = vmatprep.subr.mxu0 %v21804_v28 }
 0xab2   : > { %16343 = vmatpush3.msk.msra.mxu0 %vm10048_vm10, %v14668_v61  ;;  %v16628_v61 = vpack.c.bf16 %v14732_v25, %v14731_v19 }
 0xab3   : > { %16591 = vmatprep.subr.bf16.mxu0 %v16956_v42 }
 0xab5   : > { %16345 = vmatmul.mubr.msk.f32.vlgmr.msra.gmra.mrb[192].mxu0 %vm9995_vm13, %v12250_v57  ;;  %v14737_v57 = vld [vmem:[%s21752_s21 + $0x350] sm:$0xff] }
 0xab6   : > { %16593 = vmatpush3.bf16.msra.mxu0 %v16592_v21  ;;  %16353 = vmatprep.mubr.msk.f32.mxu0 %vm16954_vm1, %v21804_v28  ;;  %v14736_v21 = vld [vmem:[%s21752_s21 + $0x348] sm:$0xff] }
 0xab7   : > { %16351 = vmatprep.subr.mxu0 %v21804_v28 }
 0xaba   : > { %16352 = vmatpush3.msk.msra.mxu0 %vm10048_vm10, %v14673_v54  ;;  %v16631_v54 = vpack.c.bf16 %v14737_v57, %v14736_v21 }
 0xabb   : > { %16594 = vmatprep.subr.bf16.mxu0 %v16956_v42 }
 0xabd   : > { %16354 = vmatmul.mubr.msk.f32.vlgmr.msra.gmra.mrb[192].mxu0 %vm9995_vm13, %v12331_v14  ;;  %v14742_v14 = vld [vmem:[%s21752_s21 + $0x368] sm:$0xff] }
 0xabe   : > { %16596 = vmatpush3.bf16.msra.mxu0 %v16595_v41  ;;  %16362 = vmatprep.mubr.msk.f32.mxu0 %vm16954_vm1, %v21804_v28  ;;  %v14741_v41 = vld [vmem:[%s21752_s21 + $0x360] sm:$0xff] }
 0xabf   : > { %16360 = vmatprep.subr.mxu0 %v21804_v28 }
 0xac2   : > { %16361 = vmatpush3.msk.msra.mxu0 %vm10048_vm10, %v14678_v2  ;;  %v16634_v2 = vpack.c.bf16 %v14742_v14, %v14741_v41 }
 0xac3   : > { %16597 = vmatprep.subr.bf16.mxu0 %v16956_v42 }
 0xac5   : > { %16363 = vmatmul.mubr.msk.f32.vlgmr.msra.gmra.mrb[192].mxu0 %vm9995_vm13, %v12412_v55 }
 0xac6   : > { %16599 = vmatpush3.bf16.msra.mxu0 %v16598_v4  ;;  %16371 = vmatprep.mubr.msk.f32.mxu0 %vm16954_vm1, %v21804_v28  ;;  %v10545_v4 = vld [vmem:[%s21753_s22] sm:$0x1] }
 0xac7   : > { %16369 = vmatprep.subr.mxu0 %v21804_v28 }
 0xaca   : > { %16370 = vmatpush3.msk.msra.mxu0 %vm10048_vm10, %v14683_v5 }
 0xacb   : > { %16600 = vmatprep.subr.bf16.mxu0 %v16956_v42 }
 0xacd   : > { %16372 = vmatmul.mubr.msk.f32.vlgmr.msra.gmra.mrb[192].mxu0 %vm9995_vm13, %v21114_v44  ;;  %v14727_v44 = vld [vmem:[%s21752_s21 + $0x320] sm:$0xff] }
 0xace   : > { %16602 = vmatpush3.bf16.msra.mxu0 %v16601_v53  ;;  %16380 = vmatprep.mubr.msk.f32.mxu0 %vm16954_vm1, %v21804_v28  ;;  %v16625_v51 = vpack.c.bf16 %v14727_v44, %v14726_v63 }
 0xacf   : > { %16378 = vmatprep.subr.mxu0 %v21804_v28 }
 0xad2   : > { %16379 = vmatpush3.msk.msra.mxu0 %vm10048_vm10, %v14688_v36 }
 0xad3   : > { %16603 = vmatprep.subr.bf16.mxu0 %v16956_v42 }
 0xad5   : > { %16381 = vmatmul.mubr.msk.f32.vlgmr.msra.gmra.mrb[192].mxu0 %vm9995_vm13, %v12574_v17 }
 0xad6   : > { %16605 = vmatpush3.bf16.msra.mxu0 %v16604_v45  ;;  %16389 = vmatprep.mubr.msk.f32.mxu0 %vm16954_vm1, %v21804_v28 }
 0xad7   : > { %16387 = vmatprep.subr.mxu0 %v21804_v28 }
 0xada   : > { %16388 = vmatpush3.msk.msra.mxu0 %vm10048_vm10, %v14693_v18 }
 0xadb   : > { %16606 = vmatprep.subr.bf16.mxu0 %v16956_v42 }
 0xadd   : > { %16390 = vmatmul.mubr.msk.f32.vlgmr.msra.gmra.mrb[192].mxu0 %vm9995_vm13, %v12655_v40 }
 0xade   : > { %16608 = vmatpush3.bf16.msra.mxu0 %v16607_v30  ;;  %16398 = vmatprep.mubr.msk.f32.mxu0 %vm16954_vm1, %v21804_v28 }
 0xadf   : > { %16396 = vmatprep.subr.mxu0 %v21804_v28 }
 0xae2   : > { %16397 = vmatpush3.msk.msra.mxu0 %vm10048_vm10, %v14698_v47 }
 0xae3   : > { %16609 = vmatprep.subr.bf16.mxu0 %v16956_v42 }
 0xae5   : > { %16399 = vmatmul.mubr.msk.f32.vlgmr.msra.gmra.mrb[192].mxu0 %vm9995_vm13, %v12736_v29 }
 0xae6   : > { %16611 = vmatpush3.bf16.msra.mxu0 %v16610_v50  ;;  %16407 = vmatprep.mubr.msk.f32.mxu0 %vm16954_vm1, %v21804_v28 }
 0xae7   : > { %16405 = vmatprep.subr.mxu0 %v21804_v28 }
 0xaea   : > { %16406 = vmatpush3.msk.msra.mxu0 %vm10048_vm10, %v14703_v10 }
 0xaeb   : > { %16612 = vmatprep.subr.bf16.mxu0 %v16956_v42 }
 0xaed   : > { %16408 = vmatmul.mubr.msk.f32.vlgmr.msra.gmra.mrb[192].mxu0 %vm9995_vm13, %v12817_v37 }
 0xaee   : > { %16614 = vmatpush3.bf16.msra.mxu0 %v16613_v16  ;;  %16416 = vmatprep.mubr.msk.f32.mxu0 %vm16954_vm1, %v21804_v28 }
 0xaef   : > { %16414 = vmatprep.subr.mxu0 %v21804_v28 }
 0xaf2   : > { %16415 = vmatpush3.msk.msra.mxu0 %vm10048_vm10, %v14708_v7 }
 0xaf3   : > { %16615 = vmatprep.subr.bf16.mxu0 %v16956_v42 }
 0xaf5   : > { %16417 = vmatmul.mubr.msk.f32.vlgmr.msra.gmra.mrb[192].mxu0 %vm9995_vm13, %v12898_v27 }
 0xaf6   : > { %16617 = vmatpush3.bf16.msra.mxu0 %v16616_v34  ;;  %16425 = vmatprep.mubr.msk.f32.mxu0 %vm16954_vm1, %v21804_v28 }
 0xaf7   : > { %16423 = vmatprep.subr.mxu0 %v21804_v28 }
 0xafa   : > { %16424 = vmatpush3.msk.msra.mxu0 %vm10048_vm10, %v14713_v32 }
 0xafb   : > { %16618 = vmatprep.subr.bf16.mxu0 %v16956_v42 }
 0xafd   : > { %16426 = vmatmul.mubr.msk.f32.vlgmr.msra.gmra.mrb[192].mxu0 %vm9995_vm13, %v12979_v22 }
 0xafe   : > { %16620 = vmatpush3.bf16.msra.mxu0 %v16619_v56  ;;  %16434 = vmatprep.mubr.msk.f32.mxu0 %vm16954_vm1, %v21804_v28 }
 0xaff   : > { %16432 = vmatprep.subr.mxu0 %v21804_v28 }
 0xb02   : > { %16433 = vmatpush3.msk.msra.mxu0 %vm10048_vm10, %v14718_v1 }
 0xb03   : > { %16621 = vmatprep.subr.bf16.mxu0 %v16956_v42 }
 0xb05   : > { %16435 = vmatmul.mubr.msk.f32.vlgmr.msra.gmra.mrb[192].mxu0 %vm9995_vm13, %v13060_v12 }
 0xb06   : > { %16623 = vmatpush3.bf16.msra.mxu0 %v16622_v24  ;;  %16443 = vmatprep.mubr.msk.f32.mxu0 %vm16954_vm1, %v21804_v28 }
 0xb07   : > { %16441 = vmatprep.subr.mxu0 %v21804_v28 }
 0xb0a   : > { %16442 = vmatpush3.msk.msra.mxu0 %vm10048_vm10, %v14723_v60 }
 0xb0b   : > { %16624 = vmatprep.subr.bf16.mxu0 %v16956_v42 }
 0xb0d   : > { %16444 = vmatmul.mubr.msk.f32.vlgmr.msra.gmra.mrb[192].mxu0 %vm9995_vm13, %v21127_v48 }
 0xb0e   : > { %16626 = vmatpush3.bf16.msra.mxu0 %v16625_v51  ;;  %16452 = vmatprep.mubr.msk.f32.mxu0 %vm16954_vm1, %v21804_v28 }
 0xb0f   : > { %16450 = vmatprep.subr.mxu0 %v21804_v28 }
 0xb12   : > { %16451 = vmatpush3.msk.msra.mxu0 %vm10048_vm10, %v14728_v9 }
 0xb13   : > { %16627 = vmatprep.subr.bf16.mxu0 %v16956_v42 }
 0xb15   : > { %16453 = vmatmul.mubr.msk.f32.vlgmr.msra.gmra.mrb[192].mxu0 %vm9995_vm13, %v13222_v49 }
 0xb16   : > { %16629 = vmatpush3.bf16.msra.mxu0 %v16628_v61  ;;  %16461 = vmatprep.mubr.msk.f32.mxu0 %vm16954_vm1, %v21804_v28 }
 0xb17   : > { %16459 = vmatprep.subr.mxu0 %v21804_v28 }
 0xb1a   : > { %16460 = vmatpush3.msk.msra.mxu0 %vm10048_vm10, %v14733_v35 }
 0xb1b   : > { %16630 = vmatprep.subr.bf16.mxu0 %v16956_v42 }
 0xb1d   : > { %16462 = vmatmul.mubr.msk.f32.vlgmr.msra.gmra.mrb[192].mxu0 %vm9995_vm13, %v13303_v15 }
 0xb1e   : > { %16632 = vmatpush3.bf16.msra.mxu0 %v16631_v54  ;;  %16470 = vmatprep.mubr.msk.f32.mxu0 %vm16954_vm1, %v21804_v28 }
 0xb1f   : > { %16468 = vmatprep.subr.mxu0 %v21804_v28 }
 0xb22   : > { %16469 = vmatpush3.msk.msra.mxu0 %vm10048_vm10, %v14738_v20 }
 0xb23   : > { %16633 = vmatprep.subr.bf16.mxu0 %v16956_v42  ;;  %v13465_v42 = vrot.slane %v21127_v48, 4 }
 0xb25   : > { %16471 = vmatmul.mubr.msk.f32.vlgmr.msra.gmra.mrb[192].mxu0 %vm9995_vm13, %v13384_v3 }
 0xb26   : > { %16635 = vmatpush3.bf16.msra.mxu0 %v16634_v2  ;;  %16479 = vmatprep.mubr.msk.f32.mxu0 %vm16954_vm1, %v21804_v28 }
 0xb27   : > { %16477 = vmatprep.subr.mxu0 %v21804_v28  ;;  %v13545_v28 = vld [vmem:[%s21755_s24] sm:$0x1] }
 0xb2a   : > { %16478 = vmatpush3.msk.msra.mxu0 %vm10048_vm10, %v14743_v0 }
 0xb2d   : > { %16480 = vmatmul.mubr.msk.f32.vlgmr.msra.gmra.mrb[192].mxu0 %vm9995_vm13, %v13465_v42 }
 0xc00   : > { %v13537_v55 = vpop.f32.mrb[192].mxu0 }
 0xc01   : > { %v16642_v5 = vadd.f32 %v13537_v55, %v10545_v4  ;;  %v16481_v59 = vpop.f32.mrb[193].mxu0 }
 0xc03   : > { %v13542_v11 = vmax.f32 %v16642_v5, 0.0 }
 0xc05   : > { %16487 = vmatmul.mubr.msk.f32.vlgmr.msra.gmra.mrb[12].mxu1 %vm9209_vm11, %v13542_v11 }
 0xcd8   : > { %v13618_v48 = vpop.f32.mrb[12].mxu1 }
 0xcd9   : > { %v13619_v53 = vadd.f32 %v13618_v48, %v13545_v28  ;;  %v16488_v36 = vpop.f32.mrb[13].mxu1 }
 0xcdb   : > { %13623 = vst.msk [vmem:[%s756_s8] sm:$0x1] %vm13622_vm15, %v13619_v53 }
 0xcdc   : > { %16901 = shalt.err (!%p16898_p3)
}
 0xcdd   : > { %s16902_s0 = scalar_lea.hbm %s21689_s10, 16  ;;  %s16906_s3 = scalar_lea.hbm %s21756_s25, 32 }
 0xcde   : > { %p16903_p4 = scmp.ne.s32.totalorder %s21689_s10, %s16902_s0  ;;  %p16907_p9 = scmp.lt.u32.totalorder %s21689_s10, %s21756_s25 }
 0xcdf   : > { %p16908_p10 = scmp.lt.u32.totalorder %s16906_s3, %s16902_s0  ;;  %p16910_p12 = scmp.lt.u32.totalorder %s16902_s0, %s21689_s10 }
 0xce0   : > { %p16904_p7 = pnand %p16903_p4, %p17126_p5 }
 0xce1   : > { %p16909_p11 = por %p16908_p10, %p16907_p9 }
 0xce2   : > { %p16905_p8 = pneg %p16904_p7 }
 0xce3   : > { %p16911_p13 = por %p16910_p12, %p16909_p11 }
 0xce5   : > { %p16912_p0 = pnand %p16911_p13, %p16905_p8 }
 0xce7   : > { %16915 = shalt.err (!%p16912_p0)
}
 0xce8   : > { %16806 = dma.vmem_to_hbm [thread:$0]  (%p17126_p5), %s21691_s5, 16, %s21689_s10, %s13625_s9  }
 0xce9 PF: > { %p16812_p1 = scmp.ge.s32.totalorder %s16950_s30, 2  ;;  %s13649_s26 = sand.u32 1, %s16938_s29  }
 0xcea   : > { %s13650_s7 = scalar_lea.sflag [#allocation7], %s13649_s26 }
 0xceb   : > { %p16809_p2 = pnand %p16812_p1, %p17130_p6 }
 0xced   : > { %16933 = dma.done.wait (!%p16809_p2), %s13650_s7, 16  }
 0xcee   : > { %16935 = vsyncadd (!%p16809_p2), %s13650_s7, 4294967280  ;;  %s21836_s30 = sld [smem:[#allocation10_spill]]  ;;  %s21837_s0 = sld [smem:[#allocation9_spill]] }
 0xcef   : > { %s21838_s6 = sld [smem:[#allocation11_spill]]  ;;  %s21839_s29 = smov %s16942_s2 }
 0xcf4   : > { %p35_p3 = scmp.ge.s32.totalorder %s21836_s30, 4   ;;  %s21840_s2 = smov %s21837_s0 }
 0xcf6   :  { %37 = sbr.rel (!%p35_p3) target bundleno = 17 (0x11), region = 1007 }
 0xcfd   :  { %13654 = vsyncpa [#allocation7], 1 }
 0xcfe   :  { %13656 = vsyncpa [#allocation7 + $0x1], 1 }

</bundles_post_ra>
